<compile_context>
chip_gen: v5e
topology: v5e:2x2
jax: 0.10.0
libtpu: 0.0.40
codegen_flags: <defaults>
</compile_context>

<pallas_src>
import functools

import jax
import jax.numpy as jnp
from jax.experimental import pallas as pl
from jax.experimental.pallas import tpu as pltpu


# ----------------------------------------------------------------------------
# Tiling / VMEM helpers
# ----------------------------------------------------------------------------
_POINTS_PER_STEP = 4096   # keeps live bf16/f32 activations ~20-25 MiB per grid step


def _vmem_limit_bytes():
    """~3/4 of physical VMEM; 48 MiB fallback if the hardware query is unavailable."""
    try:
        cap = int(pltpu.get_tpu_info().vmem_capacity_bytes)
    except Exception:
        cap = 64 * 1024 * 1024
    return cap * 3 // 4


def _batch_tile(total, cap):
    """Pick (tb, padded_total).

    If the whole batch fits one tile, use a single full-extent block (no padding and
    no (8,128) constraint on the leading output dim).  Otherwise tb is a multiple of 8
    (required by the (tb, 1) output block) and the batch is zero-padded.
    """
    if total <= cap:
        return total, total
    tb = max(8, (cap // 8) * 8)
    return tb, pl.cdiv(total, tb) * tb


def _full_spec(a):
    # Constant index map -> block index never changes -> weights stay VMEM-resident
    # across grid steps (~1 MiB of bf16 in total).
    nd = a.ndim
    return pl.BlockSpec(a.shape, lambda b, _nd=nd: (0,) * _nd)


# ----------------------------------------------------------------------------
# PointDIS kernel: TB samples (TB*N points) per grid step.
# ----------------------------------------------------------------------------
def pointdis_kernel(x_ref,
                    w1a_ref, b1a_ref, w1b_ref, b1b_ref,
                    w2af_ref, w2ag_ref, b2a_ref, w2b_ref, b2b_ref,
                    w3a_ref, b3a_ref, w3b_ref, b3b_ref, w3c_ref, b3c_ref,
                    out_ref, *, tb, n):
    bf16 = jnp.bfloat16
    f32 = jnp.float32
    x = x_ref[...]                                           # (tb*n, 8) bf16 (coords padded 3->8)

    # --- encoder.mlp_conv1: 3 -> 128 (ReLU) -> 256 ---  (K=8 MXU pass, bf16 elementwise)
    f = jnp.dot(x, w1a_ref[...], preferred_element_type=f32)             # (tb*n, 128) f32
    f = jnp.maximum(f.astype(bf16) + b1a_ref[...], 0)                    # bf16
    f = jnp.dot(f, w1b_ref[...], preferred_element_type=f32)             # (tb*n, 256) f32
    f = f.astype(bf16) + b1b_ref[...]                                    # bf16 (no ReLU: last conv)

    # Per-sample global feature.  N % 8 == 0, so (tb*n, C) <-> (tb, n, C) reshapes are
    # tile-aligned leading-dim splits/merges (views, no relayout copies).
    g = jnp.max(f.reshape(tb, n, f.shape[-1]), axis=1)                   # (tb, 256) bf16

    # --- encoder.mlp_conv2: concat([f, broadcast(g)]) (512) -> 512 (ReLU) -> 256 ---
    # concat(...) @ W2a == f @ W2a[:256] + g @ W2a[256:]; bias folded into the per-sample
    # term hg so the big per-point chain is one bf16 add + bf16 ReLU.
    h = jnp.dot(f, w2af_ref[...], preferred_element_type=f32)            # (tb*n, 512) f32
    hg = (jnp.dot(g, w2ag_ref[...], preferred_element_type=f32)
          + b2a_ref[...]).astype(bf16)                                   # (tb, 512) bf16
    h = h.astype(bf16).reshape(tb, n, hg.shape[-1]) + hg[:, None, :]
    h = jnp.maximum(h, 0).reshape(tb * n, hg.shape[-1])                  # (tb*n, 512) bf16
    h = jnp.dot(h, w2b_ref[...], preferred_element_type=f32)             # (tb*n, 256) f32
    h = h.astype(bf16) + b2b_ref[...]
    enc = jnp.max(h.reshape(tb, n, h.shape[-1]), axis=1)                 # (tb, 256) bf16

    # --- PointDIS.mlp head: 256 -> 64 (ReLU) -> 64 (ReLU) -> 1, batched over tb samples ---
    m = jnp.dot(enc, w3a_ref[...], preferred_element_type=f32) + b3a_ref[...]
    m = jnp.maximum(m, 0.0)
    m = jnp.dot(m.astype(bf16), w3b_ref[...], preferred_element_type=f32) + b3b_ref[...]
    m = jnp.maximum(m, 0.0)
    # 64 -> 1 on the VPU/XLU (row-weight multiply + lane reduce; skips an M=tb, N=1 MXU push).
    d = jnp.sum(m * w3c_ref[...], axis=-1, keepdims=True) + b3c_ref[...]  # (tb, 1) f32
    out_ref[...] = jax.nn.sigmoid(d)


def pointdis_forward(point, params, *, points_per_step=_POINTS_PER_STEP):
    """point: (B, N, 3) float32 -> (B,) float32 sigmoid scores."""
    B, N, C = point.shape
    assert C == 3
    # TODO(synk): if N is ever padded / not a multiple of 8, the in-kernel reshapes need
    # relayouts and the max-pools need -inf masking of padded points.
    assert N % 8 == 0, "pointdis_forward expects N % 8 == 0"

    # TB scales inversely with N so the per-step working set stays roughly constant
    # (TB=64 at N=64, TB=8 at N=2048; 8 is the minimum imposed by the (tb,1) output block).
    cap = min(128, max(8, (points_per_step // N) // 8 * 8))
    tb, b_pad = _batch_tile(B, cap)
    nb = b_pad // tb

    # bf16 coords + channel pad 3->8: halves input DMA/VMEM and makes the first layer a
    # tiny K=8 MXU matmul instead of VPU lane-broadcast FMAs.
    # TODO(synk): at very large N, a (B, 3, N) channel-major layout would avoid the
    # 8->128 lane padding of this tile entirely.
    x = point.astype(jnp.bfloat16)
    x = jnp.pad(x, ((0, b_pad - B), (0, 0), (0, 8 - C)))
    x = x.reshape(b_pad * N, 8)

    in_specs = [pl.BlockSpec((tb * N, 8), lambda b: (b, 0))]
    in_specs += [_full_spec(a) for a in params]

    out = pl.pallas_call(
        functools.partial(pointdis_kernel, tb=tb, n=N),
        out_shape=jax.ShapeDtypeStruct((b_pad, 1), jnp.float32),
        grid=(nb,),
        in_specs=in_specs,
        out_specs=pl.BlockSpec((tb, 1), lambda b: (b, 0)),
        compiler_params=pltpu.CompilerParams(
            dimension_semantics=("parallel",),          # v7x: shard batch steps across TCs
            vmem_limit_bytes=_vmem_limit_bytes()),
    )(x, *params)
    return out[:B, 0]


# ----------------------------------------------------------------------------
# Feature discriminator d_f: MlpConv(512, [64, 64, 1]) + sigmoid + [:, 0, 0].
# All convs are k=1, so the result depends only on f[:, :, 0].
# ----------------------------------------------------------------------------
def featdis_kernel(x_ref, wa_ref, ba_ref, wb_ref, bb_ref, wc_ref, bc_ref, out_ref):
    f32 = jnp.float32
    x = x_ref[...].astype(jnp.bfloat16)                                  # (tb, 512)
    m = jnp.dot(x, wa_ref[...], preferred_element_type=f32) + ba_ref[...]
    m = jnp.maximum(m, 0.0)
    m = jnp.dot(m.astype(jnp.bfloat16), wb_ref[...], preferred_element_type=f32) + bb_ref[...]
    m = jnp.maximum(m, 0.0)
    d = jnp.sum(m * wc_ref[...], axis=-1, keepdims=True) + bc_ref[...]   # (tb, 1)
    out_ref[...] = jax.nn.sigmoid(d)


def featdis_forward(f, params, *, tb_cap=256):
    """f: (B, 512, W) float32 -> (B,) float32  (== sigmoid(mlp(f))[:, 0, 0])."""
    x = f[:, :, 0]                       # only spatial position 0 matters (k=1 convs)
    B, C = x.shape

    tb, b_pad = _batch_tile(B, tb_cap)   # up to 256-row tiles fill the MXU M dimension
    nb = b_pad // tb
    if b_pad != B:
        x = jnp.pad(x, ((0, b_pad - B), (0, 0)))

    in_specs = [pl.BlockSpec((tb, C), lambda b: (b, 0))]
    in_specs += [_full_spec(a) for a in params]

    out = pl.pallas_call(
        featdis_kernel,
        out_shape=jax.ShapeDtypeStruct((b_pad, 1), jnp.float32),
        grid=(nb,),
        in_specs=in_specs,
        out_specs=pl.BlockSpec((tb, 1), lambda b: (b, 0)),
        compiler_params=pltpu.CompilerParams(
            dimension_semantics=("parallel",)),
    )(x, *params)
    return out[:B, 0]


# ----------------------------------------------------------------------------
# USSPA_D forward (batch concat / split is trivial host-side JAX; jit the whole thing).
# ----------------------------------------------------------------------------
def usspa_d_forward(f_R, f_A, input_R_point_R_0, point_R_3, input_A, kernel_params):
    df_params, dp_params = kernel_params
    B = f_R.shape[0]

    f = jnp.concatenate([f_R, f_A], axis=0)
    d_f = featdis_forward(f, df_params)

    point = jnp.concatenate([input_R_point_R_0, point_R_3, input_A], axis=0)
    d_p = pointdis_forward(point, dp_params)

    return (d_f[:B], d_f[B:2 * B], d_p[:B], d_p[B:2 * B], d_p[2 * B:3 * B])


# ----------------------------------------------------------------------------
# Parameter init (PyTorch Conv1d-style U(-1/sqrt(fan_in), 1/sqrt(fan_in))) and the
# one-time kernel-ready preprocessing (bf16 casts, concat split, K-pad, transposes).
# Weights stored (in_c, out_c) so y = x @ W (W[in, out] == conv.weight[out, in, 0]);
# biases stored (1, out_c).
# ----------------------------------------------------------------------------
def _init_mlp(key, shapes):
    params = []
    for (cin, cout) in shapes:
        key, kw, kb = jax.random.split(key, 3)
        bound = 1.0 / (cin ** 0.5)
        w = jax.random.uniform(kw, (cin, cout), jnp.float32, -bound, bound)
        b = jax.random.uniform(kb, (1, cout), jnp.float32, -bound, bound)
        params += [w, b]
    return key, tuple(params)


def init_params(key):
    key, df = _init_mlp(key, [(512, 64), (64, 64), (64, 1)])          # d_f
    key, dp = _init_mlp(key, [(3, 128), (128, 256),                   # encoder.mlp_conv1
                              (512, 512), (512, 256),                 # encoder.mlp_conv2
                              (256, 64), (64, 64), (64, 1)])          # PointDIS.mlp
    return (df, dp)


def prepare_params(params):
    """Hoisted, one-time weight preprocessing so per-call wrappers don't re-emit it."""
    df, dp = params
    bf = lambda a: a.astype(jnp.bfloat16)

    (wa, ba, wb, bb, wc, bc) = df
    df_k = (bf(wa), ba, bf(wb), bb, wc.T, bc)

    (w1a, b1a, w1b, b1b, w2a, b2a, w2b, b2b,
     w3a, b3a, w3b, b3b, w3c, b3c) = dp
    c1 = w1b.shape[1]                                 # 256
    w2af, w2ag = w2a[:c1], w2a[c1:]                   # split the concat([point, global]) weight
    w1a_pad = jnp.pad(w1a, ((0, 8 - w1a.shape[0]), (0, 0)))   # K: 3 -> 8 for the MXU pass
    dp_k = (bf(w1a_pad), bf(b1a), bf(w1b), bf(b1b),
            bf(w2af), bf(w2ag), b2a, bf(w2b), bf(b2b),
            bf(w3a), b3a, bf(w3b), b3b, w3c.T, b3c)
    return (df_k, dp_k)


# ----------------------------------------------------------------------------
# Pure-JAX f32 reference of the same forward pass (for correctness check).
# ----------------------------------------------------------------------------
def pointdis_reference(point, params):
    (w1a, b1a, w1b, b1b, w2a, b2a, w2b, b2b,
     w3a, b3a, w3b, b3b, w3c, b3c) = params
    f = jnp.maximum(point @ w1a + b1a, 0.0)
    f = f @ w1b + b1b
    g = jnp.max(f, axis=1, keepdims=True)
    fcat = jnp.concatenate([f, jnp.broadcast_to(g, f.shape)], axis=-1)
    h = jnp.maximum(fcat @ w2a + b2a, 0.0)
    h = h @ w2b + b2b
    enc = jnp.max(h, axis=1, keepdims=True)
    m = jnp.maximum(enc @ w3a + b3a, 0.0)
    m = jnp.maximum(m @ w3b + b3b, 0.0)
    d = jax.nn.sigmoid(m @ w3c + b3c)
    return d[:, 0, 0]


def featdis_reference(f, params):
    (wa, ba, wb, bb, wc, bc) = params
    x = f[:, :, 0]
    m = jnp.maximum(x @ wa + ba, 0.0)
    m = jnp.maximum(m @ wb + bb, 0.0)
    return jax.nn.sigmoid(m @ wc + bc)[:, 0]


def usspa_d_reference(f_R, f_A, p0, p3, pA, params):
    df_params, dp_params = params
    B = f_R.shape[0]
    d_f = featdis_reference(jnp.concatenate([f_R, f_A], axis=0), df_params)
    d_p = pointdis_reference(jnp.concatenate([p0, p3, pA], axis=0), dp_params)
    return d_f[:B], d_f[B:2 * B], d_p[:B], d_p[B:2 * B], d_p[2 * B:3 * B]


if __name__ == "__main__":
    key = jax.random.PRNGKey(0)
    kp, k1, k2, k3, k4, k5 = jax.random.split(key, 6)
    params = init_params(kp)
    kparams = prepare_params(params)     # one-time kernel-ready weights (bf16 etc.)

    B, N = 2, 64
    f_R = jax.random.normal(k1, (B, 512, 1), dtype=jnp.float32)
    f_A = jax.random.normal(k2, (B, 512, 1), dtype=jnp.float32)
    p0 = jax.random.normal(k3, (B, N, 3), dtype=jnp.float32)
    p3 = jax.random.normal(k4, (B, N, 3), dtype=jnp.float32)
    pA = jax.random.normal(k5, (B, N, 3), dtype=jnp.float32)

    fwd = jax.jit(usspa_d_forward)
    outs = jax.block_until_ready(fwd(f_R, f_A, p0, p3, pA, kparams))
    refs = jax.block_until_ready(usspa_d_reference(f_R, f_A, p0, p3, pA, params))

    for o, r in zip(outs, refs):
        assert o.shape == (B,)
        # bf16 activations / weights (f32 accumulation) vs a pure-f32 reference ->
        # loose absolute tolerance on the sigmoid outputs.
        assert jnp.allclose(o, r, atol=6e-2, rtol=0.0), (o, r)
    print("KERNEL_OK")
</pallas_src>

<mosaic_0001>
module attributes {stable_mosaic.version = 11 : i64} {
  func.func @pointdis_kernel(%arg0: i32, %arg1: memref<384x8xbf16, #tpu.memory_space<vmem>>, %arg2: memref<8x128xbf16, #tpu.memory_space<vmem>>, %arg3: memref<1x128xbf16, #tpu.memory_space<vmem>>, %arg4: memref<128x256xbf16, #tpu.memory_space<vmem>>, %arg5: memref<1x256xbf16, #tpu.memory_space<vmem>>, %arg6: memref<256x512xbf16, #tpu.memory_space<vmem>>, %arg7: memref<256x512xbf16, #tpu.memory_space<vmem>>, %arg8: memref<1x512xf32, #tpu.memory_space<vmem>>, %arg9: memref<512x256xbf16, #tpu.memory_space<vmem>>, %arg10: memref<1x256xbf16, #tpu.memory_space<vmem>>, %arg11: memref<256x64xbf16, #tpu.memory_space<vmem>>, %arg12: memref<1x64xf32, #tpu.memory_space<vmem>>, %arg13: memref<64x64xbf16, #tpu.memory_space<vmem>>, %arg14: memref<1x64xf32, #tpu.memory_space<vmem>>, %arg15: memref<1x64xf32, #tpu.memory_space<vmem>>, %arg16: memref<1x1xf32, #tpu.memory_space<vmem>>, %arg17: memref<6x1xf32, #tpu.memory_space<vmem>>) attributes {dimension_semantics = [#tpu.dimension_semantics<parallel>], iteration_bounds = array<i64: 1>, scalar_prefetch = 0 : i64, scratch_operands = 0 : i64, tpu.core_type = #tpu.core_type<tc>, window_params = [{transform_indices = @transform_0, window_bounds = array<i64: 384, 8>}, {pipeline_mode = #tpu.pipeline_mode<synchronous>, transform_indices = @transform_1, window_bounds = array<i64: 8, 128>}, {pipeline_mode = #tpu.pipeline_mode<synchronous>, transform_indices = @transform_2, window_bounds = array<i64: 1, 128>}, {pipeline_mode = #tpu.pipeline_mode<synchronous>, transform_indices = @transform_3, window_bounds = array<i64: 128, 256>}, {pipeline_mode = #tpu.pipeline_mode<synchronous>, transform_indices = @transform_4, window_bounds = array<i64: 1, 256>}, {pipeline_mode = #tpu.pipeline_mode<synchronous>, transform_indices = @transform_5, window_bounds = array<i64: 256, 512>}, {pipeline_mode = #tpu.pipeline_mode<synchronous>, transform_indices = @transform_6, window_bounds = array<i64: 256, 512>}, {pipeline_mode = #tpu.pipeline_mode<synchronous>, transform_indices = @transform_7, window_bounds = array<i64: 1, 512>}, {pipeline_mode = #tpu.pipeline_mode<synchronous>, transform_indices = @transform_8, window_bounds = array<i64: 512, 256>}, {pipeline_mode = #tpu.pipeline_mode<synchronous>, transform_indices = @transform_9, window_bounds = array<i64: 1, 256>}, {pipeline_mode = #tpu.pipeline_mode<synchronous>, transform_indices = @transform_10, window_bounds = array<i64: 256, 64>}, {pipeline_mode = #tpu.pipeline_mode<synchronous>, transform_indices = @transform_11, window_bounds = array<i64: 1, 64>}, {pipeline_mode = #tpu.pipeline_mode<synchronous>, transform_indices = @transform_12, window_bounds = array<i64: 64, 64>}, {pipeline_mode = #tpu.pipeline_mode<synchronous>, transform_indices = @transform_13, window_bounds = array<i64: 1, 64>}, {pipeline_mode = #tpu.pipeline_mode<synchronous>, transform_indices = @transform_14, window_bounds = array<i64: 1, 64>}, {pipeline_mode = #tpu.pipeline_mode<synchronous>, transform_indices = @transform_15, window_bounds = array<i64: 1, 1>}, {transform_indices = @transform_16, window_bounds = array<i64: 6, 1>}]} {
    %c0 = arith.constant 0 : index
    %c0_0 = arith.constant 0 : index
    %0 = vector.load %arg1[%c0, %c0_0] : memref<384x8xbf16, #tpu.memory_space<vmem>>, vector<384x8xbf16>
    %c0_1 = arith.constant 0 : index
    %c0_2 = arith.constant 0 : index
    %1 = vector.load %arg2[%c0_1, %c0_2] : memref<8x128xbf16, #tpu.memory_space<vmem>>, vector<8x128xbf16>
    %cst = arith.constant dense<0.000000e+00> : vector<384x128xf32>
    %2 = tpu.matmul %0, %1, %cst {dimension_numbers = #tpu.dot_dimension_numbers<[1], [0], [0], [1], [0, 0, 1, 1], [], []>} : vector<384x8xbf16>, vector<8x128xbf16>, vector<384x128xf32> -> vector<384x128xf32>
    %3 = arith.truncf %2 : vector<384x128xf32> to vector<384x128xbf16>
    %c0_3 = arith.constant 0 : index
    %c0_4 = arith.constant 0 : index
    %4 = vector.load %arg3[%c0_3, %c0_4] : memref<1x128xbf16, #tpu.memory_space<vmem>>, vector<1x128xbf16>
    %5 = vector.broadcast %4 : vector<1x128xbf16> to vector<384x128xbf16>
    %6 = arith.addf %3, %5 : vector<384x128xbf16>
    %cst_5 = arith.constant 0.000000e+00 : bf16
    %7 = vector.broadcast %cst_5 : bf16 to vector<384x128xbf16>
    %8 = arith.maximumf %6, %7 : vector<384x128xbf16>
    %c0_6 = arith.constant 0 : index
    %c0_7 = arith.constant 0 : index
    %9 = vector.load %arg4[%c0_6, %c0_7] : memref<128x256xbf16, #tpu.memory_space<vmem>>, vector<128x256xbf16>
    %cst_8 = arith.constant dense<0.000000e+00> : vector<384x256xf32>
    %10 = tpu.matmul %8, %9, %cst_8 {dimension_numbers = #tpu.dot_dimension_numbers<[1], [0], [0], [1], [0, 0, 1, 1], [], []>} : vector<384x128xbf16>, vector<128x256xbf16>, vector<384x256xf32> -> vector<384x256xf32>
    %11 = arith.truncf %10 : vector<384x256xf32> to vector<384x256xbf16>
    %c0_9 = arith.constant 0 : index
    %c0_10 = arith.constant 0 : index
    %12 = vector.load %arg5[%c0_9, %c0_10] : memref<1x256xbf16, #tpu.memory_space<vmem>>, vector<1x256xbf16>
    %13 = vector.broadcast %12 : vector<1x256xbf16> to vector<384x256xbf16>
    %14 = arith.addf %11, %13 : vector<384x256xbf16>
    %15 = vector.shape_cast %14 : vector<384x256xbf16> to vector<6x64x256xbf16>
    %cst_11 = arith.constant dense<0xFF80> : vector<6x256xbf16>
    %16 = vector.multi_reduction <maximumf>, %15, %cst_11 [1] : vector<6x64x256xbf16> to vector<6x256xbf16>
    %c0_12 = arith.constant 0 : index
    %c0_13 = arith.constant 0 : index
    %17 = vector.load %arg6[%c0_12, %c0_13] : memref<256x512xbf16, #tpu.memory_space<vmem>>, vector<256x512xbf16>
    %cst_14 = arith.constant dense<0.000000e+00> : vector<384x512xf32>
    %18 = tpu.matmul %14, %17, %cst_14 {dimension_numbers = #tpu.dot_dimension_numbers<[1], [0], [0], [1], [0, 0, 1, 1], [], []>} : vector<384x256xbf16>, vector<256x512xbf16>, vector<384x512xf32> -> vector<384x512xf32>
    %c0_15 = arith.constant 0 : index
    %c0_16 = arith.constant 0 : index
    %19 = vector.load %arg7[%c0_15, %c0_16] : memref<256x512xbf16, #tpu.memory_space<vmem>>, vector<256x512xbf16>
    %cst_17 = arith.constant dense<0.000000e+00> : vector<6x512xf32>
    %20 = tpu.matmul %16, %19, %cst_17 {dimension_numbers = #tpu.dot_dimension_numbers<[1], [0], [0], [1], [0, 0, 1, 1], [], []>} : vector<6x256xbf16>, vector<256x512xbf16>, vector<6x512xf32> -> vector<6x512xf32>
    %c0_18 = arith.constant 0 : index
    %c0_19 = arith.constant 0 : index
    %21 = vector.load %arg8[%c0_18, %c0_19] : memref<1x512xf32, #tpu.memory_space<vmem>>, vector<1x512xf32>
    %22 = vector.broadcast %21 : vector<1x512xf32> to vector<6x512xf32>
    %23 = arith.addf %20, %22 : vector<6x512xf32>
    %24 = arith.truncf %23 : vector<6x512xf32> to vector<6x512xbf16>
    %25 = arith.truncf %18 : vector<384x512xf32> to vector<384x512xbf16>
    %26 = vector.shape_cast %25 : vector<384x512xbf16> to vector<6x64x512xbf16>
    %27 = vector.shape_cast %24 : vector<6x512xbf16> to vector<6x1x512xbf16>
    %28 = vector.broadcast %27 : vector<6x1x512xbf16> to vector<6x64x512xbf16>
    %29 = arith.addf %26, %28 : vector<6x64x512xbf16>
    %cst_20 = arith.constant 0.000000e+00 : bf16
    %30 = vector.broadcast %cst_20 : bf16 to vector<6x64x512xbf16>
    %31 = arith.maximumf %29, %30 : vector<6x64x512xbf16>
    %32 = vector.shape_cast %31 : vector<6x64x512xbf16> to vector<384x512xbf16>
    %c0_21 = arith.constant 0 : index
    %c0_22 = arith.constant 0 : index
    %33 = vector.load %arg9[%c0_21, %c0_22] : memref<512x256xbf16, #tpu.memory_space<vmem>>, vector<512x256xbf16>
    %cst_23 = arith.constant dense<0.000000e+00> : vector<384x256xf32>
    %34 = tpu.matmul %32, %33, %cst_23 {dimension_numbers = #tpu.dot_dimension_numbers<[1], [0], [0], [1], [0, 0, 1, 1], [], []>} : vector<384x512xbf16>, vector<512x256xbf16>, vector<384x256xf32> -> vector<384x256xf32>
    %35 = arith.truncf %34 : vector<384x256xf32> to vector<384x256xbf16>
    %c0_24 = arith.constant 0 : index
    %c0_25 = arith.constant 0 : index
    %36 = vector.load %arg10[%c0_24, %c0_25] : memref<1x256xbf16, #tpu.memory_space<vmem>>, vector<1x256xbf16>
    %37 = vector.broadcast %36 : vector<1x256xbf16> to vector<384x256xbf16>
    %38 = arith.addf %35, %37 : vector<384x256xbf16>
    %39 = vector.shape_cast %38 : vector<384x256xbf16> to vector<6x64x256xbf16>
    %cst_26 = arith.constant dense<0xFF80> : vector<6x256xbf16>
    %40 = vector.multi_reduction <maximumf>, %39, %cst_26 [1] : vector<6x64x256xbf16> to vector<6x256xbf16>
    %c0_27 = arith.constant 0 : index
    %c0_28 = arith.constant 0 : index
    %41 = vector.load %arg11[%c0_27, %c0_28] : memref<256x64xbf16, #tpu.memory_space<vmem>>, vector<256x64xbf16>
    %cst_29 = arith.constant dense<0.000000e+00> : vector<6x64xf32>
    %42 = tpu.matmul %40, %41, %cst_29 {dimension_numbers = #tpu.dot_dimension_numbers<[1], [0], [0], [1], [0, 0, 1, 1], [], []>} : vector<6x256xbf16>, vector<256x64xbf16>, vector<6x64xf32> -> vector<6x64xf32>
    %c0_30 = arith.constant 0 : index
    %c0_31 = arith.constant 0 : index
    %43 = vector.load %arg12[%c0_30, %c0_31] : memref<1x64xf32, #tpu.memory_space<vmem>>, vector<1x64xf32>
    %44 = vector.broadcast %43 : vector<1x64xf32> to vector<6x64xf32>
    %45 = arith.addf %42, %44 : vector<6x64xf32>
    %cst_32 = arith.constant 0.000000e+00 : f32
    %46 = vector.broadcast %cst_32 : f32 to vector<6x64xf32>
    %47 = arith.maximumf %45, %46 : vector<6x64xf32>
    %48 = arith.truncf %47 : vector<6x64xf32> to vector<6x64xbf16>
    %c0_33 = arith.constant 0 : index
    %c0_34 = arith.constant 0 : index
    %49 = vector.load %arg13[%c0_33, %c0_34] : memref<64x64xbf16, #tpu.memory_space<vmem>>, vector<64x64xbf16>
    %cst_35 = arith.constant dense<0.000000e+00> : vector<6x64xf32>
    %50 = tpu.matmul %48, %49, %cst_35 {dimension_numbers = #tpu.dot_dimension_numbers<[1], [0], [0], [1], [0, 0, 1, 1], [], []>} : vector<6x64xbf16>, vector<64x64xbf16>, vector<6x64xf32> -> vector<6x64xf32>
    %c0_36 = arith.constant 0 : index
    %c0_37 = arith.constant 0 : index
    %51 = vector.load %arg14[%c0_36, %c0_37] : memref<1x64xf32, #tpu.memory_space<vmem>>, vector<1x64xf32>
    %52 = vector.broadcast %51 : vector<1x64xf32> to vector<6x64xf32>
    %53 = arith.addf %50, %52 : vector<6x64xf32>
    %cst_38 = arith.constant 0.000000e+00 : f32
    %54 = vector.broadcast %cst_38 : f32 to vector<6x64xf32>
    %55 = arith.maximumf %53, %54 : vector<6x64xf32>
    %c0_39 = arith.constant 0 : index
    %c0_40 = arith.constant 0 : index
    %56 = vector.load %arg15[%c0_39, %c0_40] : memref<1x64xf32, #tpu.memory_space<vmem>>, vector<1x64xf32>
    %57 = vector.broadcast %56 : vector<1x64xf32> to vector<6x64xf32>
    %58 = arith.mulf %55, %57 : vector<6x64xf32>
    %cst_41 = arith.constant dense<0.000000e+00> : vector<6xf32>
    %59 = vector.multi_reduction <add>, %58, %cst_41 [1] : vector<6x64xf32> to vector<6xf32>
    %60 = vector.shape_cast %59 : vector<6xf32> to vector<6x1xf32>
    %c0_42 = arith.constant 0 : index
    %c0_43 = arith.constant 0 : index
    %61 = vector.load %arg16[%c0_42, %c0_43] : memref<1x1xf32, #tpu.memory_space<vmem>>, vector<1x1xf32>
    %62 = vector.broadcast %61 : vector<1x1xf32> to vector<6x1xf32>
    %63 = arith.addf %60, %62 : vector<6x1xf32>
    %64 = arith.negf %63 : vector<6x1xf32>
    %65 = math.exp %64 : vector<6x1xf32>
    %cst_44 = arith.constant 1.000000e+00 : f32
    %66 = vector.broadcast %cst_44 : f32 to vector<6x1xf32>
    %67 = arith.addf %66, %65 : vector<6x1xf32>
    %68 = arith.divf %66, %67 : vector<6x1xf32>
    %c0_45 = arith.constant 0 : index
    %c0_46 = arith.constant 0 : index
    %69 = vector.load %arg17[%c0_45, %c0_46] : memref<6x1xf32, #tpu.memory_space<vmem>>, vector<6x1xf32>
    tpu.vector_store %arg17[%c0_45, %c0_46], %68 {strides = array<i32>} : memref<6x1xf32, #tpu.memory_space<vmem>>, vector<6x1xf32>,
    return
  }
  func.func @transform_0(%arg0: i32) -> (i32, i32) {
    %c0_i32 = arith.constant 0 : i32
    %c0_i32_0 = arith.constant 0 : i32
    return %arg0, %c0_i32 : i32, i32
  }
  func.func @transform_1(%arg0: i32) -> (i32, i32) {
    %c0_i32 = arith.constant 0 : i32
    %c0_i32_0 = arith.constant 0 : i32
    %c0_i32_1 = arith.constant 0 : i32
    return %c0_i32, %c0_i32_0 : i32, i32
  }
  func.func @transform_2(%arg0: i32) -> (i32, i32) {
    %c0_i32 = arith.constant 0 : i32
    %c0_i32_0 = arith.constant 0 : i32
    %c0_i32_1 = arith.constant 0 : i32
    return %c0_i32, %c0_i32_0 : i32, i32
  }
  func.func @transform_3(%arg0: i32) -> (i32, i32) {
    %c0_i32 = arith.constant 0 : i32
    %c0_i32_0 = arith.constant 0 : i32
    %c0_i32_1 = arith.constant 0 : i32
    return %c0_i32, %c0_i32_0 : i32, i32
  }
  func.func @transform_4(%arg0: i32) -> (i32, i32) {
    %c0_i32 = arith.constant 0 : i32
    %c0_i32_0 = arith.constant 0 : i32
    %c0_i32_1 = arith.constant 0 : i32
    return %c0_i32, %c0_i32_0 : i32, i32
  }
  func.func @transform_5(%arg0: i32) -> (i32, i32) {
    %c0_i32 = arith.constant 0 : i32
    %c0_i32_0 = arith.constant 0 : i32
    %c0_i32_1 = arith.constant 0 : i32
    return %c0_i32, %c0_i32_0 : i32, i32
  }
  func.func @transform_6(%arg0: i32) -> (i32, i32) {
    %c0_i32 = arith.constant 0 : i32
    %c0_i32_0 = arith.constant 0 : i32
    %c0_i32_1 = arith.constant 0 : i32
    return %c0_i32, %c0_i32_0 : i32, i32
  }
  func.func @transform_7(%arg0: i32) -> (i32, i32) {
    %c0_i32 = arith.constant 0 : i32
    %c0_i32_0 = arith.constant 0 : i32
    %c0_i32_1 = arith.constant 0 : i32
    return %c0_i32, %c0_i32_0 : i32, i32
  }
  func.func @transform_8(%arg0: i32) -> (i32, i32) {
    %c0_i32 = arith.constant 0 : i32
    %c0_i32_0 = arith.constant 0 : i32
    %c0_i32_1 = arith.constant 0 : i32
    return %c0_i32, %c0_i32_0 : i32, i32
  }
  func.func @transform_9(%arg0: i32) -> (i32, i32) {
    %c0_i32 = arith.constant 0 : i32
    %c0_i32_0 = arith.constant 0 : i32
    %c0_i32_1 = arith.constant 0 : i32
    return %c0_i32, %c0_i32_0 : i32, i32
  }
  func.func @transform_10(%arg0: i32) -> (i32, i32) {
    %c0_i32 = arith.constant 0 : i32
    %c0_i32_0 = arith.constant 0 : i32
    %c0_i32_1 = arith.constant 0 : i32
    return %c0_i32, %c0_i32_0 : i32, i32
  }
  func.func @transform_11(%arg0: i32) -> (i32, i32) {
    %c0_i32 = arith.constant 0 : i32
    %c0_i32_0 = arith.constant 0 : i32
    %c0_i32_1 = arith.constant 0 : i32
    return %c0_i32, %c0_i32_0 : i32, i32
  }
  func.func @transform_12(%arg0: i32) -> (i32, i32) {
    %c0_i32 = arith.constant 0 : i32
    %c0_i32_0 = arith.constant 0 : i32
    %c0_i32_1 = arith.constant 0 : i32
    return %c0_i32, %c0_i32_0 : i32, i32
  }
  func.func @transform_13(%arg0: i32) -> (i32, i32) {
    %c0_i32 = arith.constant 0 : i32
    %c0_i32_0 = arith.constant 0 : i32
    %c0_i32_1 = arith.constant 0 : i32
    return %c0_i32, %c0_i32_0 : i32, i32
  }
  func.func @transform_14(%arg0: i32) -> (i32, i32) {
    %c0_i32 = arith.constant 0 : i32
    %c0_i32_0 = arith.constant 0 : i32
    %c0_i32_1 = arith.constant 0 : i32
    return %c0_i32, %c0_i32_0 : i32, i32
  }
  func.func @transform_15(%arg0: i32) -> (i32, i32) {
    %c0_i32 = arith.constant 0 : i32
    %c0_i32_0 = arith.constant 0 : i32
    %c0_i32_1 = arith.constant 0 : i32
    return %c0_i32, %c0_i32_0 : i32, i32
  }
  func.func @transform_16(%arg0: i32) -> (i32, i32) {
    %c0_i32 = arith.constant 0 : i32
    %c0_i32_0 = arith.constant 0 : i32
    return %arg0, %c0_i32 : i32, i32
  }
}

module attributes {stable_mosaic.version = 11 : i64} {
  func.func @featdis_kernel(%arg0: i32, %arg1: memref<4x512xf32, #tpu.memory_space<vmem>>, %arg2: memref<512x64xbf16, #tpu.memory_space<vmem>>, %arg3: memref<1x64xf32, #tpu.memory_space<vmem>>, %arg4: memref<64x64xbf16, #tpu.memory_space<vmem>>, %arg5: memref<1x64xf32, #tpu.memory_space<vmem>>, %arg6: memref<1x64xf32, #tpu.memory_space<vmem>>, %arg7: memref<1x1xf32, #tpu.memory_space<vmem>>, %arg8: memref<4x1xf32, #tpu.memory_space<vmem>>) attributes {dimension_semantics = [#tpu.dimension_semantics<parallel>], iteration_bounds = array<i64: 1>, scalar_prefetch = 0 : i64, scratch_operands = 0 : i64, tpu.core_type = #tpu.core_type<tc>, window_params = [{transform_indices = @transform_0, window_bounds = array<i64: 4, 512>}, {pipeline_mode = #tpu.pipeline_mode<synchronous>, transform_indices = @transform_1, window_bounds = array<i64: 512, 64>}, {pipeline_mode = #tpu.pipeline_mode<synchronous>, transform_indices = @transform_2, window_bounds = array<i64: 1, 64>}, {pipeline_mode = #tpu.pipeline_mode<synchronous>, transform_indices = @transform_3, window_bounds = array<i64: 64, 64>}, {pipeline_mode = #tpu.pipeline_mode<synchronous>, transform_indices = @transform_4, window_bounds = array<i64: 1, 64>}, {pipeline_mode = #tpu.pipeline_mode<synchronous>, transform_indices = @transform_5, window_bounds = array<i64: 1, 64>}, {pipeline_mode = #tpu.pipeline_mode<synchronous>, transform_indices = @transform_6, window_bounds = array<i64: 1, 1>}, {transform_indices = @transform_7, window_bounds = array<i64: 4, 1>}]} {
    %c0 = arith.constant 0 : index
    %c0_0 = arith.constant 0 : index
    %0 = vector.load %arg1[%c0, %c0_0] : memref<4x512xf32, #tpu.memory_space<vmem>>, vector<4x512xf32>
    %1 = arith.truncf %0 : vector<4x512xf32> to vector<4x512xbf16>
    %c0_1 = arith.constant 0 : index
    %c0_2 = arith.constant 0 : index
    %2 = vector.load %arg2[%c0_1, %c0_2] : memref<512x64xbf16, #tpu.memory_space<vmem>>, vector<512x64xbf16>
    %cst = arith.constant dense<0.000000e+00> : vector<4x64xf32>
    %3 = tpu.matmul %1, %2, %cst {dimension_numbers = #tpu.dot_dimension_numbers<[1], [0], [0], [1], [0, 0, 1, 1], [], []>} : vector<4x512xbf16>, vector<512x64xbf16>, vector<4x64xf32> -> vector<4x64xf32>
    %c0_3 = arith.constant 0 : index
    %c0_4 = arith.constant 0 : index
    %4 = vector.load %arg3[%c0_3, %c0_4] : memref<1x64xf32, #tpu.memory_space<vmem>>, vector<1x64xf32>
    %5 = vector.broadcast %4 : vector<1x64xf32> to vector<4x64xf32>
    %6 = arith.addf %3, %5 : vector<4x64xf32>
    %cst_5 = arith.constant 0.000000e+00 : f32
    %7 = vector.broadcast %cst_5 : f32 to vector<4x64xf32>
    %8 = arith.maximumf %6, %7 : vector<4x64xf32>
    %9 = arith.truncf %8 : vector<4x64xf32> to vector<4x64xbf16>
    %c0_6 = arith.constant 0 : index
    %c0_7 = arith.constant 0 : index
    %10 = vector.load %arg4[%c0_6, %c0_7] : memref<64x64xbf16, #tpu.memory_space<vmem>>, vector<64x64xbf16>
    %cst_8 = arith.constant dense<0.000000e+00> : vector<4x64xf32>
    %11 = tpu.matmul %9, %10, %cst_8 {dimension_numbers = #tpu.dot_dimension_numbers<[1], [0], [0], [1], [0, 0, 1, 1], [], []>} : vector<4x64xbf16>, vector<64x64xbf16>, vector<4x64xf32> -> vector<4x64xf32>
    %c0_9 = arith.constant 0 : index
    %c0_10 = arith.constant 0 : index
    %12 = vector.load %arg5[%c0_9, %c0_10] : memref<1x64xf32, #tpu.memory_space<vmem>>, vector<1x64xf32>
    %13 = vector.broadcast %12 : vector<1x64xf32> to vector<4x64xf32>
    %14 = arith.addf %11, %13 : vector<4x64xf32>
    %cst_11 = arith.constant 0.000000e+00 : f32
    %15 = vector.broadcast %cst_11 : f32 to vector<4x64xf32>
    %16 = arith.maximumf %14, %15 : vector<4x64xf32>
    %c0_12 = arith.constant 0 : index
    %c0_13 = arith.constant 0 : index
    %17 = vector.load %arg6[%c0_12, %c0_13] : memref<1x64xf32, #tpu.memory_space<vmem>>, vector<1x64xf32>
    %18 = vector.broadcast %17 : vector<1x64xf32> to vector<4x64xf32>
    %19 = arith.mulf %16, %18 : vector<4x64xf32>
    %cst_14 = arith.constant dense<0.000000e+00> : vector<4xf32>
    %20 = vector.multi_reduction <add>, %19, %cst_14 [1] : vector<4x64xf32> to vector<4xf32>
    %21 = vector.shape_cast %20 : vector<4xf32> to vector<4x1xf32>
    %c0_15 = arith.constant 0 : index
    %c0_16 = arith.constant 0 : index
    %22 = vector.load %arg7[%c0_15, %c0_16] : memref<1x1xf32, #tpu.memory_space<vmem>>, vector<1x1xf32>
    %23 = vector.broadcast %22 : vector<1x1xf32> to vector<4x1xf32>
    %24 = arith.addf %21, %23 : vector<4x1xf32>
    %25 = arith.negf %24 : vector<4x1xf32>
    %26 = math.exp %25 : vector<4x1xf32>
    %cst_17 = arith.constant 1.000000e+00 : f32
    %27 = vector.broadcast %cst_17 : f32 to vector<4x1xf32>
    %28 = arith.addf %27, %26 : vector<4x1xf32>
    %29 = arith.divf %27, %28 : vector<4x1xf32>
    %c0_18 = arith.constant 0 : index
    %c0_19 = arith.constant 0 : index
    %30 = vector.load %arg8[%c0_18, %c0_19] : memref<4x1xf32, #tpu.memory_space<vmem>>, vector<4x1xf32>
    tpu.vector_store %arg8[%c0_18, %c0_19], %29 {strides = array<i32>} : memref<4x1xf32, #tpu.memory_space<vmem>>, vector<4x1xf32>,
    return
  }
  func.func @transform_0(%arg0: i32) -> (i32, i32) {
    %c0_i32 = arith.constant 0 : i32
    %c0_i32_0 = arith.constant 0 : i32
    return %arg0, %c0_i32 : i32, i32
  }
  func.func @transform_1(%arg0: i32) -> (i32, i32) {
    %c0_i32 = arith.constant 0 : i32
    %c0_i32_0 = arith.constant 0 : i32
    %c0_i32_1 = arith.constant 0 : i32
    return %c0_i32, %c0_i32_0 : i32, i32
  }
  func.func @transform_2(%arg0: i32) -> (i32, i32) {
    %c0_i32 = arith.constant 0 : i32
    %c0_i32_0 = arith.constant 0 : i32
    %c0_i32_1 = arith.constant 0 : i32
    return %c0_i32, %c0_i32_0 : i32, i32
  }
  func.func @transform_3(%arg0: i32) -> (i32, i32) {
    %c0_i32 = arith.constant 0 : i32
    %c0_i32_0 = arith.constant 0 : i32
    %c0_i32_1 = arith.constant 0 : i32
    return %c0_i32, %c0_i32_0 : i32, i32
  }
  func.func @transform_4(%arg0: i32) -> (i32, i32) {
    %c0_i32 = arith.constant 0 : i32
    %c0_i32_0 = arith.constant 0 : i32
    %c0_i32_1 = arith.constant 0 : i32
    return %c0_i32, %c0_i32_0 : i32, i32
  }
  func.func @transform_5(%arg0: i32) -> (i32, i32) {
    %c0_i32 = arith.constant 0 : i32
    %c0_i32_0 = arith.constant 0 : i32
    %c0_i32_1 = arith.constant 0 : i32
    return %c0_i32, %c0_i32_0 : i32, i32
  }
  func.func @transform_6(%arg0: i32) -> (i32, i32) {
    %c0_i32 = arith.constant 0 : i32
    %c0_i32_0 = arith.constant 0 : i32
    %c0_i32_1 = arith.constant 0 : i32
    return %c0_i32, %c0_i32_0 : i32, i32
  }
  func.func @transform_7(%arg0: i32) -> (i32, i32) {
    %c0_i32 = arith.constant 0 : i32
    %c0_i32_0 = arith.constant 0 : i32
    return %arg0, %c0_i32 : i32, i32
  }
}

</mosaic_0001>

<bundles_post_ra>
// kernel: usspa_d_forward.2
= control target key start
LH: loop header
LB: loop body
LE: loop exit
PB: predicated region body
PF: predicated region fallthrough
CT: control target
= control target key end

     0   :  { %vm398_vm0 = vcmask 523264   ;;  %vm421_vm1 = vcmask 519168   ;;  %vm449_vm5 = vcmask 3072   ;;  %s814_s1 = inlined_call_operand.vmem [shape: bf16[512,64], index: 1, kind: input, shape index: {}]   ;;  %s815_s0 = inlined_call_operand.vmem [shape: f32[4,512], index: 0, kind: input, shape index: {}]   ;;  %s816_s2 = inlined_call_operand.vmem [shape: f32[1,64], index: 2, kind: input, shape index: {}]   ;;  %s817_s3 = inlined_call_operand.vmem [shape: bf16[64,64], index: 3, kind: input, shape index: {}]   ;;  %s818_s4 = inlined_call_operand.vmem [shape: f32[1,64], index: 4, kind: input, shape index: {}]   ;;  %s819_s5 = inlined_call_operand.vmem [shape: f32[1,64], index: 5, kind: input, shape index: {}]   ;;  %s820_s6 = inlined_call_operand.<no memory space> [shape: f32[1,1], index: 6, kind: input, shape index: {}]   ;;  %s821_s7 = inlined_call_operand.vmem [shape: f32[4,1], index: 7, kind: output, shape index: {}]  }
   0x1   :  { %v608_v0 = vld [vmem:[%s814_s1 + $0x38] sm:$0xff]  ;;  %v607_v4 = vld [vmem:[%s814_s1 + $0x30] sm:$0xff]  ;;  %v606_v8 = vld [vmem:[%s814_s1 + $0x28] sm:$0xff]  ;;  %v12_v61 = vstv %s820_s6 }
   0x2   :  { %v616_v1 = vld [vmem:[%s814_s1 + $0x78] sm:$0xff]  ;;  %308 = vmatpush.bf16.msra.mxu0 %v608_v0  ;;  %v615_v5 = vld [vmem:[%s814_s1 + $0x70] sm:$0xff]  ;;  %v614_v9 = vld [vmem:[%s814_s1 + $0x68] sm:$0xff]  ;;  %13 = vst [vmem:[#allocation2] sm:$0x1] %v12_v61 }
   0x3   :  { %v624_v2 = vld [vmem:[%s814_s1 + $0xb8] sm:$0xff]  ;;  %321 = vmatpush.bf16.msra.mxu1 %v616_v1  ;;  %v623_v6 = vld [vmem:[%s814_s1 + $0xb0] sm:$0xff]  ;;  %v622_v10 = vld [vmem:[%s814_s1 + $0xa8] sm:$0xff] }
   0x4   :  { %v632_v3 = vld [vmem:[%s814_s1 + $0xf8] sm:$0xff]  ;;  %334 = vmatpush.bf16.msra.mxu2 %v624_v2  ;;  %v631_v7 = vld [vmem:[%s814_s1 + $0xf0] sm:$0xff]  ;;  %v630_v11 = vld [vmem:[%s814_s1 + $0xe8] sm:$0xff] }
   0x5   :  { %347 = vmatpush.bf16.msra.mxu3 %v632_v3  ;;  %v605_v12 = vld [vmem:[%s814_s1 + $0x20] sm:$0xff]  ;;  %v30_v17 = vld [vmem:[%s815_s0 + $0x8] sm:$0xff]  ;;  %v604_v18 = vld [vmem:[%s814_s1 + $0x18] sm:$0xff] }
   0x6   :  { %309 = vmatpush.bf16.msra.mxu0 %v607_v4  ;;  %v613_v13 = vld [vmem:[%s814_s1 + $0x60] sm:$0xff]  ;;  %35 = vst [vmem:[#allocation1 + $0x10] ss:$2 sm:$0xff] %v30_v17  ;;  %v612_v19 = vld [vmem:[%s814_s1 + $0x58] sm:$0xff]  ;;  %v603_v22 = vld [vmem:[%s814_s1 + $0x10] sm:$0xff] }
   0x7   :  { %322 = vmatpush.bf16.msra.mxu1 %v615_v5  ;;  %v621_v14 = vld [vmem:[%s814_s1 + $0xa0] sm:$0xff]  ;;  %v620_v20 = vld [vmem:[%s814_s1 + $0x98] sm:$0xff]  ;;  %v611_v23 = vld [vmem:[%s814_s1 + $0x50] sm:$0xff] }
   0x8   :  { %335 = vmatpush.bf16.msra.mxu2 %v623_v6  ;;  %v29_v15 = vld [vmem:[%s815_s0] sm:$0xff]  ;;  %v628_v21 = vld [vmem:[%s814_s1 + $0xd8] sm:$0xff]  ;;  %v619_v24 = vld [vmem:[%s814_s1 + $0x90] sm:$0xff] }
   0x9   :  { %348 = vmatpush.bf16.msra.mxu3 %v631_v7  ;;  %v629_v16 = vld [vmem:[%s814_s1 + $0xe0] sm:$0xff]  ;;  %33 = vst [vmem:[#allocation1] ss:$2 sm:$0xff] %v29_v15  ;;  %v627_v25 = vld [vmem:[%s814_s1 + $0xd0] sm:$0xff]  ;;  %v602_v26 = vld [vmem:[%s814_s1 + $0x8] sm:$0xff] }
   0xa   :  { %310 = vmatpush.bf16.msra.mxu0 %v606_v8  ;;  %v610_v27 = vld [vmem:[%s814_s1 + $0x48] sm:$0xff]  ;;  %v601_v30 = vld [vmem:[%s814_s1] sm:$0xff]  ;;  %v636_v38 = vld [vmem:[%s817_s3 + $0x18] sm:$0xff] }
   0xb   :  { %323 = vmatpush.bf16.msra.mxu1 %v614_v9  ;;  %v618_v28 = vld [vmem:[%s814_s1 + $0x88] sm:$0xff]  ;;  %v609_v31 = vld [vmem:[%s814_s1 + $0x40] sm:$0xff]  ;;  %v635_v43 = vld [vmem:[%s817_s3 + $0x10] sm:$0xff] }
   0xc   :  { %336 = vmatpush.bf16.msra.mxu2 %v622_v10  ;;  %v626_v29 = vld [vmem:[%s814_s1 + $0xc8] sm:$0xff]  ;;  %v617_v32 = vld [vmem:[%s814_s1 + $0x80] sm:$0xff] }
   0xd   :  { %349 = vmatpush.bf16.msra.mxu3 %v630_v11  ;;  %v625_v33 = vld [vmem:[%s814_s1 + $0xc0] sm:$0xff]  ;;  %v38_v36 = vld.sshfl [vmem:[#allocation1 + $0x10] sm:$0xff pattern:$0x75316420]  ;;  %v634_v44 = vld [vmem:[%s817_s3 + $0x8] sm:$0xff] }
   0xe   :  { %311 = vmatpush.bf16.msra.mxu0 %v605_v12  ;;  %v39_v37 = vld.sshfl [vmem:[#allocation1 + $0x18] sm:$0xff pattern:$0x75316420]  ;;  %v46_v41 = vpack.c.bf16 %v38_v36, %v38_v36  ;;  %v633_v45 = vld [vmem:[%s817_s3] sm:$0xff]  ;;  %v640_v6 = vld [vmem:[#allocation2] ss:$0 sm:$0xff] }
   0xf   :  { %324 = vmatpush.bf16.msra.mxu1 %v613_v13  ;;  %v47_v42 = vpack.c.bf16 %v39_v37, %v39_v37  ;;  %v637_v46 = vld [vmem:[%s816_s2] ss:$0 sm:$0xff] }
  0x10   :  { %337 = vmatpush.bf16.msra.mxu2 %v621_v14  ;;  %v36_v34 = vld.sshfl [vmem:[#allocation1] sm:$0xff pattern:$0x75316420]  ;;  %v37_v35 = vld.sshfl [vmem:[#allocation1 + $0x8] sm:$0xff pattern:$0x75316420] }
  0x11   :  { %350 = vmatpush.bf16.msra.mxu3 %v629_v16  ;;  %v44_v39 = vpack.c.bf16 %v36_v34, %v36_v34  ;;  %v45_v40 = vpack.c.bf16 %v37_v35, %v37_v35  ;;  %v638_v62 = vld [vmem:[%s818_s4] ss:$0 sm:$0xff] }
  0x12   :  { %312 = vmatpush.bf16.msra.mxu0 %v604_v18  ;;  %v639_v1 = vld [vmem:[%s819_s5] ss:$0 sm:$0xff] }
  0x13   :  { %325 = vmatpush.bf16.msra.mxu1 %v612_v19 }
  0x14   :  { %338 = vmatpush.bf16.msra.mxu2 %v620_v20 }
  0x15   :  { %351 = vmatpush.bf16.msra.mxu3 %v628_v21 }
  0x16   :  { %313 = vmatpush.bf16.msra.mxu0 %v603_v22 }
  0x17   :  { %326 = vmatpush.bf16.msra.mxu1 %v611_v23 }
  0x18   :  { %339 = vmatpush.bf16.msra.mxu2 %v619_v24 }
  0x19   :  { %352 = vmatpush.bf16.msra.mxu3 %v627_v25 }
  0x1a   :  { %314 = vmatpush.bf16.msra.mxu0 %v602_v26 }
  0x1b   :  { %327 = vmatpush.bf16.msra.mxu1 %v610_v27 }
  0x1c   :  { %340 = vmatpush.bf16.msra.mxu2 %v618_v28 }
  0x1d   :  { %353 = vmatpush.bf16.msra.mxu3 %v626_v29 }
  0x1e   :  { %315 = vmatpush.bf16.msra.mxu0 %v601_v30 }
  0x1f   :  { %328 = vmatpush.bf16.msra.mxu1 %v609_v31 }
  0x20   :  { %341 = vmatpush.bf16.msra.mxu2 %v617_v32 }
  0x21   :  { %354 = vmatpush.bf16.msra.mxu3 %v625_v33  ;;  %316 = vmatmul.bf16.vlgmr.msra.gmra.mxu0 %v44_v39 }
  0x22   :  { %406 = vmatpush.bf16.msrb.mxu0 %v636_v38  ;;  %329 = vmatmul.bf16.vlgmr.msra.gmra.mxu1 %v45_v40 }
  0x23   :  { %342 = vmatmul.bf16.vlgmr.msra.gmra.mxu2 %v46_v41 }
  0x24   :  { %355 = vmatmul.bf16.vlgmr.msra.gmra.mxu3 %v47_v42 }
  0x26   :  { %407 = vmatpush.bf16.msrb.mxu0 %v635_v43 }
  0x2a   :  { %408 = vmatpush.bf16.msrb.mxu0 %v634_v44 }
  0x2e   :  { %409 = vmatpush.bf16.msrb.mxu0 %v633_v45 }
  0x9e   :  { %v317_v47 = vpop.f32.mrf.mxu0 }
  0x9f   :  { %v330_v48 = vpop.f32.mrf.mxu1  ;;  %v318_v49 = vadd.f32 %v637_v46, %v317_v47 }
  0xa1   :  { %v331_v50 = vadd.f32 %v330_v48, %v318_v49 }
  0xa6   :  { %v343_v51 = vpop.f32.mrf.mxu2  ;;  %v319_v54 = vpop.f32.mrf.mxu0 }
  0xa7   :  { %v356_v52 = vpop.f32.mrf.mxu3  ;;  %v344_v53 = vadd.f32 %v343_v51, %v331_v50  ;;  %v332_v55 = vpop.f32.mrf.mxu1 }
  0xa9   :  { %v357_v56 = vadd.f32 %v356_v52, %v344_v53 }
  0xab   :  { %v360_v57 = vmax.f32 %v357_v56, 0.0 }
  0xad   :  { %v361_v58 = vpack.c.bf16 %v360_v57, %v360_v57 }
  0xae   :  { %v345_v59 = vpop.f32.mrf.mxu2 }
  0xaf   :  { %v358_v60 = vpop.f32.mrf.mxu3  ;;  %599 = vmatmul.msk.bf16.vlgmr.msrb.gmra.mxu0 %vm398_vm0, %v361_v58 }
 0x12c   :  { %v411_v63 = vpop.f32.mrf.mxu0 }
 0x12d   :  { %v412_v0 = vadd.f32 %v638_v62, %v411_v63 }
 0x12f   :  { %v415_v2 = vmax.f32 %v412_v0, 0.0 }
 0x131   :  { %v420_v3 = vmul.f32 %v639_v1, %v415_v2 }
 0x133   :  { %v422_v4 = vsel %vm421_vm1, %v420_v3, 0.0 }
 0x134   :  { %v413_v5 = vpop.f32.mrf.mxu0  ;;  %423 = vadd.xlane.f32.xlu0 %v422_v4 }
 0x1a7   :  { %v424_v7 = vpop.xlane.xlu0 %423 }
 0x1a8   :  { %v429_v8 = vadd.f32 %v640_v6, %v424_v7 }
 0x1aa   :  { %v600_v9 = vmul.f32 -1.442695, %v429_v8 }
 0x1ac   :  { %641 = vpow2.f32 %v600_v9 }
 0x1b2   :  { %v642_v10 = vpop.eup %641 }
 0x1b3   :  { %v433_v11 = vadd.f32 1.0, %v642_v10 }
 0x1b5   :  { %643 = vrcp.f32 %v433_v11  ;;  %v445_v15 = vand.u32 2147483648, %v433_v11  ;;  %v443_v17 = vand.u32 2147483647, %v433_v11  ;;  %vm439_vm3 = vweird.f32 %v433_v11 }
 0x1b7   :  { %v446_v19 = vor.u32 1.1754944e-38, %v445_v15  ;;  %vm444_vm6 = vcmp.eq.f32.partialorder %v443_v17, 8.507059e+37 }
 0x1bb   :  { %v644_v12 = vpop.eup %643 }
 0x1bc   :  { %v435_v13 = vmul.f32 %v644_v12, %v433_v11  ;;  %vm440_vm2 = vweird.f32 %v644_v12 }
 0x1bd   :  { %vm441_vm4 = vmor %vm439_vm3, %vm440_vm2 }
 0x1be   :  { %v436_v14 = vsub.f32 1.0, %v435_v13 }
 0x1c0   :  { %v437_v16 = vmul.f32 %v644_v12, %v436_v14 }
 0x1c2   :  { %v438_v18 = vadd.f32 %v644_v12, %v437_v16 }
 0x1c4   :  { %v442_v20 = vsel %vm441_vm4, %v644_v12, %v438_v18 }
 0x1c5   :  { %v447_v21 = vsel %vm444_vm6, %v446_v19, %v442_v20 }
 0x1c6   :  { %450 = vst.msk [vmem:[%s821_s7] sm:$0xf] %vm449_vm5, %v447_v21 }

// kernel: usspa_d_forward.3
= control target key start
LH: loop header
LB: loop body
LE: loop exit
PB: predicated region body
PF: predicated region fallthrough
CT: control target
= control target key end

     0   :  { %s13066_s0 = inlined_call_operand.vmem [shape: bf16[384,8], index: 0, kind: input, shape index: {}]   ;;  %s13067_s1 = inlined_call_operand.vmem [shape: bf16[8,128], index: 1, kind: input, shape index: {}]   ;;  %s13068_s2 = inlined_call_operand.vmem [shape: bf16[1,128], index: 2, kind: input, shape index: {}]   ;;  %s13069_s3 = inlined_call_operand.vmem [shape: bf16[128,256], index: 3, kind: input, shape index: {}]   ;;  %s13070_s4 = inlined_call_operand.vmem [shape: bf16[1,256], index: 4, kind: input, shape index: {}]   ;;  %s13071_s5 = inlined_call_operand.vmem [shape: bf16[256,512], index: 5, kind: input, shape index: {}]   ;;  %s13072_s6 = inlined_call_operand.hbm [shape: bf16[256,512], index: 6, kind: input, shape index: {}]   ;;  %s13073_s7 = inlined_call_operand.vmem [shape: f32[1,512], index: 7, kind: input, shape index: {}]   ;;  %s13074_s8 = inlined_call_operand.hbm [shape: bf16[512,256], index: 8, kind: input, shape index: {}]   ;;  %s13075_s9 = inlined_call_operand.hbm [shape: bf16[1,256], index: 9, kind: input, shape index: {}]   ;;  %s13076_s10 = inlined_call_operand.vmem [shape: bf16[256,64], index: 10, kind: input, shape index: {}]   ;;  %s13077_s11 = inlined_call_operand.vmem [shape: f32[1,64], index: 11, kind: input, shape index: {}]   ;;  %s13078_s12 = inlined_call_operand.hbm [shape: bf16[64,64], index: 12, kind: input, shape index: {}]   ;;  %s13079_s13 = inlined_call_operand.vmem [shape: f32[1,64], index: 13, kind: input, shape index: {}]   ;;  %s13080_s14 = inlined_call_operand.hbm [shape: f32[1,64], index: 14, kind: input, shape index: {}]   ;;  %s13081_s15 = inlined_call_operand.<no memory space> [shape: f32[1,1], index: 15, kind: input, shape index: {}]   ;;  %s13082_s16 = inlined_call_operand.vmem [shape: f32[6,1], index: 16, kind: output, shape index: {}]  }
   0x1   :  { %13429 = sst [smem:[#allocation114_spill]] %s13066_s0  ;;  %v21_v0 = vstv %s13081_s15 }
   0x2   :  { %22 = vst [vmem:[#allocation2] sm:$0x1] %v21_v0 }
   0x3   :  { %23 = vsyncpa [#allocation4], 0 }
   0x4   :  { %24 = vsyncpa [#allocation6], 0  ;;  %s57_s25 = sshll.u32 %s13074_s8, 4  ;;  %s58_s25 = int_to_ptr.hbm [resolvable:$true] %s57_s25 }
   0x5   :  { %25 = vsyncpa [#allocation9], 0  ;;  %s9369_s26 = smov [#allocation5]   ;;  %s85_s30 = sshll.u32 %s13078_s12, 4  ;;  %s86_s30 = int_to_ptr.hbm [resolvable:$true] %s85_s30 }
   0x6   :  { %s59_s27 = sshll.u32 %s9369_s26, 4  ;;  %s9370_s0 = smov 128   ;;  %s60_s27 = int_to_ptr.vmem [resolvable:$true] %s59_s27 }
   0x7   :  { %s9371_s17 = smov 8   ;;  %s9372_s15 = smov [#allocation8]  }
   0x8   :  { %65 = dma.hbm_to_vmem [thread:$0]  %s58_s25, 8192, %s60_s27, [#allocation6], %s9370_s0, %s9370_s0, %s9371_s17  }
   0x9   :  { %s87_s18 = sshll.u32 %s9372_s15, 4  ;;  %s9373_s19 = smov 64   ;;  %s88_s18 = int_to_ptr.vmem [resolvable:$true] %s87_s18 }
   0xa   :  { %s9374_s20 = smov 4   ;;  %s42_s22 = sshll.u32 %s13072_s6, 4  ;;  %s43_s22 = int_to_ptr.hbm [resolvable:$true] %s42_s22 }
   0xb   :  { %93 = dma.hbm_to_vmem [thread:$0]  %s86_s30, 512, %s88_s18, [#allocation9], %s9373_s19, %s9373_s19, %s9374_s20  }
   0xc   :  { %s9375_s23 = smov [#allocation3]   ;;  %s71_s28 = sshll.u32 %s13075_s9, 4  ;;  %s72_s28 = int_to_ptr.hbm [resolvable:$true] %s71_s28 }
   0xd   :  { %s44_s24 = sshll.u32 %s9375_s23, 4  ;;  %s9376_s25 = smov 256   ;;  %s45_s24 = int_to_ptr.vmem [resolvable:$true] %s44_s24 }
   0xe   :  { %s9377_s27 = smov 16   ;;  %s9378_s29 = smov [#allocation7]  }
   0xf   :  { %50 = dma.hbm_to_vmem [thread:$0]  %s43_s22, 8192, %s45_s24, [#allocation4], %s9376_s25, %s9376_s25, %s9377_s27  }
  0x10   :  { %s73_s0 = sshll.u32 %s9378_s29, 4  ;;  %s101_s15 = sshll.u32 %s13080_s14, 4  ;;  %s74_s0 = int_to_ptr.vmem [resolvable:$true] %s73_s0  ;;  %s102_s15 = int_to_ptr.hbm [resolvable:$true] %s101_s15 }
  0x11   :  { %76 = dma.hbm_to_vmem [thread:$0]  %s72_s28, 32, %s74_s0, [#allocation6]  }
  0x12   :  { %s9379_s6 = smov [#allocation10]  }
  0x13   :  { %s103_s18 = sshll.u32 %s9379_s6, 4  ;;  %s104_s18 = int_to_ptr.vmem [resolvable:$true] %s103_s18 }
  0x14   :  { %106 = dma.hbm_to_vmem [thread:$0]  %s102_s15, 16, %s104_s18, [#allocation9]  }
  0x15   :  { %9363 = dma.done.wait [#allocation4], 8192  }
  0x16   :  { %9364 = vsyncadd [#allocation4], 4294959104 }
  0x17   :  { %9365 = dma.done.wait [#allocation6], 8224  }
  0x18   :  { %9366 = vsyncadd [#allocation6], 4294959072 }
  0x19   :  { %9367 = dma.done.wait [#allocation9], 528  }
  0x1a   :  { %9368 = vsyncadd [#allocation9], 4294966768  ;;  %vm372_vm0 = vcmask 1043456   ;;  %v178_v1 = vld [vmem:[%s13067_s1] sm:$0xf]  ;;  %s13430_s8 = sld [smem:[#allocation114_spill]] }
  0x1b   :  { %v374_v2 = vsel %vm372_vm0, %v178_v1, 0  ;;  %vm299_vm1 = vcmask 64512   ;;  %v8113_v9 = vld [vmem:[%s13069_s3 + $0x70] sm:$0xf]  ;;  %v9011_v10 = vld [vmem:[%s13069_s3 + $0x74] sm:$0xf0] }
  0x1c   :  { %383 = vmatpush.bf16.msra.mxu0 %v374_v2  ;;  %v9010_v11 = vld [vmem:[%s13069_s3 + $0x74] sm:$0xf]  ;;  %v8114_v12 = vor.u32 %v9011_v10, %v8113_v9  ;;  %v8115_v13 = vld [vmem:[%s13069_s3 + $0x78] sm:$0xf0]  ;;  %v8105_v15 = vld [vmem:[%s13069_s3 + $0x60] sm:$0xf] }
  0x1d   :  { %v8118_v14 = vor.u32 %v9010_v11, %v8115_v13  ;;  %v9009_v16 = vld [vmem:[%s13069_s3 + $0x64] sm:$0xf0]  ;;  %v9008_v17 = vld [vmem:[%s13069_s3 + $0x64] sm:$0xf]  ;;  %v8107_v19 = vld [vmem:[%s13069_s3 + $0x68] sm:$0xf0] }
  0x1e   :  { %919 = vmatpush.bf16.msra.mxu1 %v8114_v12  ;;  %v8106_v18 = vor.u32 %v9009_v16, %v8105_v15  ;;  %v8110_v20 = vor.u32 %v9008_v17, %v8107_v19  ;;  %v8097_v21 = vld [vmem:[%s13069_s3 + $0x50] sm:$0xf]  ;;  %v9007_v22 = vld [vmem:[%s13069_s3 + $0x54] sm:$0xf0]  ;;  %v9006_v23 = vld [vmem:[%s13069_s3 + $0x54] sm:$0xf] }
  0x1f   :  { %1048 = vmatpush.bf16.msra.mxu2 %v8118_v14  ;;  %v8099_v24 = vld [vmem:[%s13069_s3 + $0x58] sm:$0xf0]  ;;  %v8098_v25 = vor.u32 %v9007_v22, %v8097_v21  ;;  %v8089_v27 = vld [vmem:[%s13069_s3 + $0x40] sm:$0xf]  ;;  %v9005_v28 = vld [vmem:[%s13069_s3 + $0x44] sm:$0xf0] }
  0x20   :  { %v8972_v3 = vld [vmem:[%s13430_s8] sm:$0xff]  ;;  %v8973_v4 = vld [vmem:[%s13430_s8 + $0x8] sm:$0xff]  ;;  %v8974_v5 = vld [vmem:[%s13430_s8 + $0x10] sm:$0xff]  ;;  %v8102_v26 = vor.u32 %v9006_v23, %v8099_v24  ;;  %v8090_v30 = vor.u32 %v9005_v28, %v8089_v27  ;;  %vm3496_vm2 = vcmask 1041409   ;;  %vm3498_vm3 = vcmask 1042434  }
  0x21   :  { %8031 = vmatmul.msk.bf16.vlgmr.msra.gmra.mxu0 %vm299_vm1, %v8972_v3  ;;  %v8975_v6 = vld [vmem:[%s13430_s8 + $0x18] sm:$0xff]  ;;  %v8976_v7 = vld [vmem:[%s13430_s8 + $0x20] sm:$0xff]  ;;  %v8977_v8 = vld [vmem:[%s13430_s8 + $0x28] sm:$0xff]  ;;  %vm3500_vm4 = vcmask 1043459   ;;  %vm3502_vm5 = vcmask 1044484   ;;  %vm3504_vm6 = vcmask 1045509  }
  0x22   :  { %920 = vmatpush.bf16.msra.mxu1 %v8106_v18  ;;  %v9004_v29 = vld [vmem:[%s13069_s3 + $0x44] sm:$0xf]  ;;  %v8091_v31 = vld [vmem:[%s13069_s3 + $0x48] sm:$0xf0]  ;;  %v8978_v32 = vld [vmem:[%s13430_s8 + $0x30] sm:$0xff]  ;;  %vm4042_vm7 = vcmask 1040384  }
  0x23   :  { %1049 = vmatpush.bf16.msra.mxu2 %v8110_v20  ;;  %v8094_v33 = vor.u32 %v9004_v29, %v8091_v31  ;;  %v8081_v34 = vld [vmem:[%s13069_s3 + $0x30] sm:$0xf]  ;;  %v9003_v35 = vld [vmem:[%s13069_s3 + $0x34] sm:$0xf0]  ;;  %v9002_v37 = vld [vmem:[%s13069_s3 + $0x34] sm:$0xf] }
  0x24   :  { %v8082_v36 = vor.u32 %v9003_v35, %v8081_v34  ;;  %v8083_v38 = vld [vmem:[%s13069_s3 + $0x38] sm:$0xf0]  ;;  %v8073_v40 = vld [vmem:[%s13069_s3 + $0x20] sm:$0xf]  ;;  %v9001_v41 = vld [vmem:[%s13069_s3 + $0x24] sm:$0xf0] }
  0x25   :  { %v8086_v39 = vor.u32 %v9002_v37, %v8083_v38  ;;  %v9000_v42 = vld [vmem:[%s13069_s3 + $0x24] sm:$0xf]  ;;  %v8074_v43 = vor.u32 %v9001_v41, %v8073_v40  ;;  %v8075_v44 = vld [vmem:[%s13069_s3 + $0x28] sm:$0xf0]  ;;  %v8065_v46 = vld [vmem:[%s13069_s3 + $0x10] sm:$0xf] }
  0x26   :  { %921 = vmatpush.bf16.msra.mxu1 %v8098_v25  ;;  %v8078_v45 = vor.u32 %v9000_v42, %v8075_v44  ;;  %v8999_v47 = vld [vmem:[%s13069_s3 + $0x14] sm:$0xf0]  ;;  %v8998_v48 = vld [vmem:[%s13069_s3 + $0x14] sm:$0xf]  ;;  %v8067_v50 = vld [vmem:[%s13069_s3 + $0x18] sm:$0xf0] }
  0x27   :  { %1050 = vmatpush.bf16.msra.mxu2 %v8102_v26  ;;  %v8066_v49 = vor.u32 %v8999_v47, %v8065_v46  ;;  %v8070_v51 = vor.u32 %v8998_v48, %v8067_v50  ;;  %v8057_v52 = vld [vmem:[%s13069_s3] sm:$0xf]  ;;  %v8997_v53 = vld [vmem:[%s13069_s3 + $0x4] sm:$0xf0]  ;;  %v8996_v54 = vld [vmem:[%s13069_s3 + $0x4] sm:$0xf] }
  0x28   :  { %v8058_v55 = vor.u32 %v8997_v53, %v8057_v52  ;;  %v8059_v56 = vld [vmem:[%s13069_s3 + $0x8] sm:$0xf0]  ;;  %v8979_v57 = vld [vmem:[%s13430_s8 + $0x38] sm:$0xff]  ;;  %v553_v59 = vld [vmem:[%s13068_s2] sm:$0x1]  ;;  %vm4049_vm8 = vcmask 1041408  }
  0x29   :  { %v8062_v58 = vor.u32 %v8996_v54, %v8059_v56  ;;  %v555_v60 = vpack.i.b16 %v553_v59, %v553_v59  ;;  %v8980_v61 = vld [vmem:[%s13430_s8 + $0x40] sm:$0xff]  ;;  %v8982_v20 = vld [vmem:[%s13430_s8 + $0x50] sm:$0xff]  ;;  %v8985_v56 = vld [vmem:[%s13430_s8 + $0x68] sm:$0xff]  ;;  %vm4054_vm9 = vcmask 1042433   ;;  %vm4060_vm10 = vcmask 1043458  }
  0x2a   :  { %922 = vmatpush.bf16.msra.mxu1 %v8090_v30  ;;  %v8984_v44 = vld [vmem:[%s13430_s8 + $0x60] sm:$0xff]  ;;  %vm7875_vm11 = vcmask 523264   ;;  %vm7898_vm12 = vcmask 521216   ;;  %vm7926_vm0 = vcmask 5120  }
  0x2b   :  { %1051 = vmatpush.bf16.msra.mxu2 %v8094_v33  ;;  %v557_v0 = vperm.slane %v555_v60, 0 }
  0x2d   :  { %v9621_v2 = vunpack.c.l.bf16 %v557_v0 }
  0x2e   :  { %923 = vmatpush.bf16.msra.mxu1 %v8082_v36 }
  0x2f   :  { %1052 = vmatpush.bf16.msra.mxu2 %v8086_v39 }
  0x31   :  { %8032 = vmatmul.msk.bf16.gmra.mxu0 %vm299_vm1, %v8973_v4 }
  0x32   :  { %924 = vmatpush.bf16.msra.mxu1 %v8074_v43 }
  0x33   :  { %1053 = vmatpush.bf16.msra.mxu2 %v8078_v45 }
  0x36   :  { %925 = vmatpush.bf16.msra.mxu1 %v8066_v49 }
  0x37   :  { %1054 = vmatpush.bf16.msra.mxu2 %v8070_v51 }
  0x3a   :  { %926 = vmatpush.bf16.msra.mxu1 %v8058_v55 }
  0x3b   :  { %1055 = vmatpush.bf16.msra.mxu2 %v8062_v58 }
  0x41   :  { %8033 = vmatmul.msk.bf16.gmra.mxu0 %vm299_vm1, %v8974_v5 }
  0x51   :  { %8034 = vmatmul.msk.bf16.gmra.mxu0 %vm299_vm1, %v8975_v6 }
  0x61   :  { %8035 = vmatmul.msk.bf16.gmra.mxu0 %vm299_vm1, %v8976_v7 }
  0x71   :  { %8036 = vmatmul.msk.bf16.gmra.mxu0 %vm299_vm1, %v8977_v8  ;;  %v8981_v8 = vld [vmem:[%s13430_s8 + $0x48] sm:$0xff] }
  0x81   :  { %8037 = vmatmul.msk.bf16.gmra.mxu0 %vm299_vm1, %v8978_v32  ;;  %v8983_v32 = vld [vmem:[%s13430_s8 + $0x58] sm:$0xff] }
  0x91   :  { %8038 = vmatmul.msk.bf16.gmra.mxu0 %vm299_vm1, %v8979_v57 }
  0x9e   :  { %v385_v62 = vpop.f32.mrf.mxu0 }
  0x9f   :  { %v505_v63 = vpack.c.bf16 %v385_v62, %v385_v62 }
  0xa1   :  { %8039 = vmatmul.msk.bf16.gmra.mxu0 %vm299_vm1, %v8980_v61  ;;  %v558_v1 = vunpack.c.l.bf16 %v505_v63 }
  0xa3   :  { %v607_v5 = vadd.f32 %v9621_v2, %v558_v1 }
  0xa5   :  { %v751_v9 = vmax.f32 %v607_v5, 0.0  ;;  %v8363_v5 = vld [vmem:[%s13071_s5 + $0x1f0] sm:$0xf0] }
  0xa6   :  { %v387_v3 = vpop.f32.mrf.mxu0 }
  0xa7   :  { %v506_v4 = vpack.c.bf16 %v387_v3, %v387_v3 }
  0xa9   :  { %v559_v6 = vunpack.c.l.bf16 %v506_v4  ;;  %v9072_v4 = vld [vmem:[%s13071_s5 + $0x1e4] sm:$0xf] }
  0xab   :  { %v608_v7 = vadd.f32 %v9621_v2, %v559_v6  ;;  %v8366_v6 = vor.u32 %v9072_v4, %v8363_v5  ;;  %v9014_v4 = vld [vmem:[%s13071_s5 + $0xc] sm:$0xf0] }
  0xad   :  { %v752_v10 = vmax.f32 %v608_v7, 0.0  ;;  %2753 = vmatpush.bf16.msrb.mxu2 %v8366_v6 }
  0xae   :  { %v390_v11 = vpop.f32.mrf.mxu0 }
  0xaf   :  { %v799_v12 = vpack.c.bf16 %v752_v10, %v751_v9  ;;  %v507_v13 = vpack.c.bf16 %v390_v11, %v390_v11 }
  0xb1   :  { %8040 = vmatmul.msk.bf16.gmra.mxu0 %vm299_vm1, %v8981_v8  ;;  %927 = vmatmul.bf16.vlgmr.msra.gmra.mxu1 %v799_v12  ;;  %v560_v14 = vunpack.c.l.bf16 %v507_v13  ;;  %v8986_v8 = vld [vmem:[%s13430_s8 + $0x70] sm:$0xff] }
  0xb2   :  { %1056 = vmatmul.bf16.vlgmr.msra.gmra.mxu2 %v799_v12 }
  0xb3   :  { %v609_v17 = vadd.f32 %v9621_v2, %v560_v14  ;;  %v8361_v14 = vld [vmem:[%s13071_s5 + $0x1e0] sm:$0xf] }
  0xb5   :  { %v753_v21 = vmax.f32 %v609_v17, 0.0 }
  0xb6   :  { %v392_v15 = vpop.f32.mrf.mxu0 }
  0xb7   :  { %v508_v16 = vpack.c.bf16 %v392_v15, %v392_v15  ;;  %v9074_v15 = vld [vmem:[%s13071_s5 + $0x1ec] sm:$0xf0] }
  0xb8   :  { %v8362_v17 = vor.u32 %v9074_v15, %v8361_v14 }
  0xb9   :  { %v561_v18 = vunpack.c.l.bf16 %v508_v16  ;;  %v9040_v16 = vld [vmem:[%s13071_s5 + $0xe4] sm:$0xf] }
  0xba   :  { %2495 = vmatpush.bf16.msrb.mxu0 %v8362_v17 }
  0xbb   :  { %v610_v19 = vadd.f32 %v9621_v2, %v561_v18  ;;  %v8235_v18 = vld [vmem:[%s13071_s5 + $0xf0] sm:$0xf0] }
  0xbd   :  { %v754_v22 = vmax.f32 %v610_v19, 0.0 }
  0xbe   :  { %v395_v23 = vpop.f32.mrf.mxu0 }
  0xbf   :  { %v800_v24 = vpack.c.bf16 %v754_v22, %v753_v21  ;;  %v509_v25 = vpack.c.bf16 %v395_v23, %v395_v23  ;;  %v8233_v23 = vld [vmem:[%s13071_s5 + $0xe0] sm:$0xf] }
  0xc1   :  { %8041 = vmatmul.msk.bf16.gmra.mxu0 %vm299_vm1, %v8982_v20  ;;  %932 = vmatmul.bf16.gmra.mxu1 %v800_v24  ;;  %v562_v26 = vunpack.c.l.bf16 %v509_v25  ;;  %v8238_v20 = vor.u32 %v9040_v16, %v8235_v18 }
  0xc2   :  { %1061 = vmatmul.bf16.gmra.mxu2 %v800_v24  ;;  %v9042_v24 = vld [vmem:[%s13071_s5 + $0xec] sm:$0xf0] }
  0xc3   :  { %v611_v29 = vadd.f32 %v9621_v2, %v562_v26  ;;  %2624 = vmatpush.bf16.msrb.mxu1 %v8238_v20 }
  0xc5   :  { %v755_v33 = vmax.f32 %v611_v29, 0.0  ;;  %v1225_v29 = vld [vmem:[%s13070_s4] sm:$0x3] }
  0xc6   :  { %v397_v27 = vpop.f32.mrf.mxu0  ;;  %1227 = vst [vmem:[#allocation1] ss:$9 sm:$0xff] %v1225_v29 }
  0xc7   :  { %v510_v28 = vpack.c.bf16 %v397_v27, %v397_v27  ;;  %v8234_v27 = vor.u32 %v9042_v24, %v8233_v23  ;;  %v7124_v23 = vld [vmem:[#allocation7] sm:$0x3] }
  0xc9   :  { %v563_v30 = vunpack.c.l.bf16 %v510_v28  ;;  %2366 = vmatpush.bf16.msra.mxu3 %v8234_v27 }
  0xcb   :  { %v612_v31 = vadd.f32 %v9621_v2, %v563_v30  ;;  %v8217_v30 = vld [vmem:[%s13071_s5 + $0xc0] sm:$0xf] }
  0xcd   :  { %v756_v34 = vmax.f32 %v612_v31, 0.0  ;;  %v9038_v31 = vld [vmem:[%s13071_s5 + $0xcc] sm:$0xf0]  ;;  %v1228_v15 = vld [vmem:[#allocation1] sm:$0xff] }
  0xce   :  { %v400_v35 = vpop.f32.mrf.mxu0  ;;  %v1229_v16 = vld [vmem:[#allocation1 + $0x9] sm:$0xff] }
  0xcf   :  { %v801_v36 = vpack.c.bf16 %v756_v34, %v755_v33  ;;  %v511_v37 = vpack.c.bf16 %v400_v35, %v400_v35  ;;  %v8218_v35 = vor.u32 %v9038_v31, %v8217_v30  ;;  %7126 = vst [vmem:[#allocation1] ss:$9 sm:$0xff] %v7124_v23 }
  0xd1   :  { %8042 = vmatmul.msk.bf16.gmra.mxu0 %vm299_vm1, %v8983_v32  ;;  %937 = vmatmul.bf16.gmra.mxu1 %v801_v36  ;;  %v564_v38 = vunpack.c.l.bf16 %v511_v37  ;;  %v8987_v32 = vld [vmem:[%s13430_s8 + $0x78] sm:$0xff] }
  0xd2   :  { %1066 = vmatmul.bf16.gmra.mxu2 %v801_v36  ;;  %2367 = vmatpush.bf16.msra.mxu3 %v8218_v35  ;;  %v9068_v35 = vld [vmem:[%s13071_s5 + $0x1c4] sm:$0xf] }
  0xd3   :  { %v613_v41 = vadd.f32 %v9621_v2, %v564_v38  ;;  %v8201_v38 = vld [vmem:[%s13071_s5 + $0xa0] sm:$0xf] }
  0xd5   :  { %v757_v45 = vmax.f32 %v613_v41, 0.0 }
  0xd6   :  { %v402_v39 = vpop.f32.mrf.mxu0 }
  0xd7   :  { %v512_v40 = vpack.c.bf16 %v402_v39, %v402_v39  ;;  %v9034_v39 = vld [vmem:[%s13071_s5 + $0xac] sm:$0xf0] }
  0xd8   :  { %v8202_v41 = vor.u32 %v9034_v39, %v8201_v38 }
  0xd9   :  { %v565_v42 = vunpack.c.l.bf16 %v512_v40 }
  0xda   :  { %2368 = vmatpush.bf16.msra.mxu3 %v8202_v41 }
  0xdb   :  { %v614_v43 = vadd.f32 %v9621_v2, %v565_v42  ;;  %v8185_v42 = vld [vmem:[%s13071_s5 + $0x80] sm:$0xf] }
  0xdd   :  { %v758_v46 = vmax.f32 %v614_v43, 0.0  ;;  %v9030_v43 = vld [vmem:[%s13071_s5 + $0x8c] sm:$0xf0] }
  0xde   :  { %v405_v47 = vpop.f32.mrf.mxu0 }
  0xdf   :  { %v802_v48 = vpack.c.bf16 %v758_v46, %v757_v45  ;;  %v513_v49 = vpack.c.bf16 %v405_v47, %v405_v47  ;;  %v8186_v45 = vor.u32 %v9030_v43, %v8185_v42  ;;  %v9070_v42 = vld [vmem:[%s13071_s5 + $0x1cc] sm:$0xf0]  ;;  %v9036_v43 = vld [vmem:[%s13071_s5 + $0xc4] sm:$0xf] }
  0xe1   :  { %8043 = vmatmul.msk.bf16.gmra.mxu0 %vm299_vm1, %v8984_v44  ;;  %942 = vmatmul.bf16.gmra.mxu1 %v802_v48  ;;  %v566_v50 = vunpack.c.l.bf16 %v513_v49  ;;  %v9026_v49 = vld [vmem:[%s13071_s5 + $0x6c] sm:$0xf0] }
  0xe2   :  { %1071 = vmatmul.bf16.gmra.mxu2 %v802_v48  ;;  %2369 = vmatpush.bf16.msra.mxu3 %v8186_v45  ;;  %v8169_v48 = vld [vmem:[%s13071_s5 + $0x60] sm:$0xf] }
  0xe3   :  { %v615_v53 = vadd.f32 %v9621_v2, %v566_v50 }
  0xe5   :  { %v759_v57 = vmax.f32 %v615_v53, 0.0 }
  0xe6   :  { %v407_v51 = vpop.f32.mrf.mxu0 }
  0xe7   :  { %v514_v52 = vpack.c.bf16 %v407_v51, %v407_v51 }
  0xe9   :  { %v567_v54 = vunpack.c.l.bf16 %v514_v52  ;;  %v8170_v52 = vor.u32 %v9026_v49, %v8169_v48 }
  0xeb   :  { %v616_v55 = vadd.f32 %v9621_v2, %v567_v54  ;;  %2370 = vmatpush.bf16.msra.mxu3 %v8170_v52  ;;  %v8153_v54 = vld [vmem:[%s13071_s5 + $0x40] sm:$0xf] }
  0xed   :  { %v760_v58 = vmax.f32 %v616_v55, 0.0  ;;  %v9022_v55 = vld [vmem:[%s13071_s5 + $0x4c] sm:$0xf0] }
  0xee   :  { %v410_v59 = vpop.f32.mrf.mxu0 }
  0xef   :  { %v803_v60 = vpack.c.bf16 %v760_v58, %v759_v57  ;;  %v515_v61 = vpack.c.bf16 %v410_v59, %v410_v59  ;;  %v8154_v59 = vor.u32 %v9022_v55, %v8153_v54 }
  0xf1   :  { %8044 = vmatmul.msk.bf16.gmra.mxu0 %vm299_vm1, %v8985_v56  ;;  %947 = vmatmul.bf16.gmra.mxu1 %v803_v60  ;;  %v568_v62 = vunpack.c.l.bf16 %v515_v61  ;;  %v8988_v56 = vld [vmem:[%s13430_s8 + $0x80] sm:$0xff] }
  0xf2   :  { %1076 = vmatmul.bf16.gmra.mxu2 %v803_v60  ;;  %2371 = vmatpush.bf16.msra.mxu3 %v8154_v59 }
  0xf3   :  { %v617_v1 = vadd.f32 %v9621_v2, %v568_v62  ;;  %v8137_v62 = vld [vmem:[%s13071_s5 + $0x20] sm:$0xf] }
  0xf5   :  { %v761_v9 = vmax.f32 %v617_v1, 0.0 }
  0xf6   :  { %v412_v63 = vpop.f32.mrf.mxu0 }
  0xf7   :  { %v516_v0 = vpack.c.bf16 %v412_v63, %v412_v63  ;;  %v9018_v63 = vld [vmem:[%s13071_s5 + $0x2c] sm:$0xf0] }
  0xf8   :  { %v8138_v1 = vor.u32 %v9018_v63, %v8137_v62 }
  0xf9   :  { %v569_v3 = vunpack.c.l.bf16 %v516_v0 }
  0xfa   :  { %2372 = vmatpush.bf16.msra.mxu3 %v8138_v1 }
  0xfb   :  { %v618_v7 = vadd.f32 %v9621_v2, %v569_v3  ;;  %v8121_v3 = vld [vmem:[%s13071_s5] sm:$0xf] }
  0xfc   :  { %v8122_v6 = vor.u32 %v9014_v4, %v8121_v3 }
  0xfd   :  { %v762_v10 = vmax.f32 %v618_v7, 0.0 }
  0xfe   :  { %v415_v11 = vpop.f32.mrf.mxu0  ;;  %2373 = vmatpush.bf16.msra.mxu3 %v8122_v6 }
  0xff   :  { %v804_v12 = vpack.c.bf16 %v762_v10, %v761_v9  ;;  %v517_v13 = vpack.c.bf16 %v415_v11, %v415_v11 }
 0x101   :  { %8045 = vmatmul.msk.bf16.gmra.mxu0 %vm299_vm1, %v8986_v8  ;;  %952 = vmatmul.bf16.gmra.mxu1 %v804_v12  ;;  %v570_v19 = vunpack.c.l.bf16 %v517_v13 }
 0x102   :  { %1081 = vmatmul.bf16.gmra.mxu2 %v804_v12  ;;  %v8989_v12 = vld [vmem:[%s13430_s8 + $0x88] sm:$0xff] }
 0x103   :  { %v619_v25 = vadd.f32 %v9621_v2, %v570_v19 }
 0x105   :  { %v763_v33 = vmax.f32 %v619_v25, 0.0 }
 0x106   :  { %v417_v21 = vpop.f32.mrf.mxu0 }
 0x107   :  { %v518_v22 = vpack.c.bf16 %v417_v21, %v417_v21  ;;  %v1230_v21 = vpack.i.b16 %v1228_v15, %v1228_v15 }
 0x109   :  { %v571_v26 = vunpack.c.l.bf16 %v518_v22  ;;  %v1233_v22 = vpack.i.b16 %v1229_v16, %v1229_v16  ;;  %v1232_v25 = vperm.slane %v1230_v21, 0 }
 0x10b   :  { %v620_v28 = vadd.f32 %v9621_v2, %v571_v26  ;;  %v1235_v26 = vperm.slane %v1233_v22, 0 }
 0x10d   :  { %v764_v34 = vmax.f32 %v620_v28, 0.0 }
 0x10e   :  { %v420_v36 = vpop.f32.mrf.mxu0 }
 0x10f   :  { %v805_v37 = vpack.c.bf16 %v764_v34, %v763_v33  ;;  %v519_v40 = vpack.c.bf16 %v420_v36, %v420_v36  ;;  %v9747_v33 = vunpack.c.l.bf16 %v1232_v25  ;;  %v9749_v34 = vunpack.c.l.bf16 %v1235_v26  ;;  %v8347_v36 = vld [vmem:[%s13071_s5 + $0x1d0] sm:$0xf0] }
 0x110   :  { %v8350_v41 = vor.u32 %v9068_v35, %v8347_v36 }
 0x111   :  { %8046 = vmatmul.msk.bf16.gmra.mxu0 %vm299_vm1, %v8987_v32  ;;  %957 = vmatmul.bf16.gmra.mxu1 %v805_v37  ;;  %v572_v44 = vunpack.c.l.bf16 %v519_v40 }
 0x112   :  { %1086 = vmatmul.bf16.gmra.mxu2 %v805_v37  ;;  %v8345_v37 = vld [vmem:[%s13071_s5 + $0x1c0] sm:$0xf] }
 0x113   :  { %v621_v50 = vadd.f32 %v9621_v2, %v572_v44  ;;  %v8219_v44 = vld [vmem:[%s13071_s5 + $0xd0] sm:$0xf0]  ;;  %v8346_v45 = vor.u32 %v9070_v42, %v8345_v37  ;;  %2754 = vmatpush.bf16.msrb.mxu2 %v8350_v41 }
 0x115   :  { %v765_v57 = vmax.f32 %v621_v50, 0.0  ;;  %2496 = vmatpush.bf16.msrb.mxu0 %v8346_v45 }
 0x116   :  { %v422_v46 = vpop.f32.mrf.mxu0 }
 0x117   :  { %v520_v47 = vpack.c.bf16 %v422_v46, %v422_v46  ;;  %v8222_v46 = vor.u32 %v9036_v43, %v8219_v44 }
 0x119   :  { %v573_v51 = vunpack.c.l.bf16 %v520_v47  ;;  %2625 = vmatpush.bf16.msrb.mxu1 %v8222_v46 }
 0x11b   :  { %v622_v53 = vadd.f32 %v9621_v2, %v573_v51  ;;  %v8990_v51 = vld [vmem:[%s13430_s8 + $0x90] sm:$0xff] }
 0x11d   :  { %v766_v58 = vmax.f32 %v622_v53, 0.0 }
 0x11e   :  { %v425_v60 = vpop.f32.mrf.mxu0 }
 0x11f   :  { %v806_v61 = vpack.c.bf16 %v766_v58, %v765_v57  ;;  %v521_v0 = vpack.c.bf16 %v425_v60, %v425_v60 }
 0x121   :  { %8047 = vmatmul.msk.bf16.gmra.mxu0 %vm299_vm1, %v8988_v56  ;;  %962 = vmatmul.bf16.gmra.mxu1 %v806_v61  ;;  %v574_v5 = vunpack.c.l.bf16 %v521_v0 }
 0x122   :  { %1091 = vmatmul.bf16.gmra.mxu2 %v806_v61 }
 0x123   :  { %v623_v9 = vadd.f32 %v9621_v2, %v574_v5 }
 0x125   :  { %v767_v13 = vmax.f32 %v623_v9, 0.0 }
 0x126   :  { %v427_v7 = vpop.f32.mrf.mxu0 }
 0x127   :  { %v522_v8 = vpack.c.bf16 %v427_v7, %v427_v7 }
 0x129   :  { %v575_v10 = vunpack.c.l.bf16 %v522_v8 }
 0x12b   :  { %v624_v11 = vadd.f32 %v9621_v2, %v575_v10 }
 0x12d   :  { %v768_v14 = vmax.f32 %v624_v11, 0.0 }
 0x12e   :  { %v430_v17 = vpop.f32.mrf.mxu0  ;;  %v928_v18 = vpop.f32.mrf.mxu1 }
 0x12f   :  { %v807_v19 = vpack.c.bf16 %v768_v14, %v767_v13  ;;  %v523_v20 = vpack.c.bf16 %v430_v17, %v430_v17 }
 0x131   :  { %8048 = vmatmul.msk.bf16.gmra.mxu0 %vm299_vm1, %v8989_v12  ;;  %967 = vmatmul.bf16.gmra.mxu1 %v807_v19  ;;  %v576_v24 = vunpack.c.l.bf16 %v523_v20 }
 0x132   :  { %1096 = vmatmul.bf16.gmra.mxu2 %v807_v19 }
 0x133   :  { %v625_v32 = vadd.f32 %v9621_v2, %v576_v24 }
 0x135   :  { %v1057_v27 = vpop.f32.mrf.mxu2  ;;  %v769_v52 = vmax.f32 %v625_v32, 0.0 }
 0x136   :  { %v1177_v28 = vpack.c.bf16 %v1057_v27, %v928_v18  ;;  %v432_v29 = vpop.f32.mrf.mxu0  ;;  %v930_v30 = vpop.f32.mrf.mxu1 }
 0x137   :  { %v524_v31 = vpack.c.bf16 %v432_v29, %v432_v29  ;;  %v8991_v29 = vld [vmem:[%s13430_s8 + $0x98] sm:$0xff] }
 0x138   :  { %v1236_v38 = vunpack.c.l.bf16 %v1177_v28  ;;  %v1237_v39 = vunpack.c.h.bf16 %v1177_v28 }
 0x139   :  { %v577_v40 = vunpack.c.l.bf16 %v524_v31 }
 0x13a   :  { %v1334_v48 = vadd.f32 %v9747_v33, %v1236_v38  ;;  %v1335_v49 = vadd.f32 %v9749_v34, %v1237_v39 }
 0x13b   :  { %v626_v47 = vadd.f32 %v9621_v2, %v577_v40 }
 0x13c   :  { %v1430_v60 = vpack.c.bf16 %v1335_v49, %v1334_v48 }
 0x13d   :  { %v1059_v50 = vpop.f32.mrf.mxu2  ;;  %v770_v53 = vmax.f32 %v626_v47, 0.0 }
 0x13e   :  { %v1178_v54 = vpack.c.bf16 %v1059_v50, %v930_v30  ;;  %v435_v55 = vpop.f32.mrf.mxu0  ;;  %v933_v56 = vpop.f32.mrf.mxu1  ;;  %v1478_v1 = vunpack.c.l.bf16 %v1430_v60  ;;  %v1479_v3 = vunpack.c.h.bf16 %v1430_v60  ;;  %v1854_v13 = vunpack.c.l.b16 %v1430_v60 }
 0x13f   :  { %v808_v57 = vpack.c.bf16 %v770_v53, %v769_v52  ;;  %v525_v61 = vpack.c.bf16 %v435_v55, %v435_v55  ;;  %v1855_v14 = vunpack.c.h.b16 %v1430_v60 }
 0x140   :  { %v1238_v58 = vunpack.c.l.bf16 %v1178_v54  ;;  %v1239_v59 = vunpack.c.h.bf16 %v1178_v54 }
 0x141   :  { %8049 = vmatmul.msk.bf16.gmra.mxu0 %vm299_vm1, %v8990_v51  ;;  %972 = vmatmul.bf16.gmra.mxu1 %v808_v57  ;;  %v578_v4 = vunpack.c.l.bf16 %v525_v61 }
 0x142   :  { %v1336_v62 = vadd.f32 %v9747_v33, %v1238_v58  ;;  %v1337_v63 = vadd.f32 %v9749_v34, %v1239_v59  ;;  %1101 = vmatmul.bf16.gmra.mxu2 %v808_v57 }
 0x143   :  { %v627_v20 = vadd.f32 %v9621_v2, %v578_v4 }
 0x144   :  { %v1431_v0 = vpack.c.bf16 %v1337_v63, %v1336_v62 }
 0x145   :  { %v1062_v5 = vpop.f32.mrf.mxu2  ;;  %v771_v30 = vmax.f32 %v627_v20, 0.0 }
 0x146   :  { %v1480_v6 = vunpack.c.l.bf16 %v1431_v0  ;;  %v1481_v7 = vunpack.c.h.bf16 %v1431_v0  ;;  %v1179_v8 = vpack.c.bf16 %v1062_v5, %v933_v56  ;;  %v437_v9 = vpop.f32.mrf.mxu0  ;;  %v935_v10 = vpop.f32.mrf.mxu1  ;;  %v1856_v11 = vunpack.c.l.b16 %v1431_v0 }
 0x147   :  { %v526_v12 = vpack.c.bf16 %v437_v9, %v437_v9  ;;  %v1857_v15 = vunpack.c.h.b16 %v1431_v0 }
 0x148   :  { %v1574_v16 = vmax.f32 %v1478_v1, %v1480_v6  ;;  %v1587_v17 = vmax.f32 %v1479_v3, %v1481_v7  ;;  %v1240_v18 = vunpack.c.l.bf16 %v1179_v8  ;;  %v1241_v19 = vunpack.c.h.bf16 %v1179_v8 }
 0x149   :  { %v579_v21 = vunpack.c.l.bf16 %v526_v12  ;;  %v9779_v22 = vpack.c.b16 %v1856_v11, %v1854_v13  ;;  %v9781_v23 = vpack.c.b16 %v1857_v15, %v1855_v14 }
 0x14a   :  { %v1338_v24 = vadd.f32 %v9747_v33, %v1240_v18  ;;  %v1339_v25 = vadd.f32 %v9749_v34, %v1241_v19 }
 0x14b   :  { %13431 = vst [vmem:[#allocation14_spill] sm:$0xff] %v9781_v23  ;;  %2374 = vmatmul.bf16.vlgmr.msra.gmra.mxu3 %v9779_v22  ;;  %v628_v26 = vadd.f32 %v9621_v2, %v579_v21 }
 0x14c   :  { %v1432_v27 = vpack.c.bf16 %v1339_v25, %v1338_v24 }
 0x14d   :  { %v1064_v28 = vpop.f32.mrf.mxu2  ;;  %v772_v31 = vmax.f32 %v628_v26, 0.0 }
 0x14e   :  { %v1482_v32 = vunpack.c.l.bf16 %v1432_v27  ;;  %v1483_v35 = vunpack.c.h.bf16 %v1432_v27  ;;  %v1180_v36 = vpack.c.bf16 %v1064_v28, %v935_v10  ;;  %v440_v37 = vpop.f32.mrf.mxu0  ;;  %v938_v38 = vpop.f32.mrf.mxu1  ;;  %v1858_v57 = vunpack.c.l.b16 %v1432_v27  ;;  %v8992_v10 = vld [vmem:[%s13430_s8 + $0xa0] sm:$0xff] }
 0x14f   :  { %v809_v39 = vpack.c.bf16 %v772_v31, %v771_v30  ;;  %v527_v44 = vpack.c.bf16 %v440_v37, %v440_v37  ;;  %v1859_v58 = vunpack.c.h.b16 %v1432_v27 }
 0x150   :  { %v1575_v40 = vmax.f32 %v1574_v16, %v1482_v32  ;;  %v1588_v41 = vmax.f32 %v1587_v17, %v1483_v35  ;;  %v1242_v42 = vunpack.c.l.bf16 %v1180_v36  ;;  %v1243_v43 = vunpack.c.h.bf16 %v1180_v36 }
 0x151   :  { %8050 = vmatmul.msk.bf16.gmra.mxu0 %vm299_vm1, %v8991_v29  ;;  %977 = vmatmul.bf16.gmra.mxu1 %v809_v39  ;;  %v580_v48 = vunpack.c.l.bf16 %v527_v44 }
 0x152   :  { %v1340_v45 = vadd.f32 %v9747_v33, %v1242_v42  ;;  %v1341_v46 = vadd.f32 %v9749_v34, %v1243_v43  ;;  %1106 = vmatmul.bf16.gmra.mxu2 %v809_v39 }
 0x153   :  { %v629_v0 = vadd.f32 %v9621_v2, %v580_v48 }
 0x154   :  { %v1433_v47 = vpack.c.bf16 %v1341_v46, %v1340_v45 }
 0x155   :  { %v1067_v49 = vpop.f32.mrf.mxu2  ;;  %v773_v11 = vmax.f32 %v629_v0, 0.0  ;;  %v8993_v0 = vld [vmem:[%s13430_s8 + $0xa8] sm:$0xff] }
 0x156   :  { %v1484_v50 = vunpack.c.l.bf16 %v1433_v47  ;;  %v1485_v51 = vunpack.c.h.bf16 %v1433_v47  ;;  %v1181_v52 = vpack.c.bf16 %v1067_v49, %v938_v38  ;;  %v442_v53 = vpop.f32.mrf.mxu0  ;;  %v940_v54 = vpop.f32.mrf.mxu1  ;;  %v1860_v55 = vunpack.c.l.b16 %v1433_v47 }
 0x157   :  { %v528_v56 = vpack.c.bf16 %v442_v53, %v442_v53  ;;  %v1861_v59 = vunpack.c.h.b16 %v1433_v47 }
 0x158   :  { %v1576_v60 = vmax.f32 %v1575_v40, %v1484_v50  ;;  %v1589_v61 = vmax.f32 %v1588_v41, %v1485_v51  ;;  %v1244_v62 = vunpack.c.l.bf16 %v1181_v52  ;;  %v1245_v63 = vunpack.c.h.bf16 %v1181_v52  ;;  %v9064_v50 = vld [vmem:[%s13071_s5 + $0x1a4] sm:$0xf]  ;;  %v8331_v51 = vld [vmem:[%s13071_s5 + $0x1b0] sm:$0xf0]  ;;  %v8329_v52 = vld [vmem:[%s13071_s5 + $0x1a0] sm:$0xf] }
 0x159   :  { %v581_v1 = vunpack.c.l.bf16 %v528_v56  ;;  %v9794_v3 = vpack.c.b16 %v1860_v55, %v1858_v57  ;;  %v9796_v4 = vpack.c.b16 %v1861_v59, %v1859_v58  ;;  %v8334_v56 = vor.u32 %v9064_v50, %v8331_v51  ;;  %v9066_v57 = vld [vmem:[%s13071_s5 + $0x1ac] sm:$0xf0]  ;;  %v9032_v58 = vld [vmem:[%s13071_s5 + $0xa4] sm:$0xf]  ;;  %v8203_v59 = vld [vmem:[%s13071_s5 + $0xb0] sm:$0xf0] }
 0x15a   :  { %v1342_v5 = vadd.f32 %v9747_v33, %v1244_v62  ;;  %v1343_v6 = vadd.f32 %v9749_v34, %v1245_v63  ;;  %v8206_v62 = vor.u32 %v9032_v58, %v8203_v59 }
 0x15b   :  { %13432 = vst [vmem:[#allocation15_spill] sm:$0xff] %v9794_v3  ;;  %2379 = vmatmul.bf16.gmra.mxu3 %v9794_v3  ;;  %v630_v7 = vadd.f32 %v9621_v2, %v581_v1  ;;  %2755 = vmatpush.bf16.msrb.mxu2 %v8334_v56  ;;  %v8265_v56 = vld [vmem:[%s13071_s5 + $0x120] sm:$0xf] }
 0x15c   :  { %13433 = vst [vmem:[#allocation16_spill] sm:$0xff] %v9796_v4  ;;  %v1434_v8 = vpack.c.bf16 %v1343_v6, %v1342_v5  ;;  %2626 = vmatpush.bf16.msrb.mxu1 %v8206_v62 }
 0x15d   :  { %v1069_v9 = vpop.f32.mrf.mxu2  ;;  %v774_v12 = vmax.f32 %v630_v7, 0.0  ;;  %v8313_v7 = vld [vmem:[%s13071_s5 + $0x180] sm:$0xf] }
 0x15e   :  { %v1486_v13 = vunpack.c.l.bf16 %v1434_v8  ;;  %v1487_v14 = vunpack.c.h.bf16 %v1434_v8  ;;  %v1182_v15 = vpack.c.bf16 %v1069_v9, %v940_v54  ;;  %v445_v16 = vpop.f32.mrf.mxu0  ;;  %v943_v17 = vpop.f32.mrf.mxu1  ;;  %v1862_v40 = vunpack.c.l.b16 %v1434_v8 }
 0x15f   :  { %v810_v18 = vpack.c.bf16 %v774_v12, %v773_v11  ;;  %v529_v25 = vpack.c.bf16 %v445_v16, %v445_v16  ;;  %v1863_v41 = vunpack.c.h.b16 %v1434_v8  ;;  %v9062_v8 = vld [vmem:[%s13071_s5 + $0x18c] sm:$0xf0] }
 0x160   :  { %v1577_v19 = vmax.f32 %v1576_v60, %v1486_v13  ;;  %v1590_v20 = vmax.f32 %v1589_v61, %v1487_v14  ;;  %v1246_v21 = vunpack.c.l.bf16 %v1182_v15  ;;  %v1247_v24 = vunpack.c.h.bf16 %v1182_v15 }
 0x161   :  { %8051 = vmatmul.msk.bf16.gmra.mxu0 %vm299_vm1, %v8992_v10  ;;  %982 = vmatmul.bf16.gmra.mxu1 %v810_v18  ;;  %v582_v29 = vunpack.c.l.bf16 %v529_v25  ;;  %v8330_v61 = vor.u32 %v9066_v57, %v8329_v52  ;;  %v8314_v15 = vor.u32 %v9062_v8, %v8313_v7  ;;  %v9050_v57 = vld [vmem:[%s13071_s5 + $0x12c] sm:$0xf0] }
 0x162   :  { %v1344_v26 = vadd.f32 %v9747_v33, %v1246_v21  ;;  %v1345_v27 = vadd.f32 %v9749_v34, %v1247_v24  ;;  %1111 = vmatmul.bf16.gmra.mxu2 %v810_v18  ;;  %v9043_v21 = vld [vmem:[%s13071_s5 + $0xf4] sm:$0xf0]  ;;  %v8266_v62 = vor.u32 %v9050_v57, %v8265_v56  ;;  %v9046_v7 = vld [vmem:[%s13071_s5 + $0x10c] sm:$0xf0] }
 0x163   :  { %v631_v47 = vadd.f32 %v9621_v2, %v582_v29  ;;  %2497 = vmatpush.bf16.msrb.mxu0 %v8330_v61 }
 0x164   :  { %v1435_v28 = vpack.c.bf16 %v1345_v27, %v1344_v26  ;;  %v8297_v26 = vld [vmem:[%s13071_s5 + $0x160] sm:$0xf]  ;;  %v9058_v27 = vld [vmem:[%s13071_s5 + $0x16c] sm:$0xf0] }
 0x165   :  { %v1072_v30 = vpop.f32.mrf.mxu2  ;;  %v775_v1 = vmax.f32 %v631_v47, 0.0 }
 0x166   :  { %v1488_v31 = vunpack.c.l.bf16 %v1435_v28  ;;  %v1489_v32 = vunpack.c.h.bf16 %v1435_v28  ;;  %v1183_v35 = vpack.c.bf16 %v1072_v30, %v943_v17  ;;  %v447_v36 = vpop.f32.mrf.mxu0  ;;  %v945_v37 = vpop.f32.mrf.mxu1  ;;  %v1864_v38 = vunpack.c.l.b16 %v1435_v28 }
 0x167   :  { %v530_v39 = vpack.c.bf16 %v447_v36, %v447_v36  ;;  %v1865_v42 = vunpack.c.h.b16 %v1435_v28  ;;  %2498 = vmatpush.bf16.msrb.mxu0 %v8314_v15  ;;  %v8298_v30 = vor.u32 %v9058_v27, %v8297_v26 }
 0x168   :  { %v1578_v43 = vmax.f32 %v1577_v19, %v1488_v31  ;;  %v1591_v44 = vmax.f32 %v1590_v20, %v1489_v32  ;;  %v1248_v45 = vunpack.c.l.bf16 %v1183_v35  ;;  %v1249_v46 = vunpack.c.h.bf16 %v1183_v35  ;;  %v8241_v20 = vld [vmem:[%s13071_s5 + $0xe8] sm:$0xf] }
 0x169   :  { %v583_v48 = vunpack.c.l.bf16 %v530_v39  ;;  %v9809_v49 = vpack.c.b16 %v1864_v38, %v1862_v40  ;;  %v9820_v53 = vpack.c.b16 %v1865_v42, %v1863_v41  ;;  %v8242_v25 = vor.u32 %v9043_v21, %v8241_v20  ;;  %v9054_v38 = vld [vmem:[%s13071_s5 + $0x14c] sm:$0xf0] }
 0x16a   :  { %v1346_v54 = vadd.f32 %v9747_v33, %v1248_v45  ;;  %v1347_v55 = vadd.f32 %v9749_v34, %v1249_v46 }
 0x16b   :  { %13434 = vst [vmem:[#allocation17_spill] sm:$0xff] %v9809_v49  ;;  %v632_v60 = vadd.f32 %v9621_v2, %v583_v48  ;;  %2384 = vmatmul.bf16.gmra.mxu3 %v9809_v49  ;;  %2499 = vmatpush.bf16.msrb.mxu0 %v8298_v30 }
 0x16c   :  { %13435 = vst [vmem:[#allocation18_spill] sm:$0xff] %v9820_v53  ;;  %v1436_v63 = vpack.c.bf16 %v1347_v55, %v1346_v54  ;;  %2882 = vmatpush.bf16.msrb.mxu3 %v8242_v25 }
 0x16d   :  { %v776_v5 = vmax.f32 %v632_v60, 0.0  ;;  %v1074_v6 = vpop.f32.mrf.mxu2 }
 0x16e   :  { %v1490_v9 = vunpack.c.l.bf16 %v1436_v63  ;;  %v1491_v10 = vunpack.c.h.bf16 %v1436_v63  ;;  %v1184_v11 = vpack.c.bf16 %v1074_v6, %v945_v37  ;;  %v450_v12 = vpop.f32.mrf.mxu0  ;;  %v948_v13 = vpop.f32.mrf.mxu1  ;;  %v1866_v36 = vunpack.c.l.b16 %v1436_v63  ;;  %v8281_v37 = vld [vmem:[%s13071_s5 + $0x140] sm:$0xf] }
 0x16f   :  { %v811_v14 = vpack.c.bf16 %v776_v5, %v775_v1  ;;  %v531_v24 = vpack.c.bf16 %v450_v12, %v450_v12  ;;  %v8282_v46 = vor.u32 %v9054_v38, %v8281_v37  ;;  %v1867_v47 = vunpack.c.h.b16 %v1436_v63  ;;  %v8994_v63 = vld [vmem:[%s13430_s8 + $0xb0] sm:$0xff]  ;;  %v8249_v6 = vld [vmem:[%s13071_s5 + $0x100] sm:$0xf] }
 0x170   :  { %v1579_v16 = vmax.f32 %v1578_v43, %v1490_v9  ;;  %v1592_v17 = vmax.f32 %v1591_v44, %v1491_v10  ;;  %v1250_v18 = vunpack.c.l.bf16 %v1184_v11  ;;  %v1251_v19 = vunpack.c.h.bf16 %v1184_v11 }
 0x171   :  { %8052 = vmatmul.msk.bf16.gmra.mxu0 %vm299_vm1, %v8993_v0  ;;  %987 = vmatmul.bf16.gmra.mxu1 %v811_v14  ;;  %v584_v32 = vunpack.c.l.bf16 %v531_v24  ;;  %v8250_v15 = vor.u32 %v9046_v7, %v8249_v6 }
 0x172   :  { %v1348_v28 = vadd.f32 %v9747_v33, %v1250_v18  ;;  %v1349_v29 = vadd.f32 %v9749_v34, %v1251_v19  ;;  %1116 = vmatmul.bf16.gmra.mxu2 %v811_v14  ;;  %2500 = vmatpush.bf16.msrb.mxu0 %v8282_v46 }
 0x173   :  { %v633_v52 = vadd.f32 %v9621_v2, %v584_v32 }
 0x174   :  { %v1437_v31 = vpack.c.bf16 %v1349_v29, %v1348_v28 }
 0x175   :  { %v1077_v35 = vpop.f32.mrf.mxu2  ;;  %v777_v0 = vmax.f32 %v633_v52, 0.0 }
 0x176   :  { %v1492_v39 = vunpack.c.l.bf16 %v1437_v31  ;;  %v1493_v40 = vunpack.c.h.bf16 %v1437_v31  ;;  %v1185_v41 = vpack.c.bf16 %v1077_v35, %v948_v13  ;;  %v452_v42 = vpop.f32.mrf.mxu0  ;;  %v950_v43 = vpop.f32.mrf.mxu1  ;;  %v1868_v44 = vunpack.c.l.b16 %v1437_v31  ;;  %2501 = vmatpush.bf16.msrb.mxu0 %v8266_v62 }
 0x177   :  { %v532_v45 = vpack.c.bf16 %v452_v42, %v452_v42  ;;  %v1869_v48 = vunpack.c.h.b16 %v1437_v31 }
 0x178   :  { %v9865_v50 = vmax.f32 %v1579_v16, %v1492_v39  ;;  %v9867_v51 = vmax.f32 %v1592_v17, %v1493_v40  ;;  %v9870_v55 = vpack.c.b16 %v1868_v44, %v1866_v36  ;;  %v1252_v59 = vunpack.c.l.bf16 %v1185_v41 }
 0x179   :  { %v585_v54 = vunpack.c.l.bf16 %v532_v45  ;;  %v9878_v58 = vpack.c.b16 %v1869_v48, %v1867_v47  ;;  %v1253_v60 = vunpack.c.h.bf16 %v1185_v41 }
 0x17a   :  { %13436 = vst [vmem:[#allocation19_spill] sm:$0xff] %v9870_v55  ;;  %v1350_v8 = vadd.f32 %v9747_v33, %v1252_v59  ;;  %2502 = vmatpush.bf16.msrb.mxu0 %v8250_v15 }
 0x17b   :  { %13437 = vst [vmem:[#allocation20_spill] sm:$0xff] %v9878_v58  ;;  %v634_v61 = vadd.f32 %v9621_v2, %v585_v54  ;;  %2389 = vmatmul.bf16.gmra.mxu3 %v9870_v55  ;;  %v1351_v9 = vadd.f32 %v9749_v34, %v1253_v60 }
 0x17d   :  { %v778_v1 = vmax.f32 %v634_v61, 0.0  ;;  %v1079_v5 = vpop.f32.mrf.mxu2  ;;  %v1438_v18 = vpack.c.bf16 %v1351_v9, %v1350_v8  ;;  %v8995_v61 = vld [vmem:[%s13430_s8 + $0xb8] sm:$0xff] }
 0x17e   :  { %v455_v10 = vpop.f32.mrf.mxu0  ;;  %v953_v11 = vpop.f32.mrf.mxu1  ;;  %v1186_v12 = vpack.c.bf16 %v1079_v5, %v950_v43 }
 0x17f   :  { %v812_v13 = vpack.c.bf16 %v778_v1, %v777_v0  ;;  %v533_v14 = vpack.c.bf16 %v455_v10, %v455_v10  ;;  %v1494_v26 = vunpack.c.l.bf16 %v1438_v18  ;;  %v1495_v27 = vunpack.c.h.bf16 %v1438_v18 }
 0x180   :  { %v1254_v16 = vunpack.c.l.bf16 %v1186_v12  ;;  %v1255_v17 = vunpack.c.h.bf16 %v1186_v12  ;;  %v1870_v31 = vunpack.c.l.b16 %v1438_v18  ;;  %v1871_v47 = vunpack.c.h.b16 %v1438_v18 }
 0x181   :  { %8053 = vmatmul.msk.bf16.gmra.mxu0 %vm299_vm1, %v8994_v63  ;;  %992 = vmatmul.bf16.gmra.mxu1 %v812_v13  ;;  %v586_v21 = vunpack.c.l.bf16 %v533_v14 }
 0x182   :  { %1121 = vmatmul.bf16.gmra.mxu2 %v812_v13  ;;  %v1352_v19 = vadd.f32 %v9747_v33, %v1254_v16  ;;  %v1353_v20 = vadd.f32 %v9749_v34, %v1255_v17 }
 0x183   :  { %v635_v38 = vadd.f32 %v9621_v2, %v586_v21 }
 0x184   :  { %v1439_v24 = vpack.c.bf16 %v1353_v20, %v1352_v19 }
 0x185   :  { %v1082_v25 = vpop.f32.mrf.mxu2  ;;  %v779_v57 = vmax.f32 %v635_v38, 0.0 }
 0x186   :  { %v1187_v28 = vpack.c.bf16 %v1082_v25, %v953_v11  ;;  %v457_v29 = vpop.f32.mrf.mxu0  ;;  %v955_v30 = vpop.f32.mrf.mxu1  ;;  %v1496_v32 = vunpack.c.l.bf16 %v1439_v24  ;;  %v1497_v35 = vunpack.c.h.bf16 %v1439_v24  ;;  %v1872_v37 = vunpack.c.l.b16 %v1439_v24 }
 0x187   :  { %v534_v36 = vpack.c.bf16 %v457_v29, %v457_v29  ;;  %v1873_v48 = vunpack.c.h.b16 %v1439_v24 }
 0x188   :  { %v1256_v39 = vunpack.c.l.bf16 %v1187_v28  ;;  %v1257_v40 = vunpack.c.h.bf16 %v1187_v28  ;;  %v1600_v41 = vmax.f32 %v1494_v26, %v1496_v32  ;;  %v1613_v42 = vmax.f32 %v1495_v27, %v1497_v35 }
 0x189   :  { %v587_v43 = vunpack.c.l.bf16 %v534_v36  ;;  %v9897_v44 = vpack.c.b16 %v1872_v37, %v1870_v31  ;;  %v9903_v56 = vpack.c.b16 %v1873_v48, %v1871_v47 }
 0x18a   :  { %v1354_v45 = vadd.f32 %v9747_v33, %v1256_v39  ;;  %v1355_v46 = vadd.f32 %v9749_v34, %v1257_v40 }
 0x18b   :  { %13438 = vst [vmem:[#allocation21_spill] sm:$0xff] %v9897_v44  ;;  %v636_v52 = vadd.f32 %v9621_v2, %v587_v43  ;;  %2394 = vmatmul.bf16.gmra.mxu3 %v9897_v44 }
 0x18c   :  { %v1440_v54 = vpack.c.bf16 %v1355_v46, %v1354_v45  ;;  %13439 = vst [vmem:[#allocation22_spill] sm:$0xff] %v9903_v56 }
 0x18d   :  { %v780_v59 = vmax.f32 %v636_v52, 0.0  ;;  %v1084_v60 = vpop.f32.mrf.mxu2 }
 0x18e   :  { %v1498_v62 = vunpack.c.l.bf16 %v1440_v54  ;;  %v1499_v63 = vunpack.c.h.bf16 %v1440_v54  ;;  %v1188_v0 = vpack.c.bf16 %v1084_v60, %v955_v30  ;;  %v460_v1 = vpop.f32.mrf.mxu0  ;;  %v958_v5 = vpop.f32.mrf.mxu1  ;;  %v1874_v26 = vunpack.c.l.b16 %v1440_v54 }
 0x18f   :  { %v813_v6 = vpack.c.bf16 %v780_v59, %v779_v57  ;;  %v535_v11 = vpack.c.bf16 %v460_v1, %v460_v1  ;;  %v1875_v27 = vunpack.c.h.b16 %v1440_v54  ;;  %v1581_v1 = vrot.slane %v9865_v50, 4 }
 0x190   :  { %v1601_v7 = vmax.f32 %v1600_v41, %v1498_v62  ;;  %v1614_v8 = vmax.f32 %v1613_v42, %v1499_v63  ;;  %v1258_v9 = vunpack.c.l.bf16 %v1188_v0  ;;  %v1259_v10 = vunpack.c.h.bf16 %v1188_v0 }
 0x191   :  { %8054 = vmatmul.msk.bf16.gmra.mxu0 %vm299_vm1, %v8995_v61  ;;  %997 = vmatmul.bf16.gmra.mxu1 %v813_v6  ;;  %v588_v15 = vunpack.c.l.bf16 %v535_v11 }
 0x192   :  { %v1356_v12 = vadd.f32 %v9747_v33, %v1258_v9  ;;  %v1357_v13 = vadd.f32 %v9749_v34, %v1259_v10  ;;  %1126 = vmatmul.bf16.gmra.mxu2 %v813_v6  ;;  %v1582_v10 = vmax.f32 %v9865_v50, %v1581_v1  ;;  %v9060_v50 = vld [vmem:[%s13071_s5 + $0x184] sm:$0xf] }
 0x193   :  { %v637_v35 = vadd.f32 %v9621_v2, %v588_v15 }
 0x194   :  { %v1441_v14 = vpack.c.bf16 %v1357_v13, %v1356_v12 }
 0x195   :  { %v1087_v16 = vpop.f32.mrf.mxu2  ;;  %v781_v43 = vmax.f32 %v637_v35, 0.0 }
 0x196   :  { %v1500_v17 = vunpack.c.l.bf16 %v1441_v14  ;;  %v1501_v18 = vunpack.c.h.bf16 %v1441_v14  ;;  %v1189_v19 = vpack.c.bf16 %v1087_v16, %v958_v5  ;;  %v462_v20 = vpop.f32.mrf.mxu0  ;;  %v960_v21 = vpop.f32.mrf.mxu1  ;;  %v1876_v24 = vunpack.c.l.b16 %v1441_v14 }
 0x197   :  { %v536_v25 = vpack.c.bf16 %v462_v20, %v462_v20  ;;  %v1877_v28 = vunpack.c.h.b16 %v1441_v14  ;;  %v1594_v5 = vrot.slane %v9867_v51, 4 }
 0x198   :  { %v1602_v29 = vmax.f32 %v1601_v7, %v1500_v17  ;;  %v1615_v30 = vmax.f32 %v1614_v8, %v1501_v18  ;;  %v1260_v31 = vunpack.c.l.bf16 %v1189_v19  ;;  %v1261_v32 = vunpack.c.h.bf16 %v1189_v19 }
 0x199   :  { %v589_v36 = vunpack.c.l.bf16 %v536_v25  ;;  %v9912_v37 = vpack.c.b16 %v1876_v24, %v1874_v26  ;;  %v9914_v38 = vpack.c.b16 %v1877_v28, %v1875_v27  ;;  %v1595_v11 = vmax.f32 %v9867_v51, %v1594_v5  ;;  %v8315_v51 = vld [vmem:[%s13071_s5 + $0x190] sm:$0xf0] }
 0x19a   :  { %v1358_v39 = vadd.f32 %v9747_v33, %v1260_v31  ;;  %v1359_v40 = vadd.f32 %v9749_v34, %v1261_v32  ;;  %v8318_v35 = vor.u32 %v9060_v50, %v8315_v51 }
 0x19b   :  { %13440 = vst [vmem:[#allocation23_spill] sm:$0xff] %v9912_v37  ;;  %v638_v41 = vadd.f32 %v9621_v2, %v589_v36  ;;  %2399 = vmatmul.bf16.gmra.mxu3 %v9912_v37  ;;  %v8187_v36 = vld [vmem:[%s13071_s5 + $0x90] sm:$0xf0] }
 0x19c   :  { %13441 = vst [vmem:[#allocation24_spill] sm:$0xff] %v9914_v38  ;;  %v1442_v42 = vpack.c.bf16 %v1359_v40, %v1358_v39  ;;  %v8225_v39 = vld [vmem:[%s13071_s5 + $0xc8] sm:$0xf]  ;;  %v9039_v40 = vld [vmem:[%s13071_s5 + $0xd4] sm:$0xf0]  ;;  %2756 = vmatpush.bf16.msrb.mxu2 %v8318_v35 }
 0x19d   :  { %v782_v45 = vmax.f32 %v638_v41, 0.0  ;;  %v1089_v46 = vpop.f32.mrf.mxu2 }
 0x19e   :  { %v1502_v47 = vunpack.c.l.bf16 %v1442_v42  ;;  %v1503_v48 = vunpack.c.h.bf16 %v1442_v42  ;;  %v1190_v52 = vpack.c.bf16 %v1089_v46, %v960_v21  ;;  %v465_v54 = vpop.f32.mrf.mxu0  ;;  %v963_v57 = vpop.f32.mrf.mxu1  ;;  %v1878_v13 = vunpack.c.l.b16 %v1442_v42 }
 0x19f   :  { %v537_v59 = vpack.c.bf16 %v465_v54, %v465_v54  ;;  %v814_v60 = vpack.c.bf16 %v782_v45, %v781_v43  ;;  %v1879_v24 = vunpack.c.h.b16 %v1442_v42  ;;  %v8226_v46 = vor.u32 %v9039_v40, %v8225_v39 }
 0x1a0   :  { %v1603_v61 = vmax.f32 %v1602_v29, %v1502_v47  ;;  %v1616_v62 = vmax.f32 %v1615_v30, %v1503_v48  ;;  %v1262_v63 = vunpack.c.l.bf16 %v1190_v52  ;;  %v1263_v0 = vunpack.c.h.bf16 %v1190_v52  ;;  %v9028_v30 = vld [vmem:[%s13071_s5 + $0x84] sm:$0xf] }
 0x1a1   :  { %1002 = vmatmul.bf16.gmra.mxu1 %v814_v60  ;;  %2503 = vmatmul.bf16.vlgmr.msrb.gmra.mxu0 %v9781_v23  ;;  %v590_v8 = vunpack.c.l.bf16 %v537_v59  ;;  %v8190_v45 = vor.u32 %v9028_v30, %v8187_v36  ;;  %v1583_v52 = vrot.slane %v1582_v10, 2  ;;  %v1596_v54 = vrot.slane %v1595_v11, 2 }
 0x1a2   :  { %v1360_v6 = vadd.f32 %v9747_v33, %v1262_v63  ;;  %v1361_v7 = vadd.f32 %v9749_v34, %v1263_v0  ;;  %1131 = vmatmul.bf16.gmra.mxu2 %v814_v60  ;;  %2883 = vmatpush.bf16.msrb.mxu3 %v8226_v46 }
 0x1a3   :  { %v639_v20 = vadd.f32 %v9621_v2, %v590_v8  ;;  %2627 = vmatpush.bf16.msrb.mxu1 %v8190_v45 }
 0x1a4   :  { %v1443_v9 = vpack.c.bf16 %v1361_v7, %v1360_v6 }
 0x1a5   :  { %v1092_v12 = vpop.f32.mrf.mxu2 }
 0x1a6   :  { %v1504_v14 = vunpack.c.l.bf16 %v1443_v9  ;;  %v1505_v15 = vunpack.c.h.bf16 %v1443_v9  ;;  %v1191_v16 = vpack.c.bf16 %v1092_v12, %v963_v57  ;;  %v467_v17 = vpop.f32.mrf.mxu0  ;;  %v965_v18 = vpop.f32.mrf.mxu1  ;;  %v1880_v19 = vunpack.c.l.b16 %v1443_v9 }
 0x1a7   :  { %v538_v21 = vpack.c.bf16 %v467_v17, %v467_v17  ;;  %v1881_v25 = vunpack.c.h.b16 %v1443_v9  ;;  %v783_v57 = vmax.f32 %v639_v20, 0.0  ;;  %v1584_v12 = vmax.f32 %v1582_v10, %v1583_v52 }
 0x1a8   :  { %v1604_v26 = vmax.f32 %v1603_v61, %v1504_v14  ;;  %v1617_v27 = vmax.f32 %v1616_v62, %v1505_v15  ;;  %v1264_v28 = vunpack.c.l.bf16 %v1191_v16  ;;  %v1265_v29 = vunpack.c.h.bf16 %v1191_v16 }
 0x1a9   :  { %v591_v31 = vunpack.c.l.bf16 %v538_v21  ;;  %v9937_v32 = vpack.c.b16 %v1880_v19, %v1878_v13  ;;  %v9948_v41 = vpack.c.b16 %v1881_v25, %v1879_v24  ;;  %v1597_v13 = vmax.f32 %v1595_v11, %v1596_v54 }
 0x1aa   :  { %v1362_v42 = vadd.f32 %v9747_v33, %v1264_v28  ;;  %v1363_v43 = vadd.f32 %v9749_v34, %v1265_v29 }
 0x1ab   :  { %13442 = vst [vmem:[#allocation25_spill] sm:$0xff] %v9937_v32  ;;  %v640_v47 = vadd.f32 %v9621_v2, %v591_v31  ;;  %2404 = vmatmul.bf16.gmra.mxu3 %v9937_v32  ;;  %v1598_v19 = vrot.slane %v1597_v13, 1 }
 0x1ac   :  { %13443 = vst [vmem:[#allocation26_spill] sm:$0xff] %v9948_v41  ;;  %v1444_v48 = vpack.c.bf16 %v1363_v43, %v1362_v42 }
 0x1ad   :  { %v784_v59 = vmax.f32 %v640_v47, 0.0  ;;  %v1094_v60 = vpop.f32.mrf.mxu2  ;;  %v1599_v52 = vmax.f32 %v1597_v13, %v1598_v19 }
 0x1ae   :  { %v1506_v61 = vunpack.c.l.bf16 %v1444_v48  ;;  %v1507_v62 = vunpack.c.h.bf16 %v1444_v48  ;;  %v1192_v63 = vpack.c.bf16 %v1094_v60, %v965_v18  ;;  %v470_v0 = vpop.f32.mrf.mxu0  ;;  %v968_v1 = vpop.f32.mrf.mxu1  ;;  %v1585_v18 = vrot.slane %v1584_v12, 1 }
 0x1af   :  { %v815_v5 = vpack.c.bf16 %v784_v59, %v783_v57  ;;  %v539_v14 = vpack.c.bf16 %v470_v0, %v470_v0  ;;  %v1882_v29 = vunpack.c.l.b16 %v1444_v48  ;;  %v1883_v50 = vunpack.c.h.b16 %v1444_v48 }
 0x1b0   :  { %v1605_v6 = vmax.f32 %v1604_v26, %v1506_v61  ;;  %v1618_v7 = vmax.f32 %v1617_v27, %v1507_v62  ;;  %v1266_v8 = vunpack.c.l.bf16 %v1192_v63  ;;  %v1267_v9 = vunpack.c.h.bf16 %v1192_v63 }
 0x1b1   :  { %1007 = vmatmul.bf16.gmra.mxu1 %v815_v5  ;;  %2508 = vmatmul.bf16.gmra.mxu0 %v9796_v4  ;;  %v592_v20 = vunpack.c.l.bf16 %v539_v14  ;;  %v1586_v45 = vmax.f32 %v1584_v12, %v1585_v18 }
 0x1b2   :  { %v1364_v15 = vadd.f32 %v9747_v33, %v1266_v8  ;;  %v1365_v16 = vadd.f32 %v9749_v34, %v1267_v9  ;;  %1136 = vmatmul.bf16.gmra.mxu2 %v815_v5  ;;  %v1731_v8 = vpack.c.bf16 %v1599_v52, %v1599_v52 }
 0x1b3   :  { %v641_v39 = vadd.f32 %v9621_v2, %v592_v20  ;;  %v1730_v0 = vpack.c.bf16 %v1586_v45, %v1586_v45 }
 0x1b4   :  { %v1445_v17 = vpack.c.bf16 %v1365_v16, %v1364_v15 }
 0x1b5   :  { %v1097_v21 = vpop.f32.mrf.mxu2  ;;  %v785_v61 = vmax.f32 %v641_v39, 0.0 }
 0x1b6   :  { %v1508_v24 = vunpack.c.l.bf16 %v1445_v17  ;;  %v1509_v25 = vunpack.c.h.bf16 %v1445_v17  ;;  %v1193_v26 = vpack.c.bf16 %v1097_v21, %v968_v1  ;;  %v472_v27 = vpop.f32.mrf.mxu0  ;;  %v970_v10 = vpop.f32.mrf.mxu1  ;;  %v1884_v11 = vunpack.c.l.b16 %v1445_v17 }
 0x1b7   :  { %v540_v28 = vpack.c.bf16 %v472_v27, %v472_v27  ;;  %v1885_v51 = vunpack.c.h.b16 %v1445_v17 }
 0x1b8   :  { %v1606_v30 = vmax.f32 %v1605_v6, %v1508_v24  ;;  %v1619_v31 = vmax.f32 %v1618_v7, %v1509_v25  ;;  %v1268_v35 = vunpack.c.l.bf16 %v1193_v26  ;;  %v1269_v36 = vunpack.c.h.bf16 %v1193_v26 }
 0x1b9   :  { %v593_v40 = vunpack.c.l.bf16 %v540_v28  ;;  %v9958_v42 = vpack.c.b16 %v1884_v11, %v1882_v29  ;;  %v9960_v43 = vpack.c.b16 %v1885_v51, %v1883_v50  ;;  %v3484_v24 = vunpack.c.l.b16 %v1730_v0  ;;  %v9024_v0 = vld [vmem:[%s13071_s5 + $0x64] sm:$0xf] }
 0x1ba   :  { %v1607_v46 = vrot.slane %v1606_v30, 4  ;;  %v1620_v47 = vrot.slane %v1619_v31, 4  ;;  %v1366_v59 = vadd.f32 %v9747_v33, %v1268_v35  ;;  %v1367_v60 = vadd.f32 %v9749_v34, %v1269_v36 }
 0x1bb   :  { %13444 = vst [vmem:[#allocation27_spill] sm:$0xff] %v9958_v42  ;;  %v642_v54 = vadd.f32 %v9621_v2, %v593_v40  ;;  %2409 = vmatmul.bf16.gmra.mxu3 %v9958_v42  ;;  %v3485_v25 = vunpack.c.l.b16 %v1731_v8  ;;  %v8171_v8 = vld [vmem:[%s13071_s5 + $0x70] sm:$0xf0] }
 0x1bc   :  { %13445 = vst [vmem:[#allocation28_spill] sm:$0xff] %v9960_v43  ;;  %v1608_v48 = vmax.f32 %v1606_v30, %v1607_v46  ;;  %v1621_v57 = vmax.f32 %v1619_v31, %v1620_v47  ;;  %v1446_v16 = vpack.c.bf16 %v1367_v60, %v1366_v59 }
 0x1bd   :  { %v786_v62 = vmax.f32 %v642_v54, 0.0  ;;  %v1099_v63 = vpop.f32.mrf.mxu2 }
 0x1be   :  { %v1609_v1 = vrot.slane %v1608_v48, 2  ;;  %v1622_v5 = vrot.slane %v1621_v57, 2  ;;  %v475_v6 = vpop.f32.mrf.mxu0  ;;  %v973_v7 = vpop.f32.mrf.mxu1  ;;  %v1194_v9 = vpack.c.bf16 %v1099_v63, %v970_v10  ;;  %v1510_v28 = vunpack.c.l.bf16 %v1446_v16  ;;  %v8299_v63 = vld [vmem:[%s13071_s5 + $0x170] sm:$0xf0] }
 0x1bf   :  { %v541_v12 = vpack.c.bf16 %v475_v6, %v475_v6  ;;  %v816_v13 = vpack.c.bf16 %v786_v62, %v785_v61  ;;  %v1511_v29 = vunpack.c.h.bf16 %v1446_v16  ;;  %v1886_v30 = vunpack.c.l.b16 %v1446_v16  ;;  %v9056_v62 = vld [vmem:[%s13071_s5 + $0x164] sm:$0xf] }
 0x1c0   :  { %v1610_v14 = vmax.f32 %v1608_v48, %v1609_v1  ;;  %v1623_v15 = vmax.f32 %v1621_v57, %v1622_v5  ;;  %v1270_v17 = vunpack.c.l.bf16 %v1194_v9  ;;  %v1271_v18 = vunpack.c.h.bf16 %v1194_v9 }
 0x1c1   :  { %1012 = vmatmul.bf16.gmra.mxu1 %v816_v13  ;;  %2513 = vmatmul.bf16.gmra.mxu0 %v9820_v53  ;;  %v594_v21 = vunpack.c.l.bf16 %v541_v12  ;;  %v1887_v31 = vunpack.c.h.b16 %v1446_v16 }
 0x1c2   :  { %v1611_v19 = vrot.slane %v1610_v14, 1  ;;  %v1624_v20 = vrot.slane %v1623_v15, 1  ;;  %1141 = vmatmul.bf16.gmra.mxu2 %v816_v13  ;;  %v1368_v26 = vadd.f32 %v9747_v33, %v1270_v17  ;;  %v1369_v27 = vadd.f32 %v9749_v34, %v1271_v18 }
 0x1c3   :  { %v643_v39 = vadd.f32 %v9621_v2, %v594_v21  ;;  %v8302_v13 = vor.u32 %v9056_v62, %v8299_v63 }
 0x1c4   :  { %v1612_v10 = vmax.f32 %v1610_v14, %v1611_v19  ;;  %v1625_v11 = vmax.f32 %v1623_v15, %v1624_v20  ;;  %v1447_v50 = vpack.c.bf16 %v1369_v27, %v1368_v26  ;;  %v8174_v14 = vor.u32 %v9024_v0, %v8171_v8 }
 0x1c5   :  { %v1102_v51 = vpop.f32.mrf.mxu2  ;;  %2757 = vmatpush.bf16.msrb.mxu2 %v8302_v13  ;;  %v787_v20 = vmax.f32 %v643_v39, 0.0  ;;  %v8209_v39 = vld [vmem:[%s13071_s5 + $0xa8] sm:$0xf] }
 0x1c6   :  { %v1732_v35 = vpack.c.bf16 %v1612_v10, %v1612_v10  ;;  %v1733_v36 = vpack.c.bf16 %v1625_v11, %v1625_v11  ;;  %v1195_v40 = vpack.c.bf16 %v1102_v51, %v973_v7  ;;  %v477_v45 = vpop.f32.mrf.mxu0  ;;  %v975_v46 = vpop.f32.mrf.mxu1  ;;  %v1512_v47 = vunpack.c.l.bf16 %v1447_v50  ;;  %2628 = vmatpush.bf16.msrb.mxu1 %v8174_v14 }
 0x1c7   :  { %v1513_v52 = vunpack.c.h.bf16 %v1447_v50  ;;  %v542_v54 = vpack.c.bf16 %v477_v45, %v477_v45  ;;  %v1888_v48 = vunpack.c.l.b16 %v1447_v50  ;;  %v1889_v16 = vunpack.c.h.b16 %v1447_v50 }
 0x1c8   :  { %v3486_v57 = vunpack.c.l.b16 %v1732_v35  ;;  %v3487_v59 = vunpack.c.l.b16 %v1733_v36  ;;  %v1272_v60 = vunpack.c.l.bf16 %v1195_v40  ;;  %v1273_v61 = vunpack.c.h.bf16 %v1195_v40 }
 0x1c9   :  { %v1626_v1 = vmax.f32 %v1510_v28, %v1512_v47  ;;  %v1639_v5 = vmax.f32 %v1511_v29, %v1513_v52  ;;  %v595_v6 = vunpack.c.l.bf16 %v542_v54  ;;  %v9979_v7 = vpack.c.b16 %v1888_v48, %v1886_v30 }
 0x1ca   :  { %v1370_v9 = vadd.f32 %v9747_v33, %v1272_v60  ;;  %v1371_v12 = vadd.f32 %v9749_v34, %v1273_v61  ;;  %v9989_v17 = vsel %vm3496_vm2, %v3486_v57, %v3484_v24  ;;  %v9992_v18 = vsel %vm3496_vm2, %v3487_v59, %v3485_v25 }
 0x1cb   :  { %13446 = vst [vmem:[#allocation29_spill] sm:$0xff] %v9979_v7  ;;  %v644_v15 = vadd.f32 %v9621_v2, %v595_v6  ;;  %2414 = vmatmul.bf16.gmra.mxu3 %v9979_v7  ;;  %v9994_v27 = vpack.c.b16 %v1889_v16, %v1887_v31  ;;  %v9035_v31 = vld [vmem:[%s13071_s5 + $0xb4] sm:$0xf0] }
 0x1cc   :  { %v1448_v19 = vpack.c.bf16 %v1371_v12, %v1370_v9  ;;  %v8210_v45 = vor.u32 %v9035_v31, %v8209_v39 }
 0x1cd   :  { %v788_v21 = vmax.f32 %v644_v15, 0.0  ;;  %v1104_v26 = vpop.f32.mrf.mxu2  ;;  %13447 = vst [vmem:[#allocation30_spill] sm:$0xff] %v9994_v27 }
 0x1ce   :  { %v1514_v10 = vunpack.c.l.bf16 %v1448_v19  ;;  %v1515_v11 = vunpack.c.h.bf16 %v1448_v19  ;;  %v1196_v28 = vpack.c.bf16 %v1104_v26, %v975_v46  ;;  %v9996_v29 = vpop.f32.mrf.mxu3  ;;  %v480_v50 = vpop.f32.mrf.mxu0  ;;  %2884 = vmatpush.bf16.msrb.mxu3 %v8210_v45  ;;  %v1891_v6 = vunpack.c.h.b16 %v1448_v19 }
 0x1cf   :  { %v978_v51 = vpop.f32.mrf.mxu1  ;;  %v817_v24 = vpack.c.bf16 %v788_v21, %v787_v20  ;;  %v543_v40 = vpack.c.bf16 %v480_v50, %v480_v50 }
 0x1d0   :  { %v1627_v30 = vmax.f32 %v1626_v1, %v1514_v10  ;;  %v1640_v35 = vmax.f32 %v1639_v5, %v1515_v11  ;;  %v1274_v25 = vunpack.c.l.bf16 %v1196_v28  ;;  %v1275_v36 = vunpack.c.h.bf16 %v1196_v28 }
 0x1d1   :  { %1017 = vmatmul.bf16.gmra.mxu1 %v817_v24  ;;  %2518 = vmatmul.bf16.gmra.mxu0 %v9878_v58  ;;  %v596_v54 = vunpack.c.l.bf16 %v543_v40  ;;  %v1890_v5 = vunpack.c.l.b16 %v1448_v19 }
 0x1d2   :  { %v1372_v46 = vadd.f32 %v9747_v33, %v1274_v25  ;;  %v1373_v47 = vadd.f32 %v9749_v34, %v1275_v36  ;;  %1146 = vmatmul.bf16.gmra.mxu2 %v817_v24 }
 0x1d3   :  { %v645_v15 = vadd.f32 %v9621_v2, %v596_v54 }
 0x1d4   :  { %v1449_v52 = vpack.c.bf16 %v1373_v47, %v1372_v46 }
 0x1d5   :  { %v1107_v48 = vpop.f32.mrf.mxu2  ;;  %v789_v28 = vmax.f32 %v645_v15, 0.0 }
 0x1d6   :  { %v1516_v57 = vunpack.c.l.bf16 %v1449_v52  ;;  %v1517_v59 = vunpack.c.h.bf16 %v1449_v52  ;;  %v1197_v60 = vpack.c.bf16 %v1107_v48, %v978_v51  ;;  %v10007_v61 = vpop.f32.mrf.mxu3  ;;  %v482_v62 = vpop.f32.mrf.mxu0  ;;  %v1892_v63 = vunpack.c.l.b16 %v1449_v52 }
 0x1d7   :  { %v544_v0 = vpack.c.bf16 %v482_v62, %v482_v62  ;;  %v980_v1 = vpop.f32.mrf.mxu1  ;;  %v1893_v8 = vunpack.c.h.b16 %v1449_v52 }
 0x1d8   :  { %v1628_v9 = vmax.f32 %v1627_v30, %v1516_v57  ;;  %v1641_v12 = vmax.f32 %v1640_v35, %v1517_v59  ;;  %v1276_v13 = vunpack.c.l.bf16 %v1197_v60  ;;  %v1277_v14 = vunpack.c.h.bf16 %v1197_v60 }
 0x1d9   :  { %v597_v16 = vunpack.c.l.bf16 %v544_v0  ;;  %v10010_v20 = vpack.c.b16 %v1892_v63, %v1890_v5  ;;  %v10012_v21 = vpack.c.b16 %v1893_v8, %v1891_v6 }
 0x1da   :  { %v1374_v26 = vadd.f32 %v9747_v33, %v1276_v13  ;;  %v1375_v10 = vadd.f32 %v9749_v34, %v1277_v14 }
 0x1db   :  { %13448 = vst [vmem:[#allocation31_spill] sm:$0xff] %v10010_v20  ;;  %v646_v11 = vadd.f32 %v9621_v2, %v597_v16  ;;  %2419 = vmatmul.bf16.gmra.mxu3 %v10010_v20 }
 0x1dc   :  { %v1450_v19 = vpack.c.bf16 %v1375_v10, %v1374_v26 }
 0x1dd   :  { %v790_v50 = vmax.f32 %v646_v11, 0.0  ;;  %v1109_v51 = vpop.f32.mrf.mxu2 }
 0x1de   :  { %v1518_v24 = vunpack.c.l.bf16 %v1450_v19  ;;  %v1519_v30 = vunpack.c.h.bf16 %v1450_v19  ;;  %v1198_v35 = vpack.c.bf16 %v1109_v51, %v980_v1  ;;  %v10018_v25 = vpop.f32.mrf.mxu3  ;;  %v485_v36 = vpop.f32.mrf.mxu0  ;;  %v1895_v13 = vunpack.c.h.b16 %v1450_v19 }
 0x1df   :  { %v983_v39 = vpop.f32.mrf.mxu1  ;;  %v818_v31 = vpack.c.bf16 %v790_v50, %v789_v28  ;;  %v545_v52 = vpack.c.bf16 %v485_v36, %v485_v36 }
 0x1e0   :  { %v1629_v40 = vmax.f32 %v1628_v9, %v1518_v24  ;;  %v1642_v45 = vmax.f32 %v1641_v12, %v1519_v30  ;;  %v1278_v46 = vunpack.c.l.bf16 %v1198_v35  ;;  %v1279_v47 = vunpack.c.h.bf16 %v1198_v35 }
 0x1e1   :  { %1022 = vmatmul.bf16.gmra.mxu1 %v818_v31  ;;  %2523 = vmatmul.bf16.gmra.mxu0 %v9903_v56  ;;  %v598_v59 = vunpack.c.l.bf16 %v545_v52  ;;  %v1894_v12 = vunpack.c.l.b16 %v1450_v19 }
 0x1e2   :  { %v1376_v54 = vadd.f32 %v9747_v33, %v1278_v46  ;;  %v1377_v48 = vadd.f32 %v9749_v34, %v1279_v47  ;;  %1151 = vmatmul.bf16.gmra.mxu2 %v818_v31 }
 0x1e3   :  { %v647_v11 = vadd.f32 %v9621_v2, %v598_v59 }
 0x1e4   :  { %v1451_v57 = vpack.c.bf16 %v1377_v48, %v1376_v54 }
 0x1e5   :  { %v1112_v60 = vpop.f32.mrf.mxu2  ;;  %v791_v36 = vmax.f32 %v647_v11, 0.0 }
 0x1e6   :  { %v1520_v62 = vunpack.c.l.bf16 %v1451_v57  ;;  %v1521_v63 = vunpack.c.h.bf16 %v1451_v57  ;;  %v1199_v0 = vpack.c.bf16 %v1112_v60, %v983_v39  ;;  %v10023_v1 = vpop.f32.mrf.mxu3  ;;  %v487_v5 = vpop.f32.mrf.mxu0  ;;  %v1896_v6 = vunpack.c.l.b16 %v1451_v57 }
 0x1e7   :  { %v546_v8 = vpack.c.bf16 %v487_v5, %v487_v5  ;;  %v985_v9 = vpop.f32.mrf.mxu1  ;;  %v1897_v14 = vunpack.c.h.b16 %v1451_v57 }
 0x1e8   :  { %v1630_v15 = vmax.f32 %v1629_v40, %v1520_v62  ;;  %v1643_v16 = vmax.f32 %v1642_v45, %v1521_v63  ;;  %v1280_v26 = vunpack.c.l.bf16 %v1199_v0  ;;  %v1281_v10 = vunpack.c.h.bf16 %v1199_v0 }
 0x1e9   :  { %v599_v28 = vunpack.c.l.bf16 %v546_v8  ;;  %v10026_v50 = vpack.c.b16 %v1896_v6, %v1894_v12  ;;  %v10028_v51 = vpack.c.b16 %v1897_v14, %v1895_v13 }
 0x1ea   :  { %v1378_v24 = vadd.f32 %v9747_v33, %v1280_v26  ;;  %v1379_v30 = vadd.f32 %v9749_v34, %v1281_v10 }
 0x1eb   :  { %13449 = vst [vmem:[#allocation32_spill] sm:$0xff] %v10026_v50  ;;  %v648_v35 = vadd.f32 %v9621_v2, %v599_v28  ;;  %2424 = vmatmul.bf16.gmra.mxu3 %v10026_v50 }
 0x1ec   :  { %v1452_v19 = vpack.c.bf16 %v1379_v30, %v1378_v24 }
 0x1ed   :  { %v792_v39 = vmax.f32 %v648_v35, 0.0  ;;  %v1114_v31 = vpop.f32.mrf.mxu2 }
 0x1ee   :  { %v1522_v40 = vunpack.c.l.bf16 %v1452_v19  ;;  %v1523_v45 = vunpack.c.h.bf16 %v1452_v19  ;;  %v1200_v46 = vpack.c.bf16 %v1114_v31, %v985_v9  ;;  %v10034_v47 = vpop.f32.mrf.mxu3  ;;  %v490_v52 = vpop.f32.mrf.mxu0  ;;  %v1898_v12 = vunpack.c.l.b16 %v1452_v19 }
 0x1ef   :  { %v547_v54 = vpack.c.bf16 %v490_v52, %v490_v52  ;;  %v988_v48 = vpop.f32.mrf.mxu1  ;;  %v819_v57 = vpack.c.bf16 %v792_v39, %v791_v36  ;;  %v1899_v30 = vunpack.c.h.b16 %v1452_v19  ;;  %v9020_v52 = vld [vmem:[%s13071_s5 + $0x44] sm:$0xf] }
 0x1f0   :  { %v1631_v59 = vmax.f32 %v1630_v15, %v1522_v40  ;;  %v1644_v60 = vmax.f32 %v1643_v16, %v1523_v45  ;;  %v1282_v62 = vunpack.c.l.bf16 %v1200_v46  ;;  %v1283_v63 = vunpack.c.h.bf16 %v1200_v46  ;;  %v9052_v45 = vld [vmem:[%s13071_s5 + $0x144] sm:$0xf]  ;;  %v8283_v46 = vld [vmem:[%s13071_s5 + $0x150] sm:$0xf0] }
 0x1f1   :  { %1027 = vmatmul.bf16.gmra.mxu1 %v819_v57  ;;  %2528 = vmatmul.bf16.gmra.mxu0 %v9914_v38  ;;  %v600_v6 = vunpack.c.l.bf16 %v547_v54  ;;  %v8286_v19 = vor.u32 %v9052_v45, %v8283_v46 }
 0x1f2   :  { %v1380_v0 = vadd.f32 %v9747_v33, %v1282_v62  ;;  %v1381_v5 = vadd.f32 %v9749_v34, %v1283_v63  ;;  %1156 = vmatmul.bf16.gmra.mxu2 %v819_v57  ;;  %v8155_v57 = vld [vmem:[%s13071_s5 + $0x50] sm:$0xf0] }
 0x1f3   :  { %v649_v11 = vadd.f32 %v9621_v2, %v600_v6  ;;  %2758 = vmatpush.bf16.msrb.mxu2 %v8286_v19 }
 0x1f4   :  { %v1453_v8 = vpack.c.bf16 %v1381_v5, %v1380_v0  ;;  %v8158_v0 = vor.u32 %v9020_v52, %v8155_v57 }
 0x1f5   :  { %v1117_v9 = vpop.f32.mrf.mxu2 }
 0x1f6   :  { %v1524_v13 = vunpack.c.l.bf16 %v1453_v8  ;;  %v1525_v14 = vunpack.c.h.bf16 %v1453_v8  ;;  %v1201_v26 = vpack.c.bf16 %v1117_v9, %v988_v48  ;;  %v10039_v10 = vpop.f32.mrf.mxu3  ;;  %v492_v15 = vpop.f32.mrf.mxu0  ;;  %v1900_v16 = vunpack.c.l.b16 %v1453_v8  ;;  %2629 = vmatpush.bf16.msrb.mxu1 %v8158_v0 }
 0x1f7   :  { %13450 = vst [vmem:[#allocation33_spill] sm:$0xff] %v10039_v10  ;;  %v548_v28 = vpack.c.bf16 %v492_v15, %v492_v15  ;;  %v990_v24 = vpop.f32.mrf.mxu1  ;;  %v1901_v35 = vunpack.c.h.b16 %v1453_v8 }
 0x1f8   :  { %v1632_v36 = vmax.f32 %v1631_v59, %v1524_v13  ;;  %v1645_v39 = vmax.f32 %v1644_v60, %v1525_v14  ;;  %v1284_v31 = vunpack.c.l.bf16 %v1201_v26  ;;  %v1285_v40 = vunpack.c.h.bf16 %v1201_v26 }
 0x1f9   :  { %v601_v54 = vunpack.c.l.bf16 %v548_v28  ;;  %v10051_v48 = vpack.c.b16 %v1900_v16, %v1898_v12  ;;  %v10056_v59 = vpack.c.b16 %v1901_v35, %v1899_v30  ;;  %v793_v12 = vmax.f32 %v649_v11, 0.0  ;;  %v9031_v11 = vld [vmem:[%s13071_s5 + $0x94] sm:$0xf0] }
 0x1fa   :  { %v1633_v60 = vrot.slane %v1632_v36, 4  ;;  %v1646_v62 = vrot.slane %v1645_v39, 4  ;;  %v1382_v8 = vadd.f32 %v9747_v33, %v1284_v31  ;;  %v1383_v9 = vadd.f32 %v9749_v34, %v1285_v40  ;;  %v8193_v31 = vld [vmem:[%s13071_s5 + $0x88] sm:$0xf] }
 0x1fb   :  { %13451 = vst [vmem:[#allocation34_spill] sm:$0xff] %v10051_v48  ;;  %v650_v63 = vadd.f32 %v9621_v2, %v601_v54  ;;  %2429 = vmatmul.bf16.gmra.mxu3 %v10051_v48 }
 0x1fc   :  { %13452 = vst [vmem:[#allocation35_spill] sm:$0xff] %v10056_v59  ;;  %v1634_v5 = vmax.f32 %v1632_v36, %v1633_v60  ;;  %v1647_v6 = vmax.f32 %v1645_v39, %v1646_v62  ;;  %v1454_v39 = vpack.c.bf16 %v1383_v9, %v1382_v8 }
 0x1fd   :  { %v794_v13 = vmax.f32 %v650_v63, 0.0  ;;  %v1119_v14 = vpop.f32.mrf.mxu2 }
 0x1fe   :  { %v1635_v26 = vrot.slane %v1634_v5, 2  ;;  %v1648_v15 = vrot.slane %v1647_v6, 2  ;;  %v10062_v16 = vpop.f32.mrf.mxu3  ;;  %v495_v28 = vpop.f32.mrf.mxu0  ;;  %v1202_v30 = vpack.c.bf16 %v1119_v14, %v990_v24  ;;  %v8194_v24 = vor.u32 %v9031_v11, %v8193_v31 }
 0x1ff   :  { %13453 = vst [vmem:[#allocation36_spill] sm:$0xff] %v10062_v16  ;;  %v549_v35 = vpack.c.bf16 %v495_v28, %v495_v28  ;;  %v993_v45 = vpop.f32.mrf.mxu1  ;;  %v820_v46 = vpack.c.bf16 %v794_v13, %v793_v12  ;;  %v1527_v8 = vunpack.c.h.bf16 %v1454_v39  ;;  %v1902_v13 = vunpack.c.l.b16 %v1454_v39 }
 0x200   :  { %v1636_v52 = vmax.f32 %v1634_v5, %v1635_v26  ;;  %v1649_v36 = vmax.f32 %v1647_v6, %v1648_v15  ;;  %v1286_v40 = vunpack.c.l.bf16 %v1202_v30  ;;  %v1287_v54 = vunpack.c.h.bf16 %v1202_v30  ;;  %2885 = vmatpush.bf16.msrb.mxu3 %v8194_v24 }
 0x201   :  { %1032 = vmatmul.bf16.gmra.mxu1 %v820_v46  ;;  %2533 = vmatmul.bf16.gmra.mxu0 %v9948_v41  ;;  %v602_v60 = vunpack.c.l.bf16 %v549_v35  ;;  %v1526_v6 = vunpack.c.l.bf16 %v1454_v39  ;;  %v1903_v14 = vunpack.c.h.b16 %v1454_v39 }
 0x202   :  { %v1637_v19 = vrot.slane %v1636_v52, 1  ;;  %v1650_v57 = vrot.slane %v1649_v36, 1  ;;  %1161 = vmatmul.bf16.gmra.mxu2 %v820_v46  ;;  %v1384_v62 = vadd.f32 %v9747_v33, %v1286_v40  ;;  %v1385_v63 = vadd.f32 %v9749_v34, %v1287_v54 }
 0x203   :  { %v651_v26 = vadd.f32 %v9621_v2, %v602_v60 }
 0x204   :  { %v1638_v0 = vmax.f32 %v1636_v52, %v1637_v19  ;;  %v1651_v5 = vmax.f32 %v1649_v36, %v1650_v57  ;;  %v1455_v9 = vpack.c.bf16 %v1385_v63, %v1384_v62 }
 0x205   :  { %v1122_v12 = vpop.f32.mrf.mxu2 }
 0x206   :  { %v1203_v15 = vpack.c.bf16 %v1122_v12, %v993_v45  ;;  %v10074_v28 = vpop.f32.mrf.mxu3  ;;  %v497_v30 = vpop.f32.mrf.mxu0  ;;  %v1734_v35 = vpack.c.bf16 %v1638_v0, %v1638_v0  ;;  %v1735_v46 = vpack.c.bf16 %v1651_v5, %v1651_v5  ;;  %v1528_v31 = vunpack.c.l.bf16 %v1455_v9 }
 0x207   :  { %13454 = vst [vmem:[#allocation37_spill] sm:$0xff] %v10074_v28  ;;  %v1529_v11 = vunpack.c.h.bf16 %v1455_v9  ;;  %v550_v40 = vpack.c.bf16 %v497_v30, %v497_v30  ;;  %v995_v52 = vpop.f32.mrf.mxu1  ;;  %v1904_v36 = vunpack.c.l.b16 %v1455_v9  ;;  %v1905_v19 = vunpack.c.h.b16 %v1455_v9  ;;  %v9016_v30 = vld [vmem:[%s13071_s5 + $0x24] sm:$0xf] }
 0x208   :  { %v1288_v54 = vunpack.c.l.bf16 %v1203_v15  ;;  %v1289_v24 = vunpack.c.h.bf16 %v1203_v15  ;;  %v3488_v57 = vunpack.c.l.b16 %v1734_v35  ;;  %v1652_v62 = vmax.f32 %v1526_v6, %v1528_v31 }
 0x209   :  { %v1665_v63 = vmax.f32 %v1527_v8, %v1529_v11  ;;  %v603_v39 = vunpack.c.l.bf16 %v550_v40  ;;  %v10076_v16 = vpack.c.b16 %v1904_v36, %v1902_v13  ;;  %v10080_v0 = vpack.c.b16 %v1905_v19, %v1903_v14  ;;  %v8139_v14 = vld [vmem:[%s13071_s5 + $0x30] sm:$0xf0]  ;;  %v9048_v40 = vld [vmem:[%s13071_s5 + $0x124] sm:$0xf] }
 0x20a   :  { %v1386_v45 = vadd.f32 %v9747_v33, %v1288_v54  ;;  %v1387_v60 = vadd.f32 %v9749_v34, %v1289_v24  ;;  %v10084_v5 = vsel %vm3498_vm3, %v3488_v57, %v9989_v17  ;;  %v3489_v9 = vunpack.c.l.b16 %v1735_v46  ;;  %v8267_v36 = vld [vmem:[%s13071_s5 + $0x130] sm:$0xf0] }
 0x20b   :  { %13455 = vst [vmem:[#allocation38_spill] sm:$0xff] %v10076_v16  ;;  %v652_v12 = vadd.f32 %v9621_v2, %v603_v39  ;;  %2434 = vmatmul.bf16.gmra.mxu3 %v10076_v16  ;;  %v795_v8 = vmax.f32 %v651_v26, 0.0  ;;  %v8142_v19 = vor.u32 %v9016_v30, %v8139_v14  ;;  %v8270_v57 = vor.u32 %v9048_v40, %v8267_v36 }
 0x20c   :  { %13456 = vst [vmem:[#allocation39_spill] sm:$0xff] %v10080_v0  ;;  %v1456_v6 = vpack.c.bf16 %v1387_v60, %v1386_v45  ;;  %v10096_v17 = vsel %vm3498_vm3, %v3489_v9, %v9992_v18  ;;  %v8123_v9 = vld [vmem:[%s13071_s5 + $0x10] sm:$0xf0] }
 0x20d   :  { %v796_v15 = vmax.f32 %v652_v12, 0.0  ;;  %v1124_v13 = vpop.f32.mrf.mxu2  ;;  %v9012_v12 = vld [vmem:[%s13071_s5 + $0x4] sm:$0xf]  ;;  %2630 = vmatpush.bf16.msrb.mxu1 %v8142_v19  ;;  %2759 = vmatpush.bf16.msrb.mxu2 %v8270_v57 }
 0x20e   :  { %v1530_v35 = vunpack.c.l.bf16 %v1456_v6  ;;  %v1531_v31 = vunpack.c.h.bf16 %v1456_v6  ;;  %v1204_v11 = vpack.c.bf16 %v1124_v13, %v995_v52  ;;  %v10098_v46 = vpop.f32.mrf.mxu3  ;;  %v500_v26 = vpop.f32.mrf.mxu0  ;;  %v8251_v13 = vld [vmem:[%s13071_s5 + $0x110] sm:$0xf0] }
 0x20f   :  { %13457 = vst [vmem:[#allocation40_spill] sm:$0xff] %v10098_v46  ;;  %v998_v54 = vpop.f32.mrf.mxu1  ;;  %v821_v24 = vpack.c.bf16 %v796_v15, %v795_v8  ;;  %v551_v52 = vpack.c.bf16 %v500_v26, %v500_v26  ;;  %v9044_v8 = vld [vmem:[%s13071_s5 + $0x104] sm:$0xf]  ;;  %v8126_v15 = vor.u32 %v9012_v12, %v8123_v9  ;;  %v1907_v12 = vunpack.c.h.b16 %v1456_v6 }
 0x210   :  { %v1653_v18 = vmax.f32 %v1652_v62, %v1530_v35  ;;  %v1666_v39 = vmax.f32 %v1665_v63, %v1531_v31  ;;  %v1290_v45 = vunpack.c.l.bf16 %v1204_v11  ;;  %v1291_v60 = vunpack.c.h.bf16 %v1204_v11 }
 0x211   :  { %1037 = vmatmul.bf16.gmra.mxu1 %v821_v24  ;;  %2538 = vmatmul.bf16.gmra.mxu0 %v9960_v43  ;;  %v8254_v30 = vor.u32 %v9044_v8, %v8251_v13  ;;  %v604_v35 = vunpack.c.l.bf16 %v551_v52 }
 0x212   :  { %v1388_v62 = vadd.f32 %v9747_v33, %v1290_v45  ;;  %v1389_v63 = vadd.f32 %v9749_v34, %v1291_v60  ;;  %1166 = vmatmul.bf16.gmra.mxu2 %v821_v24  ;;  %2631 = vmatpush.bf16.msrb.mxu1 %v8126_v15  ;;  %v1906_v60 = vunpack.c.l.b16 %v1456_v6 }
 0x213   :  { %2760 = vmatpush.bf16.msrb.mxu2 %v8254_v30  ;;  %v653_v52 = vadd.f32 %v9621_v2, %v604_v35 }
 0x214   :  { %v1457_v14 = vpack.c.bf16 %v1389_v63, %v1388_v62 }
 0x215   :  { %v1127_v31 = vpop.f32.mrf.mxu2 }
 0x216   :  { %v1532_v11 = vunpack.c.l.bf16 %v1457_v14  ;;  %v1533_v26 = vunpack.c.h.bf16 %v1457_v14  ;;  %v1205_v40 = vpack.c.bf16 %v1127_v31, %v998_v54  ;;  %v10121_v36 = vpop.f32.mrf.mxu3  ;;  %v502_v45 = vpop.f32.mrf.mxu0  ;;  %v1908_v46 = vunpack.c.l.b16 %v1457_v14 }
 0x217   :  { %13458 = vst [vmem:[#allocation41_spill] sm:$0xff] %v10121_v36  ;;  %v552_v24 = vpack.c.bf16 %v502_v45, %v502_v45  ;;  %v1000_v19 = vpop.f32.mrf.mxu1  ;;  %v1909_v9 = vunpack.c.h.b16 %v1457_v14 }
 0x218   :  { %v1654_v16 = vmax.f32 %v1653_v18, %v1532_v11  ;;  %v1667_v57 = vmax.f32 %v1666_v39, %v1533_v26  ;;  %v1292_v8 = vunpack.c.l.bf16 %v1205_v40  ;;  %v1293_v62 = vunpack.c.h.bf16 %v1205_v40 }
 0x219   :  { %v605_v63 = vunpack.c.l.bf16 %v552_v24  ;;  %v10124_v13 = vpack.c.b16 %v1908_v46, %v1906_v60  ;;  %v10126_v54 = vpack.c.b16 %v1909_v9, %v1907_v12  ;;  %v797_v18 = vmax.f32 %v653_v52, 0.0 }
 0x21a   :  { %v1390_v31 = vadd.f32 %v9747_v33, %v1292_v8  ;;  %v1391_v15 = vadd.f32 %v9749_v34, %v1293_v62 }
 0x21b   :  { %13459 = vst [vmem:[#allocation42_spill] sm:$0xff] %v10124_v13  ;;  %v654_v45 = vadd.f32 %v9621_v2, %v605_v63  ;;  %2439 = vmatmul.bf16.gmra.mxu3 %v10124_v13 }
 0x21c   :  { %13460 = vst [vmem:[#allocation43_spill] sm:$0xff] %v10126_v54  ;;  %v1458_v6 = vpack.c.bf16 %v1391_v15, %v1390_v31 }
 0x21d   :  { %v798_v39 = vmax.f32 %v654_v45, 0.0  ;;  %v1129_v30 = vpop.f32.mrf.mxu2 }
 0x21e   :  { %v1534_v14 = vunpack.c.l.bf16 %v1458_v6  ;;  %v1535_v11 = vunpack.c.h.bf16 %v1458_v6  ;;  %v1206_v35 = vpack.c.bf16 %v1129_v30, %v1000_v19  ;;  %v10132_v26 = vpop.f32.mrf.mxu3  ;;  %v10134_v46 = vpop.f32.mrf.mxu0  ;;  %v1911_v30 = vunpack.c.h.b16 %v1458_v6 }
 0x21f   :  { %13461 = vst [vmem:[#allocation44_spill] sm:$0xff] %v10132_v26  ;;  %v1003_v40 = vpop.f32.mrf.mxu1  ;;  %v822_v24 = vpack.c.bf16 %v798_v39, %v797_v18  ;;  %v1910_v39 = vunpack.c.l.b16 %v1458_v6 }
 0x220   :  { %v1655_v60 = vmax.f32 %v1654_v16, %v1534_v14  ;;  %v1668_v12 = vmax.f32 %v1667_v57, %v1535_v11  ;;  %v1294_v9 = vunpack.c.l.bf16 %v1206_v35  ;;  %v1295_v8 = vunpack.c.h.bf16 %v1206_v35 }
 0x221   :  { %1042 = vmatmul.bf16.gmra.mxu1 %v822_v24  ;;  %2543 = vmatmul.bf16.gmra.mxu0 %v9994_v27 }
 0x222   :  { %v1392_v2 = vadd.f32 %v9747_v33, %v1294_v9  ;;  %v1393_v62 = vadd.f32 %v9749_v34, %v1295_v8  ;;  %1171 = vmatmul.bf16.gmra.mxu2 %v822_v24 }
 0x224   :  { %v1459_v52 = vpack.c.bf16 %v1393_v62, %v1392_v2 }
 0x225   :  { %v1132_v19 = vpop.f32.mrf.mxu2 }
 0x226   :  { %v1536_v63 = vunpack.c.l.bf16 %v1459_v52  ;;  %v1537_v31 = vunpack.c.h.bf16 %v1459_v52  ;;  %v1207_v15 = vpack.c.bf16 %v1132_v19, %v1003_v40  ;;  %v10139_v45 = vpop.f32.mrf.mxu3  ;;  %v10141_v18 = vpop.f32.mrf.mxu0  ;;  %v1912_v16 = vunpack.c.l.b16 %v1459_v52 }
 0x227   :  { %13462 = vst [vmem:[#allocation45_spill] sm:$0xff] %v10139_v45  ;;  %v1005_v57 = vpop.f32.mrf.mxu1  ;;  %v1913_v14 = vunpack.c.h.b16 %v1459_v52 }
 0x228   :  { %v1656_v11 = vmax.f32 %v1655_v60, %v1536_v63  ;;  %v1669_v35 = vmax.f32 %v1668_v12, %v1537_v31  ;;  %v1296_v9 = vunpack.c.l.bf16 %v1207_v15  ;;  %v1297_v26 = vunpack.c.h.bf16 %v1207_v15 }
 0x229   :  { %v10143_v8 = vpack.c.b16 %v1912_v16, %v1910_v39  ;;  %v10145_v24 = vpack.c.b16 %v1913_v14, %v1911_v30  ;;  %v9027_v39 = vld [vmem:[%s13071_s5 + $0x74] sm:$0xf0] }
 0x22a   :  { %v1394_v2 = vadd.f32 %v9747_v33, %v1296_v9  ;;  %v1395_v40 = vadd.f32 %v9749_v34, %v1297_v26  ;;  %v8177_v26 = vld [vmem:[%s13071_s5 + $0x68] sm:$0xf] }
 0x22b   :  { %13463 = vst [vmem:[#allocation46_spill] sm:$0xff] %v10143_v8  ;;  %2444 = vmatmul.bf16.gmra.mxu3 %v10143_v8 }
 0x22c   :  { %13464 = vst [vmem:[#allocation47_spill] sm:$0xff] %v10145_v24  ;;  %v1460_v62 = vpack.c.bf16 %v1395_v40, %v1394_v2 }
 0x22d   :  { %v1134_v19 = vpop.f32.mrf.mxu2 }
 0x22e   :  { %v1538_v45 = vunpack.c.l.bf16 %v1460_v62  ;;  %v1539_v13 = vunpack.c.h.bf16 %v1460_v62  ;;  %v1208_v6 = vpack.c.bf16 %v1134_v19, %v1005_v57  ;;  %v10150_v52 = vpop.f32.mrf.mxu3  ;;  %v10152_v60 = vpop.f32.mrf.mxu0  ;;  %v8178_v57 = vor.u32 %v9027_v39, %v8177_v26 }
 0x22f   :  { %13465 = vst [vmem:[#allocation48_spill] sm:$0xff] %v10150_v52  ;;  %v1008_v12 = vpop.f32.mrf.mxu1  ;;  %v1914_v52 = vunpack.c.l.b16 %v1460_v62  ;;  %v1915_v26 = vunpack.c.h.b16 %v1460_v62 }
 0x230   :  { %v1657_v63 = vmax.f32 %v1656_v11, %v1538_v45  ;;  %v1670_v31 = vmax.f32 %v1669_v35, %v1539_v13  ;;  %v1298_v15 = vunpack.c.l.bf16 %v1208_v6  ;;  %v1299_v16 = vunpack.c.h.bf16 %v1208_v6  ;;  %2886 = vmatpush.bf16.msrb.mxu3 %v8178_v57 }
 0x231   :  { %2548 = vmatmul.bf16.gmra.mxu0 %v10012_v21  ;;  %2632 = vmatmul.bf16.vlgmr.msrb.gmra.mxu1 %v9779_v22 }
 0x232   :  { %v1396_v30 = vadd.f32 %v9747_v33, %v1298_v15  ;;  %v1397_v45 = vadd.f32 %v9749_v34, %v1299_v16  ;;  %2761 = vmatmul.bf16.vlgmr.msrb.gmra.mxu2 %v9781_v23 }
 0x234   :  { %v1461_v13 = vpack.c.bf16 %v1397_v45, %v1396_v30 }
 0x235   :  { %v1137_v14 = vpop.f32.mrf.mxu2 }
 0x236   :  { %v1540_v11 = vunpack.c.l.bf16 %v1461_v13  ;;  %v1541_v35 = vunpack.c.h.bf16 %v1461_v13  ;;  %v1209_v9 = vpack.c.bf16 %v1137_v14, %v1008_v12  ;;  %v10165_v2 = vpop.f32.mrf.mxu3  ;;  %v10167_v40 = vpop.f32.mrf.mxu0  ;;  %v1916_v19 = vunpack.c.l.b16 %v1461_v13 }
 0x237   :  { %13466 = vst [vmem:[#allocation49_spill] sm:$0xff] %v10165_v2  ;;  %v1010_v6 = vpop.f32.mrf.mxu1  ;;  %v1917_v39 = vunpack.c.h.b16 %v1461_v13 }
 0x238   :  { %v1658_v15 = vmax.f32 %v1657_v63, %v1540_v11  ;;  %v1671_v8 = vmax.f32 %v1670_v31, %v1541_v35  ;;  %v1300_v16 = vunpack.c.l.bf16 %v1209_v9  ;;  %v1301_v36 = vunpack.c.h.bf16 %v1209_v9 }
 0x239   :  { %v10169_v23 = vpack.c.b16 %v1916_v19, %v1914_v52  ;;  %v10171_v57 = vpack.c.b16 %v1917_v39, %v1915_v26 }
 0x23a   :  { %v1659_v30 = vrot.slane %v1658_v15, 4  ;;  %v1672_v45 = vrot.slane %v1671_v8, 4  ;;  %v1398_v2 = vadd.f32 %v9747_v33, %v1300_v16  ;;  %v1399_v28 = vadd.f32 %v9749_v34, %v1301_v36 }
 0x23b   :  { %13467 = vst [vmem:[#allocation50_spill] sm:$0xff] %v10169_v23  ;;  %2449 = vmatmul.bf16.gmra.mxu3 %v10169_v23 }
 0x23c   :  { %13468 = vst [vmem:[#allocation51_spill] sm:$0xff] %v10171_v57  ;;  %v1660_v12 = vmax.f32 %v1658_v15, %v1659_v30  ;;  %v1673_v14 = vmax.f32 %v1671_v8, %v1672_v45  ;;  %v1462_v26 = vpack.c.bf16 %v1399_v28, %v1398_v2 }
 0x23d   :  { %v1139_v62 = vpop.f32.mrf.mxu2 }
 0x23e   :  { %v1661_v13 = vrot.slane %v1660_v12, 2  ;;  %v1674_v63 = vrot.slane %v1673_v14, 2  ;;  %v10176_v31 = vpop.f32.mrf.mxu3  ;;  %v10178_v11 = vpop.f32.mrf.mxu0  ;;  %v1210_v52 = vpack.c.bf16 %v1139_v62, %v1010_v6  ;;  %v1542_v45 = vunpack.c.l.bf16 %v1462_v26 }
 0x23f   :  { %13469 = vst [vmem:[#allocation52_spill] sm:$0xff] %v10176_v31  ;;  %v1013_v35 = vpop.f32.mrf.mxu1 }
 0x240   :  { %v1662_v9 = vmax.f32 %v1660_v12, %v1661_v13  ;;  %v1675_v19 = vmax.f32 %v1673_v14, %v1674_v63  ;;  %v1302_v39 = vunpack.c.l.bf16 %v1210_v52  ;;  %v1303_v23 = vunpack.c.h.bf16 %v1210_v52 }
 0x241   :  { %2553 = vmatmul.bf16.gmra.mxu0 %v10028_v51  ;;  %2637 = vmatmul.bf16.gmra.mxu1 %v9794_v3  ;;  %v1543_v12 = vunpack.c.h.bf16 %v1462_v26  ;;  %v1918_v63 = vunpack.c.l.b16 %v1462_v26 }
 0x242   :  { %v1663_v8 = vrot.slane %v1662_v9, 1  ;;  %v1676_v36 = vrot.slane %v1675_v19, 1  ;;  %2766 = vmatmul.bf16.gmra.mxu2 %v9796_v4  ;;  %v1400_v15 = vadd.f32 %v9747_v33, %v1302_v39  ;;  %v1401_v16 = vadd.f32 %v9749_v34, %v1303_v23 }
 0x243   :  { %v1919_v23 = vunpack.c.h.b16 %v1462_v26 }
 0x244   :  { %v1664_v30 = vmax.f32 %v1662_v9, %v1663_v8  ;;  %v1677_v6 = vmax.f32 %v1675_v19, %v1676_v36  ;;  %v1463_v14 = vpack.c.bf16 %v1401_v16, %v1400_v15 }
 0x245   :  { %v1142_v28 = vpop.f32.mrf.mxu2 }
 0x246   :  { %v1211_v2 = vpack.c.bf16 %v1142_v28, %v1013_v35  ;;  %v10185_v62 = vpop.f32.mrf.mxu3  ;;  %v10187_v13 = vpop.f32.mrf.mxu0  ;;  %v1736_v52 = vpack.c.bf16 %v1664_v30, %v1664_v30  ;;  %v1737_v31 = vpack.c.bf16 %v1677_v6, %v1677_v6  ;;  %v1544_v4 = vunpack.c.l.bf16 %v1463_v14 }
 0x247   :  { %13470 = vst [vmem:[#allocation53_spill] sm:$0xff] %v10185_v62  ;;  %v1545_v48 = vunpack.c.h.bf16 %v1463_v14  ;;  %v1015_v39 = vpop.f32.mrf.mxu1  ;;  %v1920_v10 = vunpack.c.l.b16 %v1463_v14  ;;  %v1921_v8 = vunpack.c.h.b16 %v1463_v14 }
 0x248   :  { %v1304_v9 = vunpack.c.l.bf16 %v1211_v2  ;;  %v1305_v19 = vunpack.c.h.bf16 %v1211_v2  ;;  %v3490_v36 = vunpack.c.l.b16 %v1736_v52  ;;  %v1678_v15 = vmax.f32 %v1542_v45, %v1544_v4 }
 0x249   :  { %v1691_v16 = vmax.f32 %v1543_v12, %v1545_v48  ;;  %v10189_v3 = vpack.c.b16 %v1920_v10, %v1918_v63  ;;  %v3491_v35 = vunpack.c.l.b16 %v1737_v31  ;;  %v10193_v30 = vpack.c.b16 %v1921_v8, %v1919_v23 }
 0x24a   :  { %v1402_v28 = vadd.f32 %v9747_v33, %v1304_v9  ;;  %v1403_v62 = vadd.f32 %v9749_v34, %v1305_v19  ;;  %v10197_v6 = vsel %vm3500_vm4, %v3490_v36, %v10084_v5 }
 0x24b   :  { %13471 = vst [vmem:[#allocation54_spill] sm:$0xff] %v10189_v3  ;;  %2454 = vmatmul.bf16.gmra.mxu3 %v10189_v3  ;;  %v10202_v26 = vsel %vm3500_vm4, %v3491_v35, %v10096_v17 }
 0x24c   :  { %13472 = vst [vmem:[#allocation55_spill] sm:$0xff] %v10193_v30  ;;  %v1464_v4 = vpack.c.bf16 %v1403_v62, %v1402_v28 }
 0x24d   :  { %v1144_v10 = vpop.f32.mrf.mxu2 }
 0x24e   :  { %v1546_v48 = vunpack.c.l.bf16 %v1464_v4  ;;  %v1547_v31 = vunpack.c.h.bf16 %v1464_v4  ;;  %v1212_v45 = vpack.c.bf16 %v1144_v10, %v1015_v39  ;;  %v10204_v12 = vpop.f32.mrf.mxu3  ;;  %v10206_v14 = vpop.f32.mrf.mxu0  ;;  %v1922_v10 = vunpack.c.l.b16 %v1464_v4 }
 0x24f   :  { %13473 = vst [vmem:[#allocation56_spill] sm:$0xff] %v10204_v12  ;;  %v1018_v2 = vpop.f32.mrf.mxu1 }
 0x250   :  { %v1679_v63 = vmax.f32 %v1678_v15, %v1546_v48  ;;  %v1692_v52 = vmax.f32 %v1691_v16, %v1547_v31  ;;  %v1306_v5 = vunpack.c.l.bf16 %v1212_v45  ;;  %v1307_v23 = vunpack.c.h.bf16 %v1212_v45 }
 0x251   :  { %2558 = vmatmul.bf16.gmra.mxu0 %v10056_v59  ;;  %2642 = vmatmul.bf16.gmra.mxu1 %v9809_v49  ;;  %v1923_v48 = vunpack.c.h.b16 %v1464_v4 }
 0x252   :  { %v1404_v17 = vadd.f32 %v9747_v33, %v1306_v5  ;;  %v1405_v62 = vadd.f32 %v9749_v34, %v1307_v23  ;;  %2771 = vmatmul.bf16.gmra.mxu2 %v9820_v53 }
 0x254   :  { %v1465_v39 = vpack.c.bf16 %v1405_v62, %v1404_v17 }
 0x255   :  { %v1147_v9 = vpop.f32.mrf.mxu2 }
 0x256   :  { %v1548_v19 = vunpack.c.l.bf16 %v1465_v39  ;;  %v1549_v8 = vunpack.c.h.bf16 %v1465_v39  ;;  %v1213_v36 = vpack.c.bf16 %v1147_v9, %v1018_v2  ;;  %v10213_v35 = vpop.f32.mrf.mxu3  ;;  %v10215_v15 = vpop.f32.mrf.mxu0  ;;  %v1924_v16 = vunpack.c.l.b16 %v1465_v39 }
 0x257   :  { %13474 = vst [vmem:[#allocation57_spill] sm:$0xff] %v10213_v35  ;;  %v1020_v28 = vpop.f32.mrf.mxu1  ;;  %v1925_v31 = vunpack.c.h.b16 %v1465_v39 }
 0x258   :  { %13475 = vst [vmem:[#allocation58_spill] sm:$0xff] %v10215_v15  ;;  %v1680_v45 = vmax.f32 %v1679_v63, %v1548_v19  ;;  %v1693_v5 = vmax.f32 %v1692_v52, %v1549_v8  ;;  %v1308_v12 = vunpack.c.l.bf16 %v1213_v36  ;;  %v1309_v23 = vunpack.c.h.bf16 %v1213_v36 }
 0x259   :  { %v10217_v3 = vpack.c.b16 %v1924_v16, %v1922_v10  ;;  %v10219_v17 = vpack.c.b16 %v1925_v31, %v1923_v48  ;;  %v9023_v10 = vld [vmem:[%s13071_s5 + $0x54] sm:$0xf0] }
 0x25a   :  { %v1406_v62 = vadd.f32 %v9747_v33, %v1308_v12  ;;  %v1407_v2 = vadd.f32 %v9749_v34, %v1309_v23  ;;  %v8161_v12 = vld [vmem:[%s13071_s5 + $0x48] sm:$0xf] }
 0x25b   :  { %13476 = vst [vmem:[#allocation59_spill] sm:$0xff] %v10217_v3  ;;  %2459 = vmatmul.bf16.gmra.mxu3 %v10217_v3 }
 0x25c   :  { %13477 = vst [vmem:[#allocation60_spill] sm:$0xff] %v10219_v17  ;;  %v1466_v9 = vpack.c.bf16 %v1407_v2, %v1406_v62 }
 0x25d   :  { %v1149_v53 = vpop.f32.mrf.mxu2 }
 0x25e   :  { %v1550_v35 = vunpack.c.l.bf16 %v1466_v9  ;;  %v1551_v15 = vunpack.c.h.bf16 %v1466_v9  ;;  %v1214_v4 = vpack.c.bf16 %v1149_v53, %v1020_v28  ;;  %v10224_v39 = vpop.f32.mrf.mxu3  ;;  %v10226_v63 = vpop.f32.mrf.mxu0  ;;  %v8162_v53 = vor.u32 %v9023_v10, %v8161_v12 }
 0x25f   :  { %13478 = vst [vmem:[#allocation61_spill] sm:$0xff] %v10224_v39  ;;  %v1023_v52 = vpop.f32.mrf.mxu1  ;;  %v1926_v39 = vunpack.c.l.b16 %v1466_v9  ;;  %v1927_v12 = vunpack.c.h.b16 %v1466_v9 }
 0x260   :  { %v1681_v19 = vmax.f32 %v1680_v45, %v1550_v35  ;;  %v1694_v8 = vmax.f32 %v1693_v5, %v1551_v15  ;;  %v1310_v36 = vunpack.c.l.bf16 %v1214_v4  ;;  %v1311_v16 = vunpack.c.h.bf16 %v1214_v4  ;;  %2887 = vmatpush.bf16.msrb.mxu3 %v8162_v53 }
 0x261   :  { %2563 = vmatmul.bf16.gmra.mxu0 %v10080_v0  ;;  %2647 = vmatmul.bf16.gmra.mxu1 %v9870_v55 }
 0x262   :  { %v1408_v28 = vadd.f32 %v9747_v33, %v1310_v36  ;;  %v1409_v35 = vadd.f32 %v9749_v34, %v1311_v16  ;;  %2776 = vmatmul.bf16.gmra.mxu2 %v9878_v58 }
 0x264   :  { %v1467_v15 = vpack.c.bf16 %v1409_v35, %v1408_v28 }
 0x265   :  { %v1152_v48 = vpop.f32.mrf.mxu2 }
 0x266   :  { %v1552_v31 = vunpack.c.l.bf16 %v1467_v15  ;;  %v1553_v45 = vunpack.c.h.bf16 %v1467_v15  ;;  %v1215_v5 = vpack.c.bf16 %v1152_v48, %v1023_v52  ;;  %v10239_v23 = vpop.f32.mrf.mxu3  ;;  %v10241_v62 = vpop.f32.mrf.mxu0  ;;  %v1928_v2 = vunpack.c.l.b16 %v1467_v15 }
 0x267   :  { %13479 = vst [vmem:[#allocation62_spill] sm:$0xff] %v10239_v23  ;;  %v1025_v4 = vpop.f32.mrf.mxu1  ;;  %v1929_v10 = vunpack.c.h.b16 %v1467_v15 }
 0x268   :  { %13480 = vst [vmem:[#allocation63_spill] sm:$0xff] %v10241_v62  ;;  %v1682_v36 = vmax.f32 %v1681_v19, %v1552_v31  ;;  %v1695_v3 = vmax.f32 %v1694_v8, %v1553_v45  ;;  %v1312_v16 = vunpack.c.l.bf16 %v1215_v5  ;;  %v1313_v55 = vunpack.c.h.bf16 %v1215_v5 }
 0x269   :  { %v10243_v58 = vpack.c.b16 %v1928_v2, %v1926_v39  ;;  %v10245_v53 = vpack.c.b16 %v1929_v10, %v1927_v12 }
 0x26a   :  { %v1410_v28 = vadd.f32 %v9747_v33, %v1312_v16  ;;  %v1411_v52 = vadd.f32 %v9749_v34, %v1313_v55 }
 0x26b   :  { %13481 = vst [vmem:[#allocation64_spill] sm:$0xff] %v10243_v58  ;;  %2464 = vmatmul.bf16.gmra.mxu3 %v10243_v58 }
 0x26c   :  { %13482 = vst [vmem:[#allocation65_spill] sm:$0xff] %v10245_v53  ;;  %v1468_v35 = vpack.c.bf16 %v1411_v52, %v1410_v28 }
 0x26d   :  { %v1154_v48 = vpop.f32.mrf.mxu2 }
 0x26e   :  { %v1554_v23 = vunpack.c.l.bf16 %v1468_v35  ;;  %v1555_v62 = vunpack.c.h.bf16 %v1468_v35  ;;  %v1216_v9 = vpack.c.bf16 %v1154_v48, %v1025_v4  ;;  %v10250_v15 = vpop.f32.mrf.mxu3  ;;  %v10252_v19 = vpop.f32.mrf.mxu0  ;;  %v1931_v48 = vunpack.c.h.b16 %v1468_v35 }
 0x26f   :  { %13483 = vst [vmem:[#allocation66_spill] sm:$0xff] %v10250_v15  ;;  %v1028_v8 = vpop.f32.mrf.mxu1 }
 0x270   :  { %v1683_v39 = vmax.f32 %v1682_v36, %v1554_v23  ;;  %v1696_v31 = vmax.f32 %v1695_v3, %v1555_v62  ;;  %v1314_v45 = vunpack.c.l.bf16 %v1216_v9  ;;  %v1315_v5 = vunpack.c.h.bf16 %v1216_v9 }
 0x271   :  { %2568 = vmatmul.bf16.gmra.mxu0 %v10126_v54  ;;  %2652 = vmatmul.bf16.gmra.mxu1 %v9897_v44  ;;  %v1930_v36 = vunpack.c.l.b16 %v1468_v35 }
 0x272   :  { %v1412_v55 = vadd.f32 %v9747_v33, %v1314_v45  ;;  %v1413_v2 = vadd.f32 %v9749_v34, %v1315_v5  ;;  %2781 = vmatmul.bf16.gmra.mxu2 %v9903_v56 }
 0x274   :  { %v1469_v4 = vpack.c.bf16 %v1413_v2, %v1412_v55 }
 0x275   :  { %v1157_v12 = vpop.f32.mrf.mxu2 }
 0x276   :  { %v1556_v10 = vunpack.c.l.bf16 %v1469_v4  ;;  %v1557_v16 = vunpack.c.h.bf16 %v1469_v4  ;;  %v1217_v28 = vpack.c.bf16 %v1157_v12, %v1028_v8  ;;  %v10259_v52 = vpop.f32.mrf.mxu3  ;;  %v10261_v3 = vpop.f32.mrf.mxu0  ;;  %v1932_v23 = vunpack.c.l.b16 %v1469_v4 }
 0x277   :  { %13484 = vst [vmem:[#allocation67_spill] sm:$0xff] %v10259_v52  ;;  %v1030_v62 = vpop.f32.mrf.mxu1  ;;  %v1933_v9 = vunpack.c.h.b16 %v1469_v4 }
 0x278   :  { %13485 = vst [vmem:[#allocation68_spill] sm:$0xff] %v10261_v3  ;;  %v1684_v15 = vmax.f32 %v1683_v39, %v1556_v10  ;;  %v1697_v45 = vmax.f32 %v1696_v31, %v1557_v16  ;;  %v1316_v58 = vunpack.c.l.bf16 %v1217_v28  ;;  %v1317_v5 = vunpack.c.h.bf16 %v1217_v28 }
 0x279   :  { %v10263_v44 = vpack.c.b16 %v1932_v23, %v1930_v36  ;;  %v10265_v55 = vpack.c.b16 %v1933_v9, %v1931_v48 }
 0x27a   :  { %v1685_v2 = vrot.slane %v1684_v15, 4  ;;  %v1698_v56 = vrot.slane %v1697_v45, 4  ;;  %v1414_v52 = vadd.f32 %v9747_v33, %v1316_v58  ;;  %v1415_v3 = vadd.f32 %v9749_v34, %v1317_v5 }
 0x27b   :  { %13486 = vst [vmem:[#allocation69_spill] sm:$0xff] %v10263_v44  ;;  %2469 = vmatmul.bf16.gmra.mxu3 %v10263_v44 }
 0x27c   :  { %13487 = vst [vmem:[#allocation70_spill] sm:$0xff] %v10265_v55  ;;  %v1686_v8 = vmax.f32 %v1684_v15, %v1685_v2  ;;  %v1699_v12 = vmax.f32 %v1697_v45, %v1698_v56  ;;  %v1470_v48 = vpack.c.bf16 %v1415_v3, %v1414_v52 }
 0x27d   :  { %v1159_v35 = vpop.f32.mrf.mxu2 }
 0x27e   :  { %v1687_v4 = vrot.slane %v1686_v8, 2  ;;  %v1700_v39 = vrot.slane %v1699_v12, 2  ;;  %v10270_v31 = vpop.f32.mrf.mxu3  ;;  %v10272_v10 = vpop.f32.mrf.mxu0  ;;  %v1218_v16 = vpack.c.bf16 %v1159_v35, %v1030_v62  ;;  %v1558_v2 = vunpack.c.l.bf16 %v1470_v48 }
 0x27f   :  { %13488 = vst [vmem:[#allocation71_spill] sm:$0xff] %v10270_v31  ;;  %v1033_v28 = vpop.f32.mrf.mxu1 }
 0x280   :  { %13489 = vst [vmem:[#allocation72_spill] sm:$0xff] %v10272_v10  ;;  %v1688_v23 = vmax.f32 %v1686_v8, %v1687_v4  ;;  %v1701_v36 = vmax.f32 %v1699_v12, %v1700_v39  ;;  %v1318_v9 = vunpack.c.l.bf16 %v1218_v16  ;;  %v1319_v44 = vunpack.c.h.bf16 %v1218_v16 }
 0x281   :  { %2573 = vmatmul.bf16.gmra.mxu0 %v10145_v24  ;;  %2657 = vmatmul.bf16.gmra.mxu1 %v9912_v37  ;;  %v1559_v8 = vunpack.c.h.bf16 %v1470_v48  ;;  %v1934_v39 = vunpack.c.l.b16 %v1470_v48  ;;  %v1935_v16 = vunpack.c.h.b16 %v1470_v48  ;;  %v8369_v48 = vld [vmem:[%s13071_s5 + $0x1e8] sm:$0xf] }
 0x282   :  { %2786 = vmatmul.bf16.gmra.mxu2 %v9914_v38  ;;  %v1689_v58 = vrot.slane %v1688_v23, 1  ;;  %v1702_v56 = vrot.slane %v1701_v36, 1  ;;  %v1416_v15 = vadd.f32 %v9747_v33, %v1318_v9  ;;  %v1417_v45 = vadd.f32 %v9749_v34, %v1319_v44 }
 0x284   :  { %v1690_v5 = vmax.f32 %v1688_v23, %v1689_v58  ;;  %v1703_v62 = vmax.f32 %v1701_v36, %v1702_v56  ;;  %v1471_v12 = vpack.c.bf16 %v1417_v45, %v1416_v15  ;;  %v9073_v58 = vld [vmem:[%s13071_s5 + $0x1ec] sm:$0xf] }
 0x285   :  { %v1162_v52 = vpop.f32.mrf.mxu2 }
 0x286   :  { %v1219_v3 = vpack.c.bf16 %v1162_v52, %v1033_v28  ;;  %v10279_v35 = vpop.f32.mrf.mxu3  ;;  %v10281_v4 = vpop.f32.mrf.mxu0  ;;  %v1738_v38 = vpack.c.bf16 %v1690_v5, %v1690_v5  ;;  %v1560_v31 = vunpack.c.l.bf16 %v1471_v12  ;;  %v1561_v37 = vunpack.c.h.bf16 %v1471_v12  ;;  %v8371_v28 = vld [vmem:[%s13071_s5 + $0x1f8] sm:$0xf0] }
 0x287   :  { %13490 = vst [vmem:[#allocation73_spill] sm:$0xff] %v10279_v35  ;;  %v1035_v9 = vpop.f32.mrf.mxu1  ;;  %v1936_v10 = vunpack.c.l.b16 %v1471_v12  ;;  %v1739_v44 = vpack.c.bf16 %v1703_v62, %v1703_v62  ;;  %v1937_v56 = vunpack.c.h.b16 %v1471_v12  ;;  %v8374_v62 = vor.u32 %v9073_v58, %v8371_v28  ;;  %v9041_v35 = vld [vmem:[%s13071_s5 + $0xec] sm:$0xf] }
 0x288   :  { %13491 = vst [vmem:[#allocation74_spill] sm:$0xff] %v10281_v4  ;;  %v1320_v23 = vunpack.c.l.bf16 %v1219_v3  ;;  %v1321_v36 = vunpack.c.h.bf16 %v1219_v3  ;;  %v3492_v15 = vunpack.c.l.b16 %v1738_v38  ;;  %v1704_v45 = vmax.f32 %v1558_v2, %v1560_v31  ;;  %v9075_v3 = vld [vmem:[%s13071_s5 + $0x1f4] sm:$0xf0]  ;;  %v8243_v4 = vld [vmem:[%s13071_s5 + $0xf8] sm:$0xf0] }
 0x289   :  { %v1717_v5 = vmax.f32 %v1559_v8, %v1561_v37  ;;  %v10292_v52 = vpack.c.b16 %v1936_v10, %v1934_v39  ;;  %v8370_v37 = vor.u32 %v9075_v3, %v8369_v48  ;;  %v8246_v31 = vor.u32 %v9041_v35, %v8243_v4  ;;  %3269 = vmatpush.bf16.msra.mxu2 %v8374_v62  ;;  %v8145_v62 = vld [vmem:[%s13071_s5 + $0x28] sm:$0xf] }
 0x28a   :  { %v1418_v12 = vadd.f32 %v9747_v33, %v1320_v23  ;;  %v1419_v38 = vadd.f32 %v9749_v34, %v1321_v36  ;;  %v10306_v10 = vpack.c.b16 %v1937_v56, %v1935_v16  ;;  %v10310_v2 = vsel %vm3502_vm5, %v3492_v15, %v10197_v6 }
 0x28b   :  { %13492 = vst [vmem:[#allocation75_spill] sm:$0xff] %v10292_v52  ;;  %2474 = vmatmul.bf16.gmra.mxu3 %v10292_v52  ;;  %v3493_v8 = vunpack.c.l.b16 %v1739_v44  ;;  %3011 = vmatpush.bf16.msra.mxu0 %v8370_v37 }
 0x28c   :  { %13493 = vst [vmem:[#allocation76_spill] sm:$0xff] %v10306_v10  ;;  %v1472_v39 = vpack.c.bf16 %v1419_v38, %v1418_v12  ;;  %3140 = vmatpush.bf16.msra.mxu1 %v8246_v31 }
 0x28d   :  { %v1164_v58 = vpop.f32.mrf.mxu2  ;;  %v10314_v23 = vsel %vm3502_vm5, %v3493_v8, %v10202_v26  ;;  %v9019_v26 = vld [vmem:[%s13071_s5 + $0x34] sm:$0xf0] }
 0x28e   :  { %v1562_v36 = vunpack.c.l.bf16 %v1472_v39  ;;  %v1563_v35 = vunpack.c.h.bf16 %v1472_v39  ;;  %v1220_v4 = vpack.c.bf16 %v1164_v58, %v1035_v9  ;;  %v10316_v28 = vpop.f32.mrf.mxu3  ;;  %v10318_v16 = vpop.f32.mrf.mxu0  ;;  %v8146_v9 = vor.u32 %v9019_v26, %v8145_v62 }
 0x28f   :  { %13494 = vst [vmem:[#allocation77_spill] sm:$0xff] %v10316_v28  ;;  %v1038_v48 = vpop.f32.mrf.mxu1  ;;  %v1939_v62 = vunpack.c.h.b16 %v1472_v39 }
 0x290   :  { %v1705_v56 = vmax.f32 %v1704_v45, %v1562_v36  ;;  %v1718_v6 = vmax.f32 %v1717_v5, %v1563_v35  ;;  %v1322_v15 = vunpack.c.l.bf16 %v1220_v4  ;;  %v1323_v44 = vunpack.c.h.bf16 %v1220_v4  ;;  %2888 = vmatpush.bf16.msrb.mxu3 %v8146_v9 }
 0x291   :  { %2578 = vmatmul.bf16.gmra.mxu0 %v10171_v57  ;;  %2662 = vmatmul.bf16.gmra.mxu1 %v9937_v32  ;;  %v1938_v4 = vunpack.c.l.b16 %v1472_v39 }
 0x292   :  { %v1420_v3 = vadd.f32 %v9747_v33, %v1322_v15  ;;  %v1421_v45 = vadd.f32 %v9749_v34, %v1323_v44  ;;  %2791 = vmatmul.bf16.gmra.mxu2 %v9948_v41 }
 0x294   :  { %v1473_v5 = vpack.c.bf16 %v1421_v45, %v1420_v3 }
 0x295   :  { %v1167_v12 = vpop.f32.mrf.mxu2 }
 0x296   :  { %v1564_v38 = vunpack.c.l.bf16 %v1473_v5  ;;  %v1565_v37 = vunpack.c.h.bf16 %v1473_v5  ;;  %v1221_v31 = vpack.c.bf16 %v1167_v12, %v1038_v48  ;;  %v10331_v8 = vpop.f32.mrf.mxu3  ;;  %v10333_v58 = vpop.f32.mrf.mxu0  ;;  %v1940_v36 = vunpack.c.l.b16 %v1473_v5 }
 0x297   :  { %13495 = vst [vmem:[#allocation78_spill] sm:$0xff] %v10331_v8  ;;  %v1040_v35 = vpop.f32.mrf.mxu1  ;;  %v1941_v26 = vunpack.c.h.b16 %v1473_v5 }
 0x298   :  { %13496 = vst [vmem:[#allocation79_spill] sm:$0xff] %v10333_v58  ;;  %v1706_v15 = vmax.f32 %v1705_v56, %v1564_v38  ;;  %v1719_v28 = vmax.f32 %v1718_v6, %v1565_v37  ;;  %v1324_v44 = vunpack.c.l.bf16 %v1221_v31  ;;  %v1325_v52 = vunpack.c.h.bf16 %v1221_v31 }
 0x299   :  { %v10335_v41 = vpack.c.b16 %v1940_v36, %v1938_v4  ;;  %v10337_v9 = vpack.c.b16 %v1941_v26, %v1939_v62 }
 0x29a   :  { %v1422_v3 = vadd.f32 %v9747_v33, %v1324_v44  ;;  %v1423_v48 = vadd.f32 %v9749_v34, %v1325_v52 }
 0x29b   :  { %13497 = vst [vmem:[#allocation80_spill] sm:$0xff] %v10335_v41  ;;  %2479 = vmatmul.bf16.gmra.mxu3 %v10335_v41 }
 0x29c   :  { %13498 = vst [vmem:[#allocation81_spill] sm:$0xff] %v10337_v9  ;;  %v1474_v45 = vpack.c.bf16 %v1423_v48, %v1422_v3 }
 0x29d   :  { %v1169_v12 = vpop.f32.mrf.mxu2 }
 0x29e   :  { %v1566_v8 = vunpack.c.l.bf16 %v1474_v45  ;;  %v1567_v58 = vunpack.c.h.bf16 %v1474_v45  ;;  %v1222_v39 = vpack.c.bf16 %v1169_v12, %v1040_v35  ;;  %v10342_v5 = vpop.f32.mrf.mxu3  ;;  %v10344_v56 = vpop.f32.mrf.mxu0  ;;  %v1943_v12 = vunpack.c.h.b16 %v1474_v45 }
 0x29f   :  { %13499 = vst [vmem:[#allocation82_spill] sm:$0xff] %v10342_v5  ;;  %v1043_v6 = vpop.f32.mrf.mxu1 }
 0x2a0   :  { %v1707_v38 = vmax.f32 %v1706_v15, %v1566_v8  ;;  %v1720_v37 = vmax.f32 %v1719_v28, %v1567_v58  ;;  %v1326_v31 = vunpack.c.l.bf16 %v1222_v39  ;;  %v1327_v36 = vunpack.c.h.bf16 %v1222_v39 }
 0x2a1   :  { %2583 = vmatmul.bf16.gmra.mxu0 %v10193_v30  ;;  %2667 = vmatmul.bf16.gmra.mxu1 %v9958_v42  ;;  %v1942_v15 = vunpack.c.l.b16 %v1474_v45 }
 0x2a2   :  { %v1424_v52 = vadd.f32 %v9747_v33, %v1326_v31  ;;  %v1425_v4 = vadd.f32 %v9749_v34, %v1327_v36  ;;  %2796 = vmatmul.bf16.gmra.mxu2 %v9960_v43 }
 0x2a4   :  { %v1475_v35 = vpack.c.bf16 %v1425_v4, %v1424_v52  ;;  %v8129_v52 = vld [vmem:[%s13071_s5 + $0x8] sm:$0xf] }
 0x2a5   :  { %v1172_v62 = vpop.f32.mrf.mxu2 }
 0x2a6   :  { %v1568_v26 = vunpack.c.l.bf16 %v1475_v35  ;;  %v1569_v44 = vunpack.c.h.bf16 %v1475_v35  ;;  %v1223_v3 = vpack.c.bf16 %v1172_v62, %v1043_v6  ;;  %v10351_v48 = vpop.f32.mrf.mxu3  ;;  %v10353_v28 = vpop.f32.mrf.mxu0  ;;  %v1944_v8 = vunpack.c.l.b16 %v1475_v35  ;;  %v9015_v6 = vld [vmem:[%s13071_s5 + $0x14] sm:$0xf0] }
 0x2a7   :  { %13500 = vst [vmem:[#allocation83_spill] sm:$0xff] %v10351_v48  ;;  %v1045_v58 = vpop.f32.mrf.mxu1  ;;  %v1945_v39 = vunpack.c.h.b16 %v1475_v35 }
 0x2a8   :  { %v1708_v5 = vmax.f32 %v1707_v38, %v1568_v26  ;;  %v1721_v31 = vmax.f32 %v1720_v37, %v1569_v44  ;;  %v1328_v41 = vunpack.c.l.bf16 %v1223_v3  ;;  %v1329_v36 = vunpack.c.h.bf16 %v1223_v3 }
 0x2a9   :  { %v10355_v42 = vpack.c.b16 %v1944_v8, %v1942_v15  ;;  %v10363_v4 = vpack.c.b16 %v1945_v39, %v1943_v12  ;;  %v8130_v38 = vor.u32 %v9015_v6, %v8129_v52 }
 0x2aa   :  { %v1426_v62 = vadd.f32 %v9747_v33, %v1328_v41  ;;  %v1427_v45 = vadd.f32 %v9749_v34, %v1329_v36 }
 0x2ab   :  { %13501 = vst [vmem:[#allocation84_spill] sm:$0xff] %v10355_v42  ;;  %2484 = vmatmul.bf16.gmra.mxu3 %v10355_v42 }
 0x2ac   :  { %13502 = vst [vmem:[#allocation85_spill] sm:$0xff] %v10363_v4  ;;  %v1476_v37 = vpack.c.bf16 %v1427_v45, %v1426_v62  ;;  %2889 = vmatpush.bf16.msrb.mxu3 %v8130_v38 }
 0x2ad   :  { %v1174_v35 = vpop.f32.mrf.mxu2 }
 0x2ae   :  { %v1570_v26 = vunpack.c.l.bf16 %v1476_v37  ;;  %v1571_v44 = vunpack.c.h.bf16 %v1476_v37  ;;  %v1224_v3 = vpack.c.bf16 %v1174_v35, %v1045_v58  ;;  %v10368_v8 = vpop.f32.mrf.mxu3  ;;  %v10370_v15 = vpop.f32.mrf.mxu0  ;;  %v9069_v58 = vld [vmem:[%s13071_s5 + $0x1cc] sm:$0xf]  ;;  %v2505_v35 = vadd.f32 %v10134_v46, %v9996_v29 }
 0x2af   :  { %13503 = vst [vmem:[#allocation86_spill] sm:$0xff] %v10368_v8  ;;  %v2633_v43 = vpop.f32.mrf.mxu1 }
 0x2b0   :  { %v1709_v12 = vmax.f32 %v1708_v5, %v1570_v26  ;;  %v1722_v39 = vmax.f32 %v1721_v31, %v1571_v44  ;;  %v1330_v48 = vunpack.c.l.bf16 %v1224_v3  ;;  %v1331_v41 = vunpack.c.h.bf16 %v1224_v3  ;;  %v8355_v5 = vld [vmem:[%s13071_s5 + $0x1d8] sm:$0xf0]  ;;  %v8353_v31 = vld [vmem:[%s13071_s5 + $0x1c8] sm:$0xf] }
 0x2b1   :  { %2588 = vmatmul.bf16.gmra.mxu0 %v10219_v17  ;;  %2672 = vmatmul.bf16.gmra.mxu1 %v9979_v7  ;;  %v8358_v6 = vor.u32 %v9069_v58, %v8355_v5  ;;  %v1946_v44 = vunpack.c.l.b16 %v1476_v37 }
 0x2b2   :  { %v1428_v36 = vadd.f32 %v9747_v33, %v1330_v48  ;;  %v1429_v52 = vadd.f32 %v9749_v34, %v1331_v41  ;;  %2801 = vmatmul.bf16.gmra.mxu2 %v9994_v27  ;;  %v9071_v33 = vld [vmem:[%s13071_s5 + $0x1d4] sm:$0xf0]  ;;  %v9037_v34 = vld [vmem:[%s13071_s5 + $0xcc] sm:$0xf]  ;;  %v8227_v48 = vld [vmem:[%s13071_s5 + $0xd8] sm:$0xf0] }
 0x2b3   :  { %v8354_v45 = vor.u32 %v9071_v33, %v8353_v31  ;;  %v8230_v38 = vor.u32 %v9037_v34, %v8227_v48  ;;  %3270 = vmatpush.bf16.msra.mxu2 %v8358_v6 }
 0x2b4   :  { %v1477_v62 = vpack.c.bf16 %v1429_v52, %v1428_v36  ;;  %v1947_v36 = vunpack.c.h.b16 %v1476_v37 }
 0x2b5   :  { %v2762_v26 = vpop.f32.mrf.mxu2  ;;  %3012 = vmatpush.bf16.msra.mxu0 %v8354_v45  ;;  %3141 = vmatpush.bf16.msra.mxu1 %v8230_v38  ;;  %v2507_v45 = vadd.f32 %v10141_v18, %v10007_v61 }
 0x2b6   :  { %v1572_v3 = vunpack.c.l.bf16 %v1477_v62  ;;  %v1573_v41 = vunpack.c.h.bf16 %v1477_v62  ;;  %v10397_v58 = vpop.f32.mrf.mxu3  ;;  %v2763_v5 = vadd.f32 %v2762_v26, %v2633_v43  ;;  %v10399_v27 = vpop.f32.mrf.mxu0  ;;  %v1948_v8 = vunpack.c.l.b16 %v1477_v62 }
 0x2b7   :  { %13504 = vst [vmem:[#allocation87_spill] sm:$0xff] %v10397_v58  ;;  %v2635_v42 = vpop.f32.mrf.mxu1  ;;  %v1949_v52 = vunpack.c.h.b16 %v1477_v62 }
 0x2b8   :  { %v1710_v31 = vmax.f32 %v1709_v12, %v1572_v3  ;;  %v1723_v33 = vmax.f32 %v1722_v39, %v1573_v41  ;;  %v10401_v34 = vpack.c.bf16 %v2763_v5, %v2505_v35  ;;  %v10403_v29 = vpack.c.b16 %v1948_v8, %v1946_v44 }
 0x2b9   :  { %v10405_v46 = vpack.c.b16 %v1949_v52, %v1947_v36 }
 0x2ba   :  { %13505 = vst [vmem:[#allocation88_spill] sm:$0xff] %v10401_v34  ;;  %v1711_v6 = vrot.slane %v1710_v31, 4  ;;  %v1724_v48 = vrot.slane %v1723_v33, 4 }
 0x2bb   :  { %13506 = vst [vmem:[#allocation89_spill] sm:$0xff] %v10403_v29  ;;  %2489 = vmatmul.bf16.gmra.mxu3 %v10403_v29 }
 0x2bc   :  { %13507 = vst [vmem:[#allocation90_spill] sm:$0xff] %v10405_v46  ;;  %v1712_v43 = vmax.f32 %v1710_v31, %v1711_v6  ;;  %v1725_v26 = vmax.f32 %v1723_v33, %v1724_v48 }
 0x2bd   :  { %v2764_v58 = vpop.f32.mrf.mxu2 }
 0x2be   :  { %v10410_v37 = vpop.f32.mrf.mxu3  ;;  %v2765_v12 = vadd.f32 %v2764_v58, %v2635_v42  ;;  %v10412_v39 = vpop.f32.mrf.mxu0  ;;  %v1713_v62 = vrot.slane %v1712_v43, 2  ;;  %v1726_v8 = vrot.slane %v1725_v26, 2  ;;  %v2510_v58 = vadd.f32 %v10152_v60, %v10018_v25 }
 0x2bf   :  { %v2638_v38 = vpop.f32.mrf.mxu1 }
 0x2c0   :  { %v10414_v35 = vpack.c.bf16 %v2765_v12, %v2507_v45  ;;  %v1714_v44 = vmax.f32 %v1712_v43, %v1713_v62  ;;  %v1727_v3 = vmax.f32 %v1725_v26, %v1726_v8  ;;  %v2512_v62 = vadd.f32 %v10167_v40, %v10023_v1 }
 0x2c1   :  { %2593 = vmatmul.bf16.gmra.mxu0 %v10245_v53  ;;  %2677 = vmatmul.bf16.gmra.mxu1 %v10010_v20 }
 0x2c2   :  { %13508 = vst [vmem:[#allocation91_spill] sm:$0xff] %v10414_v35  ;;  %2806 = vmatmul.bf16.gmra.mxu2 %v10012_v21  ;;  %v1715_v41 = vrot.slane %v1714_v44, 1  ;;  %v1728_v61 = vrot.slane %v1727_v3, 1 }
 0x2c4   :  { %v1716_v18 = vmax.f32 %v1714_v44, %v1715_v41  ;;  %v1729_v5 = vmax.f32 %v1727_v3, %v1728_v61 }
 0x2c5   :  { %v2767_v42 = vpop.f32.mrf.mxu2 }
 0x2c6   :  { %v10421_v36 = vpop.f32.mrf.mxu3  ;;  %v2768_v52 = vadd.f32 %v2767_v42, %v2638_v38  ;;  %v10423_v31 = vpop.f32.mrf.mxu0  ;;  %v1740_v33 = vpack.c.bf16 %v1716_v18, %v1716_v18  ;;  %v1741_v6 = vpack.c.bf16 %v1729_v5, %v1729_v5  ;;  %v13514_v42 = vld [vmem:[#allocation15_spill] sm:$0xff] }
 0x2c7   :  { %v2640_v48 = vpop.f32.mrf.mxu1 }
 0x2c8   :  { %v10425_v43 = vpack.c.bf16 %v2768_v52, %v2510_v58  ;;  %v3494_v26 = vunpack.c.l.b16 %v1740_v33  ;;  %v3495_v45 = vunpack.c.l.b16 %v1741_v6  ;;  %v13515_v52 = vld [vmem:[#allocation33_spill] sm:$0xff] }
 0x2c9   :  { %v2517_v33 = vadd.f32 %v10187_v13, %v13515_v52  ;;  %v8339_v13 = vld [vmem:[%s13071_s5 + $0x1b8] sm:$0xf0] }
 0x2ca   :  { %13509 = vst [vmem:[#allocation92_spill] sm:$0xff] %v10425_v43  ;;  %v10429_v12 = vsel %vm3504_vm6, %v3494_v26, %v10310_v2  ;;  %v10433_v25 = vsel %vm3504_vm6, %v3495_v45, %v10314_v23  ;;  %v2515_v23 = vadd.f32 %v10178_v11, %v10034_v47  ;;  %v13517_v45 = vld [vmem:[#allocation34_spill] sm:$0xff]  ;;  %v13518_v52 = vld [vmem:[#allocation36_spill] sm:$0xff] }
 0x2cb   :  { %13510 = vst [vmem:[#allocation93_spill] sm:$0xff] %v10429_v12  ;;  %2890 = vmatmul.bf16.vlgmr.msrb.gmra.mxu3 %v9779_v22  ;;  %v13537_v12 = vld [vmem:[#allocation21_spill] sm:$0xff] }
 0x2cc   :  { %13511 = vst [vmem:[#allocation94_spill] sm:$0xff] %v10433_v25  ;;  %v13533_v25 = vld [vmem:[#allocation42_spill] sm:$0xff] }
 0x2cd   :  { %v2769_v60 = vpop.f32.mrf.mxu2 }
 0x2ce   :  { %v10438_v8 = vpop.f32.mrf.mxu3  ;;  %v2770_v38 = vadd.f32 %v2769_v60, %v2640_v48  ;;  %v10440_v44 = vpop.f32.mrf.mxu0  ;;  %v9065_v60 = vld [vmem:[%s13071_s5 + $0x1ac] sm:$0xf] }
 0x2cf   :  { %v2643_v3 = vpop.f32.mrf.mxu1 }
 0x2d0   :  { %v10442_v41 = vpack.c.bf16 %v2770_v38, %v2512_v62  ;;  %v8337_v62 = vld [vmem:[%s13071_s5 + $0x1a8] sm:$0xf]  ;;  %v8342_v38 = vor.u32 %v9065_v60, %v8339_v13 }
 0x2d1   :  { %2598 = vmatmul.bf16.gmra.mxu0 %v10265_v55  ;;  %2682 = vmatmul.bf16.gmra.mxu1 %v10026_v50 }
 0x2d2   :  { %13512 = vst [vmem:[#allocation95_spill] sm:$0xff] %v10442_v41  ;;  %2811 = vmatmul.bf16.gmra.mxu2 %v10028_v51  ;;  %v8489_v41 = vld [vmem:[#allocation3 + $0xe0] sm:$0xf] }
 0x2d3   :  { %3271 = vmatpush.bf16.msra.mxu2 %v8342_v38  ;;  %v13520_v38 = vld [vmem:[#allocation37_spill] sm:$0xff] }
 0x2d5   :  { %v2772_v2 = vpop.f32.mrf.mxu2 }
 0x2d6   :  { %v10449_v61 = vpop.f32.mrf.mxu3  ;;  %v2773_v1 = vadd.f32 %v2772_v2, %v2643_v3  ;;  %v10451_v40 = vpop.f32.mrf.mxu0  ;;  %v9067_v3 = vld [vmem:[%s13071_s5 + $0x1b4] sm:$0xf0]  ;;  %v9033_v2 = vld [vmem:[%s13071_s5 + $0xac] sm:$0xf] }
 0x2d7   :  { %v2645_v18 = vpop.f32.mrf.mxu1 }
 0x2d8   :  { %v10453_v5 = vpack.c.bf16 %v2773_v1, %v2515_v23  ;;  %v8211_v23 = vld [vmem:[%s13071_s5 + $0xb8] sm:$0xf0]  ;;  %v8338_v1 = vor.u32 %v9067_v3, %v8337_v62 }
 0x2d9   :  { %v9106_v62 = vld [vmem:[#allocation3 + $0xec] sm:$0xf0] }
 0x2da   :  { %13513 = vst [vmem:[#allocation96_spill] sm:$0xff] %v10453_v5  ;;  %3013 = vmatpush.bf16.msra.mxu0 %v8338_v1  ;;  %v8490_v3 = vor.u32 %v9106_v62, %v8489_v41  ;;  %v8321_v41 = vld [vmem:[%s13071_s5 + $0x188] sm:$0xf] }
 0x2db   :  { %2895 = vmatmul.bf16.gmra.mxu3 %v13514_v42 }
 0x2dc   :  { %3835 = vmatpush.bf16.msra.mxu3 %v8490_v3 }
 0x2dd   :  { %v2774_v58 = vpop.f32.mrf.mxu2 }
 0x2de   :  { %v10458_v6 = vpop.f32.mrf.mxu3  ;;  %v2775_v48 = vadd.f32 %v2774_v58, %v2645_v18  ;;  %v10460_v26 = vpop.f32.mrf.mxu0  ;;  %v8214_v18 = vor.u32 %v9033_v2, %v8211_v23  ;;  %v13521_v23 = vld [vmem:[#allocation58_spill] sm:$0xff] }
 0x2df   :  { %v2648_v47 = vpop.f32.mrf.mxu1  ;;  %v2522_v43 = vadd.f32 %v13521_v23, %v13520_v38 }
 0x2e0   :  { %v10462_v11 = vpack.c.bf16 %v2775_v48, %v2517_v33  ;;  %v2520_v33 = vadd.f32 %v10206_v14, %v13518_v52  ;;  %3142 = vmatpush.bf16.msra.mxu1 %v8214_v18 }
 0x2e1   :  { %2603 = vmatmul.bf16.gmra.mxu0 %v10306_v10  ;;  %2687 = vmatmul.bf16.gmra.mxu1 %v13517_v45 }
 0x2e2   :  { %13516 = vst [vmem:[#allocation15_spill] sm:$0xff] %v10462_v11  ;;  %2816 = vmatmul.bf16.gmra.mxu2 %v10056_v59 }
 0x2e5   :  { %v2777_v58 = vpop.f32.mrf.mxu2 }
 0x2e6   :  { %v10487_v48 = vpop.f32.mrf.mxu3  ;;  %v2778_v60 = vadd.f32 %v2777_v58, %v2648_v47  ;;  %v10489_v13 = vpop.f32.mrf.mxu0  ;;  %v13524_v58 = vld [vmem:[#allocation38_spill] sm:$0xff] }
 0x2e7   :  { %v2650_v11 = vpop.f32.mrf.mxu1 }
 0x2e8   :  { %v10491_v5 = vpack.c.bf16 %v2778_v60, %v2520_v33  ;;  %v9063_v33 = vld [vmem:[%s13071_s5 + $0x194] sm:$0xf0] }
 0x2e9   :  { %v9059_v60 = vld [vmem:[%s13071_s5 + $0x174] sm:$0xf0] }
 0x2ea   :  { %13519 = vst [vmem:[#allocation33_spill] sm:$0xff] %v10491_v5  ;;  %v8289_v5 = vld [vmem:[%s13071_s5 + $0x148] sm:$0xf] }
 0x2eb   :  { %2900 = vmatmul.bf16.gmra.mxu3 %v9809_v49 }
 0x2ed   :  { %v2779_v2 = vpop.f32.mrf.mxu2 }
 0x2ee   :  { %v10496_v14 = vpop.f32.mrf.mxu3  ;;  %v2780_v52 = vadd.f32 %v2779_v2, %v2650_v11  ;;  %v10498_v47 = vpop.f32.mrf.mxu0  ;;  %v8322_v11 = vor.u32 %v9063_v33, %v8321_v41  ;;  %v13525_v2 = vld [vmem:[#allocation40_spill] sm:$0xff] }
 0x2ef   :  { %13522 = vst [vmem:[#allocation36_spill] sm:$0xff] %v10496_v14  ;;  %v2653_v1 = vpop.f32.mrf.mxu1  ;;  %v2525_v38 = vadd.f32 %v10226_v63, %v13525_v2  ;;  %v8273_v63 = vld [vmem:[%s13071_s5 + $0x128] sm:$0xf] }
 0x2f0   :  { %v10500_v18 = vpack.c.bf16 %v2780_v52, %v2522_v43  ;;  %v8305_v43 = vld [vmem:[%s13071_s5 + $0x168] sm:$0xf]  ;;  %3014 = vmatpush.bf16.msra.mxu0 %v8322_v11  ;;  %v9055_v11 = vld [vmem:[%s13071_s5 + $0x154] sm:$0xf0] }
 0x2f1   :  { %2608 = vmatmul.bf16.gmra.mxu0 %v10337_v9  ;;  %2692 = vmatmul.bf16.gmra.mxu1 %v13524_v58  ;;  %v8306_v62 = vor.u32 %v9059_v60, %v8305_v43  ;;  %v8290_v43 = vor.u32 %v9055_v11, %v8289_v5  ;;  %v13528_v60 = vld [vmem:[#allocation19_spill] sm:$0xff]  ;;  %v13529_v2 = vld [vmem:[#allocation41_spill] sm:$0xff] }
 0x2f2   :  { %13523 = vst [vmem:[#allocation37_spill] sm:$0xff] %v10500_v18  ;;  %2821 = vmatmul.bf16.gmra.mxu2 %v10080_v0  ;;  %v13539_v0 = vld [vmem:[#allocation68_spill] sm:$0xff] }
 0x2f4   :  { %3015 = vmatpush.bf16.msra.mxu0 %v8306_v62 }
 0x2f5   :  { %v2782_v3 = vpop.f32.mrf.mxu2 }
 0x2f6   :  { %v10519_v23 = vpop.f32.mrf.mxu3  ;;  %v2783_v52 = vadd.f32 %v2782_v3, %v2653_v1  ;;  %v10521_v18 = vpop.f32.mrf.mxu0  ;;  %v9051_v1 = vld [vmem:[%s13071_s5 + $0x134] sm:$0xf0] }
 0x2f7   :  { %13526 = vst [vmem:[#allocation58_spill] sm:$0xff] %v10519_v23  ;;  %v2655_v41 = vpop.f32.mrf.mxu1  ;;  %v8274_v62 = vor.u32 %v9051_v1, %v8273_v63  ;;  %v9047_v63 = vld [vmem:[%s13071_s5 + $0x114] sm:$0xf0] }
 0x2f8   :  { %v10523_v33 = vpack.c.bf16 %v2783_v52, %v2525_v38  ;;  %3016 = vmatpush.bf16.msra.mxu0 %v8290_v43  ;;  %v13530_v38 = vld [vmem:[#allocation63_spill] sm:$0xff]  ;;  %v8257_v43 = vld [vmem:[%s13071_s5 + $0x108] sm:$0xf] }
 0x2f9   :  { %v2527_v52 = vadd.f32 %v13530_v38, %v13529_v2  ;;  %v9102_v23 = vld [vmem:[#allocation3 + $0xcc] sm:$0xf0] }
 0x2fa   :  { %13527 = vst [vmem:[#allocation40_spill] sm:$0xff] %v10523_v33 }
 0x2fb   :  { %2905 = vmatmul.bf16.gmra.mxu3 %v13528_v60  ;;  %v13538_v60 = vld [vmem:[#allocation45_spill] sm:$0xff] }
 0x2fc   :  { %3017 = vmatpush.bf16.msra.mxu0 %v8274_v62 }
 0x2fd   :  { %v2784_v3 = vpop.f32.mrf.mxu2 }
 0x2fe   :  { %v10540_v33 = vpop.f32.mrf.mxu3  ;;  %v2785_v35 = vadd.f32 %v2784_v3, %v2655_v41  ;;  %v10542_v5 = vpop.f32.mrf.mxu0  ;;  %v8258_v41 = vor.u32 %v9047_v63, %v8257_v43 }
 0x2ff   :  { %13531 = vst [vmem:[#allocation41_spill] sm:$0xff] %v10540_v33  ;;  %v2658_v11 = vpop.f32.mrf.mxu1 }
 0x300   :  { %v10544_v34 = vpack.c.bf16 %v2785_v35, %v2527_v52  ;;  %3018 = vmatpush.bf16.msra.mxu0 %v8258_v41  ;;  %v13534_v35 = vld [vmem:[#allocation44_spill] sm:$0xff] }
 0x301   :  { %2613 = vmatmul.bf16.gmra.mxu0 %v10363_v4  ;;  %2697 = vmatmul.bf16.gmra.mxu1 %v13533_v25  ;;  %v2530_v62 = vadd.f32 %v10252_v19, %v13534_v35 }
 0x302   :  { %13532 = vst [vmem:[#allocation63_spill] sm:$0xff] %v10544_v34  ;;  %2826 = vmatmul.bf16.gmra.mxu2 %v10126_v54  ;;  %v2532_v54 = vadd.f32 %v13539_v0, %v13538_v60  ;;  %v8323_v0 = vld [vmem:[%s13071_s5 + $0x198] sm:$0xf0] }
 0x303   :  { %v8195_v60 = vld [vmem:[%s13071_s5 + $0x98] sm:$0xf0] }
 0x305   :  { %v2787_v1 = vpop.f32.mrf.mxu2 }
 0x306   :  { %v10557_v3 = vpop.f32.mrf.mxu3  ;;  %v2788_v2 = vadd.f32 %v2787_v1, %v2658_v11  ;;  %v10559_v38 = vpop.f32.mrf.mxu0  ;;  %v13542_v11 = vld [vmem:[#allocation46_spill] sm:$0xff] }
 0x307   :  { %13535 = vst [vmem:[#allocation42_spill] sm:$0xff] %v10557_v3  ;;  %v2660_v52 = vpop.f32.mrf.mxu1  ;;  %v9061_v1 = vld [vmem:[%s13071_s5 + $0x18c] sm:$0xf] }
 0x308   :  { %v10561_v34 = vpack.c.bf16 %v2788_v2, %v2530_v62 }
 0x30a   :  { %13536 = vst [vmem:[#allocation44_spill] sm:$0xff] %v10561_v34 }
 0x30b   :  { %2910 = vmatmul.bf16.gmra.mxu3 %v13537_v12 }
 0x30d   :  { %v2789_v33 = vpop.f32.mrf.mxu2 }
 0x30e   :  { %v10566_v43 = vpop.f32.mrf.mxu3  ;;  %v2790_v63 = vadd.f32 %v2789_v33, %v2660_v52  ;;  %v10568_v41 = vpop.f32.mrf.mxu0  ;;  %v9029_v33 = vld [vmem:[%s13071_s5 + $0x8c] sm:$0xf]  ;;  %v13543_v52 = vld [vmem:[#allocation48_spill] sm:$0xff] }
 0x30f   :  { %13540 = vst [vmem:[#allocation45_spill] sm:$0xff] %v10566_v43  ;;  %v2663_v19 = vpop.f32.mrf.mxu1  ;;  %v8198_v62 = vor.u32 %v9029_v33, %v8195_v60  ;;  %v13548_v60 = vld [vmem:[#allocation49_spill] sm:$0xff] }
 0x310   :  { %v10570_v35 = vpack.c.bf16 %v2790_v63, %v2532_v54  ;;  %v8326_v54 = vor.u32 %v9061_v1, %v8323_v0  ;;  %v13544_v63 = vld [vmem:[#allocation72_spill] sm:$0xff]  ;;  %v13547_v1 = vld [vmem:[#allocation23_spill] sm:$0xff]  ;;  %v8473_v0 = vld [vmem:[#allocation3 + $0xc0] sm:$0xf] }
 0x311   :  { %2618 = vmatmul.bf16.gmra.mxu0 %v10405_v46  ;;  %2702 = vmatmul.bf16.gmra.mxu1 %v13542_v11  ;;  %v8474_v14 = vor.u32 %v9102_v23, %v8473_v0 }
 0x312   :  { %13541 = vst [vmem:[#allocation68_spill] sm:$0xff] %v10570_v35  ;;  %2831 = vmatmul.bf16.gmra.mxu2 %v10145_v24  ;;  %v2535_v35 = vadd.f32 %v13544_v63, %v13543_v52  ;;  %3143 = vmatpush.bf16.msra.mxu1 %v8198_v62 }
 0x313   :  { %3272 = vmatpush.bf16.msra.mxu2 %v8326_v54  ;;  %v13549_v54 = vld [vmem:[#allocation74_spill] sm:$0xff]  ;;  %3836 = vmatpush.bf16.msra.mxu3 %v8474_v14 }
 0x314   :  { %v2537_v49 = vadd.f32 %v13549_v54, %v13548_v60 }
 0x315   :  { %v2792_v2 = vpop.f32.mrf.mxu2 }
 0x316   :  { %v10589_v34 = vpop.f32.mrf.mxu3  ;;  %v2793_v24 = vadd.f32 %v2792_v2, %v2663_v19  ;;  %v10591_v43 = vpop.f32.mrf.mxu0  ;;  %v13554_v2 = vld [vmem:[#allocation52_spill] sm:$0xff] }
 0x317   :  { %13545 = vst [vmem:[#allocation46_spill] sm:$0xff] %v10589_v34  ;;  %v2665_v12 = vpop.f32.mrf.mxu1  ;;  %v2540_v0 = vadd.f32 %v10318_v16, %v13554_v2 }
 0x318   :  { %v10593_v3 = vpack.c.bf16 %v2793_v24, %v2535_v35  ;;  %v13552_v24 = vld [vmem:[#allocation50_spill] sm:$0xff] }
 0x319   :  { %v13553_v35 = vld [vmem:[#allocation14_spill] sm:$0xff] }
 0x31a   :  { %13546 = vst [vmem:[#allocation48_spill] sm:$0xff] %v10593_v3 }
 0x31b   :  { %2915 = vmatmul.bf16.gmra.mxu3 %v13547_v1 }
 0x31d   :  { %v2794_v33 = vpop.f32.mrf.mxu2 }
 0x31e   :  { %v10598_v59 = vpop.f32.mrf.mxu3  ;;  %v2795_v52 = vadd.f32 %v2794_v33, %v2665_v12  ;;  %v10600_v63 = vpop.f32.mrf.mxu0 }
 0x31f   :  { %13550 = vst [vmem:[#allocation72_spill] sm:$0xff] %v10598_v59  ;;  %v2668_v19 = vpop.f32.mrf.mxu1 }
 0x320   :  { %v10602_v62 = vpack.c.bf16 %v2795_v52, %v2537_v49  ;;  %v13557_v52 = vld [vmem:[#allocation53_spill] sm:$0xff] }
 0x321   :  { %2707 = vmatmul.bf16.gmra.mxu1 %v13552_v24  ;;  %3019 = vmatmul.bf16.vlgmr.msra.gmra.mxu0 %v13553_v35 }
 0x322   :  { %13551 = vst [vmem:[#allocation49_spill] sm:$0xff] %v10602_v62  ;;  %2836 = vmatmul.bf16.gmra.mxu2 %v10171_v57  ;;  %v13558_v62 = vld [vmem:[#allocation79_spill] sm:$0xff] }
 0x323   :  { %v2542_v3 = vadd.f32 %v13558_v62, %v13557_v52 }
 0x325   :  { %v2797_v23 = vpop.f32.mrf.mxu2 }
 0x326   :  { %v10609_v60 = vpop.f32.mrf.mxu3  ;;  %v2798_v54 = vadd.f32 %v2797_v23, %v2668_v19  ;;  %v10611_v12 = vpop.f32.mrf.mxu0  ;;  %v13561_v19 = vld [vmem:[#allocation54_spill] sm:$0xff]  ;;  %v13562_v23 = vld [vmem:[#allocation16_spill] sm:$0xff] }
 0x327   :  { %13555 = vst [vmem:[#allocation74_spill] sm:$0xff] %v10609_v60  ;;  %v2670_v33 = vpop.f32.mrf.mxu1 }
 0x328   :  { %v10613_v14 = vpack.c.bf16 %v2798_v54, %v2540_v0  ;;  %v13563_v54 = vld [vmem:[#allocation56_spill] sm:$0xff] }
 0x32a   :  { %13556 = vst [vmem:[#allocation50_spill] sm:$0xff] %v10613_v14  ;;  %v2545_v14 = vadd.f32 %v10344_v56, %v13563_v54 }
 0x32b   :  { %2920 = vmatmul.bf16.gmra.mxu3 %v9937_v32 }
 0x32d   :  { %v2799_v49 = vpop.f32.mrf.mxu2 }
 0x32e   :  { %v10618_v59 = vpop.f32.mrf.mxu3  ;;  %v2800_v57 = vadd.f32 %v2799_v49, %v2670_v33  ;;  %v10620_v1 = vpop.f32.mrf.mxu0 }
 0x32f   :  { %13559 = vst [vmem:[#allocation14_spill] sm:$0xff] %v10618_v59  ;;  %v2673_v16 = vpop.f32.mrf.mxu1 }
 0x330   :  { %v10622_v2 = vpack.c.bf16 %v2800_v57, %v2542_v3  ;;  %v13566_v57 = vld [vmem:[#allocation27_spill] sm:$0xff] }
 0x331   :  { %2712 = vmatmul.bf16.gmra.mxu1 %v13561_v19  ;;  %3024 = vmatmul.bf16.gmra.mxu0 %v13562_v23 }
 0x332   :  { %13560 = vst [vmem:[#allocation52_spill] sm:$0xff] %v10622_v2  ;;  %2841 = vmatmul.bf16.gmra.mxu2 %v10193_v30  ;;  %v13567_v2 = vld [vmem:[#allocation57_spill] sm:$0xff] }
 0x333   :  { %v2547_v59 = vadd.f32 %v10353_v28, %v13567_v2  ;;  %v8307_v28 = vld [vmem:[%s13071_s5 + $0x178] sm:$0xf0]  ;;  %v9025_v2 = vld [vmem:[%s13071_s5 + $0x6c] sm:$0xf] }
 0x335   :  { %v2802_v0 = vpop.f32.mrf.mxu2 }
 0x336   :  { %v10629_v32 = vpop.f32.mrf.mxu3  ;;  %v2803_v62 = vadd.f32 %v2802_v0, %v2673_v16  ;;  %v10631_v52 = vpop.f32.mrf.mxu0  ;;  %v13571_v16 = vld [vmem:[#allocation59_spill] sm:$0xff]  ;;  %v13572_v0 = vld [vmem:[#allocation18_spill] sm:$0xff] }
 0x337   :  { %13564 = vst [vmem:[#allocation53_spill] sm:$0xff] %v10629_v32  ;;  %v2675_v33 = vpop.f32.mrf.mxu1 }
 0x338   :  { %v10633_v49 = vpack.c.bf16 %v2803_v62, %v2545_v14  ;;  %v9057_v14 = vld [vmem:[%s13071_s5 + $0x16c] sm:$0xf] }
 0x33a   :  { %13565 = vst [vmem:[#allocation79_spill] sm:$0xff] %v10633_v49 }
 0x33b   :  { %2925 = vmatmul.bf16.gmra.mxu3 %v13566_v57 }
 0x33d   :  { %v2804_v3 = vpop.f32.mrf.mxu2 }
 0x33e   :  { %v10638_v60 = vpop.f32.mrf.mxu3  ;;  %v2805_v30 = vadd.f32 %v2804_v3, %v2675_v33  ;;  %v10640_v34 = vpop.f32.mrf.mxu0  ;;  %v13573_v3 = vld [vmem:[#allocation61_spill] sm:$0xff] }
 0x33f   :  { %13568 = vst [vmem:[#allocation54_spill] sm:$0xff] %v10638_v60  ;;  %v2678_v56 = vpop.f32.mrf.mxu1 }
 0x340   :  { %13569 = vst [vmem:[#allocation16_spill] sm:$0xff] %v10640_v34  ;;  %v10642_v54 = vpack.c.bf16 %v2805_v30, %v2547_v59  ;;  %v8310_v59 = vor.u32 %v9057_v14, %v8307_v28  ;;  %v8179_v30 = vld [vmem:[%s13071_s5 + $0x78] sm:$0xf0]  ;;  %v8457_v14 = vld [vmem:[#allocation3 + $0xa0] sm:$0xf] }
 0x341   :  { %2717 = vmatmul.bf16.gmra.mxu1 %v13571_v16  ;;  %3029 = vmatmul.bf16.gmra.mxu0 %v13572_v0  ;;  %v8182_v62 = vor.u32 %v9025_v2, %v8179_v30  ;;  %v9098_v28 = vld [vmem:[#allocation3 + $0xac] sm:$0xf0]  ;;  %v13576_v30 = vld [vmem:[#allocation62_spill] sm:$0xff] }
 0x342   :  { %13570 = vst [vmem:[#allocation56_spill] sm:$0xff] %v10642_v54  ;;  %2846 = vmatmul.bf16.gmra.mxu2 %v10219_v17  ;;  %v2550_v54 = vadd.f32 %v10370_v15, %v13573_v3  ;;  %v8458_v16 = vor.u32 %v9098_v28, %v8457_v14  ;;  %v13581_v14 = vld [vmem:[#allocation66_spill] sm:$0xff] }
 0x343   :  { %3273 = vmatpush.bf16.msra.mxu2 %v8310_v59  ;;  %3144 = vmatpush.bf16.msra.mxu1 %v8182_v62  ;;  %v2552_v59 = vadd.f32 %v10399_v27, %v13576_v30  ;;  %v2555_v28 = vadd.f32 %v10412_v39, %v13581_v14  ;;  %v13588_v14 = vld [vmem:[#allocation22_spill] sm:$0xff] }
 0x344   :  { %3837 = vmatpush.bf16.msra.mxu3 %v8458_v16 }
 0x345   :  { %v2807_v33 = vpop.f32.mrf.mxu2 }
 0x346   :  { %v10661_v49 = vpop.f32.mrf.mxu3  ;;  %v2808_v17 = vadd.f32 %v2807_v33, %v2678_v56  ;;  %v10663_v60 = vpop.f32.mrf.mxu0 }
 0x347   :  { %13574 = vst [vmem:[#allocation57_spill] sm:$0xff] %v10661_v49  ;;  %v2680_v57 = vpop.f32.mrf.mxu1 }
 0x348   :  { %v10665_v32 = vpack.c.bf16 %v2808_v17, %v2550_v54  ;;  %v13579_v17 = vld [vmem:[#allocation64_spill] sm:$0xff] }
 0x349   :  { %v13580_v54 = vld [vmem:[#allocation20_spill] sm:$0xff] }
 0x34a   :  { %13575 = vst [vmem:[#allocation18_spill] sm:$0xff] %v10665_v32 }
 0x34b   :  { %2930 = vmatmul.bf16.gmra.mxu3 %v9979_v7 }
 0x34d   :  { %v2809_v2 = vpop.f32.mrf.mxu2 }
 0x34e   :  { %v2810_v34 = vadd.f32 %v2809_v2, %v2680_v57  ;;  %v10670_v15 = vpop.f32.mrf.mxu3  ;;  %v10672_v3 = vpop.f32.mrf.mxu0 }
 0x34f   :  { %13577 = vst [vmem:[#allocation61_spill] sm:$0xff] %v10670_v15  ;;  %v2683_v56 = vpop.f32.mrf.mxu1 }
 0x350   :  { %v10674_v62 = vpack.c.bf16 %v2810_v34, %v2552_v59  ;;  %v13584_v59 = vld [vmem:[#allocation67_spill] sm:$0xff] }
 0x351   :  { %2722 = vmatmul.bf16.gmra.mxu1 %v13579_v17  ;;  %3034 = vmatmul.bf16.gmra.mxu0 %v13580_v54 }
 0x352   :  { %13578 = vst [vmem:[#allocation62_spill] sm:$0xff] %v10674_v62  ;;  %2851 = vmatmul.bf16.gmra.mxu2 %v10245_v53  ;;  %v2557_v62 = vadd.f32 %v10423_v31, %v13584_v59 }
 0x355   :  { %v2812_v33 = vpop.f32.mrf.mxu2 }
 0x356   :  { %v2813_v27 = vadd.f32 %v2812_v33, %v2683_v56  ;;  %v10681_v57 = vpop.f32.mrf.mxu3  ;;  %v10683_v2 = vpop.f32.mrf.mxu0  ;;  %v13587_v33 = vld [vmem:[#allocation69_spill] sm:$0xff] }
 0x357   :  { %13582 = vst [vmem:[#allocation64_spill] sm:$0xff] %v10681_v57  ;;  %v2685_v30 = vpop.f32.mrf.mxu1 }
 0x358   :  { %v10685_v16 = vpack.c.bf16 %v2813_v27, %v2555_v28  ;;  %v13589_v27 = vld [vmem:[#allocation71_spill] sm:$0xff] }
 0x35a   :  { %13583 = vst [vmem:[#allocation20_spill] sm:$0xff] %v10685_v16  ;;  %v2560_v16 = vadd.f32 %v10440_v44, %v13589_v27  ;;  %v13596_v27 = vld [vmem:[#allocation24_spill] sm:$0xff] }
 0x35b   :  { %2935 = vmatmul.bf16.gmra.mxu3 %v10010_v20 }
 0x35d   :  { %v2814_v34 = vpop.f32.mrf.mxu2 }
 0x35e   :  { %v2815_v32 = vadd.f32 %v2814_v34, %v2685_v30  ;;  %v10690_v53 = vpop.f32.mrf.mxu3  ;;  %v10692_v15 = vpop.f32.mrf.mxu0 }
 0x35f   :  { %13585 = vst [vmem:[#allocation66_spill] sm:$0xff] %v10690_v53  ;;  %v2688_v39 = vpop.f32.mrf.mxu1 }
 0x360   :  { %v10694_v56 = vpack.c.bf16 %v2815_v32, %v2557_v62  ;;  %v13592_v62 = vld [vmem:[#allocation73_spill] sm:$0xff] }
 0x361   :  { %2727 = vmatmul.bf16.gmra.mxu1 %v13587_v33  ;;  %3039 = vmatmul.bf16.gmra.mxu0 %v13588_v14 }
 0x362   :  { %13586 = vst [vmem:[#allocation67_spill] sm:$0xff] %v10694_v56  ;;  %2856 = vmatmul.bf16.gmra.mxu2 %v10265_v55  ;;  %v2562_v56 = vadd.f32 %v10451_v40, %v13592_v62  ;;  %v8291_v40 = vld [vmem:[%s13071_s5 + $0x158] sm:$0xf0]  ;;  %v13597_v62 = vld [vmem:[#allocation77_spill] sm:$0xff] }
 0x365   :  { %v2817_v28 = vpop.f32.mrf.mxu2 }
 0x366   :  { %v2818_v20 = vadd.f32 %v2817_v28, %v2688_v39  ;;  %v10701_v31 = vpop.f32.mrf.mxu3  ;;  %v10703_v30 = vpop.f32.mrf.mxu0  ;;  %v13595_v28 = vld [vmem:[#allocation75_spill] sm:$0xff] }
 0x367   :  { %13590 = vst [vmem:[#allocation22_spill] sm:$0xff] %v10701_v31  ;;  %v2690_v34 = vpop.f32.mrf.mxu1 }
 0x368   :  { %v10705_v59 = vpack.c.bf16 %v2818_v20, %v2560_v16  ;;  %v9053_v20 = vld [vmem:[%s13071_s5 + $0x14c] sm:$0xf] }
 0x369   :  { %v9021_v16 = vld [vmem:[%s13071_s5 + $0x4c] sm:$0xf] }
 0x36a   :  { %13591 = vst [vmem:[#allocation71_spill] sm:$0xff] %v10705_v59 }
 0x36b   :  { %2940 = vmatmul.bf16.gmra.mxu3 %v10026_v50 }
 0x36d   :  { %v2819_v32 = vpop.f32.mrf.mxu2 }
 0x36e   :  { %v2820_v53 = vadd.f32 %v2819_v32, %v2690_v34  ;;  %v10710_v55 = vpop.f32.mrf.mxu3  ;;  %v10712_v57 = vpop.f32.mrf.mxu0 }
 0x36f   :  { %13593 = vst [vmem:[#allocation73_spill] sm:$0xff] %v10710_v55  ;;  %v2693_v44 = vpop.f32.mrf.mxu1 }
 0x370   :  { %v10714_v39 = vpack.c.bf16 %v2820_v53, %v2562_v56  ;;  %v8294_v53 = vor.u32 %v9053_v20, %v8291_v40  ;;  %v8163_v56 = vld [vmem:[%s13071_s5 + $0x58] sm:$0xf0]  ;;  %v8441_v20 = vld [vmem:[#allocation3 + $0x80] sm:$0xf] }
 0x371   :  { %2732 = vmatmul.bf16.gmra.mxu1 %v13595_v28  ;;  %3044 = vmatmul.bf16.gmra.mxu0 %v13596_v27  ;;  %v8166_v34 = vor.u32 %v9021_v16, %v8163_v56  ;;  %v9094_v40 = vld [vmem:[#allocation3 + $0x8c] sm:$0xf0]  ;;  %v13599_v56 = vld [vmem:[#allocation78_spill] sm:$0xff] }
 0x372   :  { %13594 = vst [vmem:[#allocation97_spill] sm:$0xff] %v10714_v39  ;;  %2861 = vmatmul.bf16.gmra.mxu2 %v10306_v10  ;;  %v2565_v39 = vadd.f32 %v10460_v26, %v13597_v62  ;;  %v8442_v7 = vor.u32 %v9094_v40, %v8441_v20  ;;  %v13604_v20 = vld [vmem:[#allocation82_spill] sm:$0xff] }
 0x373   :  { %3274 = vmatpush.bf16.msra.mxu2 %v8294_v53  ;;  %3145 = vmatpush.bf16.msra.mxu1 %v8166_v34  ;;  %v2567_v53 = vadd.f32 %v10489_v13, %v13599_v56  ;;  %v2570_v40 = vadd.f32 %v10498_v47, %v13604_v20  ;;  %v9049_v47 = vld [vmem:[%s13071_s5 + $0x12c] sm:$0xf] }
 0x374   :  { %3838 = vmatpush.bf16.msra.mxu3 %v8442_v7 }
 0x375   :  { %v2822_v32 = vpop.f32.mrf.mxu2 }
 0x376   :  { %v2823_v59 = vadd.f32 %v2822_v32, %v2693_v44  ;;  %v10733_v10 = vpop.f32.mrf.mxu3  ;;  %v10735_v55 = vpop.f32.mrf.mxu0 }
 0x377   :  { %v2695_v50 = vpop.f32.mrf.mxu1 }
 0x378   :  { %v10737_v31 = vpack.c.bf16 %v2823_v59, %v2565_v39  ;;  %v13602_v59 = vld [vmem:[#allocation80_spill] sm:$0xff]  ;;  %v13603_v39 = vld [vmem:[#allocation26_spill] sm:$0xff] }
 0x37a   :  { %13598 = vst [vmem:[#allocation24_spill] sm:$0xff] %v10737_v31 }
 0x37b   :  { %2945 = vmatmul.bf16.gmra.mxu3 %v13517_v45 }
 0x37d   :  { %v2824_v16 = vpop.f32.mrf.mxu2 }
 0x37e   :  { %v2825_v49 = vadd.f32 %v2824_v16, %v2695_v50  ;;  %v10742_v26 = vpop.f32.mrf.mxu3  ;;  %v10744_v44 = vpop.f32.mrf.mxu0 }
 0x37f   :  { %13600 = vst [vmem:[#allocation77_spill] sm:$0xff] %v10742_v26  ;;  %v2698_v32 = vpop.f32.mrf.mxu1 }
 0x380   :  { %v10746_v34 = vpack.c.bf16 %v2825_v49, %v2567_v53  ;;  %v9017_v49 = vld [vmem:[%s13071_s5 + $0x2c] sm:$0xf]  ;;  %v8147_v53 = vld [vmem:[%s13071_s5 + $0x38] sm:$0xf0] }
 0x381   :  { %2737 = vmatmul.bf16.gmra.mxu1 %v13602_v59  ;;  %3049 = vmatmul.bf16.gmra.mxu0 %v13603_v39 }
 0x382   :  { %13601 = vst [vmem:[#allocation78_spill] sm:$0xff] %v10746_v34  ;;  %2866 = vmatmul.bf16.gmra.mxu2 %v10337_v9 }
 0x385   :  { %v2827_v62 = vpop.f32.mrf.mxu2 }
 0x386   :  { %v2828_v13 = vadd.f32 %v2827_v62, %v2698_v32  ;;  %v10753_v50 = vpop.f32.mrf.mxu3  ;;  %v10755_v16 = vpop.f32.mrf.mxu0  ;;  %v8150_v32 = vor.u32 %v9017_v49, %v8147_v53  ;;  %v8275_v62 = vld [vmem:[%s13071_s5 + $0x138] sm:$0xf0] }
 0x387   :  { %13605 = vst [vmem:[#allocation26_spill] sm:$0xff] %v10753_v50  ;;  %v2700_v56 = vpop.f32.mrf.mxu1  ;;  %v13610_v49 = vld [vmem:[#allocation84_spill] sm:$0xff] }
 0x388   :  { %v10757_v7 = vpack.c.bf16 %v2828_v13, %v2570_v40  ;;  %v8278_v40 = vor.u32 %v9049_v47, %v8275_v62  ;;  %v13607_v13 = vld [vmem:[#allocation83_spill] sm:$0xff]  ;;  %3146 = vmatpush.bf16.msra.mxu1 %v8150_v32  ;;  %v13611_v53 = vld [vmem:[#allocation28_spill] sm:$0xff]  ;;  %v9013_v47 = vld [vmem:[%s13071_s5 + $0xc] sm:$0xf] }
 0x38a   :  { %13606 = vst [vmem:[#allocation82_spill] sm:$0xff] %v10757_v7  ;;  %v2572_v7 = vadd.f32 %v10521_v18, %v13607_v13  ;;  %3275 = vmatpush.bf16.msra.mxu2 %v8278_v40  ;;  %v8131_v18 = vld [vmem:[%s13071_s5 + $0x18] sm:$0xf0] }
 0x38b   :  { %2950 = vmatmul.bf16.gmra.mxu3 %v13524_v58 }
 0x38d   :  { %v2829_v20 = vpop.f32.mrf.mxu2 }
 0x38e   :  { %v2830_v34 = vadd.f32 %v2829_v20, %v2700_v56  ;;  %v10774_v31 = vpop.f32.mrf.mxu3  ;;  %v10776_v58 = vpop.f32.mrf.mxu0  ;;  %v9045_v56 = vld [vmem:[%s13071_s5 + $0x10c] sm:$0xf] }
 0x38f   :  { %13608 = vst [vmem:[#allocation83_spill] sm:$0xff] %v10774_v31  ;;  %v2703_v9 = vpop.f32.mrf.mxu1  ;;  %v13612_v20 = vld [vmem:[#allocation86_spill] sm:$0xff] }
 0x390   :  { %v10778_v50 = vpack.c.bf16 %v2830_v34, %v2572_v7  ;;  %v8134_v34 = vor.u32 %v9013_v47, %v8131_v18  ;;  %v8259_v7 = vld [vmem:[%s13071_s5 + $0x118] sm:$0xf0]  ;;  %v2575_v40 = vadd.f32 %v10542_v5, %v13612_v20  ;;  %v2580_v20 = vadd.f32 %v10568_v41, %v10410_v37 }
 0x391   :  { %2742 = vmatmul.bf16.gmra.mxu1 %v13610_v49  ;;  %3054 = vmatmul.bf16.gmra.mxu0 %v13611_v53  ;;  %v8262_v32 = vor.u32 %v9045_v56, %v8259_v7  ;;  %v13614_v18 = vld [vmem:[#allocation87_spill] sm:$0xff] }
 0x392   :  { %13609 = vst [vmem:[#allocation98_spill] sm:$0xff] %v10778_v50  ;;  %2871 = vmatmul.bf16.gmra.mxu2 %v10363_v4  ;;  %3147 = vmatpush.bf16.msra.mxu1 %v8134_v34  ;;  %v2577_v56 = vadd.f32 %v10559_v38, %v13614_v18  ;;  %v9090_v18 = vld [vmem:[#allocation3 + $0x6c] sm:$0xf0] }
 0x393   :  { %3276 = vmatpush.bf16.msra.mxu2 %v8262_v32 }
 0x395   :  { %v2832_v62 = vpop.f32.mrf.mxu2 }
 0x396   :  { %v2833_v13 = vadd.f32 %v2832_v62, %v2703_v9  ;;  %v10797_v50 = vpop.f32.mrf.mxu3  ;;  %v10801_v45 = vpop.f32.mrf.mxu0  ;;  %v13617_v9 = vld [vmem:[#allocation30_spill] sm:$0xff] }
 0x397   :  { %v2705_v31 = vpop.f32.mrf.mxu1 }
 0x398   :  { %v10799_v26 = vpack.c.bf16 %v2833_v13, %v2575_v40 }
 0x39a   :  { %13613 = vst [vmem:[#allocation28_spill] sm:$0xff] %v10799_v26  ;;  %v2582_v26 = vadd.f32 %v10591_v43, %v10421_v36 }
 0x39b   :  { %2955 = vmatmul.bf16.gmra.mxu3 %v13533_v25 }
 0x39d   :  { %v2834_v47 = vpop.f32.mrf.mxu2 }
 0x39e   :  { %v2835_v34 = vadd.f32 %v2834_v47, %v2705_v31  ;;  %v10806_v7 = vpop.f32.mrf.mxu3  ;;  %v10813_v5 = vpop.f32.mrf.mxu0  ;;  %v8425_v47 = vld [vmem:[#allocation3 + $0x60] sm:$0xf] }
 0x39f   :  { %13615 = vst [vmem:[#allocation86_spill] sm:$0xff] %v10806_v7  ;;  %v2708_v32 = vpop.f32.mrf.mxu1 }
 0x3a0   :  { %v10808_v4 = vpack.c.bf16 %v2835_v34, %v2577_v56  ;;  %v8426_v56 = vor.u32 %v9090_v18, %v8425_v47  ;;  %v2590_v18 = vadd.f32 %v10620_v1, %v10458_v6  ;;  %v13624_v6 = vld [vmem:[#allocation35_spill] sm:$0xff]  ;;  %v13625_v1 = vld [vmem:[#allocation17_spill] sm:$0xff] }
 0x3a1   :  { %2747 = vmatmul.bf16.gmra.mxu1 %v10403_v29  ;;  %3059 = vmatmul.bf16.gmra.mxu0 %v13617_v9 }
 0x3a2   :  { %13616 = vst [vmem:[#allocation87_spill] sm:$0xff] %v10808_v4  ;;  %2876 = vmatmul.bf16.gmra.mxu2 %v10405_v46  ;;  %3839 = vmatpush.bf16.msra.mxu3 %v8426_v56 }
 0x3a5   :  { %v2837_v62 = vpop.f32.mrf.mxu2 }
 0x3a6   :  { %v2838_v40 = vadd.f32 %v2837_v62, %v2708_v32  ;;  %v10817_v38 = vpop.f32.mrf.mxu3  ;;  %v10822_v34 = vpop.f32.mrf.mxu0  ;;  %v2585_v62 = vadd.f32 %v10600_v63, %v10438_v8 }
 0x3a7   :  { %v2710_v31 = vpop.f32.mrf.mxu1 }
 0x3a8   :  { %v10819_v13 = vpack.c.bf16 %v2838_v40, %v2580_v20 }
 0x3aa   :  { %13618 = vst [vmem:[#allocation30_spill] sm:$0xff] %v10819_v13 }
 0x3ab   :  { %2960 = vmatmul.bf16.gmra.mxu3 %v13542_v11 }
 0x3ad   :  { %v2839_v4 = vpop.f32.mrf.mxu2 }
 0x3ae   :  { %v2840_v46 = vadd.f32 %v2839_v4, %v2710_v31  ;;  %v10826_v7 = vpop.f32.mrf.mxu3  ;;  %v10837_v4 = vpop.f32.mrf.mxu0 }
 0x3af   :  { %v2713_v37 = vpop.f32.mrf.mxu1 }
 0x3b0   :  { %v10828_v41 = vpack.c.bf16 %v2840_v46, %v2582_v26 }
 0x3b1   :  { %3064 = vmatmul.bf16.gmra.mxu0 %v10012_v21  ;;  %3148 = vmatmul.bf16.vlgmr.msra.gmra.mxu1 %v9779_v22  ;;  %v2587_v22 = vadd.f32 %v10611_v12, %v10449_v61 }
 0x3b2   :  { %13619 = vst [vmem:[#allocation99_spill] sm:$0xff] %v10828_v41  ;;  %3277 = vmatmul.bf16.vlgmr.msra.gmra.mxu2 %v13553_v35 }
 0x3b5   :  { %v2842_v32 = vpop.f32.mrf.mxu2 }
 0x3b6   :  { %v2843_v20 = vadd.f32 %v2842_v32, %v2713_v37  ;;  %v10835_v40 = vpop.f32.mrf.mxu3  ;;  %v10848_v8 = vpop.f32.mrf.mxu0 }
 0x3b7   :  { %v2715_v36 = vpop.f32.mrf.mxu1 }
 0x3b8   :  { %v10839_v43 = vpack.c.bf16 %v2843_v20, %v2585_v62 }
 0x3ba   :  { %13620 = vst [vmem:[#allocation100_spill] sm:$0xff] %v10839_v43 }
 0x3bb   :  { %2965 = vmatmul.bf16.gmra.mxu3 %v13552_v24 }
 0x3bd   :  { %v2844_v46 = vpop.f32.mrf.mxu2 }
 0x3be   :  { %v2845_v26 = vadd.f32 %v2844_v46, %v2715_v36  ;;  %v10844_v35 = vpop.f32.mrf.mxu3  ;;  %v10859_v32 = vpop.f32.mrf.mxu0 }
 0x3bf   :  { %v2718_v31 = vpop.f32.mrf.mxu1 }
 0x3c0   :  { %v10846_v47 = vpack.c.bf16 %v2845_v26, %v2587_v22 }
 0x3c1   :  { %3069 = vmatmul.bf16.gmra.mxu0 %v10028_v51  ;;  %3153 = vmatmul.bf16.gmra.mxu1 %v13514_v42  ;;  %v2592_v42 = vadd.f32 %v10631_v52, %v10487_v48 }
 0x3c2   :  { %13621 = vst [vmem:[#allocation101_spill] sm:$0xff] %v10846_v47  ;;  %3282 = vmatmul.bf16.gmra.mxu2 %v13562_v23 }
 0x3c5   :  { %v2847_v63 = vpop.f32.mrf.mxu2 }
 0x3c6   :  { %v2848_v56 = vadd.f32 %v2847_v63, %v2718_v31  ;;  %v10855_v61 = vpop.f32.mrf.mxu3  ;;  %v10871_v22 = vpop.f32.mrf.mxu0  ;;  %v13626_v31 = vld [vmem:[#allocation36_spill] sm:$0xff] }
 0x3c7   :  { %v2720_v12 = vpop.f32.mrf.mxu1  ;;  %v13627_v63 = vld [vmem:[#allocation16_spill] sm:$0xff] }
 0x3c8   :  { %v10857_v37 = vpack.c.bf16 %v2848_v56, %v2590_v18  ;;  %v2595_v18 = vadd.f32 %v13627_v63, %v13626_v31  ;;  %v13632_v63 = vld [vmem:[#allocation39_spill] sm:$0xff] }
 0x3ca   :  { %13622 = vst [vmem:[#allocation102_spill] sm:$0xff] %v10857_v37  ;;  %v13630_v37 = vld [vmem:[#allocation58_spill] sm:$0xff] }
 0x3cb   :  { %2970 = vmatmul.bf16.gmra.mxu3 %v13561_v19 }
 0x3cd   :  { %v2849_v62 = vpop.f32.mrf.mxu2 }
 0x3ce   :  { %v2850_v20 = vadd.f32 %v2849_v62, %v2720_v12  ;;  %v10864_v23 = vpop.f32.mrf.mxu3  ;;  %v13629_v62 = vld [vmem:[#allocation59_spill] sm:$0xff]  ;;  %v10884_v31 = vpop.f32.mrf.mxu0 }
 0x3cf   :  { %v2723_v36 = vpop.f32.mrf.mxu1 }
 0x3d0   :  { %v10866_v46 = vpack.c.bf16 %v2850_v20, %v2592_v42  ;;  %v8409_v42 = vld [vmem:[#allocation3 + $0x40] sm:$0xf]  ;;  %v9086_v20 = vld [vmem:[#allocation3 + $0x4c] sm:$0xf0] }
 0x3d1   :  { %3074 = vmatmul.bf16.gmra.mxu0 %v13624_v6  ;;  %3158 = vmatmul.bf16.gmra.mxu1 %v13625_v1 }
 0x3d2   :  { %13623 = vst [vmem:[#allocation103_spill] sm:$0xff] %v10866_v46  ;;  %3287 = vmatmul.bf16.gmra.mxu2 %v13572_v0  ;;  %v8410_v46 = vor.u32 %v9086_v20, %v8409_v42  ;;  %v2597_v0 = vadd.f32 %v10663_v60, %v13630_v37  ;;  %v13634_v42 = vld [vmem:[#allocation41_spill] sm:$0xff] }
 0x3d3   :  { %v2600_v20 = vadd.f32 %v10672_v3, %v13634_v42  ;;  %v13639_v3 = vld [vmem:[#allocation43_spill] sm:$0xff] }
 0x3d4   :  { %3840 = vmatpush.bf16.msra.mxu3 %v8410_v46 }
 0x3d5   :  { %v2852_v26 = vpop.f32.mrf.mxu2 }
 0x3d6   :  { %v2853_v56 = vadd.f32 %v2852_v26, %v2723_v36  ;;  %v10875_v48 = vpop.f32.mrf.mxu3 }
 0x3d7   :  { %v2725_v52 = vpop.f32.mrf.mxu1 }
 0x3d8   :  { %v10877_v12 = vpack.c.bf16 %v2853_v56, %v2595_v18  ;;  %v13633_v18 = vld [vmem:[#allocation19_spill] sm:$0xff] }
 0x3da   :  { %13628 = vst [vmem:[#allocation35_spill] sm:$0xff] %v10877_v12 }
 0x3db   :  { %2975 = vmatmul.bf16.gmra.mxu3 %v13629_v62 }
 0x3dd   :  { %v2854_v1 = vpop.f32.mrf.mxu2 }
 0x3de   :  { %v2855_v47 = vadd.f32 %v2854_v1, %v2725_v52  ;;  %v10882_v43 = vpop.f32.mrf.mxu3  ;;  %v10897_v1 = vpop.f32.mrf.mxu0 }
 0x3df   :  { %v2728_v36 = vpop.f32.mrf.mxu1 }
 0x3e0   :  { %v10886_v26 = vpack.c.bf16 %v2855_v47, %v2597_v0  ;;  %v13636_v0 = vld [vmem:[#allocation42_spill] sm:$0xff] }
 0x3e1   :  { %3079 = vmatmul.bf16.gmra.mxu0 %v13632_v63  ;;  %3163 = vmatmul.bf16.gmra.mxu1 %v13633_v18  ;;  %v2602_v18 = vadd.f32 %v10683_v2, %v13636_v0 }
 0x3e2   :  { %13631 = vst [vmem:[#allocation17_spill] sm:$0xff] %v10886_v26  ;;  %3292 = vmatmul.bf16.gmra.mxu2 %v13580_v54 }
 0x3e5   :  { %v2857_v56 = vpop.f32.mrf.mxu2 }
 0x3e6   :  { %v2858_v60 = vadd.f32 %v2857_v56, %v2728_v36  ;;  %v10893_v37 = vpop.f32.mrf.mxu3  ;;  %v13640_v36 = vld [vmem:[#allocation21_spill] sm:$0xff]  ;;  %v10909_v56 = vpop.f32.mrf.mxu0 }
 0x3e7   :  { %v2730_v52 = vpop.f32.mrf.mxu1 }
 0x3e8   :  { %v10895_v46 = vpack.c.bf16 %v2858_v60, %v2600_v20  ;;  %v13641_v20 = vld [vmem:[#allocation45_spill] sm:$0xff] }
 0x3e9   :  { %v2605_v60 = vadd.f32 %v10692_v15, %v13641_v20  ;;  %v13647_v15 = vld [vmem:[#allocation47_spill] sm:$0xff] }
 0x3ea   :  { %13635 = vst [vmem:[#allocation36_spill] sm:$0xff] %v10895_v46  ;;  %v8756_v20 = vld [vmem:[#allocation5 + $0xf0] sm:$0xf] }
 0x3eb   :  { %2980 = vmatmul.bf16.gmra.mxu3 %v13579_v17 }
 0x3ed   :  { %v2859_v47 = vpop.f32.mrf.mxu2 }
 0x3ee   :  { %v2860_v26 = vadd.f32 %v2859_v47, %v2730_v52  ;;  %v10902_v54 = vpop.f32.mrf.mxu3 }
 0x3ef   :  { %13637 = vst [vmem:[#allocation16_spill] sm:$0xff] %v10902_v54  ;;  %v2733_v12 = vpop.f32.mrf.mxu1 }
 0x3f0   :  { %v10904_v41 = vpack.c.bf16 %v2860_v26, %v2602_v18  ;;  %v10918_v26 = vpop.f32.mrf.mxu0  ;;  %v13644_v18 = vld [vmem:[#allocation46_spill] sm:$0xff] }
 0x3f1   :  { %3084 = vmatmul.bf16.gmra.mxu0 %v13639_v3  ;;  %3168 = vmatmul.bf16.gmra.mxu1 %v13640_v36 }
 0x3f2   :  { %13638 = vst [vmem:[#allocation59_spill] sm:$0xff] %v10904_v41  ;;  %3297 = vmatmul.bf16.gmra.mxu2 %v13588_v14  ;;  %v2607_v14 = vadd.f32 %v10703_v30, %v13644_v18  ;;  %v13649_v18 = vld [vmem:[#allocation72_spill] sm:$0xff] }
 0x3f5   :  { %v2862_v42 = vpop.f32.mrf.mxu2 }
 0x3f6   :  { %v2863_v46 = vadd.f32 %v2862_v42, %v2733_v12  ;;  %v10913_v2 = vpop.f32.mrf.mxu3  ;;  %v13648_v12 = vld [vmem:[#allocation23_spill] sm:$0xff]  ;;  %v9203_v42 = vld [vmem:[#allocation5 + $0x1f4] sm:$0xf0] }
 0x3f7   :  { %13642 = vst [vmem:[#allocation58_spill] sm:$0xff] %v10913_v2  ;;  %v2735_v52 = vpop.f32.mrf.mxu1  ;;  %v9187_v2 = vld [vmem:[#allocation5 + $0x174] sm:$0xf0] }
 0x3f8   :  { %v10915_v47 = vpack.c.bf16 %v2863_v46, %v2605_v60  ;;  %v8884_v46 = vld [vmem:[#allocation5 + $0x1f0] sm:$0xf] }
 0x3f9   :  { %v8885_v60 = vor.u32 %v9203_v42, %v8884_v46  ;;  %v8393_v46 = vld [vmem:[#allocation3 + $0x20] sm:$0xf]  ;;  %v9082_v42 = vld [vmem:[#allocation3 + $0x2c] sm:$0xf0] }
 0x3fa   :  { %13643 = vst [vmem:[#allocation39_spill] sm:$0xff] %v10915_v47  ;;  %v9171_v47 = vld [vmem:[#allocation5 + $0xf4] sm:$0xf0] }
 0x3fb   :  { %2985 = vmatmul.bf16.gmra.mxu3 %v13587_v33  ;;  %v8820_v33 = vld [vmem:[#allocation5 + $0x170] sm:$0xf]  ;;  %v8757_v30 = vor.u32 %v9171_v47, %v8756_v20  ;;  %6431 = vmatpush.bf16.msrb.mxu2 %v8885_v60 }
 0x3fc   :  { %v9078_v47 = vld [vmem:[#allocation3 + $0xc] sm:$0xf0] }
 0x3fd   :  { %v2864_v0 = vpop.f32.mrf.mxu2  ;;  %6173 = vmatpush.bf16.msrb.mxu0 %v8757_v30 }
 0x3fe   :  { %v2865_v36 = vadd.f32 %v2864_v0, %v2735_v52  ;;  %v10922_v41 = vpop.f32.mrf.mxu3  ;;  %v8821_v52 = vor.u32 %v9187_v2, %v8820_v33  ;;  %v8394_v33 = vor.u32 %v9082_v42, %v8393_v46  ;;  %v8377_v2 = vld [vmem:[#allocation3] sm:$0xf]  ;;  %v13655_v46 = vld [vmem:[#allocation51_spill] sm:$0xff] }
 0x3ff   :  { %13645 = vst [vmem:[#allocation19_spill] sm:$0xff] %v10922_v41  ;;  %v2738_v13 = vpop.f32.mrf.mxu1  ;;  %v13656_v42 = vld [vmem:[#allocation25_spill] sm:$0xff] }
 0x400   :  { %v10924_v54 = vpack.c.bf16 %v2865_v36, %v2607_v14  ;;  %v2610_v14 = vadd.f32 %v10712_v57, %v13649_v18  ;;  %6302 = vmatpush.bf16.msrb.mxu1 %v8821_v52  ;;  %3841 = vmatpush.bf16.msra.mxu3 %v8394_v33  ;;  %v13652_v57 = vld [vmem:[#allocation74_spill] sm:$0xff]  ;;  %v8378_v52 = vor.u32 %v9078_v47, %v8377_v2  ;;  %v8617_v18 = vld [vmem:[#allocation3 + $0x1e0] sm:$0xf] }
 0x401   :  { %3089 = vmatmul.bf16.gmra.mxu0 %v13647_v15  ;;  %3173 = vmatmul.bf16.gmra.mxu1 %v13648_v12  ;;  %v13657_v47 = vld [vmem:[#allocation14_spill] sm:$0xff] }
 0x402   :  { %13646 = vst [vmem:[#allocation41_spill] sm:$0xff] %v10924_v54  ;;  %3302 = vmatmul.bf16.gmra.mxu2 %v13596_v27  ;;  %v10933_v27 = vpop.f32.mrf.mxu0 }
 0x404   :  { %3842 = vmatpush.bf16.msra.mxu3 %v8378_v52  ;;  %v9126_v52 = vld [vmem:[#allocation3 + $0x18c] sm:$0xf0] }
 0x405   :  { %v2867_v0 = vpop.f32.mrf.mxu2 }
 0x406   :  { %v2868_v36 = vadd.f32 %v2867_v0, %v2738_v13  ;;  %v10931_v54 = vpop.f32.mrf.mxu3  ;;  %v2612_v13 = vadd.f32 %v10735_v55, %v13652_v57  ;;  %v8601_v55 = vld [vmem:[#allocation3 + $0x1c0] sm:$0xf] }
 0x407   :  { %13650 = vst [vmem:[#allocation42_spill] sm:$0xff] %v10931_v54  ;;  %v2740_v12 = vpop.f32.mrf.mxu1 }
 0x408   :  { %v10935_v41 = vpack.c.bf16 %v2868_v36, %v2610_v14  ;;  %v9138_v14 = vld [vmem:[#allocation3 + $0x1ec] sm:$0xf0] }
 0x40a   :  { %13651 = vst [vmem:[#allocation43_spill] sm:$0xff] %v10935_v41  ;;  %v8618_v41 = vor.u32 %v9138_v14, %v8617_v18  ;;  %v10944_v54 = vpop.f32.mrf.mxu0  ;;  %v8585_v18 = vld [vmem:[#allocation3 + $0x1a0] sm:$0xf]  ;;  %v9130_v14 = vld [vmem:[#allocation3 + $0x1ac] sm:$0xf0] }
 0x40b   :  { %2990 = vmatmul.bf16.gmra.mxu3 %v13595_v28  ;;  %v8603_v28 = vld [vmem:[#allocation3 + $0x1d0] sm:$0xf0] }
 0x40c   :  { %3848 = vmatpush.bf16.msrb.mxu3 %v8618_v41 }
 0x40d   :  { %v2869_v20 = vpop.f32.mrf.mxu2 }
 0x40e   :  { %v2870_v60 = vadd.f32 %v2869_v20, %v2740_v12  ;;  %v10940_v30 = vpop.f32.mrf.mxu3  ;;  %v9134_v12 = vld [vmem:[#allocation3 + $0x1cc] sm:$0xf0]  ;;  %v2615_v20 = vadd.f32 %v10744_v44, %v13657_v47  ;;  %v13660_v44 = vld [vmem:[#allocation53_spill] sm:$0xff] }
 0x40f   :  { %13653 = vst [vmem:[#allocation21_spill] sm:$0xff] %v10940_v30  ;;  %v2743_v0 = vpop.f32.mrf.mxu1  ;;  %v8602_v33 = vor.u32 %v9134_v12, %v8601_v55  ;;  %v8553_v47 = vld [vmem:[#allocation3 + $0x160] sm:$0xf] }
 0x410   :  { %v10942_v36 = vpack.c.bf16 %v2870_v60, %v2612_v13 }
 0x411   :  { %3094 = vmatmul.bf16.gmra.mxu0 %v13655_v46  ;;  %3178 = vmatmul.bf16.gmra.mxu1 %v13656_v42  ;;  %v8586_v42 = vor.u32 %v9130_v14, %v8585_v18  ;;  %v13663_v14 = vld [vmem:[#allocation55_spill] sm:$0xff] }
 0x412   :  { %13654 = vst [vmem:[#allocation45_spill] sm:$0xff] %v10942_v36  ;;  %3307 = vmatmul.bf16.gmra.mxu2 %v13603_v39  ;;  %3849 = vmatpush.bf16.msrb.mxu3 %v8602_v33  ;;  %v8569_v39 = vld [vmem:[#allocation3 + $0x180] sm:$0xf]  ;;  %v10955_v30 = vpop.f32.mrf.mxu0 }
 0x413   :  { %v8570_v41 = vor.u32 %v9126_v52, %v8569_v39  ;;  %v9118_v39 = vld [vmem:[#allocation3 + $0x14c] sm:$0xf0] }
 0x415   :  { %v2872_v2 = vpop.f32.mrf.mxu2 }
 0x416   :  { %v2873_v57 = vadd.f32 %v2872_v2, %v2743_v0  ;;  %v10951_v13 = vpop.f32.mrf.mxu3  ;;  %3850 = vmatpush.bf16.msrb.mxu3 %v8586_v42  ;;  %v2617_v0 = vadd.f32 %v10755_v16, %v13660_v44  ;;  %v8537_v42 = vld [vmem:[#allocation3 + $0x140] sm:$0xf] }
 0x417   :  { %13658 = vst [vmem:[#allocation46_spill] sm:$0xff] %v10951_v13  ;;  %v2745_v60 = vpop.f32.mrf.mxu1  ;;  %v13664_v13 = vld [vmem:[#allocation27_spill] sm:$0xff]  ;;  %v8538_v16 = vor.u32 %v9118_v39, %v8537_v42  ;;  %v13668_v39 = vld [vmem:[#allocation57_spill] sm:$0xff] }
 0x418   :  { %v10953_v36 = vpack.c.bf16 %v2873_v57, %v2615_v20  ;;  %v9122_v20 = vld [vmem:[#allocation3 + $0x16c] sm:$0xf0] }
 0x419   :  { %v8554_v18 = vor.u32 %v9122_v20, %v8553_v47  ;;  %v8521_v47 = vld [vmem:[#allocation3 + $0x120] sm:$0xf]  ;;  %v9114_v20 = vld [vmem:[#allocation3 + $0x12c] sm:$0xf0] }
 0x41a   :  { %13659 = vst [vmem:[#allocation47_spill] sm:$0xff] %v10953_v36  ;;  %3851 = vmatpush.bf16.msrb.mxu3 %v8570_v41  ;;  %v9110_v36 = vld [vmem:[#allocation3 + $0x10c] sm:$0xf0] }
 0x41b   :  { %2995 = vmatmul.bf16.gmra.mxu3 %v13602_v59 }
 0x41d   :  { %v2874_v55 = vpop.f32.mrf.mxu2 }
 0x41e   :  { %v2875_v12 = vadd.f32 %v2874_v55, %v2745_v60  ;;  %v10960_v2 = vpop.f32.mrf.mxu3  ;;  %3852 = vmatpush.bf16.msrb.mxu3 %v8554_v18  ;;  %v10967_v60 = vpop.f32.mrf.mxu0  ;;  %v13665_v55 = vld [vmem:[#allocation54_spill] sm:$0xff] }
 0x41f   :  { %13661 = vst [vmem:[#allocation23_spill] sm:$0xff] %v10960_v2  ;;  %v2748_v33 = vpop.f32.mrf.mxu1  ;;  %v2620_v44 = vadd.f32 %v10776_v58, %v13665_v55  ;;  %v2622_v58 = vadd.f32 %v10801_v45, %v13668_v39  ;;  %v9169_v45 = vld [vmem:[#allocation5 + $0xe4] sm:$0xf0] }
 0x420   :  { %v10962_v57 = vpack.c.bf16 %v2875_v12, %v2617_v0 }
 0x421   :  { %3099 = vmatmul.bf16.gmra.mxu0 %v13663_v14  ;;  %3183 = vmatmul.bf16.gmra.mxu1 %v13664_v13  ;;  %v8505_v13 = vld [vmem:[#allocation3 + $0x100] sm:$0xf] }
 0x422   :  { %13662 = vst [vmem:[#allocation72_spill] sm:$0xff] %v10962_v57  ;;  %3312 = vmatmul.bf16.gmra.mxu2 %v13611_v53  ;;  %3853 = vmatpush.bf16.msrb.mxu3 %v8538_v16  ;;  %v8522_v53 = vor.u32 %v9114_v20, %v8521_v47  ;;  %v8506_v18 = vor.u32 %v9110_v36, %v8505_v13  ;;  %v13671_v16 = vld [vmem:[#allocation60_spill] sm:$0xff]  ;;  %v8876_v36 = vld [vmem:[#allocation5 + $0x1e0] sm:$0xf]  ;;  %v9201_v47 = vld [vmem:[#allocation5 + $0x1e4] sm:$0xf0] }
 0x423   :  { %v8748_v20 = vld [vmem:[#allocation5 + $0xe0] sm:$0xf] }
 0x424   :  { %v8812_v13 = vld [vmem:[#allocation5 + $0x160] sm:$0xf] }
 0x425   :  { %v2877_v52 = vpop.f32.mrf.mxu2 }
 0x426   :  { %v2878_v0 = vadd.f32 %v2877_v52, %v2748_v33  ;;  %v10971_v12 = vpop.f32.mrf.mxu3  ;;  %3854 = vmatpush.bf16.msrb.mxu3 %v8522_v53  ;;  %v10980_v55 = vpop.f32.mrf.mxu0  ;;  %v8877_v53 = vor.u32 %v9201_v47, %v8876_v36  ;;  %v13676_v47 = vld [vmem:[#allocation64_spill] sm:$0xff] }
 0x427   :  { %13666 = vst [vmem:[#allocation74_spill] sm:$0xff] %v10971_v12  ;;  %v2750_v41 = vpop.f32.mrf.mxu1 }
 0x428   :  { %v10973_v57 = vpack.c.bf16 %v2878_v0, %v2620_v44  ;;  %v13672_v0 = vld [vmem:[#allocation29_spill] sm:$0xff]  ;;  %6432 = vmatpush.bf16.msrb.mxu2 %v8877_v53 }
 0x42a   :  { %13667 = vst [vmem:[#allocation51_spill] sm:$0xff] %v10973_v57  ;;  %3855 = vmatpush.bf16.msrb.mxu3 %v8506_v18 }
 0x42b   :  { %3000 = vmatmul.bf16.gmra.mxu3 %v13610_v49 }
 0x42d   :  { %v2879_v42 = vpop.f32.mrf.mxu2 }
 0x42e   :  { %v2880_v33 = vadd.f32 %v2879_v42, %v2750_v41  ;;  %v10978_v52 = vpop.f32.mrf.mxu3  ;;  %v8749_v41 = vor.u32 %v9169_v45, %v8748_v20  ;;  %v9185_v42 = vld [vmem:[#allocation5 + $0x164] sm:$0xf0]  ;;  %v3023_v20 = vadd.f32 %v10822_v34, %v13676_v47 }
 0x42f   :  { %13669 = vst [vmem:[#allocation25_spill] sm:$0xff] %v10978_v52  ;;  %v3149_v12 = vpop.f32.mrf.mxu1  ;;  %v8813_v57 = vor.u32 %v9185_v42, %v8812_v13  ;;  %v10993_v52 = vpop.f32.mrf.mxu0  ;;  %v9104_v42 = vld [vmem:[#allocation3 + $0xe4] sm:$0xf] }
 0x430   :  { %v10982_v44 = vpack.c.bf16 %v2880_v33, %v2622_v58  ;;  %v13673_v58 = vld [vmem:[#allocation61_spill] sm:$0xff]  ;;  %6174 = vmatpush.bf16.msrb.mxu0 %v8749_v41  ;;  %v13680_v41 = vld [vmem:[#allocation31_spill] sm:$0xff] }
 0x431   :  { %3104 = vmatmul.bf16.gmra.mxu0 %v13671_v16  ;;  %3188 = vmatmul.bf16.gmra.mxu1 %v13672_v0  ;;  %v3021_v18 = vadd.f32 %v10813_v5, %v13673_v58  ;;  %v13681_v58 = vld [vmem:[#allocation66_spill] sm:$0xff] }
 0x432   :  { %13670 = vst [vmem:[#allocation14_spill] sm:$0xff] %v10982_v44  ;;  %3317 = vmatmul.bf16.gmra.mxu2 %v13617_v9  ;;  %6303 = vmatpush.bf16.msrb.mxu1 %v8813_v57  ;;  %v3026_v34 = vadd.f32 %v10837_v4, %v13681_v58  ;;  %v9096_v58 = vld [vmem:[#allocation3 + $0xa4] sm:$0xf] }
 0x435   :  { %v3278_v39 = vpop.f32.mrf.mxu2 }
 0x436   :  { %v10989_v33 = vpop.f32.mrf.mxu3  ;;  %v3279_v44 = vadd.f32 %v3278_v39, %v3149_v12  ;;  %v13679_v12 = vld [vmem:[#allocation65_spill] sm:$0xff]  ;;  %v8491_v39 = vld [vmem:[#allocation3 + $0xf0] sm:$0xf0] }
 0x437   :  { %13674 = vst [vmem:[#allocation53_spill] sm:$0xff] %v10989_v33  ;;  %v3151_v0 = vpop.f32.mrf.mxu1  ;;  %v11005_v57 = vpop.f32.mrf.mxu0  ;;  %v8475_v33 = vld [vmem:[#allocation3 + $0xd0] sm:$0xf0] }
 0x438   :  { %v10991_v9 = vpack.c.bf16 %v3279_v44, %v3021_v18 }
 0x43a   :  { %13675 = vst [vmem:[#allocation55_spill] sm:$0xff] %v10991_v9 }
 0x43b   :  { %3005 = vmatmul.bf16.gmra.mxu3 %v10403_v29 }
 0x43d   :  { %v3280_v36 = vpop.f32.mrf.mxu2 }
 0x43e   :  { %v10998_v53 = vpop.f32.mrf.mxu3  ;;  %v3281_v45 = vadd.f32 %v3280_v36, %v3151_v0 }
 0x43f   :  { %13677 = vst [vmem:[#allocation27_spill] sm:$0xff] %v10998_v53  ;;  %v3154_v5 = vpop.f32.mrf.mxu1  ;;  %v11018_v9 = vpop.f32.mrf.mxu0 }
 0x440   :  { %v11000_v13 = vpack.c.bf16 %v3281_v45, %v3023_v20  ;;  %v8494_v20 = vor.u32 %v9104_v42, %v8491_v39  ;;  %v13684_v45 = vld [vmem:[#allocation93_spill] sm:$0xff] }
 0x441   :  { %3109 = vmatmul.bf16.gmra.mxu0 %v13679_v12  ;;  %3193 = vmatmul.bf16.gmra.mxu1 %v13680_v41  ;;  %v11015_v41 = vpack.c.b16 %v13684_v45, %v13684_v45 }
 0x442   :  { %13678 = vst [vmem:[#allocation54_spill] sm:$0xff] %v11000_v13  ;;  %3322 = vmatmul.bf16.gmra.mxu2 %v10012_v21  ;;  %v9100_v21 = vld [vmem:[#allocation3 + $0xc4] sm:$0xf] }
 0x443   :  { %v8478_v13 = vor.u32 %v9100_v21, %v8475_v33  ;;  %v9092_v33 = vld [vmem:[#allocation3 + $0x84] sm:$0xf]  ;;  %v8443_v21 = vld [vmem:[#allocation3 + $0x90] sm:$0xf0] }
 0x444   :  { %v8446_v53 = vor.u32 %v9092_v33, %v8443_v21  ;;  %v8411_v33 = vld [vmem:[#allocation3 + $0x50] sm:$0xf0]  ;;  %v9080_v21 = vld [vmem:[#allocation3 + $0x24] sm:$0xf] }
 0x445   :  { %v3283_v44 = vpop.f32.mrf.mxu2 }
 0x446   :  { %v11009_v18 = vpop.f32.mrf.mxu3  ;;  %v3284_v0 = vadd.f32 %v3283_v44, %v3154_v5  ;;  %v13685_v5 = vld [vmem:[#allocation22_spill] sm:$0xff] }
 0x447   :  { %13682 = vst [vmem:[#allocation57_spill] sm:$0xff] %v11009_v18  ;;  %v3156_v36 = vpop.f32.mrf.mxu1  ;;  %v8459_v18 = vld [vmem:[#allocation3 + $0xb0] sm:$0xf0]  ;;  %v3028_v44 = vadd.f32 %v10848_v8, %v13685_v5  ;;  %v9088_v8 = vld [vmem:[#allocation3 + $0x64] sm:$0xf] }
 0x448   :  { %v11011_v47 = vpack.c.bf16 %v3284_v0, %v3026_v34  ;;  %v8462_v45 = vor.u32 %v9096_v58, %v8459_v18  ;;  %v8427_v5 = vld [vmem:[#allocation3 + $0x70] sm:$0xf0]  ;;  %v11033_v18 = vpop.f32.mrf.mxu0 }
 0x44a   :  { %13683 = vst [vmem:[#allocation60_spill] sm:$0xff] %v11011_v47  ;;  %v13688_v47 = vld [vmem:[#allocation70_spill] sm:$0xff] }
 0x44b   :  { %3843 = vmatmul.bf16.vlgmr.msra.gmra.mxu3 %v11015_v41 }
 0x44c   :  { %3861 = vmatpush.bf16.msra.mxu3 %v8494_v20  ;;  %v13689_v20 = vld [vmem:[#allocation32_spill] sm:$0xff] }
 0x44d   :  { %v3285_v4 = vpop.f32.mrf.mxu2 }
 0x44e   :  { %v11022_v34 = vpop.f32.mrf.mxu3  ;;  %v3286_v42 = vadd.f32 %v3285_v4, %v3156_v36 }
 0x44f   :  { %13686 = vst [vmem:[#allocation29_spill] sm:$0xff] %v11022_v34  ;;  %v3159_v39 = vpop.f32.mrf.mxu1  ;;  %v13690_v34 = vld [vmem:[#allocation73_spill] sm:$0xff] }
 0x450   :  { %v11024_v0 = vpack.c.bf16 %v3286_v42, %v3028_v44  ;;  %3862 = vmatpush.bf16.msra.mxu3 %v8478_v13  ;;  %v3031_v36 = vadd.f32 %v10859_v32, %v13690_v34  ;;  %v8430_v42 = vor.u32 %v9088_v8, %v8427_v5 }
 0x451   :  { %3114 = vmatmul.bf16.gmra.mxu0 %v13688_v47  ;;  %3198 = vmatmul.bf16.gmra.mxu1 %v13689_v20  ;;  %v13693_v20 = vld [vmem:[#allocation94_spill] sm:$0xff] }
 0x452   :  { %13687 = vst [vmem:[#allocation61_spill] sm:$0xff] %v11024_v0  ;;  %3327 = vmatmul.bf16.gmra.mxu2 %v10028_v51  ;;  %v11039_v51 = vpack.c.b16 %v13693_v20, %v13693_v20  ;;  %v9076_v20 = vld [vmem:[#allocation3 + $0x4] sm:$0xf]  ;;  %v8619_v0 = vld [vmem:[#allocation3 + $0x1f0] sm:$0xf0] }
 0x454   :  { %3863 = vmatpush.bf16.msra.mxu3 %v8462_v45  ;;  %v9084_v45 = vld [vmem:[#allocation3 + $0x44] sm:$0xf] }
 0x455   :  { %v3288_v29 = vpop.f32.mrf.mxu2  ;;  %v8414_v32 = vor.u32 %v9084_v45, %v8411_v33  ;;  %v8379_v45 = vld [vmem:[#allocation3 + $0x10] sm:$0xf0]  ;;  %v9136_v33 = vld [vmem:[#allocation3 + $0x1e4] sm:$0xf] }
 0x456   :  { %v11031_v4 = vpop.f32.mrf.mxu3  ;;  %v3289_v13 = vadd.f32 %v3288_v29, %v3159_v39  ;;  %v8395_v29 = vld [vmem:[#allocation3 + $0x30] sm:$0xf0]  ;;  %v3033_v39 = vadd.f32 %v10871_v22, %v10733_v10  ;;  %v8868_v10 = vld [vmem:[#allocation5 + $0x1d0] sm:$0xf]  ;;  %v9199_v22 = vld [vmem:[#allocation5 + $0x1d4] sm:$0xf0]  ;;  %v8622_v49 = vor.u32 %v9136_v33, %v8619_v0 }
 0x457   :  { %13691 = vst [vmem:[#allocation64_spill] sm:$0xff] %v11031_v4  ;;  %v3161_v58 = vpop.f32.mrf.mxu1  ;;  %v11048_v4 = vpop.f32.mrf.mxu0 }
 0x458   :  { %v11035_v44 = vpack.c.bf16 %v3289_v13, %v3031_v36  ;;  %3864 = vmatpush.bf16.msra.mxu3 %v8446_v53  ;;  %v8398_v13 = vor.u32 %v9080_v21, %v8395_v29  ;;  %v8382_v21 = vor.u32 %v9076_v20, %v8379_v45  ;;  %v9128_v20 = vld [vmem:[#allocation3 + $0x1a4] sm:$0xf]  ;;  %v8587_v45 = vld [vmem:[#allocation3 + $0x1b0] sm:$0xf0] }
 0x459   :  { %v8590_v33 = vor.u32 %v9128_v20, %v8587_v45  ;;  %v9116_v45 = vld [vmem:[#allocation3 + $0x144] sm:$0xf] }
 0x45a   :  { %13692 = vst [vmem:[#allocation65_spill] sm:$0xff] %v11035_v44  ;;  %v13696_v44 = vld [vmem:[#allocation76_spill] sm:$0xff] }
 0x45b   :  { %3856 = vmatmul.bf16.vlgmr.msrb.gmra.mxu3 %v11039_v51 }
 0x45c   :  { %3865 = vmatpush.bf16.msra.mxu3 %v8430_v42  ;;  %v13697_v42 = vld [vmem:[#allocation34_spill] sm:$0xff] }
 0x45d   :  { %v3290_v34 = vpop.f32.mrf.mxu2 }
 0x45e   :  { %v11044_v36 = vpop.f32.mrf.mxu3  ;;  %v3291_v53 = vadd.f32 %v3290_v34, %v3161_v58  ;;  %v8740_v58 = vld [vmem:[#allocation5 + $0xd0] sm:$0xf]  ;;  %v8869_v34 = vor.u32 %v9199_v22, %v8868_v10 }
 0x45f   :  { %13694 = vst [vmem:[#allocation31_spill] sm:$0xff] %v11044_v36  ;;  %v3164_v8 = vpop.f32.mrf.mxu1  ;;  %v11059_v0 = vpop.f32.mrf.mxu0 }
 0x460   :  { %v11046_v5 = vpack.c.bf16 %v3291_v53, %v3033_v39  ;;  %3866 = vmatpush.bf16.msra.mxu3 %v8414_v32  ;;  %v9167_v39 = vld [vmem:[#allocation5 + $0xd4] sm:$0xf0]  ;;  %v8804_v53 = vld [vmem:[#allocation5 + $0x150] sm:$0xf]  ;;  %6433 = vmatpush.bf16.msrb.mxu2 %v8869_v34  ;;  %v8571_v34 = vld [vmem:[#allocation3 + $0x190] sm:$0xf0] }
 0x461   :  { %3119 = vmatmul.bf16.gmra.mxu0 %v13696_v44  ;;  %3203 = vmatmul.bf16.gmra.mxu1 %v13697_v42  ;;  %v9183_v32 = vld [vmem:[#allocation5 + $0x154] sm:$0xf0]  ;;  %v8741_v29 = vor.u32 %v9167_v39, %v8740_v58  ;;  %v13698_v42 = vld [vmem:[#allocation77_spill] sm:$0xff]  ;;  %v9132_v44 = vld [vmem:[#allocation3 + $0x1c4] sm:$0xf] }
 0x462   :  { %13695 = vst [vmem:[#allocation66_spill] sm:$0xff] %v11046_v5  ;;  %3332 = vmatmul.bf16.gmra.mxu2 %v13624_v6  ;;  %v8805_v5 = vor.u32 %v9183_v32, %v8804_v53  ;;  %v3036_v2 = vadd.f32 %v10884_v31, %v13698_v42  ;;  %v13702_v53 = vld [vmem:[#allocation38_spill] sm:$0xff] }
 0x463   :  { %6175 = vmatpush.bf16.msrb.mxu0 %v8741_v29  ;;  %v9120_v32 = vld [vmem:[#allocation3 + $0x164] sm:$0xf] }
 0x464   :  { %3867 = vmatpush.bf16.msra.mxu3 %v8398_v13  ;;  %6304 = vmatpush.bf16.msrb.mxu1 %v8805_v5  ;;  %v8606_v13 = vor.u32 %v9132_v44, %v8603_v28  ;;  %v13701_v28 = vld [vmem:[#allocation81_spill] sm:$0xff] }
 0x465   :  { %v3293_v36 = vpop.f32.mrf.mxu2 }
 0x466   :  { %v11055_v59 = vpop.f32.mrf.mxu3  ;;  %v3294_v6 = vadd.f32 %v3293_v36, %v3164_v8  ;;  %v13700_v36 = vld [vmem:[#allocation26_spill] sm:$0xff] }
 0x467   :  { %13699 = vst [vmem:[#allocation93_spill] sm:$0xff] %v11055_v59  ;;  %v3166_v10 = vpop.f32.mrf.mxu1  ;;  %v3038_v8 = vadd.f32 %v10897_v1, %v13700_v36  ;;  %v11071_v29 = vpop.f32.mrf.mxu0  ;;  %v9083_v59 = vld [vmem:[#allocation3 + $0x34] sm:$0xf0] }
 0x468   :  { %v11057_v22 = vpack.c.bf16 %v3294_v6, %v3036_v2  ;;  %3868 = vmatpush.bf16.msra.mxu3 %v8382_v21  ;;  %v9124_v2 = vld [vmem:[#allocation3 + $0x184] sm:$0xf]  ;;  %v8555_v21 = vld [vmem:[#allocation3 + $0x170] sm:$0xf0]  ;;  %v13703_v6 = vld [vmem:[#allocation83_spill] sm:$0xff] }
 0x469   :  { %v8574_v44 = vor.u32 %v9124_v2, %v8571_v34  ;;  %v8558_v42 = vor.u32 %v9120_v32, %v8555_v21  ;;  %v9108_v32 = vld [vmem:[#allocation3 + $0x104] sm:$0xf] }
 0x46b   :  { %3869 = vmatmul.bf16.vlgmr.msra.gmra.mxu3 %v11015_v41 }
 0x46c   :  { %3874 = vmatpush.bf16.msrb.mxu3 %v8622_v49 }
 0x46d   :  { %v3295_v31 = vpop.f32.mrf.mxu2 }
 0x46e   :  { %v11064_v58 = vpop.f32.mrf.mxu3  ;;  %v3296_v5 = vadd.f32 %v3295_v31, %v3166_v10  ;;  %v3041_v10 = vadd.f32 %v10909_v56, %v13703_v6  ;;  %v8539_v31 = vld [vmem:[#allocation3 + $0x150] sm:$0xf0]  ;;  %v8497_v6 = vld [vmem:[#allocation3 + $0xe8] sm:$0xf] }
 0x46f   :  { %v3169_v39 = vpop.f32.mrf.mxu1  ;;  %v11083_v21 = vpop.f32.mrf.mxu0 }
 0x470   :  { %3875 = vmatpush.bf16.msrb.mxu3 %v8606_v13  ;;  %v11066_v49 = vpack.c.bf16 %v3296_v5, %v3038_v8  ;;  %v9112_v8 = vld [vmem:[#allocation3 + $0x124] sm:$0xf]  ;;  %v8523_v5 = vld [vmem:[#allocation3 + $0x130] sm:$0xf0] }
 0x471   :  { %3124 = vmatmul.bf16.gmra.mxu0 %v13701_v28  ;;  %3208 = vmatmul.bf16.gmra.mxu1 %v13702_v53  ;;  %v8526_v34 = vor.u32 %v9112_v8, %v8523_v5 }
 0x472   :  { %3337 = vmatmul.bf16.gmra.mxu2 %v13632_v63  ;;  %v8542_v63 = vor.u32 %v9116_v45, %v8539_v31  ;;  %v9103_v31 = vld [vmem:[#allocation3 + $0xd4] sm:$0xf0] }
 0x474   :  { %3876 = vmatpush.bf16.msrb.mxu3 %v8590_v33 }
 0x475   :  { %v3298_v1 = vpop.f32.mrf.mxu2 }
 0x476   :  { %v11075_v13 = vpop.f32.mrf.mxu3  ;;  %v3299_v20 = vadd.f32 %v3298_v1, %v3169_v39  ;;  %v8507_v39 = vld [vmem:[#allocation3 + $0x110] sm:$0xf0] }
 0x477   :  { %13704 = vst [vmem:[#allocation22_spill] sm:$0xff] %v11075_v13  ;;  %v3171_v33 = vpop.f32.mrf.mxu1  ;;  %v8510_v45 = vor.u32 %v9108_v32, %v8507_v39  ;;  %v9099_v32 = vld [vmem:[#allocation3 + $0xb4] sm:$0xf0]  ;;  %v8401_v13 = vld [vmem:[#allocation3 + $0x28] sm:$0xf] }
 0x478   :  { %3877 = vmatpush.bf16.msrb.mxu3 %v8574_v44  ;;  %v11077_v36 = vpack.c.bf16 %v3299_v20, %v3041_v10  ;;  %v3043_v44 = vadd.f32 %v10918_v26, %v10797_v50  ;;  %v9107_v10 = vld [vmem:[#allocation3 + $0xf4] sm:$0xf0]  ;;  %v13705_v20 = vld [vmem:[#allocation85_spill] sm:$0xff]  ;;  %v8481_v26 = vld [vmem:[#allocation3 + $0xc8] sm:$0xf] }
 0x479   :  { %v8498_v50 = vor.u32 %v9107_v10, %v8497_v6  ;;  %v8449_v6 = vld [vmem:[#allocation3 + $0x88] sm:$0xf]  ;;  %v9095_v10 = vld [vmem:[#allocation3 + $0x94] sm:$0xf0] }
 0x47c   :  { %3878 = vmatpush.bf16.msrb.mxu3 %v8558_v42 }
 0x47d   :  { %v3300_v2 = vpop.f32.mrf.mxu2 }
 0x47e   :  { %v11081_v53 = vpop.f32.mrf.mxu3  ;;  %v3301_v56 = vadd.f32 %v3300_v2, %v3171_v33 }
 0x47f   :  { %v3174_v1 = vpop.f32.mrf.mxu1 }
 0x480   :  { %3879 = vmatpush.bf16.msrb.mxu3 %v8542_v63  ;;  %v11085_v42 = vpack.c.bf16 %v3301_v56, %v3043_v44  ;;  %v13706_v63 = vld [vmem:[#allocation86_spill] sm:$0xff] }
 0x481   :  { %3129 = vmatmul.bf16.gmra.mxu0 %v13705_v20  ;;  %3213 = vmatmul.bf16.gmra.mxu1 %v13533_v25  ;;  %v3046_v8 = vadd.f32 %v10933_v27, %v13706_v63  ;;  %v8465_v56 = vld [vmem:[#allocation3 + $0xa8] sm:$0xf]  ;;  %v11097_v25 = vpop.f32.mrf.mxu0  ;;  %v3048_v27 = vadd.f32 %v10944_v54, %v10817_v38  ;;  %v9091_v63 = vld [vmem:[#allocation3 + $0x74] sm:$0xf0] }
 0x482   :  { %3342 = vmatmul.bf16.gmra.mxu2 %v13639_v3  ;;  %v8466_v3 = vor.u32 %v9099_v32, %v8465_v56  ;;  %v8860_v56 = vld [vmem:[#allocation5 + $0x1c0] sm:$0xf]  ;;  %v9197_v32 = vld [vmem:[#allocation5 + $0x1c4] sm:$0xf0] }
 0x483   :  { %v8417_v54 = vld [vmem:[#allocation3 + $0x48] sm:$0xf] }
 0x484   :  { %3880 = vmatpush.bf16.msrb.mxu3 %v8526_v34  ;;  %v8482_v34 = vor.u32 %v9103_v31, %v8481_v26  ;;  %v8450_v26 = vor.u32 %v9095_v10, %v8449_v6  ;;  %v9165_v6 = vld [vmem:[#allocation5 + $0xc4] sm:$0xf0] }
 0x485   :  { %v3303_v33 = vpop.f32.mrf.mxu2 }
 0x486   :  { %v11092_v5 = vpop.f32.mrf.mxu3  ;;  %v3304_v2 = vadd.f32 %v3303_v33, %v3174_v1  ;;  %v8433_v33 = vld [vmem:[#allocation3 + $0x68] sm:$0xf] }
 0x487   :  { %13707 = vst [vmem:[#allocation70_spill] sm:$0xff] %v11092_v5  ;;  %v3176_v44 = vpop.f32.mrf.mxu1  ;;  %v8732_v5 = vld [vmem:[#allocation5 + $0xc0] sm:$0xf] }
 0x488   :  { %3881 = vmatpush.bf16.msrb.mxu3 %v8510_v45  ;;  %v11094_v39 = vpack.c.bf16 %v3304_v2, %v3046_v8  ;;  %v13709_v2 = vld [vmem:[#allocation90_spill] sm:$0xff]  ;;  %v8733_v10 = vor.u32 %v9165_v6, %v8732_v5  ;;  %v8402_v5 = vor.u32 %v9083_v59, %v8401_v13  ;;  %v9135_v13 = vld [vmem:[#allocation3 + $0x1d4] sm:$0xf0] }
 0x489   :  { %v11107_v38 = vpop.f32.mrf.mxu0  ;;  %v8625_v6 = vld [vmem:[#allocation3 + $0x1e8] sm:$0xf] }
 0x48a   :  { %6176 = vmatpush.bf16.msrb.mxu0 %v8733_v10  ;;  %v8609_v59 = vld [vmem:[#allocation3 + $0x1c8] sm:$0xf] }
 0x48b   :  { %3882 = vmatmul.bf16.vlgmr.msrb.gmra.mxu3 %v11039_v51 }
 0x48c   :  { %3887 = vmatpush.bf16.msra.mxu3 %v8498_v50 }
 0x48d   :  { %v3305_v45 = vpop.f32.mrf.mxu2 }
 0x48e   :  { %v11101_v1 = vpop.f32.mrf.mxu3  ;;  %v3306_v50 = vadd.f32 %v3305_v45, %v3176_v44  ;;  %v9087_v44 = vld [vmem:[#allocation3 + $0x54] sm:$0xf0]  ;;  %v8796_v45 = vld [vmem:[#allocation5 + $0x140] sm:$0xf] }
 0x48f   :  { %13708 = vst [vmem:[#allocation32_spill] sm:$0xff] %v11101_v1  ;;  %v3179_v31 = vpop.f32.mrf.mxu1  ;;  %v8418_v1 = vor.u32 %v9087_v44, %v8417_v54 }
 0x490   :  { %3888 = vmatpush.bf16.msra.mxu3 %v8482_v34  ;;  %v11103_v8 = vpack.c.bf16 %v3306_v50, %v3048_v27  ;;  %v8434_v34 = vor.u32 %v9091_v63, %v8433_v33  ;;  %v9181_v27 = vld [vmem:[#allocation5 + $0x144] sm:$0xf0] }
 0x491   :  { %3134 = vmatmul.bf16.gmra.mxu0 %v13709_v2  ;;  %3218 = vmatmul.bf16.gmra.mxu1 %v13542_v11  ;;  %v3051_v11 = vadd.f32 %v10955_v30, %v10826_v7  ;;  %v3053_v30 = vadd.f32 %v10967_v60, %v10835_v40  ;;  %v9131_v40 = vld [vmem:[#allocation3 + $0x1b4] sm:$0xf0] }
 0x492   :  { %3347 = vmatmul.bf16.gmra.mxu2 %v13647_v15 }
 0x494   :  { %3889 = vmatpush.bf16.msra.mxu3 %v8466_v3  ;;  %v8861_v3 = vor.u32 %v9197_v32, %v8860_v56  ;;  %v8385_v32 = vld [vmem:[#allocation3 + $0x8] sm:$0xf] }
 0x495   :  { %v3308_v50 = vpop.f32.mrf.mxu2 }
 0x496   :  { %6434 = vmatpush.bf16.msrb.mxu2 %v8861_v3  ;;  %v11112_v33 = vpop.f32.mrf.mxu3  ;;  %v3309_v63 = vadd.f32 %v3308_v50, %v3179_v31  ;;  %v9079_v3 = vld [vmem:[#allocation3 + $0x14] sm:$0xf0] }
 0x497   :  { %v3181_v15 = vpop.f32.mrf.mxu1  ;;  %v8386_v54 = vor.u32 %v9079_v3, %v8385_v32 }
 0x498   :  { %3890 = vmatpush.bf16.msra.mxu3 %v8450_v26  ;;  %v8797_v26 = vor.u32 %v9181_v27, %v8796_v45  ;;  %v11114_v56 = vpack.c.bf16 %v3309_v63, %v3051_v11  ;;  %v9139_v45 = vld [vmem:[#allocation3 + $0x1f4] sm:$0xf0]  ;;  %v11116_v27 = vpop.f32.mrf.mxu0  ;;  %v3056_v11 = vadd.f32 %v10980_v55, %v10844_v35  ;;  %v3058_v35 = vadd.f32 %v10993_v52, %v10855_v61 }
 0x499   :  { %v8626_v10 = vor.u32 %v9139_v45, %v8625_v6  ;;  %v9127_v6 = vld [vmem:[#allocation3 + $0x194] sm:$0xf0] }
 0x49a   :  { %6305 = vmatpush.bf16.msrb.mxu1 %v8797_v26  ;;  %v8593_v26 = vld [vmem:[#allocation3 + $0x1a8] sm:$0xf]  ;;  %v9115_v61 = vld [vmem:[#allocation3 + $0x134] sm:$0xf0] }
 0x49c   :  { %3891 = vmatpush.bf16.msra.mxu3 %v8434_v34 }
 0x49d   :  { %v3310_v7 = vpop.f32.mrf.mxu2 }
 0x49e   :  { %v11120_v31 = vpop.f32.mrf.mxu3  ;;  %v3311_v34 = vadd.f32 %v3310_v7, %v3181_v15  ;;  %v8561_v7 = vld [vmem:[#allocation3 + $0x168] sm:$0xf] }
 0x49f   :  { %v3184_v44 = vpop.f32.mrf.mxu1 }
 0x4a0   :  { %3892 = vmatpush.bf16.msra.mxu3 %v8418_v1  ;;  %v11122_v50 = vpack.c.bf16 %v3311_v34, %v3053_v30  ;;  %v8610_v1 = vor.u32 %v9135_v13, %v8609_v59  ;;  %v9123_v30 = vld [vmem:[#allocation3 + $0x174] sm:$0xf0]  ;;  %v8545_v13 = vld [vmem:[#allocation3 + $0x148] sm:$0xf] }
 0x4a1   :  { %3223 = vmatmul.bf16.gmra.mxu1 %v13552_v24  ;;  %v8594_v24 = vor.u32 %v9131_v40, %v8593_v26 }
 0x4a2   :  { %3352 = vmatmul.bf16.gmra.mxu2 %v13655_v46  ;;  %v8577_v46 = vld [vmem:[#allocation3 + $0x188] sm:$0xf] }
 0x4a3   :  { %v8578_v45 = vor.u32 %v9127_v6, %v8577_v46 }
 0x4a4   :  { %3893 = vmatpush.bf16.msra.mxu3 %v8402_v5  ;;  %v11131_v5 = vpop.f32.mrf.mxu0 }
 0x4a5   :  { %v3313_v60 = vpop.f32.mrf.mxu2 }
 0x4a6   :  { %v11129_v63 = vpop.f32.mrf.mxu3  ;;  %v3314_v15 = vadd.f32 %v3313_v60, %v3184_v44  ;;  %v8529_v60 = vld [vmem:[#allocation3 + $0x128] sm:$0xf] }
 0x4a7   :  { %13710 = vst [vmem:[#allocation73_spill] sm:$0xff] %v11129_v63  ;;  %v3186_v32 = vpop.f32.mrf.mxu1  ;;  %v8530_v46 = vor.u32 %v9115_v61, %v8529_v60  ;;  %v9097_v61 = vld [vmem:[#allocation3 + $0xac] sm:$0xf] }
 0x4a8   :  { %3894 = vmatpush.bf16.msra.mxu3 %v8386_v54  ;;  %v11133_v3 = vpack.c.bf16 %v3314_v15, %v3056_v11  ;;  %v3061_v11 = vadd.f32 %v11005_v57, %v10864_v23  ;;  %v8483_v23 = vld [vmem:[#allocation3 + $0xd8] sm:$0xf0]  ;;  %v3063_v57 = vadd.f32 %v11018_v9, %v10875_v48  ;;  %v9163_v9 = vld [vmem:[#allocation5 + $0xb4] sm:$0xf0] }
 0x4aa   :  { %13711 = vst [vmem:[#allocation94_spill] sm:$0xff] %v11133_v3  ;;  %v13822_v3 = vld [vmem:[#allocation22_spill] sm:$0xff] }
 0x4ab   :  { %3895 = vmatmul.bf16.vlgmr.msra.gmra.mxu3 %v11015_v41 }
 0x4ac   :  { %3900 = vmatpush.bf16.msrb.mxu3 %v8626_v10  ;;  %v8562_v10 = vor.u32 %v9123_v30, %v8561_v7  ;;  %v11141_v26 = vpop.f32.mrf.mxu0  ;;  %v9105_v7 = vld [vmem:[#allocation3 + $0xec] sm:$0xf]  ;;  %v8499_v30 = vld [vmem:[#allocation3 + $0xf8] sm:$0xf0] }
 0x4ad   :  { %v3315_v34 = vpop.f32.mrf.mxu2 }
 0x4ae   :  { %v11137_v55 = vpop.f32.mrf.mxu3  ;;  %v3316_v54 = vadd.f32 %v3315_v34, %v3186_v32 }
 0x4af   :  { %13712 = vst [vmem:[#allocation34_spill] sm:$0xff] %v11137_v55  ;;  %v3189_v44 = vpop.f32.mrf.mxu1 }
 0x4b0   :  { %3901 = vmatpush.bf16.msrb.mxu3 %v8610_v1  ;;  %v11139_v59 = vpack.c.bf16 %v3316_v54, %v3058_v35  ;;  %v9119_v1 = vld [vmem:[#allocation3 + $0x154] sm:$0xf0]  ;;  %v8502_v35 = vor.u32 %v9105_v7, %v8499_v30 }
 0x4b1   :  { %3228 = vmatmul.bf16.gmra.mxu1 %v13561_v19  ;;  %v8546_v40 = vor.u32 %v9119_v1, %v8545_v13  ;;  %v9111_v19 = vld [vmem:[#allocation3 + $0x114] sm:$0xf0] }
 0x4b2   :  { %13713 = vst [vmem:[#allocation77_spill] sm:$0xff] %v11139_v59  ;;  %3357 = vmatmul.bf16.gmra.mxu2 %v13663_v14 }
 0x4b4   :  { %3902 = vmatpush.bf16.msrb.mxu3 %v8594_v24  ;;  %v11151_v14 = vpop.f32.mrf.mxu0 }
 0x4b5   :  { %v3318_v52 = vpop.f32.mrf.mxu2 }
 0x4b6   :  { %v11147_v15 = vpop.f32.mrf.mxu3  ;;  %v3319_v32 = vadd.f32 %v3318_v52, %v3189_v44  ;;  %v8467_v52 = vld [vmem:[#allocation3 + $0xb8] sm:$0xf0] }
 0x4b7   :  { %13714 = vst [vmem:[#allocation26_spill] sm:$0xff] %v11147_v15  ;;  %v3191_v24 = vpop.f32.mrf.mxu1 }
 0x4b8   :  { %3903 = vmatpush.bf16.msrb.mxu3 %v8578_v45  ;;  %v11149_v6 = vpack.c.bf16 %v3319_v32, %v3061_v11  ;;  %v8513_v45 = vld [vmem:[#allocation3 + $0x108] sm:$0xf]  ;;  %v8852_v11 = vld [vmem:[#allocation5 + $0x1b0] sm:$0xf]  ;;  %v9195_v32 = vld [vmem:[#allocation5 + $0x1b4] sm:$0xf0] }
 0x4b9   :  { %v8514_v34 = vor.u32 %v9111_v19, %v8513_v45  ;;  %v8853_v48 = vor.u32 %v9195_v32, %v8852_v11  ;;  %v9179_v45 = vld [vmem:[#allocation5 + $0x134] sm:$0xf0]  ;;  %v8470_v19 = vor.u32 %v9097_v61, %v8467_v52  ;;  %v9089_v61 = vld [vmem:[#allocation3 + $0x6c] sm:$0xf]  ;;  %v8435_v52 = vld [vmem:[#allocation3 + $0x78] sm:$0xf0] }
 0x4ba   :  { %13715 = vst [vmem:[#allocation81_spill] sm:$0xff] %v11149_v6  ;;  %v8438_v11 = vor.u32 %v9089_v61, %v8435_v52  ;;  %v9137_v61 = vld [vmem:[#allocation3 + $0x1ec] sm:$0xf]  ;;  %v8627_v52 = vld [vmem:[#allocation3 + $0x1f8] sm:$0xf0] }
 0x4bb   :  { %6435 = vmatpush.bf16.msrb.mxu2 %v8853_v48  ;;  %v8419_v48 = vld [vmem:[#allocation3 + $0x58] sm:$0xf0] }
 0x4bc   :  { %3904 = vmatpush.bf16.msrb.mxu3 %v8562_v10  ;;  %v9101_v10 = vld [vmem:[#allocation3 + $0xcc] sm:$0xf] }
 0x4bd   :  { %v3320_v54 = vpop.f32.mrf.mxu2  ;;  %v8486_v60 = vor.u32 %v9101_v10, %v8483_v23  ;;  %v8451_v10 = vld [vmem:[#allocation3 + $0x98] sm:$0xf0] }
 0x4be   :  { %v11155_v44 = vpop.f32.mrf.mxu3  ;;  %v3321_v13 = vadd.f32 %v3320_v54, %v3191_v24  ;;  %v8788_v24 = vld [vmem:[#allocation5 + $0x130] sm:$0xf]  ;;  %v9093_v54 = vld [vmem:[#allocation3 + $0x8c] sm:$0xf] }
 0x4bf   :  { %13716 = vst [vmem:[#allocation38_spill] sm:$0xff] %v11155_v44  ;;  %v3194_v1 = vpop.f32.mrf.mxu1  ;;  %v8789_v30 = vor.u32 %v9179_v45, %v8788_v24 }
 0x4c0   :  { %3905 = vmatpush.bf16.msrb.mxu3 %v8546_v40  ;;  %v11157_v40 = vpack.c.bf16 %v3321_v13, %v3063_v57 }
 0x4c1   :  { %3233 = vmatmul.bf16.gmra.mxu1 %v13629_v62  ;;  %v3066_v62 = vadd.f32 %v11033_v18, %v10882_v43  ;;  %v3068_v43 = vadd.f32 %v11048_v4, %v10893_v37  ;;  %v8387_v37 = vld [vmem:[#allocation3 + $0x18] sm:$0xf0]  ;;  %v13721_v4 = vld [vmem:[#allocation16_spill] sm:$0xff] }
 0x4c2   :  { %13717 = vst [vmem:[#allocation83_spill] sm:$0xff] %v11157_v40  ;;  %3362 = vmatmul.bf16.gmra.mxu2 %v13671_v16  ;;  %6306 = vmatpush.bf16.msrb.mxu1 %v8789_v30  ;;  %v8403_v30 = vld [vmem:[#allocation3 + $0x38] sm:$0xf0] }
 0x4c4   :  { %3906 = vmatpush.bf16.msrb.mxu3 %v8530_v46  ;;  %v8724_v46 = vld [vmem:[#allocation5 + $0xb0] sm:$0xf] }
 0x4c5   :  { %v8725_v7 = vor.u32 %v9163_v9, %v8724_v46  ;;  %v9085_v46 = vld [vmem:[#allocation3 + $0x4c] sm:$0xf] }
 0x4c6   :  { %v11166_v23 = vpop.f32.mrf.mxu3 }
 0x4c7   :  { %13718 = vst [vmem:[#allocation85_spill] sm:$0xff] %v11166_v23  ;;  %6177 = vmatpush.bf16.msrb.mxu0 %v8725_v7  ;;  %v3196_v57 = vpop.f32.mrf.mxu1  ;;  %v9081_v7 = vld [vmem:[#allocation3 + $0x2c] sm:$0xf] }
 0x4c8   :  { %3907 = vmatpush.bf16.msrb.mxu3 %v8514_v34  ;;  %v11162_v34 = vpop.f32.mrf.mxu0 }
 0x4cb   :  { %3908 = vmatmul.bf16.vlgmr.msrb.gmra.mxu3 %v11039_v51 }
 0x4cc   :  { %3913 = vmatpush.bf16.msra.mxu3 %v8502_v35  ;;  %v3323_v35 = vpop.f32.mrf.mxu2 }
 0x4cd   :  { %v3324_v16 = vadd.f32 %v3323_v35, %v3194_v1  ;;  %v8406_v35 = vor.u32 %v9081_v7, %v8403_v30  ;;  %v13724_v7 = vld [vmem:[#allocation58_spill] sm:$0xff] }
 0x4ce   :  { %v3844_v9 = vpop.f32.mrf.mxu3  ;;  %v3073_v30 = vadd.f32 %v11071_v29, %v13724_v7 }
 0x4cf   :  { %v11168_v13 = vpack.c.bf16 %v3324_v16, %v3066_v62  ;;  %v3199_v24 = vpop.f32.mrf.mxu1  ;;  %v3071_v62 = vadd.f32 %v11059_v0, %v13721_v4  ;;  %v11183_v16 = vld [vmem:[%s13073_s7] sm:$0xf]  ;;  %v9133_v0 = vld [vmem:[#allocation3 + $0x1cc] sm:$0xf] }
 0x4d0   :  { %3914 = vmatpush.bf16.msra.mxu3 %v8486_v60  ;;  %v8454_v60 = vor.u32 %v9093_v54, %v8451_v10  ;;  %v11172_v1 = vpop.f32.mrf.mxu0  ;;  %v9077_v10 = vld [vmem:[#allocation3 + $0xc] sm:$0xf]  ;;  %13722 = vst [vmem:[#allocation16_spill] sm:$0xff] %v11183_v16 }
 0x4d1   :  { %13719 = vst [vmem:[#allocation86_spill] sm:$0xff] %v11168_v13  ;;  %3238 = vmatmul.bf16.gmra.mxu1 %v13579_v17 }
 0x4d2   :  { %3367 = vmatmul.bf16.gmra.mxu2 %v13679_v12  ;;  %v8390_v12 = vor.u32 %v9077_v10, %v8387_v37 }
 0x4d4   :  { %3915 = vmatpush.bf16.msra.mxu3 %v8470_v19  ;;  %v3325_v32 = vpop.f32.mrf.mxu2  ;;  %v8422_v19 = vor.u32 %v9085_v46, %v8419_v48  ;;  %v3464_v46 = vperm.slane %v11183_v16, 0  ;;  %v8630_v48 = vor.u32 %v9137_v61, %v8627_v52  ;;  %v9125_v61 = vld [vmem:[#allocation3 + $0x18c] sm:$0xf]  ;;  %v8579_v52 = vld [vmem:[#allocation3 + $0x198] sm:$0xf0] }
 0x4d5   :  { %v3326_v18 = vadd.f32 %v3325_v32, %v3196_v57 }
 0x4d7   :  { %v11174_v45 = vpack.c.bf16 %v3326_v18, %v3068_v43  ;;  %v3201_v17 = vpop.f32.mrf.mxu1  ;;  %v8611_v43 = vld [vmem:[#allocation3 + $0x1d8] sm:$0xf0]  ;;  %v3845_v18 = vadd.f32 %v3844_v9, %v3464_v46  ;;  %v13727_v46 = vld [vmem:[#allocation19_spill] sm:$0xff] }
 0x4d8   :  { %3916 = vmatpush.bf16.msra.mxu3 %v8454_v60  ;;  %v3846_v60 = vpop.f32.mrf.mxu3  ;;  %v11187_v32 = vpop.f32.mrf.mxu0  ;;  %v13726_v9 = vld [vmem:[#allocation69_spill] sm:$0xff] }
 0x4d9   :  { %13720 = vst [vmem:[#allocation90_spill] sm:$0xff] %v11174_v45 }
 0x4dc   :  { %3917 = vmatpush.bf16.msra.mxu3 %v8438_v11  ;;  %v3328_v54 = vpop.f32.mrf.mxu2 }
 0x4dd   :  { %v3329_v57 = vadd.f32 %v3328_v54, %v3199_v24  ;;  %v8614_v24 = vor.u32 %v9133_v0, %v8611_v43  ;;  %v9121_v43 = vld [vmem:[#allocation3 + $0x16c] sm:$0xf] }
 0x4df   :  { %v11185_v11 = vpack.c.bf16 %v3329_v57, %v3071_v62  ;;  %v9129_v62 = vld [vmem:[#allocation3 + $0x1ac] sm:$0xf]  ;;  %v3204_v37 = vpop.f32.mrf.mxu1 }
 0x4e0   :  { %3918 = vmatpush.bf16.msra.mxu3 %v8422_v19  ;;  %v3857_v4 = vpop.f32.mrf.mxu3 }
 0x4e1   :  { %13723 = vst [vmem:[#allocation104_spill] sm:$0xff] %v11185_v11  ;;  %v11192_v10 = vadd.f32 %v3857_v4, %v3845_v18  ;;  %3243 = vmatmul.bf16.gmra.mxu1 %v13726_v9  ;;  %v8563_v18 = vld [vmem:[#allocation3 + $0x178] sm:$0xf0]  ;;  %v9113_v9 = vld [vmem:[#allocation3 + $0x12c] sm:$0xf] }
 0x4e2   :  { %3372 = vmatmul.bf16.gmra.mxu2 %v13688_v47  ;;  %v8566_v7 = vor.u32 %v9121_v43, %v8563_v18  ;;  %v8844_v43 = vld [vmem:[#allocation5 + $0x1a0] sm:$0xf]  ;;  %v9193_v18 = vld [vmem:[#allocation5 + $0x1a4] sm:$0xf0] }
 0x4e4   :  { %3919 = vmatpush.bf16.msra.mxu3 %v8406_v35  ;;  %v3330_v19 = vpop.f32.mrf.mxu2  ;;  %v8595_v35 = vld [vmem:[#allocation3 + $0x1b8] sm:$0xf0] }
 0x4e5   :  { %v3331_v54 = vadd.f32 %v3330_v19, %v3201_v17  ;;  %v8598_v60 = vor.u32 %v9129_v62, %v8595_v35  ;;  %v8582_v17 = vor.u32 %v9125_v61, %v8579_v52  ;;  %v13729_v35 = vld [vmem:[#allocation42_spill] sm:$0xff]  ;;  %v8531_v61 = vld [vmem:[#allocation3 + $0x138] sm:$0xf0] }
 0x4e7   :  { %v11195_v57 = vpack.c.bf16 %v3331_v54, %v3073_v30  ;;  %v3206_v19 = vpop.f32.mrf.mxu1  ;;  %v9117_v30 = vld [vmem:[#allocation3 + $0x14c] sm:$0xf]  ;;  %v8547_v54 = vld [vmem:[#allocation3 + $0x158] sm:$0xf0] }
 0x4e8   :  { %3920 = vmatpush.bf16.msra.mxu3 %v8390_v12  ;;  %v11198_v12 = vpop.f32.mrf.mxu0  ;;  %v3859_v0 = vpop.f32.mrf.mxu3  ;;  %v8550_v62 = vor.u32 %v9117_v30, %v8547_v54  ;;  %v8845_v30 = vor.u32 %v9193_v18, %v8844_v43  ;;  %v9177_v54 = vld [vmem:[#allocation5 + $0x124] sm:$0xf0]  ;;  %v13736_v18 = vld [vmem:[#allocation23_spill] sm:$0xff] }
 0x4e9   :  { %13725 = vst [vmem:[#allocation58_spill] sm:$0xff] %v11195_v57  ;;  %v13732_v0 = vld [vmem:[#allocation76_spill] sm:$0xff] }
 0x4ea   :  { %6436 = vmatpush.bf16.msrb.mxu2 %v8845_v30  ;;  %v3465_v30 = vperm.slane %v11183_v16, 1 }
 0x4eb   :  { %3921 = vmatmul.bf16.vlgmr.msra.gmra.mxu3 %v11015_v41 }
 0x4ec   :  { %3926 = vmatpush.bf16.msrb.mxu3 %v8630_v48  ;;  %v3333_v29 = vpop.f32.mrf.mxu2  ;;  %v3076_v48 = vadd.f32 %v11083_v21, %v13727_v46  ;;  %v13731_v46 = vld [vmem:[#allocation75_spill] sm:$0xff] }
 0x4ed   :  { %v3334_v41 = vadd.f32 %v3333_v29, %v3204_v37 }
 0x4ef   :  { %v3209_v52 = vpop.f32.mrf.mxu1 }
 0x4f0   :  { %3927 = vmatpush.bf16.msrb.mxu3 %v8614_v24  ;;  %v11203_v24 = vpack.c.bf16 %v3334_v41, %v3076_v48  ;;  %v11205_v4 = vpop.f32.mrf.mxu0  ;;  %v3870_v37 = vpop.f32.mrf.mxu3  ;;  %v9109_v48 = vld [vmem:[#allocation3 + $0x10c] sm:$0xf]  ;;  %v8515_v41 = vld [vmem:[#allocation3 + $0x118] sm:$0xf0] }
 0x4f1   :  { %3248 = vmatmul.bf16.gmra.mxu1 %v13731_v46 }
 0x4f2   :  { %13728 = vst [vmem:[#allocation69_spill] sm:$0xff] %v11203_v24  ;;  %3377 = vmatmul.bf16.gmra.mxu2 %v13732_v0 }
 0x4f4   :  { %3928 = vmatpush.bf16.msrb.mxu3 %v8598_v60  ;;  %v3335_v47 = vpop.f32.mrf.mxu2  ;;  %v3078_v60 = vadd.f32 %v11097_v25, %v13729_v35  ;;  %v9161_v25 = vld [vmem:[#allocation5 + $0xa4] sm:$0xf0]  ;;  %v8518_v35 = vor.u32 %v9109_v48, %v8515_v41 }
 0x4f5   :  { %v3336_v21 = vadd.f32 %v3335_v47, %v3206_v19  ;;  %v8780_v19 = vld [vmem:[#allocation5 + $0x120] sm:$0xf] }
 0x4f7   :  { %v11209_v29 = vpack.c.bf16 %v3336_v21, %v3078_v60  ;;  %v8781_v21 = vor.u32 %v9177_v54, %v8780_v19  ;;  %v11217_v0 = vpop.f32.mrf.mxu1 }
 0x4f8   :  { %3929 = vmatpush.bf16.msrb.mxu3 %v8582_v17  ;;  %v8534_v17 = vor.u32 %v9113_v9, %v8531_v61  ;;  %v3872_v46 = vpop.f32.mrf.mxu3  ;;  %v11215_v23 = vpop.f32.mrf.mxu0 }
 0x4f9   :  { %13730 = vst [vmem:[#allocation19_spill] sm:$0xff] %v11209_v29  ;;  %6307 = vmatpush.bf16.msrb.mxu1 %v8781_v21 }
 0x4fc   :  { %3930 = vmatpush.bf16.msrb.mxu3 %v8566_v7  ;;  %v8716_v7 = vld [vmem:[#allocation5 + $0xa0] sm:$0xf]  ;;  %v3338_v47 = vpop.f32.mrf.mxu2 }
 0x4fd   :  { %v8717_v60 = vor.u32 %v9161_v25, %v8716_v7  ;;  %v3339_v61 = vadd.f32 %v3338_v47, %v3209_v52  ;;  %v3086_v7 = vadd.f32 %v11131_v5, %v13736_v18 }
 0x4ff   :  { %6178 = vmatpush.bf16.msrb.mxu0 %v8717_v60  ;;  %v3214_v48 = vpop.f32.mrf.mxu1 }
 0x500   :  { %3931 = vmatpush.bf16.msrb.mxu3 %v8550_v62  ;;  %v13733_v62 = vld [vmem:[#allocation21_spill] sm:$0xff]  ;;  %v11224_v41 = vpop.f32.mrf.mxu0 }
 0x501   :  { %v3081_v9 = vadd.f32 %v11107_v38, %v13733_v62  ;;  %v13735_v38 = vld [vmem:[#allocation80_spill] sm:$0xff] }
 0x502   :  { %3253 = vmatmul.bf16.gmra.mxu1 %v13735_v38  ;;  %3382 = vmatmul.bf16.gmra.mxu2 %v13701_v28  ;;  %v13743_v38 = vld [vmem:[#allocation25_spill] sm:$0xff] }
 0x503   :  { %v11219_v43 = vpack.c.bf16 %v3339_v61, %v3081_v9  ;;  %v13742_v61 = vld [vmem:[#allocation84_spill] sm:$0xff] }
 0x504   :  { %3932 = vmatpush.bf16.msrb.mxu3 %v8534_v17  ;;  %v11222_v17 = vpop.f32.mrf.mxu2 }
 0x505   :  { %13734 = vst [vmem:[#allocation42_spill] sm:$0xff] %v11219_v43 }
 0x507   :  { %v11231_v19 = vpop.f32.mrf.mxu1 }
 0x508   :  { %3933 = vmatpush.bf16.msrb.mxu3 %v8518_v35  ;;  %v11235_v47 = vpop.f32.mrf.mxu0 }
 0x50b   :  { %3934 = vmatmul.bf16.vlgmr.msrb.gmra.mxu3 %v11039_v51  ;;  %v3871_v51 = vadd.f32 %v3870_v37, %v3465_v30 }
 0x50c   :  { %v3343_v52 = vpop.f32.mrf.mxu2 }
 0x50d   :  { %v3344_v25 = vadd.f32 %v3343_v52, %v3214_v48  ;;  %v3091_v52 = vadd.f32 %v11151_v14, %v13743_v38  ;;  %v8772_v14 = vld [vmem:[#allocation5 + $0x110] sm:$0xf] }
 0x50e   :  { %v3883_v35 = vpop.f32.mrf.mxu3 }
 0x50f   :  { %v11233_v54 = vpack.c.bf16 %v3344_v25, %v3086_v7  ;;  %v3884_v60 = vadd.f32 %v3883_v35, %v3871_v51  ;;  %v3219_v62 = vpop.f32.mrf.mxu1 }
 0x511   :  { %13737 = vst [vmem:[#allocation75_spill] sm:$0xff] %v11233_v54  ;;  %v11240_v28 = vpack.c.bf16 %v3884_v60, %v11192_v10  ;;  %v11257_v10 = vpop.f32.mrf.mxu0  ;;  %v13745_v60 = vld [vmem:[#allocation89_spill] sm:$0xff]  ;;  %v13755_v54 = vld [vmem:[#allocation31_spill] sm:$0xff] }
 0x512   :  { %3258 = vmatmul.bf16.gmra.mxu1 %v13742_v61  ;;  %3387 = vmatmul.bf16.gmra.mxu2 %v13705_v20  ;;  %v8836_v20 = vld [vmem:[#allocation5 + $0x190] sm:$0xf]  ;;  %v9191_v61 = vld [vmem:[#allocation5 + $0x194] sm:$0xf0] }
 0x513   :  { %13738 = vst [vmem:[#allocation76_spill] sm:$0xff] %v11240_v28  ;;  %v11243_v5 = vrot.slane %v11240_v28, 3 }
 0x514   :  { %v11237_v21 = vpop.f32.mrf.mxu2 }
 0x515   :  { %13739 = vst [vmem:[#allocation21_spill] sm:$0xff] %v11243_v5  ;;  %v11248_v9 = vsel %vm3496_vm2, %v11240_v28, %v11243_v5  ;;  %v11253_v37 = vsel %vm3498_vm3, %v11240_v28, %v11243_v5 }
 0x516   :  { %13740 = vst [vmem:[#allocation80_spill] sm:$0xff] %v11248_v9  ;;  %v3885_v46 = vpop.f32.mrf.mxu3  ;;  %v9159_v9 = vld [vmem:[#allocation5 + $0x94] sm:$0xf0] }
 0x517   :  { %13741 = vst [vmem:[#allocation23_spill] sm:$0xff] %v11253_v37  ;;  %v11261_v7 = vpop.f32.mrf.mxu1  ;;  %v8708_v46 = vld [vmem:[#allocation5 + $0x90] sm:$0xf]  ;;  %v8837_v37 = vor.u32 %v9191_v61, %v8836_v20 }
 0x519   :  { %v11267_v51 = vpop.f32.mrf.mxu0  ;;  %6437 = vmatpush.bf16.msrb.mxu2 %v8837_v37 }
 0x51c   :  { %v3348_v48 = vpop.f32.mrf.mxu2 }
 0x51d   :  { %v3349_v18 = vadd.f32 %v3348_v48, %v3219_v62  ;;  %v9175_v62 = vld [vmem:[#allocation5 + $0x114] sm:$0xf0]  ;;  %v8709_v48 = vor.u32 %v9159_v9, %v8708_v46 }
 0x51e   :  { %v8773_v38 = vor.u32 %v9175_v62, %v8772_v14  ;;  %v13750_v14 = vld [vmem:[#allocation29_spill] sm:$0xff] }
 0x51f   :  { %v11263_v30 = vpack.c.bf16 %v3349_v18, %v3091_v52  ;;  %v3224_v35 = vpop.f32.mrf.mxu1  ;;  %v13746_v18 = vld [vmem:[#allocation27_spill] sm:$0xff]  ;;  %6179 = vmatpush.bf16.msrb.mxu0 %v8709_v48 }
 0x520   :  { %6308 = vmatpush.bf16.msrb.mxu1 %v8773_v38 }
 0x521   :  { %13744 = vst [vmem:[#allocation84_spill] sm:$0xff] %v11263_v30  ;;  %v3096_v30 = vadd.f32 %v11172_v1, %v13746_v18  ;;  %v3101_v1 = vadd.f32 %v11198_v12, %v13750_v14  ;;  %v3106_v12 = vadd.f32 %v11215_v23, %v13755_v54  ;;  %v8676_v54 = vld [vmem:[#allocation5 + $0x50] sm:$0xf] }
 0x522   :  { %3263 = vmatmul.bf16.gmra.mxu1 %v13745_v60  ;;  %3392 = vmatmul.bf16.gmra.mxu2 %v13709_v2  ;;  %v11275_v60 = vpop.f32.mrf.mxu0 }
 0x524   :  { %v11265_v25 = vpop.f32.mrf.mxu2 }
 0x527   :  { %v11273_v28 = vpop.f32.mrf.mxu1 }
 0x528   :  { %13747 = vst [vmem:[#allocation25_spill] sm:$0xff] %v11273_v28 }
 0x52a   :  { %v11281_v46 = vpop.f32.mrf.mxu0 }
 0x52c   :  { %v3353_v52 = vpop.f32.mrf.mxu2 }
 0x52d   :  { %v3354_v44 = vadd.f32 %v3353_v52, %v3224_v35 }
 0x52e   :  { %v3896_v2 = vpop.f32.mrf.mxu3 }
 0x52f   :  { %v11277_v5 = vpack.c.bf16 %v3354_v44, %v3096_v30  ;;  %v3229_v61 = vpop.f32.mrf.mxu1  ;;  %v3466_v30 = vperm.slane %v11183_v16, 2  ;;  %v8700_v16 = vld [vmem:[#allocation5 + $0x80] sm:$0xf] }
 0x531   :  { %13748 = vst [vmem:[#allocation89_spill] sm:$0xff] %v11277_v5  ;;  %v3897_v18 = vadd.f32 %v3896_v2, %v3466_v30  ;;  %v9173_v30 = vld [vmem:[#allocation5 + $0x104] sm:$0xf0] }
 0x532   :  { %v11289_v38 = vpop.f32.mrf.mxu0 }
 0x534   :  { %v11279_v20 = vpop.f32.mrf.mxu2 }
 0x535   :  { %13749 = vst [vmem:[#allocation27_spill] sm:$0xff] %v11279_v20  ;;  %v9157_v20 = vld [vmem:[#allocation5 + $0x84] sm:$0xf0] }
 0x536   :  { %v3898_v9 = vpop.f32.mrf.mxu3 }
 0x537   :  { %v11285_v62 = vpop.f32.mrf.mxu1 }
 0x538   :  { %13751 = vst [vmem:[#allocation29_spill] sm:$0xff] %v11285_v62 }
 0x53c   :  { %v3358_v37 = vpop.f32.mrf.mxu2 }
 0x53d   :  { %v3359_v35 = vadd.f32 %v3358_v37, %v3229_v61  ;;  %v11298_v61 = vpop.f32.mrf.mxu0 }
 0x53f   :  { %v11287_v48 = vpack.c.bf16 %v3359_v35, %v3101_v1  ;;  %v3234_v44 = vpop.f32.mrf.mxu1  ;;  %v8701_v35 = vor.u32 %v9157_v20, %v8700_v16 }
 0x541   :  { %13752 = vst [vmem:[#allocation105_spill] sm:$0xff] %v11287_v48  ;;  %6180 = vmatpush.bf16.msrb.mxu0 %v8701_v35 }
 0x544   :  { %v11291_v52 = vpop.f32.mrf.mxu2 }
 0x545   :  { %13753 = vst [vmem:[#allocation106_spill] sm:$0xff] %v11291_v52  ;;  %v8828_v52 = vld [vmem:[#allocation5 + $0x180] sm:$0xf] }
 0x547   :  { %v11300_v14 = vpop.f32.mrf.mxu1 }
 0x548   :  { %13756 = vst [vmem:[#allocation31_spill] sm:$0xff] %v11300_v14  ;;  %v8764_v14 = vld [vmem:[#allocation5 + $0x100] sm:$0xf] }
 0x549   :  { %v8765_v28 = vor.u32 %v9173_v30, %v8764_v14  ;;  %v13815_v14 = vld [vmem:[#allocation46_spill] sm:$0xff] }
 0x54a   :  { %v3083_v30 = vadd.f32 %v11116_v27, %v13815_v14  ;;  %v13818_v14 = vld [vmem:[#allocation53_spill] sm:$0xff] }
 0x54b   :  { %6309 = vmatpush.bf16.msrb.mxu1 %v8765_v28 }
 0x54c   :  { %v3363_v15 = vpop.f32.mrf.mxu2 }
 0x54d   :  { %v3364_v37 = vadd.f32 %v3363_v15, %v3234_v44 }
 0x54e   :  { %v3909_v9 = vpop.f32.mrf.mxu3 }
 0x54f   :  { %v11294_v5 = vadd.f32 %v3909_v9, %v3897_v18  ;;  %v11302_v1 = vpack.c.bf16 %v3364_v37, %v3106_v12  ;;  %v3239_v15 = vpop.f32.mrf.mxu1  ;;  %v11330_v18 = vpop.f32.mrf.mxu0  ;;  %v9189_v9 = vld [vmem:[#allocation5 + $0x184] sm:$0xf0]  ;;  %v3116_v37 = vadd.f32 %v11267_v51, %v11081_v53  ;;  %v13821_v53 = vld [vmem:[#allocation93_spill] sm:$0xff]  ;;  %v11487_v51 = vadd.f32 %v11257_v10, %v13822_v3  ;;  %v13829_v3 = vld [vmem:[#allocation27_spill] sm:$0xff] }
 0x550   :  { %13771 = vst [vmem:[#allocation110_spill] sm:$0xff] %v11330_v18  ;;  %v8829_v12 = vor.u32 %v9189_v9, %v8828_v52  ;;  %v13812_v9 = vld [vmem:[#allocation61_spill] sm:$0xff] }
 0x551   :  { %13754 = vst [vmem:[#allocation107_spill] sm:$0xff] %v11294_v5 }
 0x552   :  { %13757 = vst [vmem:[#allocation108_spill] sm:$0xff] %v11302_v1  ;;  %6438 = vmatpush.bf16.msrb.mxu2 %v8829_v12  ;;  %v3111_v1 = vadd.f32 %v11235_v47, %v11064_v58  ;;  %v13809_v12 = vld [vmem:[#allocation55_spill] sm:$0xff] }
 0x554   :  { %v11316_v2 = vpop.f32.mrf.mxu2 }
 0x555   :  { %13764 = vst [vmem:[#allocation109_spill] sm:$0xff] %v11316_v2 }
 0x556   :  { %v3911_v44 = vpop.f32.mrf.mxu3 }
 0x557   :  { %v11353_v16 = vpop.f32.mrf.mxu1  ;;  %v11372_v55 = vpop.f32.mrf.mxu0 }
 0x55c   :  { %v3368_v62 = vpop.f32.mrf.mxu2 }
 0x55d   :  { %v3369_v44 = vadd.f32 %v3368_v62, %v3239_v15  ;;  %v13813_v15 = vld [vmem:[#allocation65_spill] sm:$0xff]  ;;  %v13814_v62 = vld [vmem:[#allocation66_spill] sm:$0xff] }
 0x55f   :  { %v11362_v58 = vpack.c.bf16 %v3369_v44, %v3111_v1  ;;  %v8692_v1 = vld [vmem:[#allocation5 + $0x70] sm:$0xf]  ;;  %v9155_v44 = vld [vmem:[#allocation5 + $0x74] sm:$0xf0]  ;;  %v3244_v20 = vpop.f32.mrf.mxu1  ;;  %v11417_v48 = vpop.f32.mrf.mxu0 }
 0x560   :  { %v8693_v18 = vor.u32 %v9155_v44, %v8692_v1  ;;  %v13819_v44 = vld [vmem:[#allocation57_spill] sm:$0xff] }
 0x561   :  { %13785 = vst [vmem:[#allocation111_spill] sm:$0xff] %v11362_v58  ;;  %v11462_v63 = vadd.f32 %v11187_v32, %v13819_v44  ;;  %v13824_v32 = vld [vmem:[#allocation32_spill] sm:$0xff] }
 0x562   :  { %6044 = vmatpush.bf16.msra.mxu3 %v8693_v18 }
 0x564   :  { %v11385_v28 = vpop.f32.mrf.mxu2 }
 0x567   :  { %v11431_v35 = vpop.f32.mrf.mxu1  ;;  %v3135_v44 = vpop.f32.mrf.mxu0 }
 0x56c   :  { %v3373_v18 = vpop.f32.mrf.mxu2 }
 0x56d   :  { %v3374_v52 = vadd.f32 %v3373_v18, %v3244_v20  ;;  %v13817_v18 = vld [vmem:[#allocation74_spill] sm:$0xff]  ;;  %v11454_v20 = vadd.f32 %v11162_v34, %v13818_v14  ;;  %v13820_v34 = vld [vmem:[#allocation64_spill] sm:$0xff] }
 0x56e   :  { %v11403_v2 = vpop.f32.mrf.mxu3  ;;  %v11444_v23 = vadd.f32 %v11141_v26, %v13817_v18  ;;  %v11469_v14 = vadd.f32 %v11205_v4, %v13820_v34  ;;  %v9153_v18 = vld [vmem:[#allocation5 + $0x64] sm:$0xf0]  ;;  %v11480_v4 = vadd.f32 %v11224_v41, %v13821_v53  ;;  %v11506_v41 = vadd.f32 %v11289_v38, %v11112_v33  ;;  %v13826_v38 = vld [vmem:[#allocation73_spill] sm:$0xff] }
 0x56f   :  { %v11437_v47 = vpack.c.bf16 %v3374_v52, %v3116_v37  ;;  %v13823_v53 = vld [vmem:[#allocation70_spill] sm:$0xff]  ;;  %v3249_v5 = vpop.f32.mrf.mxu1  ;;  %v9151_v52 = vld [vmem:[#allocation5 + $0x54] sm:$0xf0]  ;;  %v11520_v33 = vadd.f32 %v11298_v61, %v11120_v31  ;;  %v13832_v61 = vld [vmem:[#allocation29_spill] sm:$0xff] }
 0x570   :  { %v11496_v34 = vadd.f32 %v11275_v60, %v13823_v53  ;;  %v3346_v60 = vadd.f32 %v11237_v21, %v11231_v19  ;;  %v13833_v53 = vld [vmem:[#allocation106_spill] sm:$0xff] }
 0x571   :  { %13816 = vst [vmem:[#allocation55_spill] sm:$0xff] %v11437_v47  ;;  %v3361_v21 = vadd.f32 %v13833_v53, %v13832_v61  ;;  %v13840_v53 = vld [vmem:[#allocation16_spill] sm:$0xff] }
 0x572   :  { %v11535_v31 = vpack.c.bf16 %v3346_v60, %v11444_v23  ;;  %v13838_v23 = vld [vmem:[#allocation31_spill] sm:$0xff]  ;;  %v13839_v60 = vld [vmem:[#allocation109_spill] sm:$0xff]  ;;  %v3467_v61 = vperm.slane %v13840_v53, 3 }
 0x574   :  { %v11471_v26 = vpop.f32.mrf.mxu2  ;;  %13831 = vst [vmem:[#allocation65_spill] sm:$0xff] %v11535_v31 }
 0x576   :  { %v3924_v1 = vpop.f32.mrf.mxu3 }
 0x577   :  { %v8684_v1 = vld [vmem:[#allocation5 + $0x60] sm:$0xf]  ;;  %v3251_v53 = vpop.f32.mrf.mxu1 }
 0x578   :  { %v8685_v37 = vor.u32 %v9153_v18, %v8684_v1  ;;  %v3341_v1 = vadd.f32 %v11222_v17, %v11217_v0  ;;  %v3121_v0 = vadd.f32 %v11281_v46, %v13824_v32  ;;  %v8677_v17 = vor.u32 %v9151_v52, %v8676_v54  ;;  %v13827_v32 = vld [vmem:[#allocation110_spill] sm:$0xff] }
 0x579   :  { %v3351_v46 = vadd.f32 %v11265_v25, %v11261_v7  ;;  %v13830_v54 = vld [vmem:[#allocation34_spill] sm:$0xff] }
 0x57a   :  { %6045 = vmatpush.bf16.msra.mxu3 %v8685_v37  ;;  %v11512_v10 = vpack.c.bf16 %v3341_v1, %v3083_v30  ;;  %v11525_v30 = vadd.f32 %v13827_v32, %v13826_v38  ;;  %v13828_v1 = vld [vmem:[#allocation25_spill] sm:$0xff]  ;;  %v11532_v52 = vadd.f32 %v11372_v55, %v13830_v54  ;;  %v3137_v32 = vpop.f32.mrf.mxu0  ;;  %v13837_v55 = vld [vmem:[#allocation26_spill] sm:$0xff]  ;;  %v13842_v37 = vld [vmem:[#allocation76_spill] sm:$0xff] }
 0x57b   :  { %v3356_v7 = vadd.f32 %v13829_v3, %v13828_v1  ;;  %v11542_v3 = vpack.c.bf16 %v3351_v46, %v11454_v20  ;;  %v11549_v54 = vadd.f32 %v11417_v48, %v13837_v55  ;;  %v13841_v38 = vld [vmem:[#allocation21_spill] sm:$0xff]  ;;  %v13843_v46 = vld [vmem:[#allocation38_spill] sm:$0xff] }
 0x57c   :  { %13825 = vst [vmem:[#allocation61_spill] sm:$0xff] %v11512_v10  ;;  %v3378_v19 = vpop.f32.mrf.mxu2  ;;  %v4045_v20 = vsel %vm4042_vm7, %v13842_v37, %v13841_v38  ;;  %v13845_v1 = vld [vmem:[#allocation85_spill] sm:$0xff]  ;;  %v9149_v55 = vld [vmem:[#allocation5 + $0x44] sm:$0xf0] }
 0x57d   :  { %v3379_v25 = vadd.f32 %v3378_v19, %v3249_v5  ;;  %13834 = vst [vmem:[#allocation66_spill] sm:$0xff] %v11542_v3 }
 0x57e   :  { %6046 = vmatpush.bf16.msra.mxu3 %v8677_v17  ;;  %v3366_v17 = vadd.f32 %v13839_v60, %v13838_v23  ;;  %v11567_v23 = vadd.f32 %v3137_v32, %v13845_v1  ;;  %v11570_v60 = vpack.c.bf16 %v3361_v21, %v11469_v14  ;;  %v3923_v14 = vadd.f32 %v11403_v2, %v3467_v61  ;;  %v8668_v1 = vld [vmem:[#allocation5 + $0x40] sm:$0xf] }
 0x57f   :  { %v11544_v5 = vpack.c.bf16 %v3379_v25, %v3121_v0  ;;  %v11559_v0 = vadd.f32 %v3135_v44, %v13843_v46  ;;  %v11562_v25 = vpack.c.bf16 %v3356_v7, %v11462_v63  ;;  %v3371_v63 = vadd.f32 %v11385_v28, %v11353_v16  ;;  %v13853_v46 = vld [vmem:[#allocation107_spill] sm:$0xff] }
 0x580   :  { %13846 = vst [vmem:[#allocation53_spill] sm:$0xff] %v11570_v60  ;;  %v11580_v32 = vpack.c.bf16 %v3366_v17, %v11480_v4  ;;  %v8669_v16 = vor.u32 %v9149_v55, %v8668_v1  ;;  %v3376_v1 = vadd.f32 %v11471_v26, %v11431_v35  ;;  %v13856_v35 = vld [vmem:[#allocation23_spill] sm:$0xff] }
 0x581   :  { %13835 = vst [vmem:[#allocation46_spill] sm:$0xff] %v11544_v5  ;;  %v11593_v18 = vpack.c.bf16 %v3371_v63, %v11487_v51 }
 0x582   :  { %13844 = vst [vmem:[#allocation74_spill] sm:$0xff] %v11562_v25  ;;  %6047 = vmatpush.bf16.msra.mxu3 %v8669_v16  ;;  %v11606_v26 = vpack.c.bf16 %v3376_v1, %v11496_v34  ;;  %v13855_v16 = vld [vmem:[#allocation80_spill] sm:$0xff] }
 0x583   :  { %13849 = vst [vmem:[#allocation57_spill] sm:$0xff] %v11580_v32 }
 0x584   :  { %v3380_v21 = vpop.f32.mrf.mxu2  ;;  %13852 = vst [vmem:[#allocation64_spill] sm:$0xff] %v11593_v18 }
 0x585   :  { %v3381_v3 = vadd.f32 %v3380_v21, %v3251_v53  ;;  %13854 = vst [vmem:[#allocation93_spill] sm:$0xff] %v11606_v26  ;;  %v3254_v21 = vpop.f32.mrf.mxu1 }
 0x587   :  { %v11617_v2 = vpack.c.bf16 %v3381_v3, %v11506_v41 }
 0x589   :  { %13857 = vst [vmem:[#allocation22_spill] sm:$0xff] %v11617_v2 }
 0x58d   :  { %v11633_v60 = vpop.f32.mrf.mxu1 }
 0x58e   :  { %v3935_v48 = vpop.f32.mrf.mxu3 }
 0x58f   :  { %v3936_v17 = vadd.f32 %v3935_v48, %v3923_v14  ;;  %v8660_v48 = vld [vmem:[#allocation5 + $0x30] sm:$0xf]  ;;  %v9147_v14 = vld [vmem:[#allocation5 + $0x34] sm:$0xf0] }
 0x590   :  { %v8661_v27 = vor.u32 %v9147_v14, %v8660_v48  ;;  %v8652_v48 = vld [vmem:[#allocation5 + $0x20] sm:$0xf]  ;;  %v9145_v14 = vld [vmem:[#allocation5 + $0x24] sm:$0xf0] }
 0x591   :  { %v3940_v4 = vpack.c.bf16 %v3936_v17, %v13853_v46 }
 0x592   :  { %6048 = vmatpush.bf16.msra.mxu3 %v8661_v27 }
 0x593   :  { %v4040_v51 = vrot.slane %v3940_v4, 6  ;;  %v4041_v63 = vrot.slane %v3940_v4, 1  ;;  %v3383_v4 = vpop.f32.mrf.mxu2 }
 0x594   :  { %v3384_v34 = vadd.f32 %v3383_v4, %v3254_v21 }
 0x595   :  { %v4048_v46 = vsel %vm3498_vm3, %v4040_v51, %v4041_v63  ;;  %v4053_v17 = vsel %vm3500_vm4, %v4040_v51, %v4041_v63  ;;  %v4059_v53 = vsel %vm3502_vm5, %v4040_v51, %v4041_v63 }
 0x596   :  { %v4050_v55 = vsel %vm4049_vm8, %v4045_v20, %v4048_v46  ;;  %v4055_v44 = vsel %vm4054_vm9, %v13855_v16, %v4053_v17  ;;  %v4061_v27 = vsel %vm4060_vm10, %v13856_v35, %v4059_v53  ;;  %v3937_v1 = vpop.f32.mrf.mxu3  ;;  %v11621_v58 = vpack.c.bf16 %v3384_v34, %v11520_v33 }
 0x597   :  { %v4057_v7 = vrot.slane %v4055_v44, 1  ;;  %v4063_v37 = vrot.slane %v4061_v27, 2  ;;  %v4065_v51 = vunpack.i.h.s16 %v4050_v55  ;;  %v8631_v18 = vpack.i.b16 %v4050_v55, %v4050_v55 }
 0x598   :  { %v8653_v20 = vor.u32 %v9145_v14, %v8652_v48 }
 0x599   :  { %v4067_v46 = vunpack.i.h.s16 %v4057_v7  ;;  %v4069_v17 = vunpack.i.h.s16 %v4063_v37  ;;  %v4071_v35 = vpack.i.b16 %v4065_v51, %v4065_v51  ;;  %v8632_v44 = vpack.i.b16 %v4057_v7, %v4057_v7 }
 0x59a   :  { %6049 = vmatpush.bf16.msra.mxu3 %v8653_v20  ;;  %v8633_v4 = vpack.i.b16 %v4063_v37, %v4063_v37  ;;  %v4076_v14 = vperm.slane %v8631_v18, 0  ;;  %v4077_v27 = vperm.slane %v8631_v18, 1  ;;  %v4078_v34 = vperm.slane %v8631_v18, 2 }
 0x59b   :  { %v4073_v33 = vpack.i.b16 %v4067_v46, %v4067_v46  ;;  %v11629_v48 = vpack.i.b16 %v4069_v17, %v4069_v17  ;;  %v4079_v1 = vperm.slane %v8631_v18, 3  ;;  %v4080_v51 = vperm.slane %v4071_v35, 0  ;;  %v11631_v55 = vpop.f32.mrf.mxu2 }
 0x59c   :  { %v4081_v53 = vperm.slane %v4071_v35, 1  ;;  %v4082_v16 = vperm.slane %v4071_v35, 2  ;;  %v4083_v41 = vperm.slane %v4071_v35, 3  ;;  %v4084_v63 = vperm.slane %v8632_v44, 0 }
 0x59d   :  { %v4085_v3 = vperm.slane %v8632_v44, 1  ;;  %v4086_v7 = vperm.slane %v8632_v44, 2  ;;  %v4087_v20 = vperm.slane %v8632_v44, 3  ;;  %v4088_v5 = vperm.slane %v4073_v33, 0 }
 0x59e   :  { %v4089_v21 = vperm.slane %v4073_v33, 1  ;;  %v4090_v26 = vperm.slane %v4073_v33, 2  ;;  %v4091_v37 = vperm.slane %v4073_v33, 3  ;;  %v4092_v46 = vperm.slane %v8633_v4, 0 }
 0x59f   :  { %v4093_v17 = vperm.slane %v8633_v4, 1  ;;  %v4101_v2 = vpack.i.b16 %v4076_v14, %v4076_v14  ;;  %v4105_v47 = vpack.i.b16 %v4077_v27, %v4077_v27  ;;  %v4109_v32 = vpack.i.b16 %v4078_v34, %v4078_v34 }
 0x5a0   :  { %v4113_v18 = vpack.i.b16 %v4079_v1, %v4079_v1  ;;  %v4117_v61 = vpack.i.b16 %v4080_v51, %v4080_v51  ;;  %v4094_v35 = vperm.slane %v8633_v4, 2  ;;  %v4121_v28 = vpack.i.b16 %v4081_v53, %v4081_v53 }
 0x5a1   :  { %v4125_v25 = vpack.i.b16 %v4082_v16, %v4082_v16  ;;  %v4129_v38 = vpack.i.b16 %v4083_v41, %v4083_v41  ;;  %v4095_v44 = vperm.slane %v8633_v4, 3  ;;  %v4096_v31 = vperm.slane %v11629_v48, 0 }
 0x5a2   :  { %v4097_v19 = vperm.slane %v11629_v48, 1  ;;  %v4098_v33 = vperm.slane %v11629_v48, 2  ;;  %v4099_v10 = vperm.slane %v11629_v48, 3  ;;  %v4103_v14 = vperm.slane %v4101_v2, 0 }
 0x5a3   :  { %v4107_v27 = vperm.slane %v4105_v47, 0  ;;  %v4133_v34 = vpack.i.b16 %v4084_v63, %v4084_v63  ;;  %v4111_v1 = vperm.slane %v4109_v32, 0  ;;  %v4115_v51 = vperm.slane %v4113_v18, 0 }
 0x5a4   :  { %v4119_v43 = vperm.slane %v4117_v61, 0  ;;  %v4137_v29 = vpack.i.b16 %v4085_v3, %v4085_v3  ;;  %v4123_v24 = vperm.slane %v4121_v28, 0  ;;  %v4127_v53 = vperm.slane %v4125_v25, 0  ;;  %v3388_v28 = vpop.f32.mrf.mxu2 }
 0x5a5   :  { %v4131_v16 = vperm.slane %v4129_v38, 0  ;;  %v4141_v41 = vpack.i.b16 %v4086_v7, %v4086_v7  ;;  %v4145_v4 = vpack.i.b16 %v4087_v20, %v4087_v20  ;;  %v4149_v57 = vpack.i.b16 %v4088_v5, %v4088_v5 }
 0x5a6   :  { %v4153_v11 = vpack.i.b16 %v4089_v21, %v4089_v21  ;;  %v4157_v45 = vpack.i.b16 %v4090_v26, %v4090_v26  ;;  %v4135_v13 = vperm.slane %v4133_v34, 0  ;;  %v4139_v40 = vperm.slane %v4137_v29, 0  ;;  %v3259_v21 = vpop.f32.mrf.mxu1 }
 0x5a7   :  { %v4161_v6 = vpack.i.b16 %v4091_v37, %v4091_v37  ;;  %v4165_v59 = vpack.i.b16 %v4092_v46, %v4092_v46  ;;  %v11639_v48 = vpack.i.b16 %v4093_v17, %v4093_v17  ;;  %v11641_v47 = vpack.i.b16 %v4094_v35, %v4094_v35 }
 0x5a8   :  { %v11643_v32 = vpack.i.b16 %v4095_v44, %v4095_v44  ;;  %v11645_v2 = vpack.i.b16 %v4096_v31, %v4096_v31  ;;  %v4143_v25 = vperm.slane %v4141_v41, 0  ;;  %v11647_v38 = vpack.i.b16 %v4097_v19, %v4097_v19 }
 0x5a9   :  { %v4189_v61 = vpack.i.b16 %v4098_v33, %v4098_v33  ;;  %v4193_v5 = vpack.i.b16 %v4099_v10, %v4099_v10  ;;  %v4147_v63 = vperm.slane %v4145_v4, 0  ;;  %v4151_v26 = vperm.slane %v4149_v57, 0  ;;  %v9143_v4 = vld [vmem:[#allocation5 + $0x14] sm:$0xf0] }
 0x5aa   :  { %v4155_v3 = vperm.slane %v4153_v11, 0  ;;  %v4159_v29 = vperm.slane %v4157_v45, 0  ;;  %v4163_v7 = vperm.slane %v4161_v6, 0  ;;  %v4167_v20 = vperm.slane %v4165_v59, 0 }
 0x5ab   :  { %v4171_v37 = vperm.slane %v11639_v48, 0  ;;  %v4175_v46 = vperm.slane %v11641_v47, 0  ;;  %v4179_v31 = vperm.slane %v11643_v32, 0  ;;  %v4191_v18 = vperm.slane %v4189_v61, 0  ;;  %v9141_v48 = vld [vmem:[#allocation5 + $0x4] sm:$0xf0] }
 0x5ac   :  { %v4195_v35 = vperm.slane %v4193_v5, 0  ;;  %v11654_v10 = vunpack.c.l.bf16 %v4103_v14  ;;  %v11656_v57 = vunpack.c.l.bf16 %v4107_v27  ;;  %v11658_v45 = vunpack.c.l.bf16 %v4111_v1  ;;  %v8644_v27 = vld [vmem:[#allocation5 + $0x10] sm:$0xf] }
 0x5ad   :  { %v11660_v6 = vunpack.c.l.bf16 %v4115_v51  ;;  %v11662_v59 = vunpack.c.l.bf16 %v4119_v43  ;;  %v11664_v11 = vunpack.c.l.bf16 %v4123_v24  ;;  %v11666_v44 = vunpack.c.l.bf16 %v4127_v53  ;;  %v8636_v53 = vld [vmem:[#allocation5] sm:$0xf] }
 0x5ae   :  { %v11668_v33 = vunpack.c.l.bf16 %v4131_v16  ;;  %v11670_v34 = vunpack.c.l.bf16 %v4135_v13  ;;  %v11672_v41 = vunpack.c.l.bf16 %v4139_v40  ;;  %v11674_v14 = vunpack.c.l.bf16 %v4143_v25 }
 0x5af   :  { %v11676_v1 = vunpack.c.l.bf16 %v4147_v63  ;;  %v11678_v51 = vunpack.c.l.bf16 %v4151_v26  ;;  %v11680_v43 = vunpack.c.l.bf16 %v4155_v3  ;;  %v11682_v24 = vunpack.c.l.bf16 %v4159_v29  ;;  %v3390_v63 = vpop.f32.mrf.mxu2  ;;  %v13864_v29 = vld [vmem:[#allocation88_spill] sm:$0xff] }
 0x5b0   :  { %13858 = vst [vmem:[#allocation70_spill] sm:$0xff] %v11674_v14  ;;  %v11684_v16 = vunpack.c.l.bf16 %v4163_v7  ;;  %v11686_v13 = vunpack.c.l.bf16 %v4191_v18  ;;  %v11688_v40 = vunpack.c.l.bf16 %v4195_v35  ;;  %v4366_v47 = vunpack.c.l.bf16 %v11621_v58 }
 0x5b1   :  { %13859 = vst [vmem:[#allocation32_spill] sm:$0xff] %v11676_v1  ;;  %v4367_v32 = vunpack.c.h.bf16 %v11621_v58  ;;  %v3386_v25 = vadd.f32 %v11631_v55, %v11633_v60  ;;  %v8645_v61 = vor.u32 %v9143_v4, %v8644_v27  ;;  %v3389_v5 = vadd.f32 %v3388_v28, %v3259_v21  ;;  %v3261_v28 = vpop.f32.mrf.mxu1  ;;  %v13867_v21 = vld [vmem:[#allocation91_spill] sm:$0xff] }
 0x5b2   :  { %13860 = vst [vmem:[#allocation73_spill] sm:$0xff] %v11678_v51  ;;  %v11695_v26 = vadd.f32 %v11686_v13, %v4366_v47  ;;  %v8637_v3 = vor.u32 %v9141_v48, %v8636_v53  ;;  %v13865_v7 = vunpack.c.l.bf16 %v13864_v29  ;;  %v13866_v35 = vunpack.c.h.bf16 %v13864_v29 }
 0x5b3   :  { %13861 = vst [vmem:[#allocation110_spill] sm:$0xff] %v11680_v43  ;;  %v11704_v58 = vadd.f32 %v11688_v40, %v4367_v32  ;;  %v4028_v60 = vpack.c.bf16 %v3386_v25, %v11525_v30  ;;  %6050 = vmatpush.bf16.msra.mxu3 %v8645_v61  ;;  %v4030_v55 = vpack.c.bf16 %v3389_v5, %v11532_v52  ;;  %v13868_v27 = vunpack.c.l.bf16 %v13867_v21 }
 0x5b4   :  { %13862 = vst [vmem:[#allocation25_spill] sm:$0xff] %v11682_v24  ;;  %v4412_v18 = vadd.f32 %v11654_v10, %v13865_v7  ;;  %v4413_v19 = vadd.f32 %v11656_v57, %v13866_v35  ;;  %v11711_v53 = vunpack.c.l.bf16 %v4167_v20  ;;  %v13870_v48 = vunpack.c.h.bf16 %v13867_v21 }
 0x5b5   :  { %13863 = vst [vmem:[#allocation27_spill] sm:$0xff] %v11684_v16  ;;  %v4416_v4 = vadd.f32 %v11654_v10, %v13868_v27  ;;  %v11716_v32 = vunpack.c.l.bf16 %v4171_v37  ;;  %v4370_v35 = vunpack.c.l.bf16 %v4028_v60  ;;  %v4371_v30 = vunpack.c.h.bf16 %v4028_v60 }
 0x5b6   :  { %13869 = vst [vmem:[#allocation34_spill] sm:$0xff] %v11711_v53  ;;  %v4417_v47 = vadd.f32 %v11656_v57, %v13870_v48  ;;  %v4892_v29 = vmax.f32 %v4412_v18, 0.0  ;;  %v4893_v7 = vmax.f32 %v4413_v19, 0.0  ;;  %v4374_v25 = vunpack.c.l.bf16 %v4030_v55  ;;  %v8694_v48 = vld [vmem:[#allocation5 + $0x78] sm:$0xf0] }
 0x5b7   :  { %13871 = vst [vmem:[#allocation29_spill] sm:$0xff] %v11716_v32  ;;  %v4375_v61 = vunpack.c.h.bf16 %v4030_v55  ;;  %v4896_v52 = vmax.f32 %v4416_v4, 0.0  ;;  %v11718_v16 = vunpack.c.l.bf16 %v4175_v46  ;;  %v11720_v27 = vunpack.c.l.bf16 %v4179_v31  ;;  %6051 = vmatpush.bf16.msra.mxu3 %v8637_v3  ;;  %v9154_v4 = vld [vmem:[#allocation5 + $0x74] sm:$0xf]  ;;  %v8822_v32 = vld [vmem:[#allocation5 + $0x178] sm:$0xf0] }
 0x5b8   :  { %v4897_v5 = vmax.f32 %v4417_v47, 0.0  ;;  %v5084_v17 = vpack.c.bf16 %v4893_v7, %v4892_v29  ;;  %v11723_v20 = vadd.f32 %v11686_v13, %v4374_v25  ;;  %v13874_v18 = vunpack.c.l.bf16 %v13809_v12 }
 0x5b9   :  { %13872 = vst [vmem:[#allocation106_spill] sm:$0xff] %v11718_v16  ;;  %v11729_v19 = vadd.f32 %v11688_v40, %v4375_v61  ;;  %v13875_v46 = vperm.slane %v11645_v2, 0  ;;  %v13877_v47 = vperm.slane %v11647_v38, 0  ;;  %v11740_v3 = vadd.f32 %v11686_v13, %v4370_v35  ;;  %v9202_v61 = vld [vmem:[#allocation5 + $0x1f4] sm:$0xf]  ;;  %v13880_v2 = vld [vmem:[#allocation54_spill] sm:$0xff]  ;;  %v3264_v14 = vpop.f32.mrf.mxu1 }
 0x5ba   :  { %13873 = vst [vmem:[#allocation26_spill] sm:$0xff] %v11720_v27  ;;  %v4414_v37 = vadd.f32 %v11658_v45, %v13874_v18  ;;  %v5086_v60 = vpack.c.bf16 %v4897_v5, %v4896_v52  ;;  %v5340_v55 = vunpack.c.l.b16 %v5084_v17  ;;  %v5341_v21 = vunpack.c.h.b16 %v5084_v17  ;;  %v8886_v38 = vld [vmem:[#allocation5 + $0x1f8] sm:$0xf0]  ;;  %v9186_v16 = vld [vmem:[#allocation5 + $0x174] sm:$0xf] }
 0x5bb   :  { %v11733_v31 = vunpack.c.l.bf16 %v13875_v46  ;;  %v11737_v29 = vunpack.c.l.bf16 %v13877_v47  ;;  %v13879_v7 = vunpack.c.h.bf16 %v13809_v12  ;;  %v11746_v17 = vadd.f32 %v11688_v40, %v4371_v30  ;;  %v9170_v47 = vld [vmem:[#allocation5 + $0xf4] sm:$0xf]  ;;  %v3393_v30 = vpop.f32.mrf.mxu2 }
 0x5bc   :  { %v5344_v52 = vunpack.c.l.b16 %v5086_v60  ;;  %v5345_v5 = vunpack.c.h.b16 %v5086_v60  ;;  %v13881_v18 = vunpack.c.l.bf16 %v13880_v2  ;;  %v13882_v35 = vunpack.c.h.bf16 %v13880_v2 }
 0x5bd   :  { %13876 = vst [vmem:[#allocation31_spill] sm:$0xff] %v11733_v31  ;;  %v4415_v25 = vadd.f32 %v11660_v6, %v13879_v7  ;;  %v4894_v12 = vmax.f32 %v4414_v37, 0.0  ;;  %v8697_v7 = vor.u32 %v9154_v4, %v8694_v48  ;;  %v3391_v43 = vadd.f32 %v3390_v63, %v3261_v28  ;;  %v13885_v28 = vld [vmem:[#allocation92_spill] sm:$0xff] }
 0x5be   :  { %13878 = vst [vmem:[#allocation109_spill] sm:$0xff] %v11737_v29  ;;  %v4418_v46 = vadd.f32 %v11658_v45, %v13881_v18  ;;  %v8758_v29 = vld [vmem:[#allocation5 + $0xf8] sm:$0xf0]  ;;  %v4419_v31 = vadd.f32 %v11660_v6, %v13882_v35  ;;  %v11754_v53 = vpack.c.b16 %v5344_v52, %v5340_v55  ;;  %v11756_v60 = vpack.c.b16 %v5345_v5, %v5341_v21  ;;  %v8686_v35 = vld [vmem:[#allocation5 + $0x68] sm:$0xf0] }
 0x5bf   :  { %v4895_v27 = vmax.f32 %v4415_v25, 0.0  ;;  %6560 = vmatpush.bf16.msrb.mxu3 %v8697_v7  ;;  %v8889_v1 = vor.u32 %v9202_v61, %v8886_v38  ;;  %v8761_v2 = vor.u32 %v9170_v47, %v8758_v29  ;;  %v11762_v37 = vpack.c.bf16 %v3391_v43, %v11549_v54 }
 0x5c0   :  { %13883 = vst [vmem:[#allocation16_spill] sm:$0xff] %v11754_v53  ;;  %v4898_v24 = vmax.f32 %v4418_v46, 0.0  ;;  %v4899_v18 = vmax.f32 %v4419_v31, 0.0  ;;  %6052 = vmatmul.bf16.vlgmr.msra.gmra.mxu3 %v11754_v53  ;;  %6181 = vmatmul.bf16.vlgmr.msrb.gmra.mxu0 %v11756_v60  ;;  %v8825_v55 = vor.u32 %v9186_v16, %v8822_v32  ;;  %v3394_v21 = vadd.f32 %v3393_v30, %v3264_v14 }
 0x5c1   :  { %13884 = vst [vmem:[#allocation21_spill] sm:$0xff] %v11756_v60  ;;  %v5085_v51 = vpack.c.bf16 %v4895_v27, %v4894_v12  ;;  %6947 = vmatpush.bf16.msra.mxu2 %v8889_v1  ;;  %6689 = vmatpush.bf16.msra.mxu0 %v8761_v2  ;;  %v13886_v27 = vunpack.c.l.bf16 %v13885_v28  ;;  %v13887_v54 = vunpack.c.h.bf16 %v13885_v28  ;;  %v4378_v46 = vunpack.c.l.bf16 %v11762_v37  ;;  %v13895_v28 = vld [vmem:[#allocation60_spill] sm:$0xff] }
 0x5c2   :  { %v5087_v4 = vpack.c.bf16 %v4899_v18, %v4898_v24  ;;  %6818 = vmatpush.bf16.msra.mxu1 %v8825_v55  ;;  %v4034_v61 = vpack.c.bf16 %v3394_v21, %v11559_v0 }
 0x5c3   :  { %v5342_v48 = vunpack.c.l.b16 %v5085_v51  ;;  %v5343_v63 = vunpack.c.h.b16 %v5085_v51  ;;  %v4420_v31 = vadd.f32 %v11654_v10, %v13886_v27  ;;  %v4421_v14 = vadd.f32 %v11656_v57, %v13887_v54  ;;  %v13888_v51 = vld [vmem:[#allocation95_spill] sm:$0xff] }
 0x5c4   :  { %v5346_v43 = vunpack.c.l.b16 %v5087_v4  ;;  %v5347_v24 = vunpack.c.h.b16 %v5087_v4  ;;  %v13889_v1 = vunpack.c.l.bf16 %v13888_v51  ;;  %v13890_v32 = vunpack.c.h.bf16 %v13888_v51 }
 0x5c5   :  { %v4382_v38 = vunpack.c.l.bf16 %v4034_v61  ;;  %v4383_v0 = vunpack.c.h.bf16 %v4034_v61  ;;  %v4900_v7 = vmax.f32 %v4420_v31, 0.0  ;;  %v4901_v30 = vmax.f32 %v4421_v14, 0.0  ;;  %v3395_v61 = vpop.f32.mrf.mxu2 }
 0x5c6   :  { %v4424_v16 = vadd.f32 %v11654_v10, %v13889_v1  ;;  %v4425_v52 = vadd.f32 %v11656_v57, %v13890_v32  ;;  %v11781_v47 = vpack.c.b16 %v5346_v43, %v5342_v48  ;;  %v11783_v12 = vpack.c.b16 %v5347_v24, %v5343_v63 }
 0x5c7   :  { %v11788_v55 = vadd.f32 %v11686_v13, %v4382_v38  ;;  %v11791_v21 = vadd.f32 %v11688_v40, %v4383_v0  ;;  %v5088_v63 = vpack.c.bf16 %v4901_v30, %v4900_v7  ;;  %v13896_v27 = vunpack.c.l.bf16 %v13895_v28 }
 0x5c8   :  { %13891 = vst [vmem:[#allocation76_spill] sm:$0xff] %v11781_v47  ;;  %6310 = vmatmul.bf16.vlgmr.msrb.gmra.mxu1 %v11781_v47  ;;  %6439 = vmatmul.bf16.vlgmr.msrb.gmra.mxu2 %v11783_v12  ;;  %v4904_v4 = vmax.f32 %v4424_v16, 0.0  ;;  %v4905_v48 = vmax.f32 %v4425_v52, 0.0  ;;  %v4379_v54 = vunpack.c.h.bf16 %v11762_v37  ;;  %v11800_v14 = vadd.f32 %v11686_v13, %v4378_v46  ;;  %v3266_v16 = vpop.f32.mrf.mxu1 }
 0x5c9   :  { %13892 = vst [vmem:[#allocation38_spill] sm:$0xff] %v11783_v12  ;;  %v4422_v31 = vadd.f32 %v11658_v45, %v13896_v27  ;;  %v13897_v43 = vunpack.c.h.bf16 %v13895_v28  ;;  %v13898_v51 = vunpack.c.l.bf16 %v13812_v9  ;;  %v5348_v52 = vunpack.c.l.b16 %v5088_v63 }
 0x5ca   :  { %13893 = vst [vmem:[#allocation85_spill] sm:$0xff] %v11788_v55  ;;  %v5090_v32 = vpack.c.bf16 %v4905_v48, %v4904_v4  ;;  %v5349_v38 = vunpack.c.h.b16 %v5088_v63  ;;  %v13899_v0 = vunpack.c.h.bf16 %v13812_v9  ;;  %v3396_v27 = vadd.f32 %v3395_v61, %v3266_v16  ;;  %v13903_v63 = vld [vmem:[#allocation15_spill] sm:$0xff]  ;;  %v14081_v55 = vld [vmem:[#allocation28_spill] sm:$0xff] }
 0x5cb   :  { %13894 = vst [vmem:[#allocation107_spill] sm:$0xff] %v11791_v21  ;;  %v4423_v24 = vadd.f32 %v11660_v6, %v13897_v43  ;;  %v4426_v1 = vadd.f32 %v11658_v45, %v13898_v51  ;;  %v4902_v37 = vmax.f32 %v4422_v31, 0.0  ;;  %v13900_v43 = vld [vmem:[#allocation96_spill] sm:$0xff]  ;;  %v13907_v16 = vunpack.c.h.bf16 %v13903_v63 }
 0x5cc   :  { %v4427_v7 = vadd.f32 %v11660_v6, %v13899_v0  ;;  %v5352_v2 = vunpack.c.l.b16 %v5090_v32  ;;  %v5353_v28 = vunpack.c.h.b16 %v5090_v32  ;;  %v13901_v5 = vunpack.c.l.bf16 %v13900_v43 }
 0x5cd   :  { %v4903_v30 = vmax.f32 %v4423_v24, 0.0  ;;  %v4906_v46 = vmax.f32 %v4426_v1, 0.0  ;;  %v4036_v4 = vpack.c.bf16 %v3396_v27, %v11567_v23  ;;  %v13902_v48 = vunpack.c.h.bf16 %v13900_v43 }
 0x5ce   :  { %v4907_v18 = vmax.f32 %v4427_v7, 0.0  ;;  %v4428_v25 = vadd.f32 %v11654_v10, %v13901_v5  ;;  %v13904_v0 = vunpack.c.l.bf16 %v13903_v63  ;;  %v11821_v24 = vpack.c.b16 %v5352_v2, %v5348_v52 }
 0x5cf   :  { %v5089_v51 = vpack.c.bf16 %v4903_v30, %v4902_v37  ;;  %v4429_v9 = vadd.f32 %v11656_v57, %v13902_v48  ;;  %v11823_v61 = vpack.c.b16 %v5353_v28, %v5349_v38  ;;  %v4433_v5 = vadd.f32 %v11656_v57, %v13907_v16 }
 0x5d0   :  { %v4432_v31 = vadd.f32 %v11654_v10, %v13904_v0  ;;  %13905 = vst [vmem:[#allocation80_spill] sm:$0xff] %v11821_v24  ;;  %v5091_v1 = vpack.c.bf16 %v4907_v18, %v4906_v46  ;;  %v4386_v23 = vunpack.c.l.bf16 %v4036_v4  ;;  %v4387_v37 = vunpack.c.h.bf16 %v4036_v4  ;;  %6057 = vmatmul.bf16.gmra.mxu3 %v11821_v24 }
 0x5d1   :  { %13906 = vst [vmem:[#allocation23_spill] sm:$0xff] %v11823_v61  ;;  %v5350_v32 = vunpack.c.l.b16 %v5089_v51  ;;  %v5351_v7 = vunpack.c.h.b16 %v5089_v51  ;;  %v4908_v43 = vmax.f32 %v4428_v25, 0.0  ;;  %v4909_v48 = vmax.f32 %v4429_v9, 0.0  ;;  %6186 = vmatmul.bf16.gmra.mxu0 %v11823_v61 }
 0x5d2   :  { %v5354_v30 = vunpack.c.l.b16 %v5091_v1  ;;  %v5355_v27 = vunpack.c.h.b16 %v5091_v1  ;;  %v11829_v29 = vadd.f32 %v11688_v40, %v4379_v54  ;;  %v4912_v18 = vmax.f32 %v4432_v31, 0.0 }
 0x5d3   :  { %v4913_v52 = vmax.f32 %v4433_v5, 0.0  ;;  %v5092_v28 = vpack.c.bf16 %v4909_v48, %v4908_v43  ;;  %v13910_v51 = vunpack.c.l.bf16 %v13813_v15  ;;  %v11842_v54 = vadd.f32 %v11686_v13, %v4386_v23 }
 0x5d4   :  { %v11834_v38 = vpack.c.b16 %v5354_v30, %v5350_v32  ;;  %v11836_v46 = vpack.c.b16 %v5355_v27, %v5351_v7  ;;  %v11845_v4 = vadd.f32 %v11688_v40, %v4387_v37  ;;  %v13911_v63 = vunpack.c.h.bf16 %v13813_v15 }
 0x5d5   :  { %v4430_v25 = vadd.f32 %v11658_v45, %v13910_v51  ;;  %v5094_v9 = vpack.c.bf16 %v4913_v52, %v4912_v18  ;;  %v5356_v31 = vunpack.c.l.b16 %v5092_v28  ;;  %v5357_v1 = vunpack.c.h.b16 %v5092_v28  ;;  %v13914_v18 = vld [vmem:[#allocation33_spill] sm:$0xff] }
 0x5d6   :  { %13908 = vst [vmem:[#allocation88_spill] sm:$0xff] %v11834_v38  ;;  %v4431_v0 = vadd.f32 %v11660_v6, %v13911_v63  ;;  %v13912_v16 = vunpack.c.l.bf16 %v13814_v62  ;;  %v13913_v32 = vunpack.c.h.bf16 %v13814_v62  ;;  %v13915_v15 = vunpack.c.l.bf16 %v13914_v18 }
 0x5d7   :  { %13909 = vst [vmem:[#allocation91_spill] sm:$0xff] %v11836_v46  ;;  %v5360_v23 = vunpack.c.l.b16 %v5094_v9  ;;  %v5361_v30 = vunpack.c.h.b16 %v5094_v9  ;;  %v4910_v27 = vmax.f32 %v4430_v25, 0.0  ;;  %v13916_v28 = vunpack.c.h.bf16 %v13914_v18 }
 0x5d8   :  { %v4434_v5 = vadd.f32 %v11658_v45, %v13912_v16  ;;  %v4435_v7 = vadd.f32 %v11660_v6, %v13913_v32  ;;  %v4911_v37 = vmax.f32 %v4431_v0, 0.0  ;;  %v4436_v52 = vadd.f32 %v11654_v10, %v13915_v15  ;;  %v13919_v32 = vld [vmem:[#allocation37_spill] sm:$0xff]  ;;  %6315 = vmatmul.bf16.gmra.mxu1 %v11834_v38  ;;  %6444 = vmatmul.bf16.gmra.mxu2 %v11836_v46  ;;  %v9184_v46 = vld [vmem:[#allocation5 + $0x164] sm:$0xf] }
 0x5d9   :  { %v4437_v51 = vadd.f32 %v11656_v57, %v13916_v28  ;;  %v11862_v63 = vpack.c.b16 %v5360_v23, %v5356_v31  ;;  %v11864_v16 = vpack.c.b16 %v5361_v30, %v5357_v1  ;;  %v13920_v2 = vunpack.c.l.bf16 %v13919_v32 }
 0x5da   :  { %v4914_v43 = vmax.f32 %v4434_v5, 0.0  ;;  %v4915_v48 = vmax.f32 %v4435_v7, 0.0  ;;  %v5093_v62 = vpack.c.bf16 %v4911_v37, %v4910_v27  ;;  %v13921_v0 = vunpack.c.h.bf16 %v13919_v32  ;;  %v9152_v37 = vld [vmem:[#allocation5 + $0x64] sm:$0xf] }
 0x5db   :  { %13917 = vst [vmem:[#allocation54_spill] sm:$0xff] %v11862_v63  ;;  %v4440_v25 = vadd.f32 %v11654_v10, %v13920_v2  ;;  %v4916_v7 = vmax.f32 %v4436_v52, 0.0  ;;  %v4917_v18 = vmax.f32 %v4437_v51, 0.0  ;;  %v13922_v30 = vunpack.c.l.bf16 %v11057_v22 }
 0x5dc   :  { %13918 = vst [vmem:[#allocation92_spill] sm:$0xff] %v11864_v16  ;;  %v5095_v9 = vpack.c.bf16 %v4915_v48, %v4914_v43  ;;  %v4441_v5 = vadd.f32 %v11656_v57, %v13921_v0  ;;  %v5358_v31 = vunpack.c.l.b16 %v5093_v62  ;;  %v5359_v23 = vunpack.c.h.b16 %v5093_v62  ;;  %v9200_v43 = vld [vmem:[#allocation5 + $0x1e4] sm:$0xf]  ;;  %v8878_v0 = vld [vmem:[#allocation5 + $0x1e8] sm:$0xf0] }
 0x5dd   :  { %v4920_v1 = vmax.f32 %v4440_v25, 0.0  ;;  %v4438_v27 = vadd.f32 %v11658_v45, %v13922_v30  ;;  %v5096_v28 = vpack.c.bf16 %v4917_v18, %v4916_v7  ;;  %v13923_v48 = vunpack.c.h.bf16 %v11057_v22  ;;  %v9168_v30 = vld [vmem:[#allocation5 + $0xe4] sm:$0xf]  ;;  %v8750_v22 = vld [vmem:[#allocation5 + $0xe8] sm:$0xf0] }
 0x5de   :  { %v5362_v10 = vunpack.c.l.b16 %v5095_v9  ;;  %v5363_v2 = vunpack.c.h.b16 %v5095_v9  ;;  %v4921_v15 = vmax.f32 %v4441_v5, 0.0  ;;  %v13924_v52 = vunpack.c.l.bf16 %v11066_v49 }
 0x5df   :  { %v4439_v57 = vadd.f32 %v11660_v6, %v13923_v48  ;;  %v13925_v62 = vunpack.c.h.bf16 %v11066_v49  ;;  %v4918_v25 = vmax.f32 %v4438_v27, 0.0  ;;  %v5364_v18 = vunpack.c.l.b16 %v5096_v28  ;;  %v8814_v48 = vld [vmem:[#allocation5 + $0x168] sm:$0xf0] }
 0x5e0   :  { %v4442_v51 = vadd.f32 %v11658_v45, %v13924_v52  ;;  %v11886_v9 = vpack.c.b16 %v5362_v10, %v5358_v31  ;;  %v11888_v5 = vpack.c.b16 %v5363_v2, %v5359_v23  ;;  %v5098_v7 = vpack.c.bf16 %v4921_v15, %v4920_v1  ;;  %v13930_v2 = vld [vmem:[#allocation40_spill] sm:$0xff]  ;;  %6062 = vmatmul.bf16.gmra.mxu3 %v11862_v63  ;;  %v14054_v63 = vld [vmem:[#allocation73_spill] sm:$0xff] }
 0x5e1   :  { %v4443_v32 = vadd.f32 %v11660_v6, %v13925_v62  ;;  %v5365_v38 = vunpack.c.h.b16 %v5096_v28  ;;  %v4919_v61 = vmax.f32 %v4439_v57, 0.0  ;;  %v8689_v12 = vor.u32 %v9152_v37, %v8686_v35  ;;  %6191 = vmatmul.bf16.gmra.mxu0 %v11864_v16 }
 0x5e2   :  { %13926 = vst [vmem:[#allocation95_spill] sm:$0xff] %v11886_v9  ;;  %v4922_v24 = vmax.f32 %v4442_v51, 0.0  ;;  %v5368_v52 = vunpack.c.l.b16 %v5098_v7  ;;  %v5369_v49 = vunpack.c.h.b16 %v5098_v7  ;;  %v8881_v6 = vor.u32 %v9200_v43, %v8878_v0 }
 0x5e3   :  { %13927 = vst [vmem:[#allocation60_spill] sm:$0xff] %v11888_v5  ;;  %v4923_v45 = vmax.f32 %v4443_v32, 0.0  ;;  %v5097_v27 = vpack.c.bf16 %v4919_v61, %v4918_v25  ;;  %v8753_v47 = vor.u32 %v9168_v30, %v8750_v22  ;;  %v8817_v31 = vor.u32 %v9184_v46, %v8814_v48  ;;  %6561 = vmatpush.bf16.msrb.mxu3 %v8689_v12  ;;  %v13933_v12 = vld [vmem:[#allocation63_spill] sm:$0xff] }
 0x5e4   :  { %v11891_v10 = vpack.c.b16 %v5368_v52, %v5364_v18  ;;  %v11893_v1 = vpack.c.b16 %v5369_v49, %v5365_v38  ;;  %6948 = vmatpush.bf16.msra.mxu2 %v8881_v6  ;;  %v13931_v15 = vunpack.c.l.bf16 %v13930_v2  ;;  %v13932_v37 = vunpack.c.h.bf16 %v13930_v2 }
 0x5e5   :  { %v5099_v62 = vpack.c.bf16 %v4923_v45, %v4922_v24  ;;  %v5366_v35 = vunpack.c.l.b16 %v5097_v27  ;;  %v5367_v61 = vunpack.c.h.b16 %v5097_v27  ;;  %6690 = vmatpush.bf16.msra.mxu0 %v8753_v47  ;;  %6819 = vmatpush.bf16.msra.mxu1 %v8817_v31  ;;  %v13934_v43 = vunpack.c.l.bf16 %v13933_v12 }
 0x5e6   :  { %13928 = vst [vmem:[#allocation96_spill] sm:$0xff] %v11891_v10  ;;  %v4444_v28 = vadd.f32 %v11662_v59, %v13931_v15  ;;  %v4445_v38 = vadd.f32 %v11664_v11, %v13932_v37  ;;  %v13935_v51 = vunpack.c.h.bf16 %v13933_v12  ;;  %v13938_v47 = vunpack.c.l.bf16 %v11077_v36  ;;  %v13942_v15 = vld [vmem:[#allocation44_spill] sm:$0xff] }
 0x5e7   :  { %13929 = vst [vmem:[#allocation15_spill] sm:$0xff] %v11893_v1  ;;  %v5370_v24 = vunpack.c.l.b16 %v5099_v62  ;;  %v5371_v46 = vunpack.c.h.b16 %v5099_v62  ;;  %v4448_v57 = vadd.f32 %v11662_v59, %v13934_v43  ;;  %v13939_v18 = vunpack.c.h.bf16 %v11077_v36  ;;  %v13945_v43 = vld [vmem:[#allocation68_spill] sm:$0xff] }
 0x5e8   :  { %v4449_v32 = vadd.f32 %v11664_v11, %v13935_v51  ;;  %v4924_v25 = vmax.f32 %v4444_v28, 0.0  ;;  %v4446_v7 = vadd.f32 %v11666_v44, %v13938_v47  ;;  %v4925_v48 = vmax.f32 %v4445_v38, 0.0  ;;  %6320 = vmatmul.bf16.gmra.mxu1 %v11886_v9  ;;  %6449 = vmatmul.bf16.gmra.mxu2 %v11888_v5 }
 0x5e9   :  { %v11909_v0 = vpack.c.b16 %v5370_v24, %v5366_v35  ;;  %v11911_v30 = vpack.c.b16 %v5371_v46, %v5367_v61  ;;  %v4447_v22 = vadd.f32 %v11668_v33, %v13939_v18  ;;  %v4928_v45 = vmax.f32 %v4448_v57, 0.0 }
 0x5ea   :  { %v4929_v52 = vmax.f32 %v4449_v32, 0.0  ;;  %v13940_v49 = vunpack.c.l.bf16 %v11085_v42  ;;  %v13941_v27 = vunpack.c.h.bf16 %v11085_v42  ;;  %v4926_v31 = vmax.f32 %v4446_v7, 0.0 }
 0x5eb   :  { %13936 = vst [vmem:[#allocation33_spill] sm:$0xff] %v11909_v0  ;;  %v4927_v2 = vmax.f32 %v4447_v22, 0.0  ;;  %v13943_v28 = vunpack.c.l.bf16 %v13942_v15  ;;  %v5100_v36 = vpack.c.bf16 %v4925_v48, %v4924_v25  ;;  %v13944_v46 = vunpack.c.h.bf16 %v13942_v15 }
 0x5ec   :  { %13937 = vst [vmem:[#allocation37_spill] sm:$0xff] %v11911_v30  ;;  %v4450_v6 = vadd.f32 %v11666_v44, %v13940_v49  ;;  %v4451_v62 = vadd.f32 %v11668_v33, %v13941_v27  ;;  %v5102_v24 = vpack.c.bf16 %v4929_v52, %v4928_v45  ;;  %v13946_v57 = vunpack.c.l.bf16 %v13945_v43 }
 0x5ed   :  { %v4452_v35 = vadd.f32 %v11662_v59, %v13943_v28  ;;  %v4453_v37 = vadd.f32 %v11664_v11, %v13944_v46  ;;  %v5101_v12 = vpack.c.bf16 %v4927_v2, %v4926_v31  ;;  %v13947_v51 = vunpack.c.h.bf16 %v13945_v43 }
 0x5ee   :  { %v4930_v61 = vmax.f32 %v4450_v6, 0.0  ;;  %v4931_v38 = vmax.f32 %v4451_v62, 0.0  ;;  %v4456_v42 = vadd.f32 %v11662_v59, %v13946_v57  ;;  %v5372_v25 = vunpack.c.l.b16 %v5100_v36 }
 0x5ef   :  { %v4457_v32 = vadd.f32 %v11664_v11, %v13947_v51  ;;  %v5376_v47 = vunpack.c.l.b16 %v5102_v24  ;;  %v5373_v7 = vunpack.c.h.b16 %v5100_v36  ;;  %v5377_v18 = vunpack.c.h.b16 %v5102_v24 }
 0x5f0   :  { %v5103_v22 = vpack.c.bf16 %v4931_v38, %v4930_v61  ;;  %v5374_v48 = vunpack.c.l.b16 %v5101_v12  ;;  %v5375_v45 = vunpack.c.h.b16 %v5101_v12  ;;  %v4932_v52 = vmax.f32 %v4452_v35, 0.0  ;;  %6067 = vmatmul.bf16.gmra.mxu3 %v11891_v10 }
 0x5f1   :  { %v11939_v49 = vpack.c.b16 %v5376_v47, %v5372_v25  ;;  %v11941_v6 = vpack.c.b16 %v5377_v18, %v5373_v7  ;;  %v4933_v27 = vmax.f32 %v4453_v37, 0.0  ;;  %v4936_v62 = vmax.f32 %v4456_v42, 0.0  ;;  %6196 = vmatmul.bf16.gmra.mxu0 %v11893_v1 }
 0x5f2   :  { %v5378_v31 = vunpack.c.l.b16 %v5103_v22  ;;  %v5379_v2 = vunpack.c.h.b16 %v5103_v22  ;;  %v4937_v15 = vmax.f32 %v4457_v32, 0.0  ;;  %v13950_v28 = vunpack.c.l.bf16 %v11094_v39 }
 0x5f3   :  { %13948 = vst [vmem:[#allocation40_spill] sm:$0xff] %v11939_v49  ;;  %v5104_v43 = vpack.c.bf16 %v4933_v27, %v4932_v52  ;;  %v13951_v36 = vunpack.c.h.bf16 %v11094_v39  ;;  %v13952_v35 = vunpack.c.l.bf16 %v11103_v8  ;;  %v13953_v38 = vunpack.c.h.bf16 %v11103_v8  ;;  %v13956_v52 = vld [vmem:[#allocation48_spill] sm:$0xff] }
 0x5f4   :  { %13949 = vst [vmem:[#allocation63_spill] sm:$0xff] %v11941_v6  ;;  %v4454_v46 = vadd.f32 %v11666_v44, %v13950_v28  ;;  %v11955_v12 = vpack.c.b16 %v5378_v31, %v5374_v48  ;;  %v11957_v57 = vpack.c.b16 %v5379_v2, %v5375_v45  ;;  %v5106_v42 = vpack.c.bf16 %v4937_v15, %v4936_v62  ;;  %v13959_v45 = vld [vmem:[#allocation49_spill] sm:$0xff] }
 0x5f5   :  { %v4455_v24 = vadd.f32 %v11668_v33, %v13951_v36  ;;  %v4458_v61 = vadd.f32 %v11666_v44, %v13952_v35  ;;  %v4459_v37 = vadd.f32 %v11668_v33, %v13953_v38  ;;  %v5380_v32 = vunpack.c.l.b16 %v5104_v43 }
 0x5f6   :  { %13954 = vst [vmem:[#allocation44_spill] sm:$0xff] %v11955_v12  ;;  %v4934_v51 = vmax.f32 %v4454_v46, 0.0  ;;  %v5381_v25 = vunpack.c.h.b16 %v5104_v43  ;;  %v5384_v7 = vunpack.c.l.b16 %v5106_v42  ;;  %v5385_v18 = vunpack.c.h.b16 %v5106_v42 }
 0x5f7   :  { %13955 = vst [vmem:[#allocation68_spill] sm:$0xff] %v11957_v57  ;;  %v4935_v47 = vmax.f32 %v4455_v24, 0.0  ;;  %v4938_v39 = vmax.f32 %v4458_v61, 0.0  ;;  %v4939_v22 = vmax.f32 %v4459_v37, 0.0  ;;  %v13957_v27 = vunpack.c.l.bf16 %v13956_v52 }
 0x5f8   :  { %v13958_v36 = vunpack.c.h.bf16 %v13956_v52  ;;  %v13960_v31 = vunpack.c.l.bf16 %v13959_v45  ;;  %v13961_v2 = vunpack.c.h.bf16 %v13959_v45  ;;  %v11973_v46 = vpack.c.b16 %v5384_v7, %v5380_v32  ;;  %6325 = vmatmul.bf16.gmra.mxu1 %v11909_v0  ;;  %6454 = vmatmul.bf16.gmra.mxu2 %v11911_v30  ;;  %v13978_v30 = vld [vmem:[#allocation94_spill] sm:$0xff] }
 0x5f9   :  { %v4460_v28 = vadd.f32 %v11662_v59, %v13957_v27  ;;  %v5105_v8 = vpack.c.bf16 %v4935_v47, %v4934_v51  ;;  %v11975_v43 = vpack.c.b16 %v5385_v18, %v5381_v25  ;;  %v5107_v24 = vpack.c.bf16 %v4939_v22, %v4938_v39  ;;  %v14004_v0 = vld [vmem:[#allocation18_spill] sm:$0xff] }
 0x5fa   :  { %v4461_v48 = vadd.f32 %v11664_v11, %v13958_v36  ;;  %v4464_v62 = vadd.f32 %v11662_v59, %v13960_v31  ;;  %v4465_v15 = vadd.f32 %v11664_v11, %v13961_v2  ;;  %13962 = vst [vmem:[#allocation48_spill] sm:$0xff] %v11973_v46  ;;  %v13964_v27 = vunpack.c.l.bf16 %v11114_v56 }
 0x5fb   :  { %13963 = vst [vmem:[#allocation49_spill] sm:$0xff] %v11975_v43  ;;  %v4940_v35 = vmax.f32 %v4460_v28, 0.0  ;;  %v5382_v61 = vunpack.c.l.b16 %v5105_v8  ;;  %v5383_v38 = vunpack.c.h.b16 %v5105_v8  ;;  %v5386_v51 = vunpack.c.l.b16 %v5107_v24 }
 0x5fc   :  { %v4941_v37 = vmax.f32 %v4461_v48, 0.0  ;;  %v4944_v42 = vmax.f32 %v4464_v62, 0.0  ;;  %v5387_v47 = vunpack.c.h.b16 %v5107_v24  ;;  %v4945_v52 = vmax.f32 %v4465_v15, 0.0 }
 0x5fd   :  { %v4462_v36 = vadd.f32 %v11666_v44, %v13964_v27  ;;  %v13965_v31 = vunpack.c.h.bf16 %v11114_v56  ;;  %v13966_v25 = vunpack.c.l.bf16 %v11122_v50  ;;  %v13967_v7 = vunpack.c.h.bf16 %v11122_v50  ;;  %v13970_v27 = vld [vmem:[#allocation50_spill] sm:$0xff] }
 0x5fe   :  { %v5108_v45 = vpack.c.bf16 %v4941_v37, %v4940_v35  ;;  %v11989_v22 = vpack.c.b16 %v5386_v51, %v5382_v61  ;;  %v11991_v28 = vpack.c.b16 %v5387_v47, %v5383_v38  ;;  %v5110_v8 = vpack.c.bf16 %v4945_v52, %v4944_v42  ;;  %v13973_v51 = vld [vmem:[#allocation52_spill] sm:$0xff] }
 0x5ff   :  { %v4463_v32 = vadd.f32 %v11668_v33, %v13965_v31  ;;  %v4466_v39 = vadd.f32 %v11666_v44, %v13966_v25  ;;  %v4467_v18 = vadd.f32 %v11668_v33, %v13967_v7  ;;  %v4942_v48 = vmax.f32 %v4462_v36, 0.0 }
 0x600   :  { %13968 = vst [vmem:[#allocation112_spill] sm:$0xff] %v11989_v22  ;;  %v5388_v62 = vunpack.c.l.b16 %v5108_v45  ;;  %v5389_v2 = vunpack.c.h.b16 %v5108_v45  ;;  %v5392_v24 = vunpack.c.l.b16 %v5110_v8  ;;  %v5393_v35 = vunpack.c.h.b16 %v5110_v8  ;;  %6072 = vmatmul.bf16.gmra.mxu3 %v11939_v49 }
 0x601   :  { %13969 = vst [vmem:[#allocation113_spill] sm:$0xff] %v11991_v28  ;;  %v4943_v15 = vmax.f32 %v4463_v32, 0.0  ;;  %v4946_v56 = vmax.f32 %v4466_v39, 0.0  ;;  %v4947_v37 = vmax.f32 %v4467_v18, 0.0  ;;  %v13971_v31 = vunpack.c.l.bf16 %v13970_v27  ;;  %6201 = vmatmul.bf16.gmra.mxu0 %v11941_v6 }
 0x602   :  { %v13972_v38 = vunpack.c.h.bf16 %v13970_v27  ;;  %v13974_v47 = vunpack.c.l.bf16 %v13973_v51  ;;  %v12005_v36 = vpack.c.b16 %v5392_v24, %v5388_v62  ;;  %v12007_v45 = vpack.c.b16 %v5393_v35, %v5389_v2  ;;  %v13981_v24 = vld [vmem:[#allocation77_spill] sm:$0xff] }
 0x603   :  { %v4468_v25 = vadd.f32 %v11662_v59, %v13971_v31  ;;  %v5109_v61 = vpack.c.bf16 %v4943_v15, %v4942_v48  ;;  %v5111_v32 = vpack.c.bf16 %v4947_v37, %v4946_v56  ;;  %v13977_v39 = vunpack.c.h.bf16 %v13973_v51 }
 0x604   :  { %v4469_v42 = vadd.f32 %v11664_v11, %v13972_v38  ;;  %v4472_v52 = vadd.f32 %v11662_v59, %v13974_v47  ;;  %13975 = vst [vmem:[#allocation50_spill] sm:$0xff] %v12005_v36  ;;  %v13979_v59 = vunpack.c.l.bf16 %v13978_v30  ;;  %v13980_v2 = vunpack.c.h.bf16 %v13978_v30 }
 0x605   :  { %13976 = vst [vmem:[#allocation52_spill] sm:$0xff] %v12007_v45  ;;  %v4473_v7 = vadd.f32 %v11664_v11, %v13977_v39  ;;  %v5390_v18 = vunpack.c.l.b16 %v5109_v61  ;;  %v5391_v8 = vunpack.c.h.b16 %v5109_v61  ;;  %v4948_v48 = vmax.f32 %v4468_v25, 0.0 }
 0x606   :  { %v4949_v15 = vmax.f32 %v4469_v42, 0.0  ;;  %v5394_v27 = vunpack.c.l.b16 %v5111_v32  ;;  %v5395_v31 = vunpack.c.h.b16 %v5111_v32  ;;  %v4952_v38 = vmax.f32 %v4472_v52, 0.0 }
 0x607   :  { %v4953_v50 = vmax.f32 %v4473_v7, 0.0  ;;  %v4470_v62 = vadd.f32 %v11666_v44, %v13979_v59  ;;  %v4471_v56 = vadd.f32 %v11668_v33, %v13980_v2  ;;  %v13982_v35 = vunpack.c.l.bf16 %v13981_v24  ;;  %v13986_v2 = vld [vmem:[#allocation79_spill] sm:$0xff] }
 0x608   :  { %v5112_v23 = vpack.c.bf16 %v4949_v15, %v4948_v48  ;;  %v12021_v37 = vpack.c.b16 %v5394_v27, %v5390_v18  ;;  %v12023_v25 = vpack.c.b16 %v5395_v31, %v5391_v8  ;;  %v13985_v42 = vunpack.c.h.bf16 %v13981_v24  ;;  %v13989_v27 = vld [vmem:[#allocation56_spill] sm:$0xff]  ;;  %6330 = vmatmul.bf16.gmra.mxu1 %v11955_v12  ;;  %6459 = vmatmul.bf16.gmra.mxu2 %v11957_v57 }
 0x609   :  { %v4474_v11 = vadd.f32 %v11666_v44, %v13982_v35  ;;  %v5114_v61 = vpack.c.bf16 %v4953_v50, %v4952_v38  ;;  %v4950_v32 = vmax.f32 %v4470_v62, 0.0  ;;  %v4951_v39 = vmax.f32 %v4471_v56, 0.0 }
 0x60a   :  { %13983 = vst [vmem:[#allocation94_spill] sm:$0xff] %v12021_v37  ;;  %v4475_v51 = vadd.f32 %v11668_v33, %v13985_v42  ;;  %v5396_v47 = vunpack.c.l.b16 %v5112_v23  ;;  %v5397_v52 = vunpack.c.h.b16 %v5112_v23  ;;  %v13987_v44 = vunpack.c.l.bf16 %v13986_v2  ;;  %v13996_v23 = vld [vmem:[#allocation70_spill] sm:$0xff] }
 0x60b   :  { %13984 = vst [vmem:[#allocation77_spill] sm:$0xff] %v12023_v25  ;;  %v5400_v30 = vunpack.c.l.b16 %v5114_v61  ;;  %v5401_v7 = vunpack.c.h.b16 %v5114_v61  ;;  %v4954_v48 = vmax.f32 %v4474_v11, 0.0  ;;  %v5113_v59 = vpack.c.bf16 %v4951_v39, %v4950_v32 }
 0x60c   :  { %v4955_v15 = vmax.f32 %v4475_v51, 0.0  ;;  %v4476_v18 = vadd.f32 %v11670_v34, %v13987_v44  ;;  %v13988_v8 = vunpack.c.h.bf16 %v13986_v2  ;;  %v13990_v31 = vunpack.c.l.bf16 %v13989_v27 }
 0x60d   :  { %v12040_v38 = vpack.c.b16 %v5400_v30, %v5396_v47  ;;  %v12042_v62 = vpack.c.b16 %v5401_v7, %v5397_v52  ;;  %v5398_v24 = vunpack.c.l.b16 %v5113_v59  ;;  %v5399_v35 = vunpack.c.h.b16 %v5113_v59  ;;  %v13998_v30 = vld [vmem:[#allocation32_spill] sm:$0xff] }
 0x60e   :  { %v4477_v50 = vadd.f32 %v11672_v41, %v13988_v8  ;;  %v4480_v33 = vadd.f32 %v11670_v34, %v13990_v31  ;;  %v5115_v56 = vpack.c.bf16 %v4955_v15, %v4954_v48  ;;  %v13993_v11 = vunpack.c.h.bf16 %v13989_v27  ;;  %v13994_v8 = vld [vmem:[#allocation81_spill] sm:$0xff]  ;;  %v13999_v48 = vld [vmem:[#allocation83_spill] sm:$0xff] }
 0x60f   :  { %13991 = vst [vmem:[#allocation79_spill] sm:$0xff] %v12040_v38  ;;  %v4956_v42 = vmax.f32 %v4476_v18, 0.0  ;;  %v13995_v31 = vunpack.c.l.bf16 %v13994_v8  ;;  %v13997_v52 = vunpack.c.h.bf16 %v13994_v8  ;;  %v14000_v15 = vunpack.c.l.bf16 %v13999_v48 }
 0x610   :  { %13992 = vst [vmem:[#allocation56_spill] sm:$0xff] %v12042_v62  ;;  %v4481_v61 = vadd.f32 %v11672_v41, %v13993_v11  ;;  %v5402_v51 = vunpack.c.l.b16 %v5115_v56  ;;  %v5403_v32 = vunpack.c.h.b16 %v5115_v56  ;;  %v4957_v39 = vmax.f32 %v4477_v50, 0.0  ;;  %6077 = vmatmul.bf16.gmra.mxu3 %v11973_v46  ;;  %v14052_v46 = vld [vmem:[#allocation24_spill] sm:$0xff] }
 0x611   :  { %v4960_v2 = vmax.f32 %v4480_v33, 0.0  ;;  %v4478_v47 = vadd.f32 %v13996_v23, %v13995_v31  ;;  %v4479_v7 = vadd.f32 %v13998_v30, %v13997_v52  ;;  %v4482_v59 = vadd.f32 %v13996_v23, %v14000_v15  ;;  %6206 = vmatmul.bf16.gmra.mxu0 %v11975_v43 }
 0x612   :  { %v4961_v44 = vmax.f32 %v4481_v61, 0.0  ;;  %v12056_v27 = vpack.c.b16 %v5402_v51, %v5398_v24  ;;  %v12058_v18 = vpack.c.b16 %v5403_v32, %v5399_v35  ;;  %v5116_v56 = vpack.c.bf16 %v4957_v39, %v4956_v42  ;;  %v9150_v24 = vld [vmem:[#allocation5 + $0x54] sm:$0xf]  ;;  %v8678_v35 = vld [vmem:[#allocation5 + $0x58] sm:$0xf0] }
 0x613   :  { %v14003_v50 = vunpack.c.h.bf16 %v13999_v48  ;;  %v4958_v61 = vmax.f32 %v4478_v47, 0.0  ;;  %v4959_v31 = vmax.f32 %v4479_v7, 0.0  ;;  %v4962_v6 = vmax.f32 %v4482_v59, 0.0  ;;  %v9198_v42 = vld [vmem:[#allocation5 + $0x1d4] sm:$0xf] }
 0x614   :  { %14001 = vst [vmem:[#allocation81_spill] sm:$0xff] %v12056_v27  ;;  %v5118_v11 = vpack.c.bf16 %v4961_v44, %v4960_v2  ;;  %v5404_v8 = vunpack.c.l.b16 %v5116_v56  ;;  %v5405_v49 = vunpack.c.h.b16 %v5116_v56  ;;  %v14005_v1 = vunpack.c.l.bf16 %v14004_v0  ;;  %v8870_v7 = vld [vmem:[#allocation5 + $0x1d8] sm:$0xf0]  ;;  %v9166_v48 = vld [vmem:[#allocation5 + $0xd4] sm:$0xf] }
 0x615   :  { %14002 = vst [vmem:[#allocation70_spill] sm:$0xff] %v12058_v18  ;;  %v4483_v33 = vadd.f32 %v13998_v30, %v14003_v50  ;;  %v5117_v39 = vpack.c.bf16 %v4959_v31, %v4958_v61  ;;  %v14006_v2 = vunpack.c.h.bf16 %v14004_v0  ;;  %v8681_v47 = vor.u32 %v9150_v24, %v8678_v35  ;;  %v8742_v59 = vld [vmem:[#allocation5 + $0xd8] sm:$0xf0]  ;;  %v9182_v61 = vld [vmem:[#allocation5 + $0x154] sm:$0xf] }
 0x616   :  { %v4484_v15 = vadd.f32 %v11670_v34, %v14005_v1  ;;  %v5408_v51 = vunpack.c.l.b16 %v5118_v11  ;;  %v5409_v32 = vunpack.c.h.b16 %v5118_v11  ;;  %v14007_v1 = vld [vmem:[#allocation62_spill] sm:$0xff]  ;;  %v8873_v10 = vor.u32 %v9198_v42, %v8870_v7  ;;  %v8806_v31 = vld [vmem:[#allocation5 + $0x158] sm:$0xf0] }
 0x617   :  { %v4963_v52 = vmax.f32 %v4483_v33, 0.0  ;;  %v4485_v44 = vadd.f32 %v11672_v41, %v14006_v2  ;;  %v14008_v50 = vunpack.c.l.bf16 %v14007_v1  ;;  %v14009_v57 = vunpack.c.h.bf16 %v14007_v1  ;;  %6562 = vmatpush.bf16.msrb.mxu3 %v8681_v47  ;;  %v14013_v7 = vld [vmem:[#allocation86_spill] sm:$0xff] }
 0x618   :  { %v8745_v11 = vor.u32 %v9166_v48, %v8742_v59  ;;  %v12077_v0 = vpack.c.b16 %v5408_v51, %v5404_v8  ;;  %v12079_v2 = vpack.c.b16 %v5409_v32, %v5405_v49  ;;  %v8809_v24 = vor.u32 %v9182_v61, %v8806_v31  ;;  %6949 = vmatpush.bf16.msra.mxu2 %v8873_v10 }
 0x619   :  { %v5119_v56 = vpack.c.bf16 %v4963_v52, %v4962_v6  ;;  %v4488_v33 = vadd.f32 %v11670_v34, %v14008_v50  ;;  %v4489_v12 = vadd.f32 %v11672_v41, %v14009_v57  ;;  %v5406_v35 = vunpack.c.l.b16 %v5117_v39  ;;  %6335 = vmatmul.bf16.gmra.mxu1 %v11989_v22  ;;  %6464 = vmatmul.bf16.gmra.mxu2 %v11991_v28 }
 0x61a   :  { %14010 = vst [vmem:[#allocation32_spill] sm:$0xff] %v12077_v0  ;;  %v5407_v52 = vunpack.c.h.b16 %v5117_v39  ;;  %6691 = vmatpush.bf16.msra.mxu0 %v8745_v11  ;;  %v4964_v5 = vmax.f32 %v4484_v15, 0.0  ;;  %v4965_v1 = vmax.f32 %v4485_v44, 0.0  ;;  %6820 = vmatpush.bf16.msra.mxu1 %v8809_v24  ;;  %v14014_v8 = vunpack.c.l.bf16 %v14013_v7  ;;  %v14017_v39 = vld [vmem:[#allocation90_spill] sm:$0xff]  ;;  %v14020_v11 = vld [vmem:[#allocation20_spill] sm:$0xff] }
 0x61b   :  { %14011 = vst [vmem:[#allocation83_spill] sm:$0xff] %v12079_v2  ;;  %v5410_v6 = vunpack.c.l.b16 %v5119_v56  ;;  %v5411_v50 = vunpack.c.h.b16 %v5119_v56  ;;  %v4968_v9 = vmax.f32 %v4488_v33, 0.0  ;;  %v4969_v42 = vmax.f32 %v4489_v12, 0.0 }
 0x61c   :  { %v4486_v49 = vadd.f32 %v13996_v23, %v14014_v8  ;;  %v14015_v51 = vunpack.c.h.bf16 %v14013_v7  ;;  %v5120_v10 = vpack.c.bf16 %v4965_v1, %v4964_v5  ;;  %v14018_v48 = vunpack.c.l.bf16 %v14017_v39  ;;  %v14023_v8 = vld [vmem:[#allocation67_spill] sm:$0xff] }
 0x61d   :  { %v12081_v57 = vpack.c.b16 %v5410_v6, %v5406_v35  ;;  %v12089_v47 = vpack.c.b16 %v5411_v50, %v5407_v52  ;;  %v14019_v44 = vunpack.c.h.bf16 %v14017_v39  ;;  %v5122_v12 = vpack.c.bf16 %v4969_v42, %v4968_v9 }
 0x61e   :  { %v4487_v32 = vadd.f32 %v13998_v30, %v14015_v51  ;;  %v4490_v15 = vadd.f32 %v13996_v23, %v14018_v48  ;;  %v4966_v56 = vmax.f32 %v4486_v49, 0.0  ;;  %v14021_v61 = vunpack.c.l.bf16 %v14020_v11 }
 0x61f   :  { %14012 = vst [vmem:[#allocation18_spill] sm:$0xff] %v12081_v57  ;;  %v4491_v59 = vadd.f32 %v13998_v30, %v14019_v44  ;;  %v5412_v24 = vunpack.c.l.b16 %v5120_v10  ;;  %v5413_v35 = vunpack.c.h.b16 %v5120_v10  ;;  %v5416_v5 = vunpack.c.l.b16 %v5122_v12 }
 0x620   :  { %14016 = vst [vmem:[#allocation62_spill] sm:$0xff] %v12089_v47  ;;  %v4967_v33 = vmax.f32 %v4487_v32, 0.0  ;;  %v4492_v31 = vadd.f32 %v11670_v34, %v14021_v61  ;;  %v4970_v6 = vmax.f32 %v4490_v15, 0.0  ;;  %v5417_v50 = vunpack.c.h.b16 %v5122_v12  ;;  %6082 = vmatmul.bf16.gmra.mxu3 %v12005_v36 }
 0x621   :  { %v4971_v52 = vmax.f32 %v4491_v59, 0.0  ;;  %v14022_v7 = vunpack.c.h.bf16 %v14020_v11  ;;  %v14024_v49 = vunpack.c.l.bf16 %v14023_v8  ;;  %v14025_v32 = vunpack.c.h.bf16 %v14023_v8  ;;  %6211 = vmatmul.bf16.gmra.mxu0 %v12007_v45  ;;  %v14064_v45 = vld [vmem:[#allocation27_spill] sm:$0xff] }
 0x622   :  { %v5121_v1 = vpack.c.bf16 %v4967_v33, %v4966_v56  ;;  %v4972_v39 = vmax.f32 %v4492_v31, 0.0  ;;  %v12111_v48 = vpack.c.b16 %v5416_v5, %v5412_v24  ;;  %v12113_v15 = vpack.c.b16 %v5417_v50, %v5413_v35  ;;  %v14031_v31 = vld [vmem:[#allocation58_spill] sm:$0xff] }
 0x623   :  { %v4493_v9 = vadd.f32 %v11672_v41, %v14022_v7  ;;  %v5123_v42 = vpack.c.bf16 %v4971_v52, %v4970_v6  ;;  %v4496_v51 = vadd.f32 %v11670_v34, %v14024_v49  ;;  %v4497_v10 = vadd.f32 %v11672_v41, %v14025_v32  ;;  %v14028_v6 = vld [vmem:[#allocation104_spill] sm:$0xff] }
 0x624   :  { %14026 = vst [vmem:[#allocation86_spill] sm:$0xff] %v12111_v48  ;;  %v5414_v44 = vunpack.c.l.b16 %v5121_v1  ;;  %v5415_v59 = vunpack.c.h.b16 %v5121_v1  ;;  %v14029_v52 = vunpack.c.l.bf16 %v14028_v6  ;;  %v14030_v8 = vunpack.c.h.bf16 %v14028_v6 }
 0x625   :  { %14027 = vst [vmem:[#allocation90_spill] sm:$0xff] %v12113_v15  ;;  %v5418_v12 = vunpack.c.l.b16 %v5123_v42  ;;  %v5419_v56 = vunpack.c.h.b16 %v5123_v42  ;;  %v4973_v33 = vmax.f32 %v4493_v9, 0.0  ;;  %v4976_v11 = vmax.f32 %v4496_v51, 0.0 }
 0x626   :  { %v4977_v61 = vmax.f32 %v4497_v10, 0.0  ;;  %v4494_v7 = vadd.f32 %v13996_v23, %v14029_v52  ;;  %v4495_v49 = vadd.f32 %v13998_v30, %v14030_v8  ;;  %v14032_v24 = vunpack.c.l.bf16 %v14031_v31 }
 0x627   :  { %v12124_v5 = vpack.c.b16 %v5418_v12, %v5414_v44  ;;  %v12126_v50 = vpack.c.b16 %v5419_v56, %v5415_v59  ;;  %v5124_v1 = vpack.c.bf16 %v4973_v33, %v4972_v39  ;;  %v14035_v9 = vunpack.c.h.bf16 %v14031_v31  ;;  %v14036_v44 = vld [vmem:[#allocation71_spill] sm:$0xff] }
 0x628   :  { %v4498_v35 = vadd.f32 %v13996_v23, %v14032_v24  ;;  %v5126_v51 = vpack.c.bf16 %v4977_v61, %v4976_v11  ;;  %v4974_v32 = vmax.f32 %v4494_v7, 0.0  ;;  %v4975_v10 = vmax.f32 %v4495_v49, 0.0  ;;  %v14039_v7 = vld [vmem:[#allocation97_spill] sm:$0xff] }
 0x629   :  { %14033 = vst [vmem:[#allocation20_spill] sm:$0xff] %v12124_v5  ;;  %v4499_v42 = vadd.f32 %v13998_v30, %v14035_v9  ;;  %v5420_v6 = vunpack.c.l.b16 %v5124_v1  ;;  %v5421_v8 = vunpack.c.h.b16 %v5124_v1  ;;  %v14037_v12 = vunpack.c.l.bf16 %v14036_v44  ;;  %6340 = vmatmul.bf16.gmra.mxu1 %v12021_v37  ;;  %6469 = vmatmul.bf16.gmra.mxu2 %v12023_v25 }
 0x62a   :  { %14034 = vst [vmem:[#allocation67_spill] sm:$0xff] %v12126_v50  ;;  %v4978_v52 = vmax.f32 %v4498_v35, 0.0  ;;  %v5424_v39 = vunpack.c.l.b16 %v5126_v51  ;;  %v5425_v56 = vunpack.c.h.b16 %v5126_v51  ;;  %v5125_v33 = vpack.c.bf16 %v4975_v10, %v4974_v32 }
 0x62b   :  { %v4979_v24 = vmax.f32 %v4499_v42, 0.0  ;;  %v4500_v59 = vadd.f32 %v11670_v34, %v14037_v12  ;;  %v14038_v31 = vunpack.c.h.bf16 %v14036_v44  ;;  %v14040_v49 = vunpack.c.l.bf16 %v14039_v7 }
 0x62c   :  { %v14041_v9 = vunpack.c.h.bf16 %v14039_v7  ;;  %v12145_v28 = vpack.c.b16 %v5424_v39, %v5420_v6  ;;  %v12147_v12 = vpack.c.b16 %v5425_v56, %v5421_v8  ;;  %v5422_v51 = vunpack.c.l.b16 %v5125_v33 }
 0x62d   :  { %v4501_v11 = vadd.f32 %v11672_v41, %v14038_v31  ;;  %v5127_v61 = vpack.c.bf16 %v4979_v24, %v4978_v52  ;;  %v4504_v35 = vadd.f32 %v11670_v34, %v14040_v49  ;;  %v4980_v42 = vmax.f32 %v4500_v59, 0.0  ;;  %v14044_v24 = vld [vmem:[#allocation69_spill] sm:$0xff]  ;;  %v14047_v59 = vld [vmem:[#allocation19_spill] sm:$0xff] }
 0x62e   :  { %v4505_v1 = vadd.f32 %v11672_v41, %v14041_v9  ;;  %14042 = vst [vmem:[#allocation104_spill] sm:$0xff] %v12145_v28  ;;  %v5423_v32 = vunpack.c.h.b16 %v5125_v33  ;;  %v14045_v43 = vunpack.c.l.bf16 %v14044_v24  ;;  %v14046_v7 = vunpack.c.h.bf16 %v14044_v24 }
 0x62f   :  { %14043 = vst [vmem:[#allocation58_spill] sm:$0xff] %v12147_v12  ;;  %v5426_v10 = vunpack.c.l.b16 %v5127_v61  ;;  %v5427_v44 = vunpack.c.h.b16 %v5127_v61  ;;  %v4981_v22 = vmax.f32 %v4501_v11, 0.0  ;;  %v4984_v31 = vmax.f32 %v4504_v35, 0.0 }
 0x630   :  { %v4985_v52 = vmax.f32 %v4505_v1, 0.0  ;;  %v4502_v34 = vadd.f32 %v13996_v23, %v14045_v43  ;;  %v4503_v41 = vadd.f32 %v13998_v30, %v14046_v7  ;;  %v14048_v6 = vunpack.c.l.bf16 %v14047_v59  ;;  %6087 = vmatmul.bf16.gmra.mxu3 %v12040_v38 }
 0x631   :  { %v12158_v39 = vpack.c.b16 %v5426_v10, %v5422_v51  ;;  %v12160_v56 = vpack.c.b16 %v5427_v44, %v5423_v32  ;;  %v5128_v33 = vpack.c.bf16 %v4981_v22, %v4980_v42  ;;  %v14051_v11 = vunpack.c.h.bf16 %v14047_v59  ;;  %v14056_v32 = vld [vmem:[#allocation110_spill] sm:$0xff]  ;;  %6216 = vmatmul.bf16.gmra.mxu0 %v12042_v62 }
 0x632   :  { %v4506_v8 = vadd.f32 %v13996_v23, %v14048_v6  ;;  %v5130_v49 = vpack.c.bf16 %v4985_v52, %v4984_v31  ;;  %v4982_v35 = vmax.f32 %v4502_v34, 0.0  ;;  %v4983_v43 = vmax.f32 %v4503_v41, 0.0  ;;  %v14057_v31 = vld [vmem:[#allocation78_spill] sm:$0xff] }
 0x633   :  { %14049 = vst [vmem:[#allocation71_spill] sm:$0xff] %v12158_v39  ;;  %v4507_v61 = vadd.f32 %v13998_v30, %v14051_v11  ;;  %v5428_v1 = vunpack.c.l.b16 %v5128_v33  ;;  %v5429_v24 = vunpack.c.h.b16 %v5128_v33  ;;  %v14053_v16 = vunpack.c.l.bf16 %v14052_v46 }
 0x634   :  { %14050 = vst [vmem:[#allocation97_spill] sm:$0xff] %v12160_v56  ;;  %v4986_v9 = vmax.f32 %v4506_v8, 0.0  ;;  %v5432_v22 = vunpack.c.l.b16 %v5130_v49  ;;  %v5433_v42 = vunpack.c.h.b16 %v5130_v49  ;;  %v5129_v51 = vpack.c.bf16 %v4983_v43, %v4982_v35 }
 0x635   :  { %v4987_v7 = vmax.f32 %v4507_v61, 0.0  ;;  %v4508_v23 = vadd.f32 %v14054_v63, %v14053_v16  ;;  %v14055_v30 = vunpack.c.h.bf16 %v14052_v46  ;;  %v14058_v52 = vunpack.c.l.bf16 %v14057_v31 }
 0x636   :  { %v14059_v41 = vunpack.c.h.bf16 %v14057_v31  ;;  %v12179_v6 = vpack.c.b16 %v5432_v22, %v5428_v1  ;;  %v12181_v8 = vpack.c.b16 %v5433_v42, %v5429_v24  ;;  %v5430_v33 = vunpack.c.l.b16 %v5129_v51 }
 0x637   :  { %v4509_v10 = vadd.f32 %v14056_v32, %v14055_v30  ;;  %v5131_v44 = vpack.c.bf16 %v4987_v7, %v4986_v9  ;;  %v4512_v34 = vadd.f32 %v14054_v63, %v14058_v52  ;;  %v4988_v59 = vmax.f32 %v4508_v23, 0.0  ;;  %v14060_v9 = vld [vmem:[#allocation42_spill] sm:$0xff]  ;;  %v14062_v30 = vld [vmem:[#allocation25_spill] sm:$0xff] }
 0x638   :  { %v4513_v16 = vadd.f32 %v14056_v32, %v14059_v41  ;;  %v5431_v11 = vunpack.c.h.b16 %v5129_v51  ;;  %v14061_v7 = vunpack.c.l.bf16 %v14060_v9  ;;  %v14063_v31 = vunpack.c.h.bf16 %v14060_v9  ;;  %v14065_v23 = vld [vmem:[#allocation61_spill] sm:$0xff] }
 0x639   :  { %v5434_v61 = vunpack.c.l.b16 %v5131_v44  ;;  %v5435_v46 = vunpack.c.h.b16 %v5131_v44  ;;  %v4989_v49 = vmax.f32 %v4509_v10, 0.0  ;;  %v4992_v35 = vmax.f32 %v4512_v34, 0.0  ;;  %6345 = vmatmul.bf16.gmra.mxu1 %v12056_v27  ;;  %6474 = vmatmul.bf16.gmra.mxu2 %v12058_v18 }
 0x63a   :  { %v4993_v43 = vmax.f32 %v4513_v16, 0.0  ;;  %v4510_v52 = vadd.f32 %v14062_v30, %v14061_v7  ;;  %v4511_v41 = vadd.f32 %v14064_v45, %v14063_v31  ;;  %v14066_v1 = vunpack.c.l.bf16 %v14065_v23 }
 0x63b   :  { %v12192_v22 = vpack.c.b16 %v5434_v61, %v5430_v33  ;;  %v12194_v42 = vpack.c.b16 %v5435_v46, %v5431_v11  ;;  %v5132_v51 = vpack.c.bf16 %v4989_v49, %v4988_v59  ;;  %v14067_v10 = vunpack.c.h.bf16 %v14065_v23  ;;  %v14068_v33 = vld [vmem:[#allocation82_spill] sm:$0xff] }
 0x63c   :  { %v4514_v24 = vadd.f32 %v14062_v30, %v14066_v1  ;;  %v5134_v34 = vpack.c.bf16 %v4993_v43, %v4992_v35  ;;  %v4990_v16 = vmax.f32 %v4510_v52, 0.0  ;;  %v4991_v7 = vmax.f32 %v4511_v41, 0.0  ;;  %v14071_v52 = vld [vmem:[#allocation98_spill] sm:$0xff] }
 0x63d   :  { %v4515_v44 = vadd.f32 %v14064_v45, %v14067_v10  ;;  %v5436_v9 = vunpack.c.l.b16 %v5132_v51  ;;  %v5437_v31 = vunpack.c.h.b16 %v5132_v51  ;;  %v14069_v61 = vunpack.c.l.bf16 %v14068_v33 }
 0x63e   :  { %v4994_v36 = vmax.f32 %v4514_v24, 0.0  ;;  %v5440_v59 = vunpack.c.l.b16 %v5134_v34  ;;  %v5441_v46 = vunpack.c.h.b16 %v5134_v34  ;;  %v5133_v49 = vpack.c.bf16 %v4991_v7, %v4990_v16 }
 0x63f   :  { %v4995_v1 = vmax.f32 %v4515_v44, 0.0  ;;  %v4516_v11 = vadd.f32 %v14054_v63, %v14069_v61  ;;  %v14070_v23 = vunpack.c.h.bf16 %v14068_v33  ;;  %v14072_v41 = vunpack.c.l.bf16 %v14071_v52 }
 0x640   :  { %v14073_v10 = vunpack.c.h.bf16 %v14071_v52  ;;  %v12213_v25 = vpack.c.b16 %v5440_v59, %v5436_v9  ;;  %v12215_v61 = vpack.c.b16 %v5441_v46, %v5437_v31  ;;  %v5438_v34 = vunpack.c.l.b16 %v5133_v49  ;;  %6092 = vmatmul.bf16.gmra.mxu3 %v12077_v0  ;;  %v14122_v0 = vld [vmem:[#allocation105_spill] sm:$0xff] }
 0x641   :  { %v4517_v35 = vadd.f32 %v14056_v32, %v14070_v23  ;;  %v5135_v43 = vpack.c.bf16 %v4995_v1, %v4994_v36  ;;  %v4520_v24 = vadd.f32 %v14054_v63, %v14072_v41  ;;  %v4996_v44 = vmax.f32 %v4516_v11, 0.0  ;;  %v14075_v1 = vld [vmem:[#allocation75_spill] sm:$0xff]  ;;  %v14078_v11 = vld [vmem:[#allocation65_spill] sm:$0xff]  ;;  %6221 = vmatmul.bf16.gmra.mxu0 %v12079_v2 }
 0x642   :  { %v4521_v51 = vadd.f32 %v14056_v32, %v14073_v10  ;;  %14074 = vst [vmem:[#allocation69_spill] sm:$0xff] %v12215_v61  ;;  %v5439_v16 = vunpack.c.h.b16 %v5133_v49  ;;  %v14076_v60 = vunpack.c.l.bf16 %v14075_v1  ;;  %v14077_v52 = vunpack.c.h.bf16 %v14075_v1 }
 0x643   :  { %v5442_v7 = vunpack.c.l.b16 %v5135_v43  ;;  %v5443_v33 = vunpack.c.h.b16 %v5135_v43  ;;  %v4997_v37 = vmax.f32 %v4517_v35, 0.0  ;;  %v5000_v23 = vmax.f32 %v4520_v24, 0.0 }
 0x644   :  { %v5001_v36 = vmax.f32 %v4521_v51, 0.0  ;;  %v4518_v41 = vadd.f32 %v14062_v30, %v14076_v60  ;;  %v4519_v10 = vadd.f32 %v14064_v45, %v14077_v52  ;;  %v14079_v9 = vunpack.c.l.bf16 %v14078_v11 }
 0x645   :  { %v12226_v59 = vpack.c.b16 %v5442_v7, %v5438_v34  ;;  %v12228_v46 = vpack.c.b16 %v5443_v33, %v5439_v16  ;;  %v5136_v49 = vpack.c.bf16 %v4997_v37, %v4996_v44  ;;  %v14080_v35 = vunpack.c.h.bf16 %v14078_v11 }
 0x646   :  { %v4522_v31 = vadd.f32 %v14062_v30, %v14079_v9  ;;  %v5138_v24 = vpack.c.bf16 %v5001_v36, %v5000_v23  ;;  %v4998_v51 = vmax.f32 %v4518_v41, 0.0  ;;  %v4999_v60 = vmax.f32 %v4519_v10, 0.0  ;;  %v14084_v23 = vld [vmem:[#allocation87_spill] sm:$0xff] }
 0x647   :  { %v4523_v43 = vadd.f32 %v14064_v45, %v14080_v35  ;;  %v5444_v1 = vunpack.c.l.b16 %v5136_v49  ;;  %v5445_v21 = vunpack.c.h.b16 %v5136_v49  ;;  %v14082_v61 = vunpack.c.l.bf16 %v14081_v55 }
 0x648   :  { %v5002_v53 = vmax.f32 %v4522_v31, 0.0  ;;  %v5448_v37 = vunpack.c.l.b16 %v5138_v24  ;;  %v5449_v44 = vunpack.c.h.b16 %v5138_v24  ;;  %v5137_v34 = vpack.c.bf16 %v4999_v60, %v4998_v51 }
 0x649   :  { %v5003_v52 = vmax.f32 %v4523_v43, 0.0  ;;  %v4524_v9 = vadd.f32 %v14054_v63, %v14082_v61  ;;  %v14083_v16 = vunpack.c.h.bf16 %v14081_v55  ;;  %v14085_v36 = vunpack.c.l.bf16 %v14084_v23  ;;  %6350 = vmatmul.bf16.gmra.mxu1 %v12081_v57  ;;  %6479 = vmatmul.bf16.gmra.mxu2 %v12089_v47 }
 0x64a   :  { %v14086_v10 = vunpack.c.h.bf16 %v14084_v23  ;;  %v12247_v31 = vpack.c.b16 %v5448_v37, %v5444_v1  ;;  %v12249_v49 = vpack.c.b16 %v5449_v44, %v5445_v21  ;;  %v5446_v35 = vunpack.c.l.b16 %v5137_v34 }
 0x64b   :  { %v4525_v7 = vadd.f32 %v14056_v32, %v14083_v16  ;;  %v5139_v33 = vpack.c.bf16 %v5003_v52, %v5002_v53  ;;  %v4528_v41 = vadd.f32 %v14054_v63, %v14085_v36  ;;  %v5004_v11 = vmax.f32 %v4524_v9, 0.0  ;;  %v14088_v52 = vld [vmem:[#allocation84_spill] sm:$0xff]  ;;  %v14091_v9 = vld [vmem:[#allocation66_spill] sm:$0xff] }
 0x64c   :  { %v4529_v61 = vadd.f32 %v14056_v32, %v14086_v10  ;;  %14087 = vst [vmem:[#allocation19_spill] sm:$0xff] %v12249_v49  ;;  %v5447_v43 = vunpack.c.h.b16 %v5137_v34  ;;  %v14089_v16 = vunpack.c.l.bf16 %v14088_v52  ;;  %v14090_v23 = vunpack.c.h.bf16 %v14088_v52  ;;  %v9148_v52 = vld [vmem:[#allocation5 + $0x44] sm:$0xf] }
 0x64d   :  { %v5450_v24 = vunpack.c.l.b16 %v5139_v33  ;;  %v5451_v55 = vunpack.c.h.b16 %v5139_v33  ;;  %v5005_v51 = vmax.f32 %v4525_v7, 0.0  ;;  %v5008_v60 = vmax.f32 %v4528_v41, 0.0 }
 0x64e   :  { %v5009_v53 = vmax.f32 %v4529_v61, 0.0  ;;  %v4526_v36 = vadd.f32 %v14062_v30, %v14089_v16  ;;  %v4527_v10 = vadd.f32 %v14064_v45, %v14090_v23  ;;  %v14092_v1 = vunpack.c.l.bf16 %v14091_v9  ;;  %v8670_v23 = vld [vmem:[#allocation5 + $0x48] sm:$0xf0] }
 0x64f   :  { %v12260_v37 = vpack.c.b16 %v5450_v24, %v5446_v35  ;;  %v12262_v44 = vpack.c.b16 %v5451_v55, %v5447_v43  ;;  %v5140_v34 = vpack.c.bf16 %v5005_v51, %v5004_v11  ;;  %v14095_v7 = vunpack.c.h.bf16 %v14091_v9  ;;  %v14096_v43 = vld [vmem:[#allocation30_spill] sm:$0xff] }
 0x650   :  { %v4530_v21 = vadd.f32 %v14062_v30, %v14092_v1  ;;  %v5142_v41 = vpack.c.bf16 %v5009_v53, %v5008_v60  ;;  %v5006_v61 = vmax.f32 %v4526_v36, 0.0  ;;  %v5007_v16 = vmax.f32 %v4527_v10, 0.0  ;;  %6097 = vmatmul.bf16.gmra.mxu3 %v12111_v48 }
 0x651   :  { %14093 = vst [vmem:[#allocation24_spill] sm:$0xff] %v12260_v37  ;;  %v4531_v33 = vadd.f32 %v14064_v45, %v14095_v7  ;;  %v5452_v1 = vunpack.c.l.b16 %v5140_v34  ;;  %v5453_v35 = vunpack.c.h.b16 %v5140_v34  ;;  %v14097_v55 = vunpack.c.l.bf16 %v14096_v43  ;;  %6226 = vmatmul.bf16.gmra.mxu0 %v12113_v15 }
 0x652   :  { %14094 = vst [vmem:[#allocation73_spill] sm:$0xff] %v12262_v44  ;;  %v5010_v62 = vmax.f32 %v4530_v21, 0.0  ;;  %v8673_v51 = vor.u32 %v9148_v52, %v8670_v23  ;;  %v5456_v9 = vunpack.c.l.b16 %v5142_v41  ;;  %v5457_v7 = vunpack.c.h.b16 %v5142_v41  ;;  %v14099_v21 = vld [vmem:[#allocation99_spill] sm:$0xff]  ;;  %v9164_v44 = vld [vmem:[#allocation5 + $0xc4] sm:$0xf] }
 0x653   :  { %v5011_v24 = vmax.f32 %v4531_v33, 0.0  ;;  %v4532_v11 = vadd.f32 %v14054_v63, %v14097_v55  ;;  %v5141_v60 = vpack.c.bf16 %v5007_v16, %v5006_v61  ;;  %v14098_v36 = vunpack.c.h.bf16 %v14096_v43  ;;  %v8862_v16 = vld [vmem:[#allocation5 + $0x1c8] sm:$0xf0] }
 0x654   :  { %v14100_v18 = vunpack.c.l.bf16 %v14099_v21  ;;  %v14101_v34 = vunpack.c.h.bf16 %v14099_v21  ;;  %6563 = vmatpush.bf16.msrb.mxu3 %v8673_v51  ;;  %v12281_v38 = vpack.c.b16 %v5456_v9, %v5452_v1  ;;  %v12283_v52 = vpack.c.b16 %v5457_v7, %v5453_v35  ;;  %v14104_v21 = vld [vmem:[#allocation89_spill] sm:$0xff]  ;;  %v14107_v51 = vld [vmem:[#allocation74_spill] sm:$0xff] }
 0x655   :  { %v5143_v53 = vpack.c.bf16 %v5011_v24, %v5010_v62  ;;  %v4533_v10 = vadd.f32 %v14056_v32, %v14098_v36  ;;  %v5454_v41 = vunpack.c.l.b16 %v5141_v60  ;;  %v5455_v61 = vunpack.c.h.b16 %v5141_v60  ;;  %v9196_v62 = vld [vmem:[#allocation5 + $0x1c4] sm:$0xf]  ;;  %v6182_v60 = vpop.f32.mrf.mxu0 }
 0x656   :  { %v4536_v27 = vadd.f32 %v14054_v63, %v14100_v18  ;;  %v4537_v33 = vadd.f32 %v14056_v32, %v14101_v34  ;;  %14102 = vst [vmem:[#allocation110_spill] sm:$0xff] %v12281_v38  ;;  %v5012_v43 = vmax.f32 %v4532_v11, 0.0  ;;  %v8865_v36 = vor.u32 %v9196_v62, %v8862_v16  ;;  %v8734_v63 = vld [vmem:[#allocation5 + $0xc8] sm:$0xf0]  ;;  %v9180_v18 = vld [vmem:[#allocation5 + $0x144] sm:$0xf] }
 0x657   :  { %14103 = vst [vmem:[#allocation78_spill] sm:$0xff] %v12283_v52  ;;  %v5458_v23 = vunpack.c.l.b16 %v5143_v53  ;;  %v5459_v24 = vunpack.c.h.b16 %v5143_v53  ;;  %v5013_v55 = vmax.f32 %v4533_v10, 0.0  ;;  %v14105_v37 = vunpack.c.l.bf16 %v14104_v21  ;;  %v8798_v11 = vld [vmem:[#allocation5 + $0x148] sm:$0xf0] }
 0x658   :  { %v14106_v1 = vunpack.c.h.bf16 %v14104_v21  ;;  %v14108_v9 = vunpack.c.l.bf16 %v14107_v51  ;;  %v8737_v53 = vor.u32 %v9164_v44, %v8734_v63  ;;  %v5016_v62 = vmax.f32 %v4536_v27, 0.0  ;;  %6950 = vmatpush.bf16.msra.mxu2 %v8865_v36  ;;  %v14114_v63 = vld [vmem:[#allocation34_spill] sm:$0xff]  ;;  %v14117_v36 = vld [vmem:[#allocation101_spill] sm:$0xff] }
 0x659   :  { %v4534_v32 = vadd.f32 %v14062_v30, %v14105_v37  ;;  %v12294_v10 = vpack.c.b16 %v5458_v23, %v5454_v41  ;;  %v12296_v34 = vpack.c.b16 %v5459_v24, %v5455_v61  ;;  %v8801_v16 = vor.u32 %v9180_v18, %v8798_v11  ;;  %6355 = vmatmul.bf16.gmra.mxu1 %v12124_v5 }
 0x65a   :  { %v4535_v35 = vadd.f32 %v14064_v45, %v14106_v1  ;;  %v4538_v7 = vadd.f32 %v14062_v30, %v14108_v9  ;;  %v5017_v52 = vmax.f32 %v4537_v33, 0.0  ;;  %v5144_v37 = vpack.c.bf16 %v5013_v55, %v5012_v43  ;;  %6692 = vmatpush.bf16.msra.mxu0 %v8737_v53  ;;  %v14112_v9 = vld [vmem:[#allocation100_spill] sm:$0xff]  ;;  %v14116_v43 = vld [vmem:[#allocation29_spill] sm:$0xff]  ;;  %6484 = vmatmul.bf16.gmra.mxu2 %v12126_v50 }
 0x65b   :  { %14109 = vst [vmem:[#allocation42_spill] sm:$0xff] %v12294_v10  ;;  %v14111_v21 = vunpack.c.h.bf16 %v14107_v51  ;;  %v5014_v38 = vmax.f32 %v4534_v32, 0.0  ;;  %v14113_v44 = vunpack.c.l.bf16 %v14112_v9  ;;  %6821 = vmatpush.bf16.msra.mxu1 %v8801_v16  ;;  %v14118_v18 = vunpack.c.l.bf16 %v14117_v36 }
 0x65c   :  { %14110 = vst [vmem:[#allocation25_spill] sm:$0xff] %v12296_v34  ;;  %v5015_v49 = vmax.f32 %v4535_v35, 0.0  ;;  %v5018_v30 = vmax.f32 %v4538_v7, 0.0  ;;  %v5146_v27 = vpack.c.bf16 %v5017_v52, %v5016_v62  ;;  %v5460_v61 = vunpack.c.l.b16 %v5144_v37  ;;  %v6053_v62 = vpop.f32.mrf.mxu3 }
 0x65d   :  { %v4539_v1 = vadd.f32 %v14064_v45, %v14111_v21  ;;  %v4540_v41 = vadd.f32 %v14114_v63, %v14113_v44  ;;  %v5461_v33 = vunpack.c.h.b16 %v5144_v37  ;;  %v14115_v45 = vunpack.c.h.bf16 %v14112_v9  ;;  %v6311_v21 = vpop.f32.mrf.mxu1 }
 0x65e   :  { %v5145_v24 = vpack.c.bf16 %v5015_v49, %v5014_v38  ;;  %v4544_v32 = vadd.f32 %v14114_v63, %v14118_v18  ;;  %v14119_v35 = vunpack.c.h.bf16 %v14117_v36  ;;  %v5464_v7 = vunpack.c.l.b16 %v5146_v27  ;;  %v6184_v18 = vpop.f32.mrf.mxu0 }
 0x65f   :  { %v5019_v23 = vmax.f32 %v4539_v1, 0.0  ;;  %v4541_v55 = vadd.f32 %v14116_v43, %v14115_v45  ;;  %v5465_v53 = vunpack.c.h.b16 %v5146_v27  ;;  %v5020_v11 = vmax.f32 %v4540_v41, 0.0 }
 0x660   :  { %v4545_v51 = vadd.f32 %v14116_v43, %v14119_v35  ;;  %v5462_v37 = vunpack.c.l.b16 %v5145_v24  ;;  %v5463_v16 = vunpack.c.h.b16 %v5145_v24  ;;  %v5024_v49 = vmax.f32 %v4544_v32, 0.0  ;;  %6102 = vmatmul.bf16.gmra.mxu3 %v12145_v28 }
 0x661   :  { %v5147_v52 = vpack.c.bf16 %v5019_v23, %v5018_v30  ;;  %v5021_v38 = vmax.f32 %v4541_v55, 0.0  ;;  %v6183_v1 = vadd.f32 %v6182_v60, %v6053_v62  ;;  %v12315_v9 = vpack.c.b16 %v5464_v7, %v5460_v61  ;;  %v14124_v30 = vld [vmem:[#allocation106_spill] sm:$0xff]  ;;  %v14128_v61 = vld [vmem:[#allocation53_spill] sm:$0xff]  ;;  %6231 = vmatmul.bf16.gmra.mxu0 %v12147_v12 }
 0x662   :  { %v12317_v44 = vpack.c.b16 %v5465_v53, %v5461_v33  ;;  %v5025_v2 = vmax.f32 %v4545_v51, 0.0  ;;  %v14123_v27 = vunpack.c.l.bf16 %v14122_v0  ;;  %v14126_v24 = vunpack.c.h.bf16 %v14122_v0  ;;  %v14127_v55 = vld [vmem:[#allocation26_spill] sm:$0xff] }
 0x663   :  { %14120 = vst [vmem:[#allocation27_spill] sm:$0xff] %v12315_v9  ;;  %v5466_v45 = vunpack.c.l.b16 %v5147_v52  ;;  %v5467_v36 = vunpack.c.h.b16 %v5147_v52  ;;  %v5148_v35 = vpack.c.bf16 %v5021_v38, %v5020_v11  ;;  %v6312_v23 = vadd.f32 %v6311_v21, %v6183_v1 }
 0x664   :  { %14121 = vst [vmem:[#allocation61_spill] sm:$0xff] %v12317_v44  ;;  %v4542_v41 = vadd.f32 %v14124_v30, %v14123_v27  ;;  %v4543_v60 = vadd.f32 %v14127_v55, %v14126_v24  ;;  %v14129_v32 = vunpack.c.l.bf16 %v14128_v61  ;;  %v5150_v7 = vpack.c.bf16 %v5025_v2, %v5024_v49  ;;  %v6440_v2 = vpop.f32.mrf.mxu2 }
 0x665   :  { %v12322_v34 = vpack.c.b16 %v5466_v45, %v5462_v37  ;;  %v12332_v51 = vpack.c.b16 %v5467_v36, %v5463_v16  ;;  %v5468_v53 = vunpack.c.l.b16 %v5148_v35  ;;  %v5469_v52 = vunpack.c.h.b16 %v5148_v35  ;;  %v14132_v45 = vld [vmem:[#allocation102_spill] sm:$0xff]  ;;  %v14135_v35 = vld [vmem:[#allocation103_spill] sm:$0xff] }
 0x666   :  { %v4546_v33 = vadd.f32 %v14124_v30, %v14129_v32  ;;  %v14131_v11 = vunpack.c.h.bf16 %v14128_v61  ;;  %v5022_v0 = vmax.f32 %v4542_v41, 0.0  ;;  %v5023_v37 = vmax.f32 %v4543_v60, 0.0 }
 0x667   :  { %14125 = vst [vmem:[#allocation82_spill] sm:$0xff] %v12322_v34  ;;  %v5472_v21 = vunpack.c.l.b16 %v5150_v7  ;;  %v5473_v1 = vunpack.c.h.b16 %v5150_v7  ;;  %v14133_v27 = vunpack.c.l.bf16 %v14132_v45  ;;  %v14134_v32 = vunpack.c.h.bf16 %v14132_v45  ;;  %v6055_v7 = vpop.f32.mrf.mxu3 }
 0x668   :  { %14130 = vst [vmem:[#allocation98_spill] sm:$0xff] %v12332_v51  ;;  %v4547_v62 = vadd.f32 %v14127_v55, %v14131_v11  ;;  %v5026_v38 = vmax.f32 %v4546_v33, 0.0  ;;  %v5149_v36 = vpack.c.bf16 %v5023_v37, %v5022_v0  ;;  %v14136_v61 = vunpack.c.l.bf16 %v14135_v35  ;;  %v6187_v51 = vpop.f32.mrf.mxu0 }
 0x669   :  { %v4548_v24 = vadd.f32 %v14114_v63, %v14133_v27  ;;  %v4549_v16 = vadd.f32 %v14116_v43, %v14134_v32  ;;  %v14137_v41 = vunpack.c.h.bf16 %v14135_v35  ;;  %v12349_v33 = vadd.f32 %v6440_v2, %v6312_v23  ;;  %v6313_v32 = vpop.f32.mrf.mxu1  ;;  %v14141_v35 = vld [vmem:[#allocation108_spill] sm:$0xff]  ;;  %6360 = vmatmul.bf16.gmra.mxu1 %v12158_v39 }
 0x66a   :  { %v5027_v49 = vmax.f32 %v4547_v62, 0.0  ;;  %v4552_v11 = vadd.f32 %v14114_v63, %v14136_v61  ;;  %v12351_v47 = vpack.c.b16 %v5472_v21, %v5468_v53  ;;  %v12353_v27 = vpack.c.b16 %v5473_v1, %v5469_v52  ;;  %6489 = vmatmul.bf16.gmra.mxu2 %v12160_v56  ;;  %v9178_v39 = vld [vmem:[#allocation5 + $0x134] sm:$0xf] }
 0x66b   :  { %v4553_v60 = vadd.f32 %v14116_v43, %v14137_v41  ;;  %14138 = vst [vmem:[#allocation75_spill] sm:$0xff] %v12349_v33  ;;  %v5028_v45 = vmax.f32 %v4548_v24, 0.0  ;;  %v6185_v57 = vadd.f32 %v6184_v18, %v6055_v7  ;;  %v5470_v0 = vunpack.c.l.b16 %v5149_v36 }
 0x66c   :  { %14139 = vst [vmem:[#allocation65_spill] sm:$0xff] %v12351_v47  ;;  %v5151_v62 = vpack.c.bf16 %v5027_v49, %v5026_v38  ;;  %v5471_v37 = vunpack.c.h.b16 %v5149_v36  ;;  %v5029_v34 = vmax.f32 %v4549_v16, 0.0  ;;  %v5032_v61 = vmax.f32 %v4552_v11, 0.0  ;;  %v14144_v38 = vld [vmem:[#allocation57_spill] sm:$0xff] }
 0x66d   :  { %14140 = vst [vmem:[#allocation28_spill] sm:$0xff] %v12353_v27  ;;  %v5033_v44 = vmax.f32 %v4553_v60, 0.0  ;;  %v14142_v9 = vunpack.c.l.bf16 %v14141_v35  ;;  %v6314_v2 = vadd.f32 %v6313_v32, %v6185_v57  ;;  %v14143_v52 = vunpack.c.h.bf16 %v14141_v35  ;;  %v6442_v32 = vpop.f32.mrf.mxu2 }
 0x66e   :  { %v5474_v41 = vunpack.c.l.b16 %v5151_v62  ;;  %v5475_v53 = vunpack.c.h.b16 %v5151_v62  ;;  %v5152_v1 = vpack.c.bf16 %v5029_v34, %v5028_v45  ;;  %v14145_v24 = vunpack.c.l.bf16 %v14144_v38 }
 0x66f   :  { %v4550_v23 = vadd.f32 %v14124_v30, %v14142_v9  ;;  %v4551_v21 = vadd.f32 %v14127_v55, %v14143_v52  ;;  %v5154_v18 = vpack.c.bf16 %v5033_v44, %v5032_v61  ;;  %v14146_v16 = vunpack.c.h.bf16 %v14144_v38  ;;  %v14149_v52 = vld [vmem:[#allocation35_spill] sm:$0xff] }
 0x670   :  { %v4554_v49 = vadd.f32 %v14124_v30, %v14145_v24  ;;  %v12369_v57 = vpack.c.b16 %v5474_v41, %v5470_v0  ;;  %v12371_v9 = vpack.c.b16 %v5475_v53, %v5471_v37  ;;  %v5476_v34 = vunpack.c.l.b16 %v5152_v1  ;;  %v6058_v0 = vpop.f32.mrf.mxu3  ;;  %6107 = vmatmul.bf16.gmra.mxu3 %v12179_v6 }
 0x671   :  { %v4555_v36 = vadd.f32 %v14127_v55, %v14146_v16  ;;  %v5030_v11 = vmax.f32 %v4550_v23, 0.0  ;;  %v5031_v60 = vmax.f32 %v4551_v21, 0.0  ;;  %v5480_v44 = vunpack.c.l.b16 %v5154_v18  ;;  %v6316_v21 = vpop.f32.mrf.mxu1  ;;  %6236 = vmatmul.bf16.gmra.mxu0 %v12181_v8 }
 0x672   :  { %14147 = vst [vmem:[#allocation87_spill] sm:$0xff] %v12369_v57  ;;  %v5477_v7 = vunpack.c.h.b16 %v5152_v1  ;;  %v5481_v45 = vunpack.c.h.b16 %v5154_v18  ;;  %v5034_v62 = vmax.f32 %v4554_v49, 0.0  ;;  %v14150_v38 = vunpack.c.l.bf16 %v14149_v52 }
 0x673   :  { %14148 = vst [vmem:[#allocation84_spill] sm:$0xff] %v12371_v9  ;;  %v5035_v61 = vmax.f32 %v4555_v36, 0.0  ;;  %v5153_v35 = vpack.c.bf16 %v5031_v60, %v5030_v11  ;;  %v12376_v16 = vadd.f32 %v6442_v32, %v6314_v2  ;;  %v12378_v41 = vpack.c.b16 %v5480_v44, %v5476_v34  ;;  %v6189_v11 = vpop.f32.mrf.mxu0  ;;  %v14153_v60 = vld [vmem:[#allocation17_spill] sm:$0xff] }
 0x674   :  { %v4556_v24 = vadd.f32 %v14114_v63, %v14150_v38  ;;  %v12380_v37 = vpack.c.b16 %v5481_v45, %v5477_v7  ;;  %v14152_v23 = vunpack.c.h.bf16 %v14149_v52  ;;  %v6188_v1 = vadd.f32 %v6187_v51, %v6058_v0 }
 0x675   :  { %14151 = vst [vmem:[#allocation66_spill] sm:$0xff] %v12376_v16  ;;  %v5155_v18 = vpack.c.bf16 %v5035_v61, %v5034_v62  ;;  %v5478_v49 = vunpack.c.l.b16 %v5153_v35  ;;  %v5479_v36 = vunpack.c.h.b16 %v5153_v35  ;;  %v14154_v15 = vunpack.c.l.bf16 %v14153_v60 }
 0x676   :  { %v4557_v53 = vadd.f32 %v14116_v43, %v14152_v23  ;;  %v14155_v32 = vunpack.c.h.bf16 %v14153_v60  ;;  %v5036_v44 = vmax.f32 %v4556_v24, 0.0  ;;  %v6317_v45 = vadd.f32 %v6316_v21, %v6188_v1  ;;  %v14156_v23 = vld [vmem:[#allocation111_spill] sm:$0xff]  ;;  %v14160_v21 = vld [vmem:[#allocation64_spill] sm:$0xff] }
 0x677   :  { %v4560_v2 = vadd.f32 %v14114_v63, %v14154_v15  ;;  %v5482_v52 = vunpack.c.l.b16 %v5155_v18  ;;  %v5483_v38 = vunpack.c.h.b16 %v5155_v18  ;;  %v14157_v16 = vunpack.c.l.bf16 %v14156_v23 }
 0x678   :  { %v4561_v34 = vadd.f32 %v14116_v43, %v14155_v32  ;;  %v5037_v7 = vmax.f32 %v4557_v53, 0.0  ;;  %v14158_v35 = vunpack.c.h.bf16 %v14156_v23  ;;  %v14161_v1 = vunpack.c.l.bf16 %v14160_v21  ;;  %v6060_v5 = vpop.f32.mrf.mxu3 }
 0x679   :  { %v4558_v51 = vadd.f32 %v14124_v30, %v14157_v16  ;;  %v5040_v62 = vmax.f32 %v4560_v2, 0.0  ;;  %v12399_v24 = vpack.c.b16 %v5482_v52, %v5478_v49  ;;  %v12401_v53 = vpack.c.b16 %v5483_v38, %v5479_v36  ;;  %v14163_v49 = vld [vmem:[#allocation36_spill] sm:$0xff]  ;;  %6365 = vmatmul.bf16.gmra.mxu1 %v12192_v22 }
 0x67a   :  { %v5041_v61 = vmax.f32 %v4561_v34, 0.0  ;;  %v5156_v15 = vpack.c.bf16 %v5037_v7, %v5036_v44  ;;  %v4559_v0 = vadd.f32 %v14127_v55, %v14158_v35  ;;  %v4562_v18 = vadd.f32 %v14124_v30, %v14161_v1  ;;  %v6445_v7 = vpop.f32.mrf.mxu2  ;;  %6494 = vmatmul.bf16.gmra.mxu2 %v12194_v42 }
 0x67b   :  { %14159 = vst [vmem:[#allocation30_spill] sm:$0xff] %v12401_v53  ;;  %v14162_v16 = vunpack.c.h.bf16 %v14160_v21  ;;  %v5038_v44 = vmax.f32 %v4558_v51, 0.0  ;;  %v14164_v52 = vunpack.c.l.bf16 %v14163_v49  ;;  %v12412_v38 = vadd.f32 %v6445_v7, %v6317_v45  ;;  %v6192_v33 = vpop.f32.mrf.mxu0 }
 0x67c   :  { %v5158_v32 = vpack.c.bf16 %v5041_v61, %v5040_v62  ;;  %v5484_v2 = vunpack.c.l.b16 %v5156_v15  ;;  %v5485_v34 = vunpack.c.h.b16 %v5156_v15  ;;  %v5039_v23 = vmax.f32 %v4559_v0, 0.0  ;;  %v6318_v61 = vpop.f32.mrf.mxu1  ;;  %v14167_v0 = vld [vmem:[#allocation59_spill] sm:$0xff] }
 0x67d   :  { %v4563_v60 = vadd.f32 %v14127_v55, %v14162_v16  ;;  %v5042_v50 = vmax.f32 %v4562_v18, 0.0  ;;  %v4564_v36 = vadd.f32 %v14114_v63, %v14164_v52  ;;  %14165 = vst [vmem:[#allocation99_spill] sm:$0xff] %v12412_v38  ;;  %v14166_v21 = vunpack.c.h.bf16 %v14163_v49 }
 0x67e   :  { %v5488_v1 = vunpack.c.l.b16 %v5158_v32  ;;  %v5489_v48 = vunpack.c.h.b16 %v5158_v32  ;;  %v6190_v15 = vadd.f32 %v6189_v11, %v6060_v5  ;;  %v5157_v51 = vpack.c.bf16 %v5039_v23, %v5038_v44 }
 0x67f   :  { %v5043_v35 = vmax.f32 %v4563_v60, 0.0  ;;  %v4565_v62 = vadd.f32 %v14116_v43, %v14166_v21  ;;  %v14168_v18 = vunpack.c.l.bf16 %v14167_v0  ;;  %v14170_v7 = vunpack.c.h.bf16 %v14167_v0 }
 0x680   :  { %v12420_v53 = vpack.c.b16 %v5488_v1, %v5484_v2  ;;  %v12422_v45 = vpack.c.b16 %v5489_v48, %v5485_v34  ;;  %v5044_v49 = vmax.f32 %v4564_v36, 0.0  ;;  %v6319_v52 = vadd.f32 %v6318_v61, %v6190_v15  ;;  %v14172_v2 = vld [vmem:[#allocation55_spill] sm:$0xff]  ;;  %v14176_v15 = vld [vmem:[#allocation93_spill] sm:$0xff]  ;;  %6112 = vmatmul.bf16.gmra.mxu3 %v12213_v25 }
 0x681   :  { %v5159_v16 = vpack.c.bf16 %v5043_v35, %v5042_v50  ;;  %v4568_v60 = vadd.f32 %v14114_v63, %v14168_v18  ;;  %v4569_v32 = vadd.f32 %v14116_v43, %v14170_v7  ;;  %v5486_v21 = vunpack.c.l.b16 %v5157_v51 }
 0x682   :  { %14169 = vst [vmem:[#allocation89_spill] sm:$0xff] %v12422_v45  ;;  %v5487_v5 = vunpack.c.h.b16 %v5157_v51  ;;  %v5045_v50 = vmax.f32 %v4565_v62, 0.0  ;;  %v14173_v34 = vunpack.c.l.bf16 %v14172_v2  ;;  %v14174_v35 = vunpack.c.h.bf16 %v14172_v2  ;;  %v6447_v0 = vpop.f32.mrf.mxu2  ;;  %v14181_v2 = vld [vmem:[#allocation31_spill] sm:$0xff] }
 0x683   :  { %v5490_v38 = vunpack.c.l.b16 %v5159_v16  ;;  %v5491_v11 = vunpack.c.h.b16 %v5159_v16  ;;  %v5048_v44 = vmax.f32 %v4568_v60, 0.0  ;;  %v5049_v23 = vmax.f32 %v4569_v32, 0.0  ;;  %v14179_v32 = vld [vmem:[#allocation39_spill] sm:$0xff] }
 0x684   :  { %v4566_v43 = vadd.f32 %v14124_v30, %v14173_v34  ;;  %v4567_v36 = vadd.f32 %v14127_v55, %v14174_v35  ;;  %v5160_v62 = vpack.c.bf16 %v5045_v50, %v5044_v49  ;;  %v14177_v51 = vunpack.c.l.bf16 %v14176_v15 }
 0x685   :  { %v12430_v48 = vpack.c.b16 %v5490_v38, %v5486_v21  ;;  %v12438_v1 = vpack.c.b16 %v5491_v11, %v5487_v5  ;;  %v5162_v61 = vpack.c.bf16 %v5049_v23, %v5048_v44  ;;  %v14178_v38 = vunpack.c.h.bf16 %v14176_v15  ;;  %v6063_v5 = vpop.f32.mrf.mxu3  ;;  %v6321_v44 = vpop.f32.mrf.mxu1 }
 0x686   :  { %v4570_v16 = vadd.f32 %v14124_v30, %v14177_v51  ;;  %v5046_v60 = vmax.f32 %v4566_v43, 0.0  ;;  %v5047_v7 = vmax.f32 %v4567_v36, 0.0  ;;  %v14180_v21 = vunpack.c.l.bf16 %v14179_v32  ;;  %v6194_v15 = vpop.f32.mrf.mxu0  ;;  %v14185_v36 = vld [vmem:[#allocation109_spill] sm:$0xff] }
 0x687   :  { %14171 = vst [vmem:[#allocation74_spill] sm:$0xff] %v12430_v48  ;;  %v4571_v18 = vadd.f32 %v14127_v55, %v14178_v38  ;;  %v12449_v35 = vadd.f32 %v6447_v0, %v6319_v52  ;;  %v5492_v49 = vunpack.c.l.b16 %v5160_v62  ;;  %v5496_v11 = vunpack.c.l.b16 %v5162_v61 }
 0x688   :  { %14175 = vst [vmem:[#allocation100_spill] sm:$0xff] %v12438_v1  ;;  %v4572_v34 = vadd.f32 %v14181_v2, %v14180_v21  ;;  %v5493_v50 = vunpack.c.h.b16 %v5160_v62  ;;  %v6193_v23 = vadd.f32 %v6192_v33, %v6063_v5  ;;  %v5497_v30 = vunpack.c.h.b16 %v5162_v61  ;;  %v14186_v21 = vld [vmem:[#allocation41_spill] sm:$0xff] }
 0x689   :  { %14182 = vst [vmem:[#allocation34_spill] sm:$0xff] %v12449_v35  ;;  %v5050_v51 = vmax.f32 %v4570_v16, 0.0  ;;  %v5051_v63 = vmax.f32 %v4571_v18, 0.0  ;;  %v12451_v12 = vpack.c.b16 %v5496_v11, %v5492_v49  ;;  %v5161_v55 = vpack.c.bf16 %v5047_v7, %v5046_v60  ;;  %v9146_v16 = vld [vmem:[#allocation5 + $0x34] sm:$0xf]  ;;  %6370 = vmatmul.bf16.gmra.mxu1 %v12226_v59 }
 0x68a   :  { %v14184_v43 = vunpack.c.h.bf16 %v14179_v32  ;;  %v14187_v52 = vunpack.c.l.bf16 %v14186_v21  ;;  %v6322_v35 = vadd.f32 %v6321_v44, %v6193_v23  ;;  %v12459_v28 = vpack.c.b16 %v5497_v30, %v5493_v50  ;;  %v8662_v18 = vld [vmem:[#allocation5 + $0x38] sm:$0xf0]  ;;  %v14190_v30 = vld [vmem:[#allocation46_spill] sm:$0xff]  ;;  %6499 = vmatmul.bf16.gmra.mxu2 %v12228_v46 }
 0x68b   :  { %14183 = vst [vmem:[#allocation29_spill] sm:$0xff] %v12451_v12  ;;  %v5163_v62 = vpack.c.bf16 %v5051_v63, %v5050_v51  ;;  %v14189_v33 = vunpack.c.h.bf16 %v14186_v21  ;;  %v5494_v60 = vunpack.c.l.b16 %v5161_v55  ;;  %v5495_v7 = vunpack.c.h.b16 %v5161_v55  ;;  %v14195_v55 = vld [vmem:[#allocation22_spill] sm:$0xff] }
 0x68c   :  { %v4573_v38 = vadd.f32 %v14185_v36, %v14184_v43  ;;  %v4576_v0 = vadd.f32 %v14181_v2, %v14187_v52  ;;  %14188 = vst [vmem:[#allocation101_spill] sm:$0xff] %v12459_v28  ;;  %v5052_v32 = vmax.f32 %v4572_v34, 0.0  ;;  %v8665_v49 = vor.u32 %v9146_v16, %v8662_v18 }
 0x68d   :  { %v4577_v61 = vadd.f32 %v14185_v36, %v14189_v33  ;;  %v5498_v11 = vunpack.c.l.b16 %v5163_v62  ;;  %v5499_v44 = vunpack.c.h.b16 %v5163_v62  ;;  %v14191_v51 = vunpack.c.l.bf16 %v14190_v30  ;;  %v6450_v33 = vpop.f32.mrf.mxu2  ;;  %v6065_v18 = vpop.f32.mrf.mxu3 }
 0x68e   :  { %v5053_v5 = vmax.f32 %v4573_v38, 0.0  ;;  %v5056_v50 = vmax.f32 %v4576_v0, 0.0  ;;  %v14192_v21 = vunpack.c.h.bf16 %v14190_v30  ;;  %6564 = vmatpush.bf16.msrb.mxu3 %v8665_v49  ;;  %v14196_v38 = vunpack.c.l.bf16 %v14195_v55 }
 0x68f   :  { %v5057_v23 = vmax.f32 %v4577_v61, 0.0  ;;  %v4574_v43 = vadd.f32 %v11686_v13, %v14191_v51  ;;  %v12472_v56 = vpack.c.b16 %v5498_v11, %v5494_v60  ;;  %v12474_v34 = vpack.c.b16 %v5499_v44, %v5495_v7  ;;  %v6323_v60 = vpop.f32.mrf.mxu1  ;;  %v9162_v44 = vld [vmem:[#allocation5 + $0xb4] sm:$0xf] }
 0x690   :  { %v5164_v63 = vpack.c.bf16 %v5053_v5, %v5052_v32  ;;  %v4575_v52 = vadd.f32 %v11688_v40, %v14192_v21  ;;  %v4578_v0 = vadd.f32 %v11686_v13, %v14196_v38  ;;  %v14197_v62 = vunpack.c.h.bf16 %v14195_v55  ;;  %v9194_v32 = vld [vmem:[#allocation5 + $0x1b4] sm:$0xf]  ;;  %v8854_v5 = vld [vmem:[#allocation5 + $0x1b8] sm:$0xf0]  ;;  %6117 = vmatmul.bf16.gmra.mxu3 %v12247_v31 }
 0x691   :  { %14193 = vst [vmem:[#allocation105_spill] sm:$0xff] %v12472_v56  ;;  %v12482_v16 = vadd.f32 %v6450_v33, %v6322_v35  ;;  %v5166_v30 = vpack.c.bf16 %v5057_v23, %v5056_v50  ;;  %v6195_v11 = vadd.f32 %v6194_v15, %v6065_v18  ;;  %v8857_v7 = vor.u32 %v9194_v32, %v8854_v5  ;;  %v8726_v21 = vld [vmem:[#allocation5 + $0xb8] sm:$0xf0]  ;;  %v6197_v33 = vpop.f32.mrf.mxu0 }
 0x692   :  { %14194 = vst [vmem:[#allocation106_spill] sm:$0xff] %v12474_v34  ;;  %v4579_v61 = vadd.f32 %v11688_v40, %v14197_v62  ;;  %v5500_v51 = vunpack.c.l.b16 %v5164_v63  ;;  %v5501_v49 = vunpack.c.h.b16 %v5164_v63  ;;  %v14199_v34 = vld [vmem:[#allocation43_spill] sm:$0xff]  ;;  %v8729_v38 = vor.u32 %v9162_v44, %v8726_v21  ;;  %v8790_v62 = vld [vmem:[#allocation5 + $0x138] sm:$0xf0] }
 0x693   :  { %14198 = vst [vmem:[#allocation26_spill] sm:$0xff] %v12482_v16  ;;  %v14200_v13 = vunpack.c.l.bf16 %v14199_v34  ;;  %v14201_v40 = vunpack.c.h.bf16 %v14199_v34  ;;  %v5504_v50 = vunpack.c.l.b16 %v5166_v30  ;;  %v5505_v23 = vunpack.c.h.b16 %v5166_v30  ;;  %6951 = vmatpush.bf16.msra.mxu2 %v8857_v7  ;;  %v14202_v34 = vld [vmem:[#allocation45_spill] sm:$0xff] }
 0x694   :  { %v5054_v63 = vmax.f32 %v4574_v43, 0.0  ;;  %v6324_v16 = vadd.f32 %v6323_v60, %v6195_v11  ;;  %v8793_v15 = vor.u32 %v9178_v39, %v8790_v62  ;;  %v5055_v18 = vmax.f32 %v4575_v52, 0.0  ;;  %6693 = vmatpush.bf16.msra.mxu0 %v8729_v38 }
 0x695   :  { %v4580_v55 = vadd.f32 %v14181_v2, %v14200_v13  ;;  %v4581_v35 = vadd.f32 %v14185_v36, %v14201_v40  ;;  %v5058_v32 = vmax.f32 %v4578_v0, 0.0  ;;  %v12490_v5 = vpack.c.b16 %v5504_v50, %v5500_v51  ;;  %v6452_v21 = vpop.f32.mrf.mxu2 }
 0x696   :  { %v12492_v56 = vpack.c.b16 %v5505_v23, %v5501_v49  ;;  %v5059_v13 = vmax.f32 %v4579_v61, 0.0  ;;  %v14203_v28 = vunpack.c.l.bf16 %v14202_v34  ;;  %v5165_v43 = vpack.c.bf16 %v5055_v18, %v5054_v63  ;;  %6822 = vmatpush.bf16.msra.mxu1 %v8793_v15 }
 0x697   :  { %v14204_v30 = vunpack.c.h.bf16 %v14202_v34  ;;  %v5060_v52 = vmax.f32 %v4580_v55, 0.0  ;;  %v5061_v0 = vmax.f32 %v4581_v35, 0.0  ;;  %v14205_v61 = vmax.f32 %v11695_v26, 0.0  ;;  %v6068_v35 = vpop.f32.mrf.mxu3  ;;  %v6326_v26 = vpop.f32.mrf.mxu1 }
 0x698   :  { %v4584_v40 = vadd.f32 %v14181_v2, %v14203_v28  ;;  %v5167_v51 = vpack.c.bf16 %v5059_v13, %v5058_v32  ;;  %v14206_v60 = vmax.f32 %v11704_v58, 0.0  ;;  %v14207_v28 = vmax.f32 %v11740_v3, 0.0 }
 0x699   :  { %v4585_v39 = vadd.f32 %v14185_v36, %v14204_v30  ;;  %v14208_v7 = vmax.f32 %v11746_v17, 0.0  ;;  %v5502_v38 = vunpack.c.l.b16 %v5165_v43  ;;  %v5503_v62 = vunpack.c.h.b16 %v5165_v43  ;;  %v6199_v3 = vpop.f32.mrf.mxu0 }
 0x69a   :  { %v5064_v49 = vmax.f32 %v4584_v40, 0.0  ;;  %v5169_v11 = vpack.c.bf16 %v14206_v60, %v14205_v61  ;;  %v5168_v23 = vpack.c.bf16 %v5061_v0, %v5060_v52  ;;  %v12510_v55 = vadd.f32 %v6452_v21, %v6324_v16 }
 0x69b   :  { %v5171_v44 = vpack.c.bf16 %v14208_v7, %v14207_v28  ;;  %v5065_v50 = vmax.f32 %v4585_v39, 0.0  ;;  %v5506_v63 = vunpack.c.l.b16 %v5167_v51  ;;  %v5507_v15 = vunpack.c.h.b16 %v5167_v51  ;;  %v14210_v51 = vld [vmem:[#allocation47_spill] sm:$0xff] }
 0x69c   :  { %v5510_v18 = vunpack.c.l.b16 %v5169_v11  ;;  %v6198_v32 = vadd.f32 %v6197_v33, %v6068_v35  ;;  %v5508_v13 = vunpack.c.l.b16 %v5168_v23  ;;  %v5509_v34 = vunpack.c.h.b16 %v5168_v23 }
 0x69d   :  { %v5170_v58 = vpack.c.bf16 %v5065_v50, %v5064_v49  ;;  %v12512_v40 = vpack.c.b16 %v5506_v63, %v5502_v38  ;;  %v12514_v17 = vpack.c.b16 %v5507_v15, %v5503_v62  ;;  %v5514_v30 = vunpack.c.l.b16 %v5171_v44 }
 0x69e   :  { %v5511_v43 = vunpack.c.h.b16 %v5169_v11  ;;  %v6327_v39 = vadd.f32 %v6326_v26, %v6198_v32  ;;  %v5515_v0 = vunpack.c.h.b16 %v5171_v44  ;;  %v5083_v61 = vmax.f32 %v11845_v4, 0.0  ;;  %v14214_v4 = vld [vmem:[#allocation72_spill] sm:$0xff]  ;;  %v6455_v32 = vpop.f32.mrf.mxu2 }
 0x69f   :  { %v5512_v52 = vunpack.c.l.b16 %v5170_v58  ;;  %v5513_v16 = vunpack.c.h.b16 %v5170_v58  ;;  %v12519_v33 = vpack.c.b16 %v5514_v30, %v5510_v18  ;;  %v14211_v49 = vunpack.c.l.bf16 %v14210_v51 }
 0x6a0   :  { %v14212_v28 = vunpack.c.h.bf16 %v14210_v51  ;;  %v12531_v44 = vpack.c.b16 %v5515_v0, %v5511_v43  ;;  %v14215_v38 = vunpack.c.l.bf16 %v14214_v4  ;;  %v14216_v50 = vunpack.c.h.bf16 %v14214_v4  ;;  %v14221_v43 = vld [vmem:[#allocation51_spill] sm:$0xff] }
 0x6a1   :  { %14209 = vst [vmem:[#allocation53_spill] sm:$0xff] %v12519_v33  ;;  %v4588_v60 = vadd.f32 %v14181_v2, %v14211_v49  ;;  %v12527_v7 = vpack.c.b16 %v5512_v52, %v5508_v13  ;;  %v12529_v21 = vpack.c.b16 %v5513_v16, %v5509_v34  ;;  %v14217_v15 = vmax.f32 %v11723_v20, 0.0  ;;  %v6070_v20 = vpop.f32.mrf.mxu3 }
 0x6a2   :  { %v4589_v11 = vadd.f32 %v14185_v36, %v14212_v28  ;;  %14213 = vst [vmem:[#allocation102_spill] sm:$0xff] %v12531_v44  ;;  %v4592_v62 = vadd.f32 %v14181_v2, %v14215_v38  ;;  %v4593_v23 = vadd.f32 %v14185_v36, %v14216_v50  ;;  %v14218_v18 = vmax.f32 %v11729_v19, 0.0 }
 0x6a3   :  { %v5068_v35 = vmax.f32 %v4588_v60, 0.0  ;;  %v14219_v13 = vmax.f32 %v11800_v14, 0.0  ;;  %v14220_v34 = vmax.f32 %v11829_v29, 0.0  ;;  %v14222_v52 = vunpack.c.l.bf16 %v14221_v43 }
 0x6a4   :  { %v5069_v63 = vmax.f32 %v4589_v11, 0.0  ;;  %v5173_v26 = vpack.c.bf16 %v14218_v18, %v14217_v15  ;;  %v5072_v58 = vmax.f32 %v4592_v62, 0.0  ;;  %v14223_v0 = vunpack.c.h.bf16 %v14221_v43  ;;  %v6328_v11 = vpop.f32.mrf.mxu1  ;;  %v6202_v62 = vpop.f32.mrf.mxu0 }
 0x6a5   :  { %v5175_v30 = vpack.c.bf16 %v14220_v34, %v14219_v13  ;;  %v4596_v16 = vadd.f32 %v14181_v2, %v14222_v52  ;;  %v12553_v49 = vadd.f32 %v6455_v32, %v6327_v39  ;;  %v5073_v19 = vmax.f32 %v4593_v23, 0.0  ;;  %v14224_v13 = vld [vmem:[#allocation14_spill] sm:$0xff] }
 0x6a6   :  { %v4597_v51 = vadd.f32 %v14185_v36, %v14223_v0  ;;  %v5172_v60 = vpack.c.bf16 %v5069_v63, %v5068_v35  ;;  %v5518_v28 = vunpack.c.l.b16 %v5173_v26  ;;  %v6200_v4 = vadd.f32 %v6199_v3, %v6070_v20 }
 0x6a7   :  { %v5522_v14 = vunpack.c.l.b16 %v5175_v30  ;;  %v5519_v38 = vunpack.c.h.b16 %v5173_v26  ;;  %v5523_v29 = vunpack.c.h.b16 %v5175_v30  ;;  %v5174_v50 = vpack.c.bf16 %v5073_v19, %v5072_v58  ;;  %v14229_v58 = vld [vmem:[#allocation69_spill] sm:$0xff] }
 0x6a8   :  { %v5516_v15 = vunpack.c.l.b16 %v5172_v60  ;;  %v5517_v18 = vunpack.c.h.b16 %v5172_v60  ;;  %v14225_v34 = vunpack.c.l.bf16 %v14224_v13  ;;  %v6329_v52 = vadd.f32 %v6328_v11, %v6200_v4  ;;  %6241 = vmatmul.bf16.gmra.mxu0 %v14229_v58  ;;  %v14232_v60 = vld [vmem:[#allocation107_spill] sm:$0xff] }
 0x6a9   :  { %v12558_v39 = vpack.c.b16 %v5522_v14, %v5518_v28  ;;  %v12560_v32 = vpack.c.b16 %v5523_v29, %v5519_v38  ;;  %v14228_v23 = vunpack.c.h.bf16 %v14224_v13  ;;  %v5520_v35 = vunpack.c.l.b16 %v5174_v50  ;;  %v6457_v38 = vpop.f32.mrf.mxu2  ;;  %v6073_v13 = vpop.f32.mrf.mxu3 }
 0x6aa   :  { %v4600_v43 = vadd.f32 %v14181_v2, %v14225_v34  ;;  %v5521_v63 = vunpack.c.h.b16 %v5174_v50  ;;  %v5076_v26 = vmax.f32 %v4596_v16, 0.0  ;;  %v5077_v30 = vmax.f32 %v4597_v51, 0.0  ;;  %v14230_v2 = vld [vmem:[#allocation85_spill] sm:$0xff] }
 0x6ab   :  { %14226 = vst [vmem:[#allocation103_spill] sm:$0xff] %v12558_v39  ;;  %v4601_v3 = vadd.f32 %v14185_v36, %v14228_v23  ;;  %v14231_v19 = vmax.f32 %v14230_v2, 0.0  ;;  %v14233_v28 = vmax.f32 %v14232_v60, 0.0  ;;  %v12571_v4 = vpack.c.b16 %v5520_v35, %v5516_v15 }
 0x6ac   :  { %14227 = vst [vmem:[#allocation108_spill] sm:$0xff] %v12560_v32  ;;  %v5080_v0 = vmax.f32 %v4600_v43, 0.0  ;;  %v12573_v14 = vpack.c.b16 %v5521_v63, %v5517_v18  ;;  %v5176_v36 = vpack.c.bf16 %v5077_v30, %v5076_v26  ;;  %v14236_v16 = vmax.f32 %v11842_v54, 0.0  ;;  %v6204_v35 = vpop.f32.mrf.mxu0 }
 0x6ad   :  { %v5081_v20 = vmax.f32 %v4601_v3, 0.0  ;;  %v5177_v11 = vpack.c.bf16 %v14233_v28, %v14231_v19  ;;  %14234 = vst [vmem:[#allocation57_spill] sm:$0xff] %v12571_v4  ;;  %v12577_v50 = vadd.f32 %v6457_v38, %v6329_v52  ;;  %v6331_v3 = vpop.f32.mrf.mxu1  ;;  %v6203_v2 = vadd.f32 %v6202_v62, %v6073_v13 }
 0x6ae   :  { %14235 = vst [vmem:[#allocation35_spill] sm:$0xff] %v12573_v14  ;;  %v5179_v51 = vpack.c.bf16 %v5083_v61, %v14236_v16  ;;  %v5524_v34 = vunpack.c.l.b16 %v5176_v36  ;;  %v5525_v43 = vunpack.c.h.b16 %v5176_v36 }
 0x6af   :  { %v5178_v29 = vpack.c.bf16 %v5081_v20, %v5080_v0  ;;  %v5526_v23 = vunpack.c.l.b16 %v5177_v11  ;;  %v5527_v18 = vunpack.c.h.b16 %v5177_v11  ;;  %v6332_v26 = vadd.f32 %v6331_v3, %v6203_v2  ;;  %v14243_v2 = vld [vmem:[#allocation24_spill] sm:$0xff] }
 0x6b0   :  { %v5530_v15 = vunpack.c.l.b16 %v5179_v51  ;;  %v5531_v63 = vunpack.c.h.b16 %v5179_v51  ;;  %6375 = vmatmul.bf16.gmra.mxu1 %v14243_v2  ;;  %v8782_v2 = vld [vmem:[#allocation5 + $0x128] sm:$0xf0] }
 0x6b1   :  { %v5528_v60 = vunpack.c.l.b16 %v5178_v29  ;;  %v5529_v19 = vunpack.c.h.b16 %v5178_v29  ;;  %v6460_v62 = vpop.f32.mrf.mxu2  ;;  %v6075_v20 = vpop.f32.mrf.mxu3  ;;  %v14241_v29 = vld [vmem:[#allocation19_spill] sm:$0xff] }
 0x6b2   :  { %v12583_v54 = vpack.c.b16 %v5530_v15, %v5526_v23  ;;  %v12587_v61 = vpack.c.b16 %v5531_v63, %v5527_v18  ;;  %v12589_v52 = vadd.f32 %v6460_v62, %v6332_v26  ;;  %v6205_v11 = vadd.f32 %v6204_v35, %v6075_v20  ;;  %v8654_v15 = vld [vmem:[#allocation5 + $0x28] sm:$0xf0]  ;;  %v9192_v62 = vld [vmem:[#allocation5 + $0x1a4] sm:$0xf] }
 0x6b3   :  { %v12579_v30 = vpack.c.b16 %v5528_v60, %v5524_v34  ;;  %v12581_v0 = vpack.c.b16 %v5529_v19, %v5525_v43  ;;  %v14244_v60 = vld [vmem:[#allocation73_spill] sm:$0xff]  ;;  %v9144_v19 = vld [vmem:[#allocation5 + $0x24] sm:$0xf]  ;;  %v8846_v20 = vld [vmem:[#allocation5 + $0x1a8] sm:$0xf0] }
 0x6b4   :  { %14239 = vst [vmem:[#allocation64_spill] sm:$0xff] %v12583_v54  ;;  %v6207_v36 = vpop.f32.mrf.mxu0  ;;  %6504 = vmatmul.bf16.gmra.mxu2 %v14244_v60  ;;  %v8657_v35 = vor.u32 %v9144_v19, %v8654_v15  ;;  %v14245_v19 = vld [vmem:[#allocation110_spill] sm:$0xff] }
 0x6b5   :  { %14237 = vst [vmem:[#allocation17_spill] sm:$0xff] %v12579_v30  ;;  %v6333_v28 = vpop.f32.mrf.mxu1  ;;  %6122 = vmatmul.bf16.gmra.mxu3 %v14245_v19 }
 0x6b6   :  { %14238 = vst [vmem:[#allocation111_spill] sm:$0xff] %v12581_v0  ;;  %v6334_v38 = vadd.f32 %v6333_v28, %v6205_v11  ;;  %6565 = vmatpush.bf16.msrb.mxu3 %v8657_v35 }
 0x6b7   :  { %14240 = vst [vmem:[#allocation36_spill] sm:$0xff] %v12587_v61 }
 0x6b8   :  { %6246 = vmatmul.bf16.gmra.mxu0 %v14241_v29 }
 0x6b9   :  { %v6462_v16 = vpop.f32.mrf.mxu2  ;;  %v6078_v13 = vpop.f32.mrf.mxu3 }
 0x6ba   :  { %v12593_v51 = vadd.f32 %v6462_v16, %v6334_v38  ;;  %v6208_v43 = vadd.f32 %v6207_v36, %v6078_v13  ;;  %v8849_v38 = vor.u32 %v9192_v62, %v8846_v20  ;;  %v9160_v36 = vld [vmem:[#allocation5 + $0xa4] sm:$0xf]  ;;  %v8718_v16 = vld [vmem:[#allocation5 + $0xa8] sm:$0xf0] }
 0x6bb   :  { %v9176_v13 = vld [vmem:[#allocation5 + $0x124] sm:$0xf] }
 0x6bc   :  { %14242 = vst [vmem:[#allocation59_spill] sm:$0xff] %v12593_v51  ;;  %v6209_v23 = vpop.f32.mrf.mxu0  ;;  %6952 = vmatpush.bf16.msra.mxu2 %v8849_v38  ;;  %v8785_v51 = vor.u32 %v9176_v13, %v8782_v2 }
 0x6bd   :  { %v6336_v34 = vpop.f32.mrf.mxu1 }
 0x6be   :  { %v6337_v3 = vadd.f32 %v6336_v34, %v6208_v43  ;;  %v8721_v43 = vor.u32 %v9160_v36, %v8718_v16  ;;  %6823 = vmatpush.bf16.msra.mxu1 %v8785_v51  ;;  %v14248_v36 = vld [vmem:[#allocation25_spill] sm:$0xff] }
 0x6c0   :  { %6694 = vmatpush.bf16.msra.mxu0 %v8721_v43  ;;  %6380 = vmatmul.bf16.gmra.mxu1 %v12294_v10  ;;  %v14249_v43 = vld [vmem:[#allocation27_spill] sm:$0xff] }
 0x6c1   :  { %v6465_v18 = vpop.f32.mrf.mxu2  ;;  %v6080_v26 = vpop.f32.mrf.mxu3 }
 0x6c2   :  { %v12597_v63 = vadd.f32 %v6465_v18, %v6337_v3  ;;  %v6210_v11 = vadd.f32 %v6209_v23, %v6080_v26  ;;  %v14246_v3 = vld [vmem:[#allocation78_spill] sm:$0xff] }
 0x6c4   :  { %v6212_v34 = vpop.f32.mrf.mxu0  ;;  %6509 = vmatmul.bf16.gmra.mxu2 %v14248_v36 }
 0x6c5   :  { %v6338_v28 = vpop.f32.mrf.mxu1  ;;  %6127 = vmatmul.bf16.gmra.mxu3 %v14249_v43 }
 0x6c6   :  { %v6339_v60 = vadd.f32 %v6338_v28, %v6210_v11 }
 0x6c8   :  { %6251 = vmatmul.bf16.gmra.mxu0 %v14246_v3 }
 0x6c9   :  { %v6467_v15 = vpop.f32.mrf.mxu2  ;;  %v6083_v23 = vpop.f32.mrf.mxu3 }
 0x6ca   :  { %v12601_v35 = vadd.f32 %v6467_v15, %v6339_v60  ;;  %v6213_v26 = vadd.f32 %v6212_v34, %v6083_v23  ;;  %v14250_v60 = vld [vmem:[#allocation61_spill] sm:$0xff] }
 0x6cc   :  { %14247 = vst [vmem:[#allocation55_spill] sm:$0xff] %v12601_v35  ;;  %v6214_v62 = vpop.f32.mrf.mxu0  ;;  %v14251_v35 = vld [vmem:[#allocation82_spill] sm:$0xff] }
 0x6cd   :  { %v6341_v18 = vpop.f32.mrf.mxu1 }
 0x6ce   :  { %v6342_v20 = vadd.f32 %v6341_v18, %v6213_v26 }
 0x6d0   :  { %6385 = vmatmul.bf16.gmra.mxu1 %v14251_v35 }
 0x6d1   :  { %v6470_v28 = vpop.f32.mrf.mxu2  ;;  %v6085_v11 = vpop.f32.mrf.mxu3 }
 0x6d2   :  { %v12605_v2 = vadd.f32 %v6470_v28, %v6342_v20  ;;  %v6215_v16 = vadd.f32 %v6214_v62, %v6085_v11  ;;  %v14252_v20 = vld [vmem:[#allocation98_spill] sm:$0xff] }
 0x6d4   :  { %v6217_v13 = vpop.f32.mrf.mxu0  ;;  %6514 = vmatmul.bf16.gmra.mxu2 %v14252_v20 }
 0x6d5   :  { %v6343_v38 = vpop.f32.mrf.mxu1  ;;  %6132 = vmatmul.bf16.gmra.mxu3 %v12351_v47 }
 0x6d6   :  { %v6344_v51 = vadd.f32 %v6343_v38, %v6215_v16 }
 0x6d8   :  { %6256 = vmatmul.bf16.gmra.mxu0 %v14250_v60 }
 0x6d9   :  { %v6472_v15 = vpop.f32.mrf.mxu2  ;;  %v6088_v23 = vpop.f32.mrf.mxu3 }
 0x6da   :  { %v12609_v34 = vadd.f32 %v6472_v15, %v6344_v51  ;;  %v6218_v26 = vadd.f32 %v6217_v13, %v6088_v23 }
 0x6dc   :  { %v6219_v10 = vpop.f32.mrf.mxu0 }
 0x6dd   :  { %v6346_v18 = vpop.f32.mrf.mxu1 }
 0x6de   :  { %v6347_v36 = vadd.f32 %v6346_v18, %v6218_v26 }
 0x6e0   :  { %6390 = vmatmul.bf16.gmra.mxu1 %v12369_v57 }
 0x6e1   :  { %v6475_v28 = vpop.f32.mrf.mxu2  ;;  %v6090_v11 = vpop.f32.mrf.mxu3 }
 0x6e2   :  { %v12613_v62 = vadd.f32 %v6475_v28, %v6347_v36  ;;  %v6220_v16 = vadd.f32 %v6219_v10, %v6090_v11  ;;  %v9142_v36 = vld [vmem:[#allocation5 + $0x14] sm:$0xf]  ;;  %v8646_v10 = vld [vmem:[#allocation5 + $0x18] sm:$0xf0] }
 0x6e3   :  { %v8649_v28 = vor.u32 %v9142_v36, %v8646_v10 }
 0x6e4   :  { %14253 = vst [vmem:[#allocation93_spill] sm:$0xff] %v12613_v62  ;;  %v6222_v43 = vpop.f32.mrf.mxu0  ;;  %6519 = vmatmul.bf16.gmra.mxu2 %v12371_v9  ;;  %v8774_v62 = vld [vmem:[#allocation5 + $0x118] sm:$0xf0] }
 0x6e5   :  { %v6348_v38 = vpop.f32.mrf.mxu1  ;;  %6566 = vmatpush.bf16.msrb.mxu3 %v8649_v28 }
 0x6e6   :  { %v6349_v60 = vadd.f32 %v6348_v38, %v6220_v16  ;;  %6137 = vmatmul.bf16.gmra.mxu3 %v12378_v41 }
 0x6e8   :  { %6261 = vmatmul.bf16.gmra.mxu0 %v12353_v27  ;;  %v9190_v27 = vld [vmem:[#allocation5 + $0x194] sm:$0xf] }
 0x6e9   :  { %v6477_v51 = vpop.f32.mrf.mxu2  ;;  %v6093_v15 = vpop.f32.mrf.mxu3 }
 0x6ea   :  { %v12617_v13 = vadd.f32 %v6477_v51, %v6349_v60  ;;  %v6223_v18 = vadd.f32 %v6222_v43, %v6093_v15  ;;  %v8838_v60 = vld [vmem:[#allocation5 + $0x198] sm:$0xf0]  ;;  %v9158_v43 = vld [vmem:[#allocation5 + $0x94] sm:$0xf] }
 0x6eb   :  { %v8841_v47 = vor.u32 %v9190_v27, %v8838_v60  ;;  %v8710_v15 = vld [vmem:[#allocation5 + $0x98] sm:$0xf0] }
 0x6ec   :  { %14254 = vst [vmem:[#allocation39_spill] sm:$0xff] %v12617_v13  ;;  %v6224_v26 = vpop.f32.mrf.mxu0  ;;  %v8713_v57 = vor.u32 %v9158_v43, %v8710_v15 }
 0x6ed   :  { %v6351_v23 = vpop.f32.mrf.mxu1  ;;  %6953 = vmatpush.bf16.msra.mxu2 %v8841_v47 }
 0x6ee   :  { %v6352_v20 = vadd.f32 %v6351_v23, %v6223_v18  ;;  %v9174_v23 = vld [vmem:[#allocation5 + $0x114] sm:$0xf]  ;;  %6695 = vmatpush.bf16.msra.mxu0 %v8713_v57 }
 0x6ef   :  { %v8777_v35 = vor.u32 %v9174_v23, %v8774_v62 }
 0x6f0   :  { %6395 = vmatmul.bf16.gmra.mxu1 %v12399_v24 }
 0x6f1   :  { %v6480_v11 = vpop.f32.mrf.mxu2  ;;  %v6095_v16 = vpop.f32.mrf.mxu3  ;;  %6824 = vmatpush.bf16.msra.mxu1 %v8777_v35 }
 0x6f2   :  { %v12621_v38 = vadd.f32 %v6480_v11, %v6352_v20  ;;  %v6225_v13 = vadd.f32 %v6224_v26, %v6095_v16  ;;  %v14255_v16 = vld [vmem:[#allocation30_spill] sm:$0xff] }
 0x6f4   :  { %v6227_v18 = vpop.f32.mrf.mxu0  ;;  %6524 = vmatmul.bf16.gmra.mxu2 %v14255_v16 }
 0x6f5   :  { %v6353_v51 = vpop.f32.mrf.mxu1 }
 0x6f6   :  { %v6354_v9 = vadd.f32 %v6353_v51, %v6225_v13  ;;  %6142 = vmatmul.bf16.gmra.mxu3 %v12420_v53 }
 0x6f8   :  { %6266 = vmatmul.bf16.gmra.mxu0 %v12380_v37 }
 0x6f9   :  { %v6482_v20 = vpop.f32.mrf.mxu2  ;;  %v6098_v26 = vpop.f32.mrf.mxu3 }
 0x6fa   :  { %v12625_v36 = vadd.f32 %v6482_v20, %v6354_v9  ;;  %v6228_v10 = vadd.f32 %v6227_v18, %v6098_v26 }
 0x6fc   :  { %v6229_v28 = vpop.f32.mrf.mxu0 }
 0x6fd   :  { %v6356_v27 = vpop.f32.mrf.mxu1 }
 0x6fe   :  { %v6357_v11 = vadd.f32 %v6356_v27, %v6228_v10 }
 0x700   :  { %6400 = vmatmul.bf16.gmra.mxu1 %v12430_v48  ;;  %v14260_v48 = vld [vmem:[#allocation105_spill] sm:$0xff] }
 0x701   :  { %v6485_v47 = vpop.f32.mrf.mxu2  ;;  %v6100_v57 = vpop.f32.mrf.mxu3 }
 0x702   :  { %v12629_v62 = vadd.f32 %v6485_v47, %v6357_v11  ;;  %v6230_v60 = vadd.f32 %v6229_v28, %v6100_v57 }
 0x704   :  { %v6232_v51 = vpop.f32.mrf.mxu0  ;;  %6529 = vmatmul.bf16.gmra.mxu2 %v12438_v1 }
 0x705   :  { %v6358_v13 = vpop.f32.mrf.mxu1 }
 0x706   :  { %v6359_v35 = vadd.f32 %v6358_v13, %v6230_v60  ;;  %6147 = vmatmul.bf16.gmra.mxu3 %v12451_v12  ;;  %v14258_v60 = vld [vmem:[#allocation101_spill] sm:$0xff]  ;;  %v9188_v12 = vld [vmem:[#allocation5 + $0x184] sm:$0xf] }
 0x708   :  { %6271 = vmatmul.bf16.gmra.mxu0 %v12422_v45 }
 0x709   :  { %v6487_v9 = vpop.f32.mrf.mxu2  ;;  %v6103_v15 = vpop.f32.mrf.mxu3 }
 0x70a   :  { %v12633_v43 = vadd.f32 %v6487_v9, %v6359_v35  ;;  %v6233_v18 = vadd.f32 %v6232_v51, %v6103_v15 }
 0x70c   :  { %14256 = vst [vmem:[#allocation31_spill] sm:$0xff] %v12633_v43  ;;  %v6234_v20 = vpop.f32.mrf.mxu0  ;;  %v8766_v43 = vld [vmem:[#allocation5 + $0x108] sm:$0xf0] }
 0x70d   :  { %v6361_v23 = vpop.f32.mrf.mxu1 }
 0x70e   :  { %v6362_v26 = vadd.f32 %v6361_v23, %v6233_v18 }
 0x710   :  { %6405 = vmatmul.bf16.gmra.mxu1 %v14260_v48 }
 0x711   :  { %v6490_v27 = vpop.f32.mrf.mxu2  ;;  %v6105_v28 = vpop.f32.mrf.mxu3 }
 0x712   :  { %v12637_v10 = vadd.f32 %v6490_v27, %v6362_v26  ;;  %v6235_v47 = vadd.f32 %v6234_v20, %v6105_v28  ;;  %v14261_v26 = vld [vmem:[#allocation106_spill] sm:$0xff]  ;;  %v8638_v20 = vld [vmem:[#allocation5 + $0x8] sm:$0xf0] }
 0x713   :  { %v9140_v27 = vld [vmem:[#allocation5 + $0x4] sm:$0xf] }
 0x714   :  { %14257 = vst [vmem:[#allocation109_spill] sm:$0xff] %v12637_v10  ;;  %v6237_v57 = vpop.f32.mrf.mxu0  ;;  %6534 = vmatmul.bf16.gmra.mxu2 %v14261_v26  ;;  %v8641_v28 = vor.u32 %v9140_v27, %v8638_v20 }
 0x715   :  { %v6363_v11 = vpop.f32.mrf.mxu1 }
 0x716   :  { %v6364_v13 = vadd.f32 %v6363_v11, %v6235_v47  ;;  %6567 = vmatpush.bf16.msrb.mxu3 %v8641_v28 }
 0x717   :  { %6152 = vmatmul.bf16.gmra.mxu3 %v12490_v5 }
 0x718   :  { %6276 = vmatmul.bf16.gmra.mxu0 %v14258_v60 }
 0x719   :  { %v6492_v35 = vpop.f32.mrf.mxu2  ;;  %v6108_v9 = vpop.f32.mrf.mxu3 }
 0x71a   :  { %v12641_v51 = vadd.f32 %v6492_v35, %v6364_v13  ;;  %v6238_v23 = vadd.f32 %v6237_v57, %v6108_v9  ;;  %v8830_v13 = vld [vmem:[#allocation5 + $0x188] sm:$0xf0]  ;;  %v9156_v57 = vld [vmem:[#allocation5 + $0x84] sm:$0xf] }
 0x71b   :  { %v8833_v10 = vor.u32 %v9188_v12, %v8830_v13  ;;  %v8702_v9 = vld [vmem:[#allocation5 + $0x88] sm:$0xf0] }
 0x71c   :  { %14259 = vst [vmem:[#allocation41_spill] sm:$0xff] %v12641_v51  ;;  %v6239_v18 = vpop.f32.mrf.mxu0  ;;  %v8705_v48 = vor.u32 %v9156_v57, %v8702_v9 }
 0x71d   :  { %v6366_v15 = vpop.f32.mrf.mxu1  ;;  %6954 = vmatpush.bf16.msra.mxu2 %v8833_v10 }
 0x71e   :  { %v6367_v1 = vadd.f32 %v6366_v15, %v6238_v23  ;;  %v9172_v15 = vld [vmem:[#allocation5 + $0x104] sm:$0xf]  ;;  %6696 = vmatpush.bf16.msra.mxu0 %v8705_v48 }
 0x71f   :  { %v8769_v45 = vor.u32 %v9172_v15, %v8766_v43 }
 0x720   :  { %6410 = vmatmul.bf16.gmra.mxu1 %v12512_v40 }
 0x721   :  { %v6495_v11 = vpop.f32.mrf.mxu2  ;;  %v6110_v60 = vpop.f32.mrf.mxu3  ;;  %6825 = vmatpush.bf16.msra.mxu1 %v8769_v45 }
 0x722   :  { %v12645_v47 = vadd.f32 %v6495_v11, %v6367_v1  ;;  %v6240_v51 = vadd.f32 %v6239_v18, %v6110_v60 }
 0x724   :  { %6539 = vmatmul.bf16.gmra.mxu2 %v12514_v17 }
 0x725   :  { %v6368_v35 = vpop.f32.mrf.mxu1  ;;  %v6242_v23 = vpop.f32.mrf.mxu0 }
 0x726   :  { %v6369_v26 = vadd.f32 %v6368_v35, %v6240_v51 }
 0x727   :  { %6157 = vmatmul.bf16.gmra.mxu3 %v12527_v7 }
 0x728   :  { %6281 = vmatmul.bf16.gmra.mxu0 %v12492_v56 }
 0x729   :  { %v6497_v1 = vpop.f32.mrf.mxu2  ;;  %v6113_v60 = vpop.f32.mrf.mxu3 }
 0x72a   :  { %v12649_v27 = vadd.f32 %v6497_v1, %v6369_v26  ;;  %v6243_v18 = vadd.f32 %v6242_v23, %v6113_v60 }
 0x72d   :  { %v6371_v12 = vpop.f32.mrf.mxu1  ;;  %v6244_v20 = vpop.f32.mrf.mxu0 }
 0x72e   :  { %v6372_v28 = vadd.f32 %v6371_v12, %v6243_v18 }
 0x730   :  { %6415 = vmatmul.bf16.gmra.mxu1 %v12519_v33  ;;  %v14327_v33 = vld [vmem:[#allocation104_spill] sm:$0xff] }
 0x731   :  { %v6500_v10 = vpop.f32.mrf.mxu2  ;;  %v6115_v48 = vpop.f32.mrf.mxu3 }
 0x732   :  { %v12653_v43 = vadd.f32 %v6500_v10, %v6372_v28  ;;  %v6245_v11 = vadd.f32 %v6244_v20, %v6115_v48 }
 0x734   :  { %6544 = vmatmul.bf16.gmra.mxu2 %v12531_v44 }
 0x735   :  { %v6373_v51 = vpop.f32.mrf.mxu1  ;;  %v6247_v13 = vpop.f32.mrf.mxu0 }
 0x736   :  { %v6374_v45 = vadd.f32 %v6373_v51, %v6245_v11 }
 0x737   :  { %6162 = vmatmul.bf16.gmra.mxu3 %v12571_v4 }
 0x738   :  { %6286 = vmatmul.bf16.gmra.mxu0 %v12529_v21 }
 0x739   :  { %v6502_v26 = vpop.f32.mrf.mxu2  ;;  %v6118_v57 = vpop.f32.mrf.mxu3 }
 0x73a   :  { %v12657_v35 = vadd.f32 %v6502_v26, %v6374_v45  ;;  %v6248_v15 = vadd.f32 %v6247_v13, %v6118_v57 }
 0x73d   :  { %v6376_v9 = vpop.f32.mrf.mxu1  ;;  %v6249_v23 = vpop.f32.mrf.mxu0 }
 0x73e   :  { %v6377_v1 = vadd.f32 %v6376_v9, %v6248_v15 }
 0x740   :  { %6420 = vmatmul.bf16.gmra.mxu1 %v12558_v39 }
 0x741   :  { %v6505_v60 = vpop.f32.mrf.mxu2  ;;  %v6120_v18 = vpop.f32.mrf.mxu3 }
 0x742   :  { %v12661_v12 = vadd.f32 %v6505_v60, %v6377_v1  ;;  %v6250_v28 = vadd.f32 %v6249_v23, %v6120_v18 }
 0x744   :  { %14262 = vst [vmem:[#allocation46_spill] sm:$0xff] %v12661_v12  ;;  %6549 = vmatmul.bf16.gmra.mxu2 %v12560_v32 }
 0x745   :  { %v6378_v20 = vpop.f32.mrf.mxu1  ;;  %v6252_v10 = vpop.f32.mrf.mxu0 }
 0x746   :  { %v6379_v48 = vadd.f32 %v6378_v20, %v6250_v28 }
 0x747   :  { %6167 = vmatmul.bf16.gmra.mxu3 %v12579_v30  ;;  %v14267_v30 = vld [vmem:[#allocation16_spill] sm:$0xff] }
 0x748   :  { %6291 = vmatmul.bf16.gmra.mxu0 %v12573_v14  ;;  %v14324_v14 = vld [vmem:[#allocation20_spill] sm:$0xff] }
 0x749   :  { %v6507_v51 = vpop.f32.mrf.mxu2  ;;  %v6123_v13 = vpop.f32.mrf.mxu3 }
 0x74a   :  { %v12665_v11 = vadd.f32 %v6507_v51, %v6379_v48  ;;  %v6253_v26 = vadd.f32 %v6252_v10, %v6123_v13 }
 0x74c   :  { %14263 = vst [vmem:[#allocation22_spill] sm:$0xff] %v12665_v11 }
 0x74d   :  { %v6381_v45 = vpop.f32.mrf.mxu1  ;;  %v6254_v57 = vpop.f32.mrf.mxu0 }
 0x74e   :  { %v6382_v9 = vadd.f32 %v6381_v45, %v6253_v26 }
 0x750   :  { %6425 = vmatmul.bf16.gmra.mxu1 %v12583_v54 }
 0x751   :  { %v6510_v15 = vpop.f32.mrf.mxu2  ;;  %v6125_v1 = vpop.f32.mrf.mxu3 }
 0x752   :  { %v12669_v23 = vadd.f32 %v6510_v15, %v6382_v9  ;;  %v6255_v18 = vadd.f32 %v6254_v57, %v6125_v1 }
 0x754   :  { %14264 = vst [vmem:[#allocation43_spill] sm:$0xff] %v12669_v23  ;;  %6554 = vmatmul.bf16.gmra.mxu2 %v12587_v61 }
 0x755   :  { %v6383_v60 = vpop.f32.mrf.mxu1  ;;  %v6257_v20 = vpop.f32.mrf.mxu0 }
 0x756   :  { %v6384_v28 = vadd.f32 %v6383_v60, %v6255_v18 }
 0x757   :  { %6568 = vmatmul.bf16.vlgmr.msrb.gmra.mxu3 %v14267_v30 }
 0x758   :  { %6296 = vmatmul.bf16.gmra.mxu0 %v12581_v0 }
 0x759   :  { %v6512_v48 = vpop.f32.mrf.mxu2  ;;  %v6128_v51 = vpop.f32.mrf.mxu3 }
 0x75a   :  { %v12673_v10 = vadd.f32 %v6512_v48, %v6384_v28  ;;  %v6258_v45 = vadd.f32 %v6257_v20, %v6128_v51  ;;  %v14268_v28 = vld [vmem:[#allocation21_spill] sm:$0xff] }
 0x75c   :  { %14265 = vst [vmem:[#allocation45_spill] sm:$0xff] %v12673_v10  ;;  %v14270_v10 = vld [vmem:[#allocation76_spill] sm:$0xff] }
 0x75d   :  { %v6386_v13 = vpop.f32.mrf.mxu1  ;;  %v6259_v26 = vpop.f32.mrf.mxu0 }
 0x75e   :  { %v6387_v32 = vadd.f32 %v6386_v13, %v6258_v45 }
 0x760   :  { %6826 = vmatmul.bf16.vlgmr.msra.gmra.mxu1 %v14270_v10 }
 0x761   :  { %v6515_v9 = vpop.f32.mrf.mxu2  ;;  %v6130_v15 = vpop.f32.mrf.mxu3 }
 0x762   :  { %v12677_v57 = vadd.f32 %v6515_v9, %v6387_v32  ;;  %v6260_v60 = vadd.f32 %v6259_v26, %v6130_v15  ;;  %v14271_v32 = vld [vmem:[#allocation38_spill] sm:$0xff] }
 0x764   :  { %14266 = vst [vmem:[#allocation47_spill] sm:$0xff] %v12677_v57  ;;  %6955 = vmatmul.bf16.vlgmr.msra.gmra.mxu2 %v14271_v32  ;;  %v14273_v57 = vld [vmem:[#allocation80_spill] sm:$0xff] }
 0x765   :  { %v6388_v1 = vpop.f32.mrf.mxu1  ;;  %v6262_v18 = vpop.f32.mrf.mxu0 }
 0x766   :  { %v6389_v0 = vadd.f32 %v6388_v1, %v6260_v60 }
 0x767   :  { %6573 = vmatmul.bf16.gmra.mxu3 %v14273_v57 }
 0x768   :  { %6697 = vmatmul.bf16.vlgmr.msra.gmra.mxu0 %v14268_v28 }
 0x769   :  { %v6517_v48 = vpop.f32.mrf.mxu2  ;;  %v6133_v51 = vpop.f32.mrf.mxu3 }
 0x76a   :  { %v12681_v20 = vadd.f32 %v6517_v48, %v6389_v0  ;;  %v6263_v45 = vadd.f32 %v6262_v18, %v6133_v51  ;;  %v14274_v0 = vld [vmem:[#allocation23_spill] sm:$0xff] }
 0x76c   :  { %14269 = vst [vmem:[#allocation72_spill] sm:$0xff] %v12681_v20  ;;  %v14276_v20 = vld [vmem:[#allocation88_spill] sm:$0xff] }
 0x76d   :  { %v6391_v13 = vpop.f32.mrf.mxu1  ;;  %v6264_v54 = vpop.f32.mrf.mxu0 }
 0x76e   :  { %v6392_v61 = vadd.f32 %v6391_v13, %v6263_v45 }
 0x770   :  { %6831 = vmatmul.bf16.gmra.mxu1 %v14276_v20 }
 0x771   :  { %v6520_v9 = vpop.f32.mrf.mxu2  ;;  %v6135_v15 = vpop.f32.mrf.mxu3 }
 0x772   :  { %v12685_v26 = vadd.f32 %v6520_v9, %v6392_v61  ;;  %v6265_v30 = vadd.f32 %v6264_v54, %v6135_v15  ;;  %v14277_v61 = vld [vmem:[#allocation91_spill] sm:$0xff] }
 0x774   :  { %14272 = vst [vmem:[#allocation51_spill] sm:$0xff] %v12685_v26  ;;  %6960 = vmatmul.bf16.gmra.mxu2 %v14277_v61  ;;  %v14279_v26 = vld [vmem:[#allocation54_spill] sm:$0xff] }
 0x775   :  { %v6393_v1 = vpop.f32.mrf.mxu1  ;;  %v6267_v60 = vpop.f32.mrf.mxu0 }
 0x776   :  { %v6394_v28 = vadd.f32 %v6393_v1, %v6265_v30 }
 0x777   :  { %6578 = vmatmul.bf16.gmra.mxu3 %v14279_v26 }
 0x778   :  { %6702 = vmatmul.bf16.gmra.mxu0 %v14274_v0 }
 0x779   :  { %v6522_v48 = vpop.f32.mrf.mxu2  ;;  %v6138_v51 = vpop.f32.mrf.mxu3 }
 0x77a   :  { %v12689_v18 = vadd.f32 %v6522_v48, %v6394_v28  ;;  %v6268_v10 = vadd.f32 %v6267_v60, %v6138_v51  ;;  %v14280_v28 = vld [vmem:[#allocation92_spill] sm:$0xff] }
 0x77c   :  { %14275 = vst [vmem:[#allocation14_spill] sm:$0xff] %v12689_v18  ;;  %v14282_v18 = vld [vmem:[#allocation95_spill] sm:$0xff] }
 0x77d   :  { %v6396_v13 = vpop.f32.mrf.mxu1  ;;  %v6269_v45 = vpop.f32.mrf.mxu0 }
 0x77e   :  { %v6397_v32 = vadd.f32 %v6396_v13, %v6268_v10 }
 0x780   :  { %6836 = vmatmul.bf16.gmra.mxu1 %v14282_v18 }
 0x781   :  { %v6525_v9 = vpop.f32.mrf.mxu2  ;;  %v6140_v15 = vpop.f32.mrf.mxu3 }
 0x782   :  { %v12693_v54 = vadd.f32 %v6525_v9, %v6397_v32  ;;  %v6270_v57 = vadd.f32 %v6269_v45, %v6140_v15  ;;  %v14283_v32 = vld [vmem:[#allocation60_spill] sm:$0xff] }
 0x784   :  { %14278 = vst [vmem:[#allocation69_spill] sm:$0xff] %v12693_v54  ;;  %6965 = vmatmul.bf16.gmra.mxu2 %v14283_v32  ;;  %v14285_v54 = vld [vmem:[#allocation96_spill] sm:$0xff] }
 0x785   :  { %v6398_v1 = vpop.f32.mrf.mxu1  ;;  %v6272_v30 = vpop.f32.mrf.mxu0 }
 0x786   :  { %v6399_v0 = vadd.f32 %v6398_v1, %v6270_v57 }
 0x787   :  { %6583 = vmatmul.bf16.gmra.mxu3 %v14285_v54 }
 0x788   :  { %6707 = vmatmul.bf16.gmra.mxu0 %v14280_v28 }
 0x789   :  { %v6527_v48 = vpop.f32.mrf.mxu2  ;;  %v6143_v51 = vpop.f32.mrf.mxu3 }
 0x78a   :  { %v12697_v60 = vadd.f32 %v6527_v48, %v6399_v0  ;;  %v6273_v20 = vadd.f32 %v6272_v30, %v6143_v51  ;;  %v14286_v0 = vld [vmem:[#allocation15_spill] sm:$0xff] }
 0x78c   :  { %14281 = vst [vmem:[#allocation85_spill] sm:$0xff] %v12697_v60  ;;  %v14288_v60 = vld [vmem:[#allocation33_spill] sm:$0xff] }
 0x78d   :  { %v6401_v13 = vpop.f32.mrf.mxu1  ;;  %v6274_v10 = vpop.f32.mrf.mxu0 }
 0x78e   :  { %v6402_v61 = vadd.f32 %v6401_v13, %v6273_v20 }
 0x790   :  { %6841 = vmatmul.bf16.gmra.mxu1 %v14288_v60 }
 0x791   :  { %v6530_v9 = vpop.f32.mrf.mxu2  ;;  %v6145_v15 = vpop.f32.mrf.mxu3 }
 0x792   :  { %v12701_v45 = vadd.f32 %v6530_v9, %v6402_v61  ;;  %v6275_v26 = vadd.f32 %v6274_v10, %v6145_v15  ;;  %v14289_v61 = vld [vmem:[#allocation37_spill] sm:$0xff] }
 0x794   :  { %14284 = vst [vmem:[#allocation107_spill] sm:$0xff] %v12701_v45  ;;  %6970 = vmatmul.bf16.gmra.mxu2 %v14289_v61  ;;  %v14291_v45 = vld [vmem:[#allocation40_spill] sm:$0xff] }
 0x795   :  { %v6403_v1 = vpop.f32.mrf.mxu1  ;;  %v6277_v57 = vpop.f32.mrf.mxu0 }
 0x796   :  { %v6404_v28 = vadd.f32 %v6403_v1, %v6275_v26 }
 0x797   :  { %6588 = vmatmul.bf16.gmra.mxu3 %v14291_v45 }
 0x798   :  { %6712 = vmatmul.bf16.gmra.mxu0 %v14286_v0 }
 0x799   :  { %v6532_v48 = vpop.f32.mrf.mxu2  ;;  %v6148_v51 = vpop.f32.mrf.mxu3 }
 0x79a   :  { %v12705_v30 = vadd.f32 %v6532_v48, %v6404_v28  ;;  %v6278_v18 = vadd.f32 %v6277_v57, %v6148_v51  ;;  %v14292_v28 = vld [vmem:[#allocation63_spill] sm:$0xff] }
 0x79c   :  { %14287 = vst [vmem:[#allocation19_spill] sm:$0xff] %v12705_v30  ;;  %v14294_v30 = vld [vmem:[#allocation44_spill] sm:$0xff] }
 0x79d   :  { %v6406_v13 = vpop.f32.mrf.mxu1  ;;  %v6279_v20 = vpop.f32.mrf.mxu0 }
 0x79e   :  { %v6407_v32 = vadd.f32 %v6406_v13, %v6278_v18 }
 0x7a0   :  { %6846 = vmatmul.bf16.gmra.mxu1 %v14294_v30 }
 0x7a1   :  { %v6535_v9 = vpop.f32.mrf.mxu2  ;;  %v6150_v15 = vpop.f32.mrf.mxu3 }
 0x7a2   :  { %v12709_v10 = vadd.f32 %v6535_v9, %v6407_v32  ;;  %v6280_v54 = vadd.f32 %v6279_v20, %v6150_v15  ;;  %v14295_v32 = vld [vmem:[#allocation68_spill] sm:$0xff] }
 0x7a4   :  { %14290 = vst [vmem:[#allocation110_spill] sm:$0xff] %v12709_v10  ;;  %6975 = vmatmul.bf16.gmra.mxu2 %v14295_v32  ;;  %v14297_v10 = vld [vmem:[#allocation48_spill] sm:$0xff] }
 0x7a5   :  { %v6408_v1 = vpop.f32.mrf.mxu1  ;;  %v6282_v26 = vpop.f32.mrf.mxu0 }
 0x7a6   :  { %v6409_v0 = vadd.f32 %v6408_v1, %v6280_v54 }
 0x7a7   :  { %6593 = vmatmul.bf16.gmra.mxu3 %v14297_v10 }
 0x7a8   :  { %6717 = vmatmul.bf16.gmra.mxu0 %v14292_v28 }
 0x7a9   :  { %v6537_v48 = vpop.f32.mrf.mxu2  ;;  %v6153_v51 = vpop.f32.mrf.mxu3 }
 0x7aa   :  { %v12713_v57 = vadd.f32 %v6537_v48, %v6409_v0  ;;  %v6283_v60 = vadd.f32 %v6282_v26, %v6153_v51  ;;  %v14298_v0 = vld [vmem:[#allocation49_spill] sm:$0xff] }
 0x7ac   :  { %14293 = vst [vmem:[#allocation78_spill] sm:$0xff] %v12713_v57  ;;  %v14300_v57 = vld [vmem:[#allocation112_spill] sm:$0xff] }
 0x7ad   :  { %v6411_v13 = vpop.f32.mrf.mxu1  ;;  %v6284_v18 = vpop.f32.mrf.mxu0 }
 0x7ae   :  { %v6412_v61 = vadd.f32 %v6411_v13, %v6283_v60 }
 0x7b0   :  { %6851 = vmatmul.bf16.gmra.mxu1 %v14300_v57 }
 0x7b1   :  { %v6540_v9 = vpop.f32.mrf.mxu2  ;;  %v6155_v15 = vpop.f32.mrf.mxu3 }
 0x7b2   :  { %v12717_v20 = vadd.f32 %v6540_v9, %v6412_v61  ;;  %v6285_v45 = vadd.f32 %v6284_v18, %v6155_v15  ;;  %v14301_v61 = vld [vmem:[#allocation113_spill] sm:$0xff] }
 0x7b4   :  { %14296 = vst [vmem:[#allocation30_spill] sm:$0xff] %v12717_v20  ;;  %6980 = vmatmul.bf16.gmra.mxu2 %v14301_v61  ;;  %v14303_v20 = vld [vmem:[#allocation50_spill] sm:$0xff] }
 0x7b5   :  { %v6413_v1 = vpop.f32.mrf.mxu1  ;;  %v6287_v54 = vpop.f32.mrf.mxu0 }
 0x7b6   :  { %v6414_v28 = vadd.f32 %v6413_v1, %v6285_v45 }
 0x7b7   :  { %6598 = vmatmul.bf16.gmra.mxu3 %v14303_v20 }
 0x7b8   :  { %6722 = vmatmul.bf16.gmra.mxu0 %v14298_v0 }
 0x7b9   :  { %v6542_v48 = vpop.f32.mrf.mxu2  ;;  %v6158_v51 = vpop.f32.mrf.mxu3 }
 0x7ba   :  { %v12721_v26 = vadd.f32 %v6542_v48, %v6414_v28  ;;  %v6288_v30 = vadd.f32 %v6287_v54, %v6158_v51  ;;  %v14304_v28 = vld [vmem:[#allocation52_spill] sm:$0xff] }
 0x7bc   :  { %14299 = vst [vmem:[#allocation16_spill] sm:$0xff] %v12721_v26  ;;  %v14306_v26 = vld [vmem:[#allocation94_spill] sm:$0xff] }
 0x7bd   :  { %v6416_v13 = vpop.f32.mrf.mxu1  ;;  %v6289_v60 = vpop.f32.mrf.mxu0 }
 0x7be   :  { %v6417_v32 = vadd.f32 %v6416_v13, %v6288_v30 }
 0x7c0   :  { %6856 = vmatmul.bf16.gmra.mxu1 %v14306_v26 }
 0x7c1   :  { %v6545_v9 = vpop.f32.mrf.mxu2  ;;  %v6160_v15 = vpop.f32.mrf.mxu3 }
 0x7c2   :  { %v12725_v18 = vadd.f32 %v6545_v9, %v6417_v32  ;;  %v6290_v10 = vadd.f32 %v6289_v60, %v6160_v15  ;;  %v14307_v32 = vld [vmem:[#allocation77_spill] sm:$0xff] }
 0x7c4   :  { %14302 = vst [vmem:[#allocation21_spill] sm:$0xff] %v12725_v18  ;;  %6985 = vmatmul.bf16.gmra.mxu2 %v14307_v32  ;;  %v14309_v18 = vld [vmem:[#allocation79_spill] sm:$0xff] }
 0x7c5   :  { %v6418_v1 = vpop.f32.mrf.mxu1  ;;  %v6292_v45 = vpop.f32.mrf.mxu0 }
 0x7c6   :  { %v6419_v0 = vadd.f32 %v6418_v1, %v6290_v10 }
 0x7c7   :  { %6603 = vmatmul.bf16.gmra.mxu3 %v14309_v18 }
 0x7c8   :  { %6727 = vmatmul.bf16.gmra.mxu0 %v14304_v28 }
 0x7c9   :  { %v6547_v48 = vpop.f32.mrf.mxu2  ;;  %v6163_v51 = vpop.f32.mrf.mxu3 }
 0x7ca   :  { %v12729_v54 = vadd.f32 %v6547_v48, %v6419_v0  ;;  %v6293_v57 = vadd.f32 %v6292_v45, %v6163_v51  ;;  %v14310_v0 = vld [vmem:[#allocation56_spill] sm:$0xff] }
 0x7cc   :  { %14305 = vst [vmem:[#allocation76_spill] sm:$0xff] %v12729_v54  ;;  %v14312_v54 = vld [vmem:[#allocation81_spill] sm:$0xff] }
 0x7cd   :  { %v6421_v13 = vpop.f32.mrf.mxu1  ;;  %v6294_v30 = vpop.f32.mrf.mxu0 }
 0x7ce   :  { %v6422_v61 = vadd.f32 %v6421_v13, %v6293_v57 }
 0x7d0   :  { %6861 = vmatmul.bf16.gmra.mxu1 %v14312_v54 }
 0x7d1   :  { %v6550_v9 = vpop.f32.mrf.mxu2  ;;  %v6165_v15 = vpop.f32.mrf.mxu3 }
 0x7d2   :  { %v12733_v60 = vadd.f32 %v6550_v9, %v6422_v61  ;;  %v6295_v20 = vadd.f32 %v6294_v30, %v6165_v15  ;;  %v14313_v61 = vld [vmem:[#allocation70_spill] sm:$0xff] }
 0x7d4   :  { %14308 = vst [vmem:[#allocation38_spill] sm:$0xff] %v12733_v60  ;;  %6990 = vmatmul.bf16.gmra.mxu2 %v14313_v61  ;;  %v14315_v60 = vld [vmem:[#allocation32_spill] sm:$0xff]  ;;  %v7128_v61 = vld [vmem:[#allocation1 + $0x9] sm:$0xff] }
 0x7d5   :  { %v6423_v1 = vpop.f32.mrf.mxu1  ;;  %v6297_v10 = vpop.f32.mrf.mxu0 }
 0x7d6   :  { %v6424_v28 = vadd.f32 %v6423_v1, %v6295_v20 }
 0x7d7   :  { %6608 = vmatmul.bf16.gmra.mxu3 %v14315_v60 }
 0x7d8   :  { %6732 = vmatmul.bf16.gmra.mxu0 %v14310_v0 }
 0x7d9   :  { %v6552_v48 = vpop.f32.mrf.mxu2  ;;  %v6168_v51 = vpop.f32.mrf.mxu3 }
 0x7da   :  { %v12737_v45 = vadd.f32 %v6552_v48, %v6424_v28  ;;  %v6298_v26 = vadd.f32 %v6297_v10, %v6168_v51  ;;  %v14316_v28 = vld [vmem:[#allocation83_spill] sm:$0xff] }
 0x7dc   :  { %14311 = vst [vmem:[#allocation80_spill] sm:$0xff] %v12737_v45 }
 0x7dd   :  { %v6426_v13 = vpop.f32.mrf.mxu1  ;;  %v6299_v57 = vpop.f32.mrf.mxu0 }
 0x7de   :  { %v6427_v32 = vadd.f32 %v6426_v13, %v6298_v26  ;;  %v7127_v26 = vld [vmem:[#allocation1] sm:$0xff] }
 0x7e1   :  { %v6555_v9 = vpop.f32.mrf.mxu2  ;;  %v6170_v15 = vpop.f32.mrf.mxu3 }
 0x7e2   :  { %v12741_v30 = vadd.f32 %v6555_v9, %v6427_v32  ;;  %v6300_v18 = vadd.f32 %v6299_v57, %v6170_v15  ;;  %v14318_v9 = vld [vmem:[#allocation18_spill] sm:$0xff]  ;;  %v7129_v57 = vpack.i.b16 %v7127_v26, %v7127_v26  ;;  %v7132_v15 = vpack.i.b16 %v7128_v61, %v7128_v61 }
 0x7e3   :  { %6866 = vmatmul.bf16.gmra.mxu1 %v14318_v9  ;;  %v14321_v61 = vld [vmem:[#allocation86_spill] sm:$0xff] }
 0x7e4   :  { %14314 = vst [vmem:[#allocation23_spill] sm:$0xff] %v12741_v30  ;;  %v14319_v30 = vld [vmem:[#allocation62_spill] sm:$0xff]  ;;  %v7134_v23 = vperm.slane %v7132_v15, 0 }
 0x7e5   :  { %v6428_v1 = vpop.f32.mrf.mxu1  ;;  %v6698_v20 = vpop.f32.mrf.mxu0  ;;  %6995 = vmatmul.bf16.gmra.mxu2 %v14319_v30 }
 0x7e6   :  { %v6429_v0 = vadd.f32 %v6428_v1, %v6300_v18  ;;  %v12755_v26 = vunpack.c.l.bf16 %v7134_v23 }
 0x7e7   :  { %6613 = vmatmul.bf16.gmra.mxu3 %v14321_v61  ;;  %v14325_v61 = vld [vmem:[#allocation67_spill] sm:$0xff] }
 0x7e8   :  { %6737 = vmatmul.bf16.gmra.mxu0 %v14316_v28  ;;  %v7131_v28 = vperm.slane %v7129_v57, 0 }
 0x7e9   :  { %v6557_v48 = vpop.f32.mrf.mxu2  ;;  %v6569_v51 = vpop.f32.mrf.mxu3 }
 0x7ea   :  { %v12745_v10 = vadd.f32 %v6557_v48, %v6429_v0  ;;  %v6699_v54 = vadd.f32 %v6698_v20, %v6569_v51  ;;  %v12753_v30 = vunpack.c.l.bf16 %v7131_v28 }
 0x7ec   :  { %14317 = vst [vmem:[#allocation88_spill] sm:$0xff] %v12745_v10  ;;  %v14320_v10 = vld [vmem:[#allocation75_spill] sm:$0xff] }
 0x7ed   :  { %v6827_v13 = vpop.f32.mrf.mxu1  ;;  %v6700_v45 = vpop.f32.mrf.mxu0 }
 0x7ee   :  { %v6828_v32 = vadd.f32 %v6827_v13, %v6699_v54  ;;  %v9211_v13 = vld [vmem:[%s13076_s10 + $0x38] sm:$0xff] }
 0x7ef   :  { %7811 = vmatpush.bf16.msra.mxu3 %v9211_v13 }
 0x7f1   :  { %v6956_v1 = vpop.f32.mrf.mxu2  ;;  %v6571_v18 = vpop.f32.mrf.mxu3 }
 0x7f2   :  { %v6957_v60 = vadd.f32 %v6956_v1, %v6828_v32  ;;  %v6701_v48 = vadd.f32 %v6700_v45, %v6571_v18  ;;  %v14322_v32 = vld [vmem:[#allocation90_spill] sm:$0xff] }
 0x7f3   :  { %6871 = vmatmul.bf16.gmra.mxu1 %v14324_v14 }
 0x7f4   :  { %v7076_v39 = vpack.c.bf16 %v6957_v60, %v14320_v10 }
 0x7f5   :  { %v6829_v0 = vpop.f32.mrf.mxu1  ;;  %v6703_v20 = vpop.f32.mrf.mxu0  ;;  %7000 = vmatmul.bf16.gmra.mxu2 %v14325_v61 }
 0x7f6   :  { %v6830_v51 = vadd.f32 %v6829_v0, %v6701_v48  ;;  %v7135_v54 = vunpack.c.l.bf16 %v7076_v39  ;;  %v7136_v9 = vunpack.c.h.bf16 %v7076_v39  ;;  %v14323_v0 = vld [vmem:[#allocation66_spill] sm:$0xff] }
 0x7f7   :  { %6618 = vmatmul.bf16.gmra.mxu3 %v14327_v33 }
 0x7f8   :  { %6742 = vmatmul.bf16.gmra.mxu0 %v14322_v32  ;;  %v7233_v15 = vadd.f32 %v12753_v30, %v7135_v54  ;;  %v7234_v1 = vadd.f32 %v12755_v26, %v7136_v9 }
 0x7f9   :  { %v6958_v45 = vpop.f32.mrf.mxu2  ;;  %v6574_v10 = vpop.f32.mrf.mxu3 }
 0x7fa   :  { %v6959_v57 = vadd.f32 %v6958_v45, %v6830_v51  ;;  %v6704_v18 = vadd.f32 %v6703_v20, %v6574_v10  ;;  %v7329_v13 = vpack.c.bf16 %v7234_v1, %v7233_v15 }
 0x7fc   :  { %v7077_v39 = vpack.c.bf16 %v6959_v57, %v14323_v0  ;;  %v7377_v20 = vunpack.c.l.bf16 %v7329_v13  ;;  %v7378_v0 = vunpack.c.h.bf16 %v7329_v13 }
 0x7fd   :  { %v6832_v60 = vpop.f32.mrf.mxu1  ;;  %v6705_v28 = vpop.f32.mrf.mxu0 }
 0x7fe   :  { %v6833_v48 = vadd.f32 %v6832_v60, %v6704_v18  ;;  %v7137_v23 = vunpack.c.l.bf16 %v7077_v39  ;;  %v7138_v11 = vunpack.c.h.bf16 %v7077_v39  ;;  %v14326_v39 = vld [vmem:[#allocation99_spill] sm:$0xff] }
 0x800   :  { %v7235_v51 = vadd.f32 %v12753_v30, %v7137_v23  ;;  %v7236_v32 = vadd.f32 %v12755_v26, %v7138_v11  ;;  %v14328_v11 = vld [vmem:[#allocation58_spill] sm:$0xff] }
 0x801   :  { %v6961_v54 = vpop.f32.mrf.mxu2  ;;  %v6576_v4 = vpop.f32.mrf.mxu3 }
 0x802   :  { %v7330_v45 = vpack.c.bf16 %v7236_v32, %v7235_v51  ;;  %v6962_v9 = vadd.f32 %v6961_v54, %v6833_v48  ;;  %v6706_v57 = vadd.f32 %v6705_v28, %v6576_v4 }
 0x804   :  { %v7379_v60 = vunpack.c.l.bf16 %v7330_v45  ;;  %v7380_v18 = vunpack.c.h.bf16 %v7330_v45  ;;  %v7078_v12 = vpack.c.bf16 %v6962_v9, %v14326_v39 }
 0x805   :  { %v6834_v10 = vpop.f32.mrf.mxu1  ;;  %v6708_v14 = vpop.f32.mrf.mxu0 }
 0x806   :  { %v6835_v44 = vadd.f32 %v6834_v10, %v6706_v57  ;;  %v7473_v61 = vmax.f32 %v7377_v20, %v7379_v60  ;;  %v7486_v15 = vmax.f32 %v7378_v0, %v7380_v18  ;;  %v7139_v1 = vunpack.c.l.bf16 %v7078_v12  ;;  %v14329_v20 = vld [vmem:[#allocation34_spill] sm:$0xff] }
 0x807   :  { %v7140_v23 = vunpack.c.h.bf16 %v7078_v12  ;;  %6623 = vmatmul.bf16.gmra.mxu3 %v12179_v6 }
 0x808   :  { %6747 = vmatmul.bf16.gmra.mxu0 %v14328_v11  ;;  %v7237_v48 = vadd.f32 %v12753_v30, %v7139_v1  ;;  %v14330_v11 = vld [vmem:[#allocation71_spill] sm:$0xff]  ;;  %v14331_v1 = vld [vmem:[#allocation97_spill] sm:$0xff] }
 0x809   :  { %v7238_v51 = vadd.f32 %v12755_v26, %v7140_v23  ;;  %v6963_v4 = vpop.f32.mrf.mxu2  ;;  %v6579_v32 = vpop.f32.mrf.mxu3  ;;  %6876 = vmatmul.bf16.gmra.mxu1 %v14330_v11  ;;  %7005 = vmatmul.bf16.gmra.mxu2 %v14331_v1 }
 0x80a   :  { %v6964_v13 = vadd.f32 %v6963_v4, %v6835_v44  ;;  %v6709_v45 = vadd.f32 %v6708_v14, %v6579_v32 }
 0x80b   :  { %v7331_v28 = vpack.c.bf16 %v7238_v51, %v7237_v48 }
 0x80c   :  { %v7079_v57 = vpack.c.bf16 %v6964_v13, %v14329_v20 }
 0x80d   :  { %v6837_v54 = vpop.f32.mrf.mxu1  ;;  %v7381_v9 = vunpack.c.l.bf16 %v7331_v28  ;;  %v7382_v10 = vunpack.c.h.bf16 %v7331_v28  ;;  %v6710_v0 = vpop.f32.mrf.mxu0 }
 0x80e   :  { %v6838_v12 = vadd.f32 %v6837_v54, %v6709_v45  ;;  %v7141_v18 = vunpack.c.l.bf16 %v7079_v57  ;;  %v7142_v39 = vunpack.c.h.bf16 %v7079_v57 }
 0x80f   :  { %v7474_v60 = vmax.f32 %v7473_v61, %v7381_v9  ;;  %v7487_v33 = vmax.f32 %v7486_v15, %v7382_v10  ;;  %v14332_v61 = vld [vmem:[#allocation26_spill] sm:$0xff] }
 0x810   :  { %v7239_v23 = vadd.f32 %v12753_v30, %v7141_v18  ;;  %v7240_v44 = vadd.f32 %v12755_v26, %v7142_v39 }
 0x811   :  { %v6966_v48 = vpop.f32.mrf.mxu2  ;;  %v6581_v4 = vpop.f32.mrf.mxu3 }
 0x812   :  { %v7332_v14 = vpack.c.bf16 %v7240_v44, %v7239_v23  ;;  %v6967_v51 = vadd.f32 %v6966_v48, %v6838_v12  ;;  %v6711_v13 = vadd.f32 %v6710_v0, %v6581_v4 }
 0x814   :  { %v7383_v32 = vunpack.c.l.bf16 %v7332_v14  ;;  %v7384_v54 = vunpack.c.h.bf16 %v7332_v14  ;;  %v7080_v15 = vpack.c.bf16 %v6967_v51, %v14332_v61 }
 0x815   :  { %v6839_v28 = vpop.f32.mrf.mxu1  ;;  %v6713_v45 = vpop.f32.mrf.mxu0 }
 0x816   :  { %v6840_v9 = vadd.f32 %v6839_v28, %v6711_v13  ;;  %v7475_v10 = vmax.f32 %v7474_v60, %v7383_v32  ;;  %v7488_v20 = vmax.f32 %v7487_v33, %v7384_v54  ;;  %v7143_v57 = vunpack.c.l.bf16 %v7080_v15 }
 0x817   :  { %v7144_v11 = vunpack.c.h.bf16 %v7080_v15  ;;  %6628 = vmatmul.bf16.gmra.mxu3 %v12213_v25 }
 0x818   :  { %6752 = vmatmul.bf16.gmra.mxu0 %v12181_v8  ;;  %v7241_v18 = vadd.f32 %v12753_v30, %v7143_v57 }
 0x819   :  { %v7242_v12 = vadd.f32 %v12755_v26, %v7144_v11  ;;  %v6968_v39 = vpop.f32.mrf.mxu2  ;;  %v6584_v23 = vpop.f32.mrf.mxu3  ;;  %6881 = vmatmul.bf16.gmra.mxu1 %v12192_v22  ;;  %7010 = vmatmul.bf16.gmra.mxu2 %v12194_v42 }
 0x81a   :  { %v6969_v1 = vadd.f32 %v6968_v39, %v6840_v9  ;;  %v6714_v48 = vadd.f32 %v6713_v45, %v6584_v23 }
 0x81b   :  { %v7333_v0 = vpack.c.bf16 %v7242_v12, %v7241_v18 }
 0x81c   :  { %v7081_v60 = vpack.c.bf16 %v6969_v1, %v12510_v55  ;;  %v9210_v1 = vld [vmem:[%s13076_s10 + $0x30] sm:$0xff] }
 0x81d   :  { %v6842_v44 = vpop.f32.mrf.mxu1  ;;  %v7385_v14 = vunpack.c.l.bf16 %v7333_v0  ;;  %v7386_v51 = vunpack.c.h.bf16 %v7333_v0  ;;  %v6715_v33 = vpop.f32.mrf.mxu0  ;;  %7812 = vmatpush.bf16.msra.mxu3 %v9210_v1 }
 0x81e   :  { %v6843_v4 = vadd.f32 %v6842_v44, %v6714_v48  ;;  %v7145_v13 = vunpack.c.l.bf16 %v7081_v60  ;;  %v7146_v8 = vunpack.c.h.bf16 %v7081_v60 }
 0x81f   :  { %v7476_v28 = vmax.f32 %v7475_v10, %v7385_v14  ;;  %v7489_v6 = vmax.f32 %v7488_v20, %v7386_v51 }
 0x820   :  { %v7243_v32 = vadd.f32 %v12753_v30, %v7145_v13  ;;  %v7244_v54 = vadd.f32 %v12755_v26, %v7146_v8 }
 0x821   :  { %v6971_v61 = vpop.f32.mrf.mxu2  ;;  %v6586_v9 = vpop.f32.mrf.mxu3 }
 0x822   :  { %v7334_v15 = vpack.c.bf16 %v7244_v54, %v7243_v32  ;;  %v6972_v45 = vadd.f32 %v6971_v61, %v6843_v4  ;;  %v6716_v55 = vadd.f32 %v6715_v33, %v6586_v9 }
 0x824   :  { %v7387_v11 = vunpack.c.l.bf16 %v7334_v15  ;;  %v7388_v18 = vunpack.c.h.bf16 %v7334_v15  ;;  %v7082_v10 = vpack.c.bf16 %v6972_v45, %v12553_v49 }
 0x825   :  { %v6844_v57 = vpop.f32.mrf.mxu1  ;;  %v6718_v42 = vpop.f32.mrf.mxu0 }
 0x826   :  { %v6845_v20 = vadd.f32 %v6844_v57, %v6716_v55  ;;  %v7477_v12 = vmax.f32 %v7476_v28, %v7387_v11  ;;  %v7490_v39 = vmax.f32 %v7489_v6, %v7388_v18  ;;  %v7147_v22 = vunpack.c.l.bf16 %v7082_v10 }
 0x827   :  { %v7148_v0 = vunpack.c.h.bf16 %v7082_v10  ;;  %6633 = vmatmul.bf16.gmra.mxu3 %v12247_v31 }
 0x828   :  { %6757 = vmatmul.bf16.gmra.mxu0 %v14229_v58  ;;  %v7245_v23 = vadd.f32 %v12753_v30, %v7147_v22 }
 0x829   :  { %v7246_v44 = vadd.f32 %v12755_v26, %v7148_v0  ;;  %v6973_v48 = vpop.f32.mrf.mxu2  ;;  %v6589_v51 = vpop.f32.mrf.mxu3  ;;  %6886 = vmatmul.bf16.gmra.mxu1 %v12226_v59  ;;  %7015 = vmatmul.bf16.gmra.mxu2 %v12228_v46 }
 0x82a   :  { %v6974_v14 = vadd.f32 %v6973_v48, %v6845_v20  ;;  %v6719_v33 = vadd.f32 %v6718_v42, %v6589_v51 }
 0x82b   :  { %v7335_v49 = vpack.c.bf16 %v7246_v44, %v7245_v23 }
 0x82c   :  { %v7083_v25 = vpack.c.bf16 %v6974_v14, %v12577_v50  ;;  %v14333_v14 = vld [vmem:[#allocation59_spill] sm:$0xff] }
 0x82d   :  { %v6847_v60 = vpop.f32.mrf.mxu1  ;;  %v7389_v4 = vunpack.c.l.bf16 %v7335_v49  ;;  %v7390_v28 = vunpack.c.h.bf16 %v7335_v49  ;;  %v6720_v54 = vpop.f32.mrf.mxu0 }
 0x82e   :  { %v6848_v58 = vadd.f32 %v6847_v60, %v6719_v33  ;;  %v7149_v8 = vunpack.c.l.bf16 %v7083_v25  ;;  %v7150_v32 = vunpack.c.h.bf16 %v7083_v25  ;;  %v14334_v33 = vld [vmem:[#allocation24_spill] sm:$0xff] }
 0x82f   :  { %v7478_v6 = vmax.f32 %v7477_v12, %v7389_v4  ;;  %v7491_v13 = vmax.f32 %v7490_v39, %v7390_v28  ;;  %v14335_v4 = vld [vmem:[#allocation73_spill] sm:$0xff] }
 0x830   :  { %v7247_v61 = vadd.f32 %v12753_v30, %v7149_v8  ;;  %v7248_v15 = vadd.f32 %v12755_v26, %v7150_v32 }
 0x831   :  { %v6976_v45 = vpop.f32.mrf.mxu2  ;;  %v6591_v55 = vpop.f32.mrf.mxu3 }
 0x832   :  { %v7336_v9 = vpack.c.bf16 %v7248_v15, %v7247_v61  ;;  %v6977_v57 = vadd.f32 %v6976_v45, %v6848_v58  ;;  %v6721_v50 = vadd.f32 %v6720_v54, %v6591_v55 }
 0x834   :  { %v7391_v18 = vunpack.c.l.bf16 %v7336_v9  ;;  %v7392_v10 = vunpack.c.h.bf16 %v7336_v9  ;;  %v7084_v20 = vpack.c.bf16 %v6977_v57, %v12589_v52 }
 0x835   :  { %v6849_v11 = vpop.f32.mrf.mxu1  ;;  %v6723_v46 = vpop.f32.mrf.mxu0 }
 0x836   :  { %v6850_v12 = vadd.f32 %v6849_v11, %v6721_v50  ;;  %v12800_v39 = vmax.f32 %v7478_v6, %v7391_v18  ;;  %v12802_v59 = vmax.f32 %v7491_v13, %v7392_v10  ;;  %v7151_v22 = vunpack.c.l.bf16 %v7084_v20 }
 0x837   :  { %v7152_v0 = vunpack.c.h.bf16 %v7084_v20  ;;  %6638 = vmatmul.bf16.gmra.mxu3 %v14245_v19 }
 0x838   :  { %6762 = vmatmul.bf16.gmra.mxu0 %v14241_v29  ;;  %v7249_v49 = vadd.f32 %v12753_v30, %v7151_v22 }
 0x839   :  { %v6978_v42 = vpop.f32.mrf.mxu2  ;;  %v6594_v23 = vpop.f32.mrf.mxu3  ;;  %v7250_v52 = vadd.f32 %v12755_v26, %v7152_v0  ;;  %6891 = vmatmul.bf16.gmra.mxu1 %v14334_v33  ;;  %7020 = vmatmul.bf16.gmra.mxu2 %v14335_v4 }
 0x83a   :  { %v6979_v1 = vadd.f32 %v6978_v42, %v6850_v12  ;;  %v6724_v48 = vadd.f32 %v6723_v46, %v6594_v23 }
 0x83b   :  { %v7337_v25 = vpack.c.bf16 %v7250_v52, %v7249_v49 }
 0x83c   :  { %v7085_v51 = vpack.c.bf16 %v6979_v1, %v14333_v14  ;;  %v14336_v14 = vld [vmem:[#allocation55_spill] sm:$0xff] }
 0x83d   :  { %v6852_v44 = vpop.f32.mrf.mxu1  ;;  %v6725_v31 = vpop.f32.mrf.mxu0  ;;  %v7393_v45 = vunpack.c.l.bf16 %v7337_v25  ;;  %v7394_v57 = vunpack.c.h.bf16 %v7337_v25 }
 0x83e   :  { %v6853_v60 = vadd.f32 %v6852_v44, %v6724_v48  ;;  %v7153_v29 = vunpack.c.l.bf16 %v7085_v51  ;;  %v7154_v28 = vunpack.c.h.bf16 %v7085_v51 }
 0x840   :  { %v7251_v58 = vadd.f32 %v12753_v30, %v7153_v29  ;;  %v7252_v6 = vadd.f32 %v12755_v26, %v7154_v28  ;;  %v14338_v29 = vld [vmem:[#allocation25_spill] sm:$0xff] }
 0x841   :  { %v6981_v13 = vpop.f32.mrf.mxu2  ;;  %v6596_v32 = vpop.f32.mrf.mxu3 }
 0x842   :  { %v6982_v8 = vadd.f32 %v6981_v13, %v6853_v60  ;;  %v7338_v54 = vpack.c.bf16 %v7252_v6, %v7251_v58  ;;  %v6726_v15 = vadd.f32 %v6725_v31, %v6596_v32 }
 0x844   :  { %v7086_v9 = vpack.c.bf16 %v6982_v8, %v12597_v63  ;;  %v7395_v55 = vunpack.c.l.bf16 %v7338_v54  ;;  %v7396_v11 = vunpack.c.h.bf16 %v7338_v54 }
 0x845   :  { %v6854_v61 = vpop.f32.mrf.mxu1  ;;  %v6728_v20 = vpop.f32.mrf.mxu0 }
 0x846   :  { %v6855_v50 = vadd.f32 %v6854_v61, %v6726_v15  ;;  %v7155_v18 = vunpack.c.l.bf16 %v7086_v9  ;;  %v7156_v10 = vunpack.c.h.bf16 %v7086_v9  ;;  %v7499_v12 = vmax.f32 %v7393_v45, %v7395_v55 }
 0x847   :  { %v7512_v46 = vmax.f32 %v7394_v57, %v7396_v11 }
 0x848   :  { %6767 = vmatmul.bf16.gmra.mxu0 %v14246_v3  ;;  %v7253_v22 = vadd.f32 %v12753_v30, %v7155_v18  ;;  %v7254_v0 = vadd.f32 %v12755_v26, %v7156_v10  ;;  %v14337_v3 = vld [vmem:[#allocation42_spill] sm:$0xff] }
 0x849   :  { %v6983_v42 = vpop.f32.mrf.mxu2  ;;  %v6599_v23 = vpop.f32.mrf.mxu3  ;;  %6896 = vmatmul.bf16.gmra.mxu1 %v14337_v3  ;;  %7025 = vmatmul.bf16.gmra.mxu2 %v14338_v29 }
 0x84a   :  { %v7339_v1 = vpack.c.bf16 %v7254_v0, %v7253_v22  ;;  %v6984_v63 = vadd.f32 %v6983_v42, %v6855_v50  ;;  %v6729_v48 = vadd.f32 %v6728_v20, %v6599_v23  ;;  %v14339_v20 = vld [vmem:[#allocation27_spill] sm:$0xff] }
 0x84b   :  { %6643 = vmatmul.bf16.gmra.mxu3 %v14339_v20 }
 0x84c   :  { %v7397_v49 = vunpack.c.l.bf16 %v7339_v1  ;;  %v7398_v52 = vunpack.c.h.bf16 %v7339_v1  ;;  %v7087_v51 = vpack.c.bf16 %v6984_v63, %v14336_v14 }
 0x84d   :  { %v6857_v44 = vpop.f32.mrf.mxu1  ;;  %v6730_v28 = vpop.f32.mrf.mxu0 }
 0x84e   :  { %v6858_v60 = vadd.f32 %v6857_v44, %v6729_v48  ;;  %v7500_v33 = vmax.f32 %v7499_v12, %v7397_v49  ;;  %v7513_v4 = vmax.f32 %v7512_v46, %v7398_v52  ;;  %v7157_v19 = vunpack.c.l.bf16 %v7087_v51  ;;  %v14340_v12 = vld [vmem:[#allocation61_spill] sm:$0xff] }
 0x84f   :  { %v7158_v31 = vunpack.c.h.bf16 %v7087_v51 }
 0x850   :  { %v7255_v25 = vadd.f32 %v12753_v30, %v7157_v19  ;;  %v14342_v19 = vld [vmem:[#allocation98_spill] sm:$0xff] }
 0x851   :  { %v7256_v58 = vadd.f32 %v12755_v26, %v7158_v31  ;;  %v6986_v6 = vpop.f32.mrf.mxu2  ;;  %v6601_v32 = vpop.f32.mrf.mxu3 }
 0x852   :  { %v6987_v8 = vadd.f32 %v6986_v6, %v6858_v60  ;;  %v6731_v61 = vadd.f32 %v6730_v28, %v6601_v32 }
 0x853   :  { %v7340_v13 = vpack.c.bf16 %v7256_v58, %v7255_v25 }
 0x854   :  { %v7088_v9 = vpack.c.bf16 %v6987_v8, %v12605_v2 }
 0x855   :  { %v6859_v54 = vpop.f32.mrf.mxu1  ;;  %v7399_v15 = vunpack.c.l.bf16 %v7340_v13  ;;  %v7400_v45 = vunpack.c.h.bf16 %v7340_v13  ;;  %v6733_v10 = vpop.f32.mrf.mxu0 }
 0x856   :  { %v6860_v57 = vadd.f32 %v6859_v54, %v6731_v61  ;;  %v7159_v50 = vunpack.c.l.bf16 %v7088_v9  ;;  %v7160_v18 = vunpack.c.h.bf16 %v7088_v9  ;;  %v14343_v54 = vld [vmem:[#allocation93_spill] sm:$0xff] }
 0x857   :  { %v7501_v55 = vmax.f32 %v7500_v33, %v7399_v15  ;;  %v7514_v11 = vmax.f32 %v7513_v4, %v7400_v45  ;;  %v14341_v4 = vld [vmem:[#allocation82_spill] sm:$0xff] }
 0x858   :  { %6772 = vmatmul.bf16.gmra.mxu0 %v14340_v12  ;;  %v7257_v46 = vadd.f32 %v12753_v30, %v7159_v50  ;;  %v7258_v22 = vadd.f32 %v12755_v26, %v7160_v18  ;;  %v9209_v50 = vld [vmem:[%s13076_s10 + $0x28] sm:$0xff] }
 0x859   :  { %v6988_v0 = vpop.f32.mrf.mxu2  ;;  %v6604_v63 = vpop.f32.mrf.mxu3  ;;  %6901 = vmatmul.bf16.gmra.mxu1 %v14341_v4  ;;  %7030 = vmatmul.bf16.gmra.mxu2 %v14342_v19  ;;  %v14344_v18 = vld [vmem:[#allocation65_spill] sm:$0xff]  ;;  %v14348_v4 = vld [vmem:[#allocation84_spill] sm:$0xff] }
 0x85a   :  { %v7341_v42 = vpack.c.bf16 %v7258_v22, %v7257_v46  ;;  %v6989_v1 = vadd.f32 %v6988_v0, %v6860_v57  ;;  %v6734_v2 = vadd.f32 %v6733_v10, %v6604_v63  ;;  %v14345_v10 = vld [vmem:[#allocation28_spill] sm:$0xff]  ;;  %7813 = vmatpush.bf16.msra.mxu3 %v9209_v50 }
 0x85b   :  { %6648 = vmatmul.bf16.gmra.mxu3 %v14344_v18 }
 0x85c   :  { %v7401_v44 = vunpack.c.l.bf16 %v7341_v42  ;;  %v7402_v48 = vunpack.c.h.bf16 %v7341_v42  ;;  %v7089_v49 = vpack.c.bf16 %v6989_v1, %v12609_v34 }
 0x85d   :  { %v6862_v23 = vpop.f32.mrf.mxu1  ;;  %v6735_v31 = vpop.f32.mrf.mxu0 }
 0x85e   :  { %v6863_v52 = vadd.f32 %v6862_v23, %v6734_v2  ;;  %v7502_v14 = vmax.f32 %v7501_v55, %v7401_v44  ;;  %v7515_v51 = vmax.f32 %v7514_v11, %v7402_v48  ;;  %v7161_v60 = vunpack.c.l.bf16 %v7089_v49  ;;  %v14346_v44 = vld [vmem:[#allocation39_spill] sm:$0xff] }
 0x85f   :  { %v7162_v33 = vunpack.c.h.bf16 %v7089_v49 }
 0x860   :  { %v7259_v3 = vadd.f32 %v12753_v30, %v7161_v60 }
 0x861   :  { %v7260_v29 = vadd.f32 %v12755_v26, %v7162_v33  ;;  %v6991_v28 = vpop.f32.mrf.mxu2  ;;  %v6606_v6 = vpop.f32.mrf.mxu3  ;;  %v14347_v33 = vld [vmem:[#allocation87_spill] sm:$0xff] }
 0x862   :  { %v6992_v58 = vadd.f32 %v6991_v28, %v6863_v52  ;;  %v6736_v34 = vadd.f32 %v6735_v31, %v6606_v6 }
 0x863   :  { %v7342_v25 = vpack.c.bf16 %v7260_v29, %v7259_v3 }
 0x864   :  { %v7090_v61 = vpack.c.bf16 %v6992_v58, %v14343_v54 }
 0x865   :  { %v6864_v13 = vpop.f32.mrf.mxu1  ;;  %v7403_v8 = vunpack.c.l.bf16 %v7342_v25  ;;  %v7404_v32 = vunpack.c.h.bf16 %v7342_v25  ;;  %v6738_v11 = vpop.f32.mrf.mxu0 }
 0x866   :  { %v6865_v15 = vadd.f32 %v6864_v13, %v6736_v34  ;;  %v7163_v57 = vunpack.c.l.bf16 %v7090_v61  ;;  %v7164_v55 = vunpack.c.h.bf16 %v7090_v61 }
 0x867   :  { %v7503_v45 = vmax.f32 %v7502_v14, %v7403_v8  ;;  %v7516_v9 = vmax.f32 %v7515_v51, %v7404_v32 }
 0x868   :  { %6777 = vmatmul.bf16.gmra.mxu0 %v14345_v10  ;;  %v7261_v20 = vadd.f32 %v12753_v30, %v7163_v57  ;;  %v7262_v12 = vadd.f32 %v12755_v26, %v7164_v55 }
 0x869   :  { %v6993_v46 = vpop.f32.mrf.mxu2  ;;  %v6609_v42 = vpop.f32.mrf.mxu3  ;;  %6906 = vmatmul.bf16.gmra.mxu1 %v14347_v33  ;;  %7035 = vmatmul.bf16.gmra.mxu2 %v14348_v4 }
 0x86a   :  { %v7343_v22 = vpack.c.bf16 %v7262_v12, %v7261_v20  ;;  %v6994_v0 = vadd.f32 %v6993_v46, %v6865_v15  ;;  %v6739_v63 = vadd.f32 %v6738_v11, %v6609_v42 }
 0x86b   :  { %6653 = vmatmul.bf16.gmra.mxu3 %v12378_v41 }
 0x86c   :  { %v7405_v23 = vunpack.c.l.bf16 %v7343_v22  ;;  %v7406_v2 = vunpack.c.h.bf16 %v7343_v22  ;;  %v7091_v48 = vpack.c.bf16 %v6994_v0, %v14346_v44 }
 0x86d   :  { %v6867_v1 = vpop.f32.mrf.mxu1  ;;  %v6740_v19 = vpop.f32.mrf.mxu0 }
 0x86e   :  { %v6868_v49 = vadd.f32 %v6867_v1, %v6739_v63  ;;  %v7504_v52 = vmax.f32 %v7503_v45, %v7405_v23  ;;  %v7517_v14 = vmax.f32 %v7516_v9, %v7406_v2  ;;  %v7165_v51 = vunpack.c.l.bf16 %v7091_v48 }
 0x86f   :  { %v7166_v60 = vunpack.c.h.bf16 %v7091_v48 }
 0x870   :  { %v7263_v31 = vadd.f32 %v12753_v30, %v7165_v51 }
 0x871   :  { %v7264_v3 = vadd.f32 %v12755_v26, %v7166_v60  ;;  %v6996_v29 = vpop.f32.mrf.mxu2  ;;  %v6611_v58 = vpop.f32.mrf.mxu3 }
 0x872   :  { %v6997_v25 = vadd.f32 %v6996_v29, %v6868_v49  ;;  %v6741_v13 = vadd.f32 %v6740_v19, %v6611_v58  ;;  %v9208_v19 = vld [vmem:[%s13076_s10 + $0x20] sm:$0xff] }
 0x873   :  { %v7344_v28 = vpack.c.bf16 %v7264_v3, %v7263_v31  ;;  %v14349_v29 = vld [vmem:[#allocation89_spill] sm:$0xff]  ;;  %7814 = vmatpush.bf16.msra.mxu3 %v9208_v19 }
 0x874   :  { %v7092_v32 = vpack.c.bf16 %v6997_v25, %v12621_v38 }
 0x875   :  { %v6869_v6 = vpop.f32.mrf.mxu1  ;;  %v7407_v34 = vunpack.c.l.bf16 %v7344_v28  ;;  %v7408_v8 = vunpack.c.h.bf16 %v7344_v28  ;;  %v6743_v45 = vpop.f32.mrf.mxu0 }
 0x876   :  { %v6870_v54 = vadd.f32 %v6869_v6, %v6741_v13  ;;  %v7167_v9 = vunpack.c.l.bf16 %v7092_v32  ;;  %v7168_v57 = vunpack.c.h.bf16 %v7092_v32 }
 0x877   :  { %v12847_v61 = vmax.f32 %v7504_v52, %v7407_v34  ;;  %v12849_v15 = vmax.f32 %v7517_v14, %v7408_v8 }
 0x878   :  { %6782 = vmatmul.bf16.gmra.mxu0 %v12380_v37  ;;  %v7265_v20 = vadd.f32 %v12753_v30, %v7167_v9  ;;  %v7266_v38 = vadd.f32 %v12755_v26, %v7168_v57 }
 0x879   :  { %v6998_v55 = vpop.f32.mrf.mxu2  ;;  %v6614_v50 = vpop.f32.mrf.mxu3  ;;  %6911 = vmatmul.bf16.gmra.mxu1 %v12399_v24  ;;  %7040 = vmatmul.bf16.gmra.mxu2 %v14255_v16 }
 0x87a   :  { %v6999_v11 = vadd.f32 %v6998_v55, %v6870_v54  ;;  %v6744_v10 = vadd.f32 %v6743_v45, %v6614_v50  ;;  %v7345_v0 = vpack.c.bf16 %v7266_v38, %v7265_v20  ;;  %v14350_v45 = vld [vmem:[#allocation31_spill] sm:$0xff] }
 0x87b   :  { %6658 = vmatmul.bf16.gmra.mxu3 %v12420_v53 }
 0x87c   :  { %v7093_v12 = vpack.c.bf16 %v6999_v11, %v12625_v36  ;;  %v7409_v36 = vunpack.c.l.bf16 %v7345_v0  ;;  %v7410_v24 = vunpack.c.h.bf16 %v7345_v0 }
 0x87d   :  { %v6872_v18 = vpop.f32.mrf.mxu1  ;;  %v6745_v41 = vpop.f32.mrf.mxu0 }
 0x87e   :  { %v6873_v46 = vadd.f32 %v6872_v18, %v6744_v10  ;;  %v7169_v37 = vunpack.c.l.bf16 %v7093_v12  ;;  %v7170_v22 = vunpack.c.h.bf16 %v7093_v12  ;;  %v14351_v18 = vld [vmem:[#allocation74_spill] sm:$0xff]  ;;  %v14352_v10 = vld [vmem:[#allocation100_spill] sm:$0xff] }
 0x880   :  { %v7267_v42 = vadd.f32 %v12753_v30, %v7169_v37  ;;  %v7268_v1 = vadd.f32 %v12755_v26, %v7170_v22 }
 0x881   :  { %v7001_v63 = vpop.f32.mrf.mxu2  ;;  %v6616_v2 = vpop.f32.mrf.mxu3 }
 0x882   :  { %v7002_v23 = vadd.f32 %v7001_v63, %v6873_v46  ;;  %v7346_v44 = vpack.c.bf16 %v7268_v1, %v7267_v42  ;;  %v6746_v49 = vadd.f32 %v6745_v41, %v6616_v2 }
 0x884   :  { %v7094_v52 = vpack.c.bf16 %v7002_v23, %v12629_v62  ;;  %v7411_v14 = vunpack.c.l.bf16 %v7346_v44  ;;  %v7412_v16 = vunpack.c.h.bf16 %v7346_v44  ;;  %v14353_v23 = vld [vmem:[#allocation109_spill] sm:$0xff] }
 0x885   :  { %v6874_v48 = vpop.f32.mrf.mxu1  ;;  %v6748_v4 = vpop.f32.mrf.mxu0 }
 0x886   :  { %v6875_v51 = vadd.f32 %v6874_v48, %v6746_v49  ;;  %v7171_v60 = vunpack.c.l.bf16 %v7094_v52  ;;  %v7172_v33 = vunpack.c.h.bf16 %v7094_v52  ;;  %v7525_v31 = vmax.f32 %v7409_v36, %v7411_v14  ;;  %v14354_v14 = vld [vmem:[#allocation29_spill] sm:$0xff] }
 0x887   :  { %v7538_v3 = vmax.f32 %v7410_v24, %v7412_v16  ;;  %v14355_v16 = vld [vmem:[#allocation101_spill] sm:$0xff] }
 0x888   :  { %6787 = vmatmul.bf16.gmra.mxu0 %v14349_v29  ;;  %v7269_v28 = vadd.f32 %v12753_v30, %v7171_v60  ;;  %v7270_v62 = vadd.f32 %v12755_v26, %v7172_v33 }
 0x889   :  { %v7003_v25 = vpop.f32.mrf.mxu2  ;;  %v6619_v13 = vpop.f32.mrf.mxu3  ;;  %6916 = vmatmul.bf16.gmra.mxu1 %v14351_v18  ;;  %7045 = vmatmul.bf16.gmra.mxu2 %v14352_v10 }
 0x88a   :  { %v7347_v58 = vpack.c.bf16 %v7270_v62, %v7269_v28  ;;  %v7004_v6 = vadd.f32 %v7003_v25, %v6875_v51  ;;  %v6749_v8 = vadd.f32 %v6748_v4, %v6619_v13  ;;  %v14356_v25 = vld [vmem:[#allocation41_spill] sm:$0xff] }
 0x88b   :  { %6663 = vmatmul.bf16.gmra.mxu3 %v14354_v14 }
 0x88c   :  { %v7413_v32 = vunpack.c.l.bf16 %v7347_v58  ;;  %v7414_v54 = vunpack.c.h.bf16 %v7347_v58  ;;  %v7095_v9 = vpack.c.bf16 %v7004_v6, %v14350_v45  ;;  %v14358_v45 = vld [vmem:[#allocation106_spill] sm:$0xff] }
 0x88d   :  { %v6877_v34 = vpop.f32.mrf.mxu1  ;;  %v6750_v20 = vpop.f32.mrf.mxu0 }
 0x88e   :  { %v6878_v57 = vadd.f32 %v6877_v34, %v6749_v8  ;;  %v7526_v55 = vmax.f32 %v7525_v31, %v7413_v32  ;;  %v7539_v53 = vmax.f32 %v7538_v3, %v7414_v54  ;;  %v7173_v11 = vunpack.c.l.bf16 %v7095_v9  ;;  %v14357_v54 = vld [vmem:[#allocation105_spill] sm:$0xff] }
 0x88f   :  { %v7174_v50 = vunpack.c.h.bf16 %v7095_v9 }
 0x890   :  { %v7271_v38 = vadd.f32 %v12753_v30, %v7173_v11 }
 0x891   :  { %v7272_v12 = vadd.f32 %v12755_v26, %v7174_v50  ;;  %v7006_v46 = vpop.f32.mrf.mxu2  ;;  %v6621_v22 = vpop.f32.mrf.mxu3 }
 0x892   :  { %v7007_v37 = vadd.f32 %v7006_v46, %v6878_v57  ;;  %v6751_v42 = vadd.f32 %v6750_v20, %v6621_v22 }
 0x893   :  { %v7348_v41 = vpack.c.bf16 %v7272_v12, %v7271_v38 }
 0x894   :  { %v7096_v2 = vpack.c.bf16 %v7007_v37, %v14353_v23 }
 0x895   :  { %v6879_v0 = vpop.f32.mrf.mxu1  ;;  %v7415_v1 = vunpack.c.l.bf16 %v7348_v41  ;;  %v7416_v63 = vunpack.c.h.bf16 %v7348_v41  ;;  %v6753_v24 = vpop.f32.mrf.mxu0 }
 0x896   :  { %v6880_v44 = vadd.f32 %v6879_v0, %v6751_v42  ;;  %v7175_v36 = vunpack.c.l.bf16 %v7096_v2  ;;  %v7176_v52 = vunpack.c.h.bf16 %v7096_v2 }
 0x897   :  { %v7527_v48 = vmax.f32 %v7526_v55, %v7415_v1  ;;  %v7540_v49 = vmax.f32 %v7539_v53, %v7416_v63 }
 0x898   :  { %6792 = vmatmul.bf16.gmra.mxu0 %v14355_v16  ;;  %v7273_v51 = vadd.f32 %v12753_v30, %v7175_v36  ;;  %v7274_v60 = vadd.f32 %v12755_v26, %v7176_v52 }
 0x899   :  { %v7008_v33 = vpop.f32.mrf.mxu2  ;;  %v6624_v31 = vpop.f32.mrf.mxu3  ;;  %6921 = vmatmul.bf16.gmra.mxu1 %v14357_v54  ;;  %7050 = vmatmul.bf16.gmra.mxu2 %v14358_v45 }
 0x89a   :  { %v7349_v4 = vpack.c.bf16 %v7274_v60, %v7273_v51  ;;  %v7009_v19 = vadd.f32 %v7008_v33, %v6880_v44  ;;  %v6754_v29 = vadd.f32 %v6753_v24, %v6624_v31 }
 0x89b   :  { %6668 = vmatmul.bf16.gmra.mxu3 %v12490_v5 }
 0x89c   :  { %v7417_v28 = vunpack.c.l.bf16 %v7349_v4  ;;  %v7418_v62 = vunpack.c.h.bf16 %v7349_v4  ;;  %v7097_v58 = vpack.c.bf16 %v7009_v19, %v14356_v25 }
 0x89d   :  { %v6882_v3 = vpop.f32.mrf.mxu1  ;;  %v6755_v9 = vpop.f32.mrf.mxu0 }
 0x89e   :  { %v6883_v6 = vadd.f32 %v6882_v3, %v6754_v29  ;;  %v7528_v13 = vmax.f32 %v7527_v48, %v7417_v28  ;;  %v7541_v34 = vmax.f32 %v7540_v49, %v7418_v62  ;;  %v7177_v8 = vunpack.c.l.bf16 %v7097_v58 }
 0x89f   :  { %v7178_v32 = vunpack.c.h.bf16 %v7097_v58 }
 0x8a0   :  { %v7275_v57 = vadd.f32 %v12753_v30, %v7177_v8  ;;  %v9207_v8 = vld [vmem:[%s13076_s10 + $0x18] sm:$0xff] }
 0x8a1   :  { %v7276_v55 = vadd.f32 %v12755_v26, %v7178_v32  ;;  %v7011_v53 = vpop.f32.mrf.mxu2  ;;  %v6626_v18 = vpop.f32.mrf.mxu3  ;;  %7815 = vmatpush.bf16.msra.mxu3 %v9207_v8 }
 0x8a2   :  { %v7012_v50 = vadd.f32 %v7011_v53, %v6883_v6  ;;  %v6756_v20 = vadd.f32 %v6755_v9, %v6626_v18 }
 0x8a3   :  { %v7350_v11 = vpack.c.bf16 %v7276_v55, %v7275_v57 }
 0x8a4   :  { %v7098_v46 = vpack.c.bf16 %v7012_v50, %v12645_v47 }
 0x8a5   :  { %v6884_v10 = vpop.f32.mrf.mxu1  ;;  %v7419_v38 = vunpack.c.l.bf16 %v7350_v11  ;;  %v7420_v12 = vunpack.c.h.bf16 %v7350_v11  ;;  %v6758_v1 = vpop.f32.mrf.mxu0 }
 0x8a6   :  { %v6885_v41 = vadd.f32 %v6884_v10, %v6756_v20  ;;  %v7179_v0 = vunpack.c.l.bf16 %v7098_v46  ;;  %v7180_v42 = vunpack.c.h.bf16 %v7098_v46  ;;  %v14359_v10 = vld [vmem:[#allocation53_spill] sm:$0xff] }
 0x8a7   :  { %v7529_v37 = vmax.f32 %v7528_v13, %v7419_v38  ;;  %v7542_v22 = vmax.f32 %v7541_v34, %v7420_v12 }
 0x8a8   :  { %6797 = vmatmul.bf16.gmra.mxu0 %v12492_v56  ;;  %v7277_v63 = vadd.f32 %v12753_v30, %v7179_v0  ;;  %v7278_v23 = vadd.f32 %v12755_v26, %v7180_v42 }
 0x8a9   :  { %v7013_v2 = vpop.f32.mrf.mxu2  ;;  %v6629_v49 = vpop.f32.mrf.mxu3  ;;  %6926 = vmatmul.bf16.gmra.mxu1 %v12512_v40  ;;  %7055 = vmatmul.bf16.gmra.mxu2 %v12514_v17 }
 0x8aa   :  { %v7351_v44 = vpack.c.bf16 %v7278_v23, %v7277_v63  ;;  %v7014_v48 = vadd.f32 %v7013_v2, %v6885_v41  ;;  %v6759_v47 = vadd.f32 %v6758_v1, %v6629_v49  ;;  %v14361_v23 = vld [vmem:[#allocation46_spill] sm:$0xff] }
 0x8ab   :  { %6673 = vmatmul.bf16.gmra.mxu3 %v12527_v7  ;;  %v14360_v7 = vld [vmem:[#allocation102_spill] sm:$0xff] }
 0x8ac   :  { %v7421_v52 = vunpack.c.l.bf16 %v7351_v44  ;;  %v7422_v24 = vunpack.c.h.bf16 %v7351_v44  ;;  %v7099_v14 = vpack.c.bf16 %v7014_v48, %v12649_v27 }
 0x8ad   :  { %v6887_v36 = vpop.f32.mrf.mxu1  ;;  %v6760_v56 = vpop.f32.mrf.mxu0 }
 0x8ae   :  { %v6888_v16 = vadd.f32 %v6887_v36, %v6759_v47  ;;  %v7530_v51 = vmax.f32 %v7529_v37, %v7421_v52  ;;  %v7543_v60 = vmax.f32 %v7542_v22, %v7422_v24  ;;  %v7181_v5 = vunpack.c.l.bf16 %v7099_v14 }
 0x8af   :  { %v7182_v33 = vunpack.c.h.bf16 %v7099_v14 }
 0x8b0   :  { %v7279_v4 = vadd.f32 %v12753_v30, %v7181_v5 }
 0x8b1   :  { %v7280_v19 = vadd.f32 %v12755_v26, %v7182_v33  ;;  %v7016_v31 = vpop.f32.mrf.mxu2  ;;  %v6631_v28 = vpop.f32.mrf.mxu3 }
 0x8b2   :  { %v7017_v29 = vadd.f32 %v7016_v31, %v6888_v16  ;;  %v6761_v27 = vadd.f32 %v6760_v56, %v6631_v28 }
 0x8b3   :  { %v7352_v3 = vpack.c.bf16 %v7280_v19, %v7279_v4 }
 0x8b4   :  { %v7100_v6 = vpack.c.bf16 %v7017_v29, %v12653_v43 }
 0x8b5   :  { %v6889_v62 = vpop.f32.mrf.mxu1  ;;  %v7423_v25 = vunpack.c.l.bf16 %v7352_v3  ;;  %v7424_v58 = vunpack.c.h.bf16 %v7352_v3  ;;  %v6763_v17 = vpop.f32.mrf.mxu0 }
 0x8b6   :  { %v6890_v13 = vadd.f32 %v6889_v62, %v6761_v27  ;;  %v7183_v32 = vunpack.c.l.bf16 %v7100_v6  ;;  %v7184_v54 = vunpack.c.h.bf16 %v7100_v6  ;;  %v14364_v27 = vld [vmem:[#allocation22_spill] sm:$0xff] }
 0x8b7   :  { %v12894_v34 = vmax.f32 %v7530_v51, %v7423_v25  ;;  %v12896_v40 = vmax.f32 %v7543_v60, %v7424_v58  ;;  %v14362_v51 = vld [vmem:[#allocation57_spill] sm:$0xff]  ;;  %v14363_v60 = vld [vmem:[#allocation35_spill] sm:$0xff] }
 0x8b8   :  { %6802 = vmatmul.bf16.gmra.mxu0 %v12529_v21  ;;  %v7281_v53 = vadd.f32 %v12753_v30, %v7183_v32  ;;  %v7282_v11 = vadd.f32 %v12755_v26, %v7184_v54  ;;  %v14365_v32 = vld [vmem:[#allocation103_spill] sm:$0xff]  ;;  %v14366_v54 = vld [vmem:[#allocation108_spill] sm:$0xff] }
 0x8b9   :  { %v7018_v45 = vpop.f32.mrf.mxu2  ;;  %v6634_v43 = vpop.f32.mrf.mxu3  ;;  %6931 = vmatmul.bf16.gmra.mxu1 %v14359_v10  ;;  %7060 = vmatmul.bf16.gmra.mxu2 %v14360_v7 }
 0x8ba   :  { %v7019_v9 = vadd.f32 %v7018_v45, %v6890_v13  ;;  %v6764_v55 = vadd.f32 %v6763_v17, %v6634_v43  ;;  %v7353_v12 = vpack.c.bf16 %v7282_v11, %v7281_v53 }
 0x8bb   :  { %6678 = vmatmul.bf16.gmra.mxu3 %v14362_v51 }
 0x8bc   :  { %v7101_v50 = vpack.c.bf16 %v7019_v9, %v12657_v35  ;;  %v7425_v35 = vunpack.c.l.bf16 %v7353_v12  ;;  %v7426_v44 = vunpack.c.h.bf16 %v7353_v12 }
 0x8bd   :  { %v6892_v57 = vpop.f32.mrf.mxu1  ;;  %v6765_v21 = vpop.f32.mrf.mxu0 }
 0x8be   :  { %v6893_v18 = vadd.f32 %v6892_v57, %v6764_v55  ;;  %v7185_v20 = vunpack.c.l.bf16 %v7101_v50  ;;  %v7186_v38 = vunpack.c.h.bf16 %v7101_v50 }
 0x8c0   :  { %v7283_v46 = vadd.f32 %v12753_v30, %v7185_v20  ;;  %v7284_v41 = vadd.f32 %v12755_v26, %v7186_v38 }
 0x8c1   :  { %v7021_v37 = vpop.f32.mrf.mxu2  ;;  %v6636_v0 = vpop.f32.mrf.mxu3 }
 0x8c2   :  { %v7022_v22 = vadd.f32 %v7021_v37, %v6893_v18  ;;  %v7354_v42 = vpack.c.bf16 %v7284_v41, %v7283_v46  ;;  %v6766_v63 = vadd.f32 %v6765_v21, %v6636_v0  ;;  %v14367_v21 = vld [vmem:[#allocation43_spill] sm:$0xff]  ;;  %v14368_v0 = vld [vmem:[#allocation17_spill] sm:$0xff] }
 0x8c4   :  { %v7102_v2 = vpack.c.bf16 %v7022_v22, %v14361_v23  ;;  %v7427_v48 = vunpack.c.l.bf16 %v7354_v42  ;;  %v7428_v49 = vunpack.c.h.bf16 %v7354_v42  ;;  %v14369_v42 = vld [vmem:[#allocation111_spill] sm:$0xff] }
 0x8c5   :  { %v6894_v1 = vpop.f32.mrf.mxu1  ;;  %v6768_v24 = vpop.f32.mrf.mxu0 }
 0x8c6   :  { %v6895_v36 = vadd.f32 %v6894_v1, %v6766_v63  ;;  %v7187_v47 = vunpack.c.l.bf16 %v7102_v2  ;;  %v7188_v52 = vunpack.c.h.bf16 %v7102_v2  ;;  %v7551_v14 = vmax.f32 %v7425_v35, %v7427_v48 }
 0x8c7   :  { %v7564_v16 = vmax.f32 %v7426_v44, %v7428_v49 }
 0x8c8   :  { %6807 = vmatmul.bf16.gmra.mxu0 %v14363_v60  ;;  %v7285_v5 = vadd.f32 %v12753_v30, %v7187_v47  ;;  %v7286_v33 = vadd.f32 %v12755_v26, %v7188_v52  ;;  %v14370_v52 = vld [vmem:[#allocation45_spill] sm:$0xff] }
 0x8c9   :  { %v7023_v56 = vpop.f32.mrf.mxu2  ;;  %v6639_v31 = vpop.f32.mrf.mxu3  ;;  %6936 = vmatmul.bf16.gmra.mxu1 %v14365_v32  ;;  %7065 = vmatmul.bf16.gmra.mxu2 %v14366_v54 }
 0x8ca   :  { %v7355_v4 = vpack.c.bf16 %v7286_v33, %v7285_v5  ;;  %v7024_v19 = vadd.f32 %v7023_v56, %v6895_v36  ;;  %v6769_v29 = vadd.f32 %v6768_v24, %v6639_v31  ;;  %v14371_v33 = vld [vmem:[#allocation64_spill] sm:$0xff] }
 0x8cb   :  { %6683 = vmatmul.bf16.gmra.mxu3 %v14368_v0  ;;  %v14372_v56 = vld [vmem:[#allocation36_spill] sm:$0xff] }
 0x8cc   :  { %v7429_v28 = vunpack.c.l.bf16 %v7355_v4  ;;  %v7430_v62 = vunpack.c.h.bf16 %v7355_v4  ;;  %v7103_v25 = vpack.c.bf16 %v7024_v19, %v14364_v27 }
 0x8cd   :  { %v6897_v3 = vpop.f32.mrf.mxu1  ;;  %v6770_v45 = vpop.f32.mrf.mxu0 }
 0x8ce   :  { %v6898_v58 = vadd.f32 %v6897_v3, %v6769_v29  ;;  %v7552_v6 = vmax.f32 %v7551_v14, %v7429_v28  ;;  %v7565_v13 = vmax.f32 %v7564_v16, %v7430_v62  ;;  %v7189_v17 = vunpack.c.l.bf16 %v7103_v25 }
 0x8cf   :  { %v7190_v8 = vunpack.c.h.bf16 %v7103_v25 }
 0x8d0   :  { %v7287_v9 = vadd.f32 %v12753_v30, %v7189_v17 }
 0x8d1   :  { %v7288_v43 = vadd.f32 %v12755_v26, %v7190_v8  ;;  %v7026_v57 = vpop.f32.mrf.mxu2  ;;  %v6641_v11 = vpop.f32.mrf.mxu3 }
 0x8d2   :  { %v7027_v53 = vadd.f32 %v7026_v57, %v6898_v58  ;;  %v6771_v18 = vadd.f32 %v6770_v45, %v6641_v11  ;;  %v9206_v57 = vld [vmem:[%s13076_s10 + $0x10] sm:$0xff] }
 0x8d3   :  { %v7356_v55 = vpack.c.bf16 %v7288_v43, %v7287_v9  ;;  %7816 = vmatpush.bf16.msra.mxu3 %v9206_v57 }
 0x8d4   :  { %v7104_v20 = vpack.c.bf16 %v7027_v53, %v14367_v21 }
 0x8d5   :  { %v6899_v50 = vpop.f32.mrf.mxu1  ;;  %v7431_v10 = vunpack.c.l.bf16 %v7356_v55  ;;  %v7432_v7 = vunpack.c.h.bf16 %v7356_v55  ;;  %v6773_v22 = vpop.f32.mrf.mxu0 }
 0x8d6   :  { %v6900_v38 = vadd.f32 %v6899_v50, %v6771_v18  ;;  %v7191_v41 = vunpack.c.l.bf16 %v7104_v20  ;;  %v7192_v37 = vunpack.c.h.bf16 %v7104_v20 }
 0x8d7   :  { %v7553_v12 = vmax.f32 %v7552_v6, %v7431_v10  ;;  %v7566_v46 = vmax.f32 %v7565_v13, %v7432_v7  ;;  %v14373_v13 = vld [vmem:[#allocation47_spill] sm:$0xff] }
 0x8d8   :  { %6812 = vmatmul.bf16.gmra.mxu0 %v14369_v42  ;;  %v7289_v1 = vadd.f32 %v12753_v30, %v7191_v41  ;;  %v7290_v63 = vadd.f32 %v12755_v26, %v7192_v37 }
 0x8d9   :  { %v7028_v35 = vpop.f32.mrf.mxu2  ;;  %v6644_v44 = vpop.f32.mrf.mxu3  ;;  %6941 = vmatmul.bf16.gmra.mxu1 %v14371_v33  ;;  %7070 = vmatmul.bf16.gmra.mxu2 %v14372_v56 }
 0x8da   :  { %v7357_v23 = vpack.c.bf16 %v7290_v63, %v7289_v1  ;;  %v7029_v2 = vadd.f32 %v7028_v35, %v6900_v38  ;;  %v6774_v49 = vadd.f32 %v6773_v22, %v6644_v44 }
 0x8dc   :  { %v7433_v36 = vunpack.c.l.bf16 %v7357_v23  ;;  %v7434_v47 = vunpack.c.h.bf16 %v7357_v23  ;;  %v7105_v24 = vpack.c.bf16 %v7029_v2, %v14370_v52 }
 0x8dd   :  { %v6902_v48 = vpop.f32.mrf.mxu1  ;;  %v6775_v4 = vpop.f32.mrf.mxu0 }
 0x8de   :  { %v6903_v14 = vadd.f32 %v6902_v48, %v6774_v49  ;;  %v7554_v16 = vmax.f32 %v7553_v12, %v7433_v36  ;;  %v7567_v51 = vmax.f32 %v7566_v46, %v7434_v47  ;;  %v7193_v60 = vunpack.c.l.bf16 %v7105_v24  ;;  %v14374_v12 = vld [vmem:[#allocation72_spill] sm:$0xff] }
 0x8df   :  { %v7194_v5 = vunpack.c.h.bf16 %v7105_v24  ;;  %v14375_v24 = vld [vmem:[#allocation51_spill] sm:$0xff] }
 0x8e0   :  { %v7291_v19 = vadd.f32 %v12753_v30, %v7193_v60 }
 0x8e1   :  { %v7292_v31 = vadd.f32 %v12755_v26, %v7194_v5  ;;  %v7031_v3 = vpop.f32.mrf.mxu2  ;;  %v6646_v62 = vpop.f32.mrf.mxu3 }
 0x8e2   :  { %v7032_v28 = vadd.f32 %v7031_v3, %v6903_v14  ;;  %v6776_v25 = vadd.f32 %v6775_v4, %v6646_v62 }
 0x8e3   :  { %v7358_v29 = vpack.c.bf16 %v7292_v31, %v7291_v19 }
 0x8e4   :  { %v7106_v17 = vpack.c.bf16 %v7032_v28, %v14373_v13 }
 0x8e5   :  { %v6904_v27 = vpop.f32.mrf.mxu1  ;;  %v7435_v58 = vunpack.c.l.bf16 %v7358_v29  ;;  %v7436_v6 = vunpack.c.h.bf16 %v7358_v29  ;;  %v6778_v43 = vpop.f32.mrf.mxu0 }
 0x8e6   :  { %v6905_v8 = vadd.f32 %v6904_v27, %v6776_v25  ;;  %v7195_v45 = vunpack.c.l.bf16 %v7106_v17  ;;  %v7196_v9 = vunpack.c.h.bf16 %v7106_v17  ;;  %v14376_v27 = vld [vmem:[#allocation14_spill] sm:$0xff] }
 0x8e7   :  { %v7555_v32 = vmax.f32 %v7554_v16, %v7435_v58  ;;  %v7568_v54 = vmax.f32 %v7567_v51, %v7436_v6 }
 0x8e8   :  { %v7293_v55 = vadd.f32 %v12753_v30, %v7195_v45  ;;  %v7294_v53 = vadd.f32 %v12755_v26, %v7196_v9 }
 0x8e9   :  { %v7033_v11 = vpop.f32.mrf.mxu2  ;;  %v6649_v10 = vpop.f32.mrf.mxu3 }
 0x8ea   :  { %v7359_v50 = vpack.c.bf16 %v7294_v53, %v7293_v55  ;;  %v7034_v18 = vadd.f32 %v7033_v11, %v6905_v8  ;;  %v6779_v21 = vadd.f32 %v6778_v43, %v6649_v10 }
 0x8ec   :  { %v7437_v20 = vunpack.c.l.bf16 %v7359_v50  ;;  %v7438_v38 = vunpack.c.h.bf16 %v7359_v50  ;;  %v7107_v46 = vpack.c.bf16 %v7034_v18, %v14374_v12  ;;  %v14377_v50 = vld [vmem:[#allocation69_spill] sm:$0xff] }
 0x8ed   :  { %v6907_v7 = vpop.f32.mrf.mxu1  ;;  %v6780_v1 = vpop.f32.mrf.mxu0 }
 0x8ee   :  { %v6908_v41 = vadd.f32 %v6907_v7, %v6779_v21  ;;  %v7556_v37 = vmax.f32 %v7555_v32, %v7437_v20  ;;  %v7569_v22 = vmax.f32 %v7568_v54, %v7438_v38  ;;  %v7197_v0 = vunpack.c.l.bf16 %v7107_v46 }
 0x8ef   :  { %v7198_v42 = vunpack.c.h.bf16 %v7107_v46 }
 0x8f0   :  { %v7295_v63 = vadd.f32 %v12753_v30, %v7197_v0 }
 0x8f1   :  { %v7296_v35 = vadd.f32 %v12755_v26, %v7198_v42  ;;  %v7036_v23 = vpop.f32.mrf.mxu2  ;;  %v6651_v48 = vpop.f32.mrf.mxu3  ;;  %v7506_v42 = vrot.slane %v12847_v61, 4 }
 0x8f2   :  { %v7037_v44 = vadd.f32 %v7036_v23, %v6908_v41  ;;  %v6781_v36 = vadd.f32 %v6780_v1, %v6651_v48  ;;  %v7519_v1 = vrot.slane %v12849_v15, 4  ;;  %v7493_v48 = vrot.slane %v12802_v59, 4 }
 0x8f3   :  { %v7360_v2 = vpack.c.bf16 %v7296_v35, %v7295_v63 }
 0x8f4   :  { %v7108_v14 = vpack.c.bf16 %v7037_v44, %v14375_v24  ;;  %v7480_v44 = vrot.slane %v12800_v39, 4  ;;  %v14378_v24 = vld [vmem:[#allocation85_spill] sm:$0xff] }
 0x8f5   :  { %v6909_v49 = vpop.f32.mrf.mxu1  ;;  %v7439_v47 = vunpack.c.l.bf16 %v7360_v2  ;;  %v7440_v52 = vunpack.c.h.bf16 %v7360_v2  ;;  %v6783_v5 = vpop.f32.mrf.mxu0 }
 0x8f6   :  { %v6910_v16 = vadd.f32 %v6909_v49, %v6781_v36  ;;  %v7199_v33 = vunpack.c.l.bf16 %v7108_v14  ;;  %v7200_v56 = vunpack.c.h.bf16 %v7108_v14 }
 0x8f7   :  { %v12940_v51 = vmax.f32 %v7556_v37, %v7439_v47  ;;  %v12942_v60 = vmax.f32 %v7569_v22, %v7440_v52 }
 0x8f8   :  { %v7297_v28 = vadd.f32 %v12753_v30, %v7199_v33  ;;  %v7298_v62 = vadd.f32 %v12755_v26, %v7200_v56 }
 0x8f9   :  { %v7038_v4 = vpop.f32.mrf.mxu2  ;;  %v6654_v31 = vpop.f32.mrf.mxu3 }
 0x8fa   :  { %v7039_v19 = vadd.f32 %v7038_v4, %v6910_v16  ;;  %v6784_v29 = vadd.f32 %v6783_v5, %v6654_v31  ;;  %v7361_v8 = vpack.c.bf16 %v7298_v62, %v7297_v28  ;;  %v7507_v16 = vmax.f32 %v12847_v61, %v7506_v42 }
 0x8fb   :  { %v7520_v5 = vmax.f32 %v12849_v15, %v7519_v1  ;;  %v7494_v28 = vmax.f32 %v12802_v59, %v7493_v48 }
 0x8fc   :  { %v7109_v25 = vpack.c.bf16 %v7039_v19, %v14376_v27  ;;  %v7441_v11 = vunpack.c.l.bf16 %v7361_v8  ;;  %v7442_v10 = vunpack.c.h.bf16 %v7361_v8 }
 0x8fd   :  { %v6912_v3 = vpop.f32.mrf.mxu1  ;;  %v6785_v6 = vpop.f32.mrf.mxu0  ;;  %v7495_v8 = vrot.slane %v7494_v28, 2 }
 0x8fe   :  { %v6913_v58 = vadd.f32 %v6912_v3, %v6784_v29  ;;  %v7201_v13 = vunpack.c.l.bf16 %v7109_v25  ;;  %v7202_v17 = vunpack.c.h.bf16 %v7109_v25  ;;  %v7481_v29 = vmax.f32 %v12800_v39, %v7480_v44  ;;  %v14380_v44 = vld [vmem:[#allocation19_spill] sm:$0xff] }
 0x8ff   :  { %v7508_v25 = vrot.slane %v7507_v16, 2 }
 0x900   :  { %v7299_v32 = vadd.f32 %v12753_v30, %v7201_v13  ;;  %v7300_v54 = vadd.f32 %v12755_v26, %v7202_v17  ;;  %v7482_v17 = vrot.slane %v7481_v29, 2 }
 0x901   :  { %v7041_v45 = vpop.f32.mrf.mxu2  ;;  %v6656_v43 = vpop.f32.mrf.mxu3 }
 0x902   :  { %v7042_v9 = vadd.f32 %v7041_v45, %v6913_v58  ;;  %v7362_v57 = vpack.c.bf16 %v7300_v54, %v7299_v32  ;;  %v6786_v53 = vadd.f32 %v6785_v6, %v6656_v43  ;;  %v7521_v58 = vrot.slane %v7520_v5, 2  ;;  %v14379_v43 = vld [vmem:[#allocation107_spill] sm:$0xff] }
 0x904   :  { %v7110_v18 = vpack.c.bf16 %v7042_v9, %v14377_v50  ;;  %v7443_v7 = vunpack.c.l.bf16 %v7362_v57  ;;  %v7444_v21 = vunpack.c.h.bf16 %v7362_v57  ;;  %v7509_v57 = vmax.f32 %v7507_v16, %v7508_v25 }
 0x905   :  { %v6914_v55 = vpop.f32.mrf.mxu1  ;;  %v6788_v46 = vpop.f32.mrf.mxu0  ;;  %v7522_v59 = vmax.f32 %v7520_v5, %v7521_v58 }
 0x906   :  { %v6915_v20 = vadd.f32 %v6914_v55, %v6786_v53  ;;  %v7203_v38 = vunpack.c.l.bf16 %v7110_v18  ;;  %v7204_v12 = vunpack.c.h.bf16 %v7110_v18  ;;  %v7577_v41 = vmax.f32 %v7441_v11, %v7443_v7 }
 0x907   :  { %v7590_v37 = vmax.f32 %v7442_v10, %v7444_v21  ;;  %v7483_v7 = vmax.f32 %v7481_v29, %v7482_v17  ;;  %v7496_v21 = vmax.f32 %v7494_v28, %v7495_v8  ;;  %v14381_v17 = vld [vmem:[#allocation110_spill] sm:$0xff] }
 0x908   :  { %v7301_v22 = vadd.f32 %v12753_v30, %v7203_v38  ;;  %v7302_v0 = vadd.f32 %v12755_v26, %v7204_v12  ;;  %v7510_v12 = vrot.slane %v7509_v57, 1 }
 0x909   :  { %v7043_v63 = vpop.f32.mrf.mxu2  ;;  %v6659_v2 = vpop.f32.mrf.mxu3  ;;  %v7484_v42 = vrot.slane %v7483_v7, 1  ;;  %v7497_v1 = vrot.slane %v7496_v21, 1 }
 0x90a   :  { %v7363_v35 = vpack.c.bf16 %v7302_v0, %v7301_v22  ;;  %v7044_v23 = vadd.f32 %v7043_v63, %v6915_v20  ;;  %v6789_v36 = vadd.f32 %v6788_v46, %v6659_v2  ;;  %v7523_v46 = vrot.slane %v7522_v59, 1 }
 0x90c   :  { %v7445_v47 = vunpack.c.l.bf16 %v7363_v35  ;;  %v7446_v52 = vunpack.c.h.bf16 %v7363_v35  ;;  %v7111_v14 = vpack.c.bf16 %v7044_v23, %v14378_v24 }
 0x90d   :  { %v6917_v49 = vpop.f32.mrf.mxu1  ;;  %v6790_v3 = vpop.f32.mrf.mxu0 }
 0x90e   :  { %v6918_v33 = vadd.f32 %v6917_v49, %v6789_v36  ;;  %v7578_v56 = vmax.f32 %v7577_v41, %v7445_v47  ;;  %v7591_v4 = vmax.f32 %v7590_v37, %v7446_v52  ;;  %v7205_v19 = vunpack.c.l.bf16 %v7111_v14 }
 0x90f   :  { %v7206_v31 = vunpack.c.h.bf16 %v7111_v14  ;;  %v7511_v49 = vmax.f32 %v7509_v57, %v7510_v12  ;;  %v7524_v36 = vmax.f32 %v7522_v59, %v7523_v46 }
 0x910   :  { %v7303_v62 = vadd.f32 %v12753_v30, %v7205_v19 }
 0x911   :  { %v7304_v27 = vadd.f32 %v12755_v26, %v7206_v31  ;;  %v7046_v6 = vpop.f32.mrf.mxu2  ;;  %v6661_v15 = vpop.f32.mrf.mxu3  ;;  %v7631_v31 = vpack.c.bf16 %v7511_v49, %v7511_v49 }
 0x912   :  { %v7047_v13 = vadd.f32 %v7046_v6, %v6918_v33  ;;  %v6791_v54 = vadd.f32 %v6790_v3, %v6661_v15  ;;  %v7485_v33 = vmax.f32 %v7483_v7, %v7484_v42  ;;  %v7632_v3 = vpack.c.bf16 %v7524_v36, %v7524_v36 }
 0x913   :  { %v7364_v61 = vpack.c.bf16 %v7304_v27, %v7303_v62 }
 0x914   :  { %v7112_v39 = vpack.c.bf16 %v7047_v13, %v14379_v43  ;;  %v7629_v25 = vpack.c.bf16 %v7485_v33, %v7485_v33 }
 0x915   :  { %v6919_v32 = vpop.f32.mrf.mxu1  ;;  %v7447_v45 = vunpack.c.l.bf16 %v7364_v61  ;;  %v7448_v9 = vunpack.c.h.bf16 %v7364_v61  ;;  %v6793_v10 = vpop.f32.mrf.mxu0 }
 0x916   :  { %v6920_v55 = vadd.f32 %v6919_v32, %v6791_v54  ;;  %v7207_v50 = vunpack.c.l.bf16 %v7112_v39  ;;  %v7208_v18 = vunpack.c.h.bf16 %v7112_v39  ;;  %v9205_v32 = vld [vmem:[%s13076_s10 + $0x8] sm:$0xff]  ;;  %v7691_v54 = vunpack.c.l.b16 %v7631_v31 }
 0x917   :  { %v7579_v53 = vmax.f32 %v7578_v56, %v7447_v45  ;;  %v7592_v11 = vmax.f32 %v7591_v4, %v7448_v9  ;;  %v7498_v56 = vmax.f32 %v7496_v21, %v7497_v1  ;;  %v7692_v45 = vunpack.c.l.b16 %v7632_v3  ;;  %7817 = vmatpush.bf16.msra.mxu3 %v9205_v32 }
 0x918   :  { %v7305_v20 = vadd.f32 %v12753_v30, %v7207_v50  ;;  %v7306_v38 = vadd.f32 %v12755_v26, %v7208_v18 }
 0x919   :  { %v7048_v41 = vpop.f32.mrf.mxu2  ;;  %v6664_v0 = vpop.f32.mrf.mxu3  ;;  %v7630_v58 = vpack.c.bf16 %v7498_v56, %v7498_v56  ;;  %v14383_v56 = vld [vmem:[#allocation30_spill] sm:$0xff] }
 0x91a   :  { %v7365_v37 = vpack.c.bf16 %v7306_v38, %v7305_v20  ;;  %v7049_v22 = vadd.f32 %v7048_v41, %v6920_v55  ;;  %v6794_v35 = vadd.f32 %v6793_v10, %v6664_v0  ;;  %v14382_v0 = vld [vmem:[#allocation78_spill] sm:$0xff] }
 0x91c   :  { %v7449_v23 = vunpack.c.l.bf16 %v7365_v37  ;;  %v7450_v2 = vunpack.c.h.bf16 %v7365_v37  ;;  %v7113_v48 = vpack.c.bf16 %v7049_v22, %v14380_v44 }
 0x91d   :  { %v6922_v63 = vpop.f32.mrf.mxu1  ;;  %v6795_v5 = vpop.f32.mrf.mxu0 }
 0x91e   :  { %v6923_v47 = vadd.f32 %v6922_v63, %v6794_v35  ;;  %v7580_v52 = vmax.f32 %v7579_v53, %v7449_v23  ;;  %v7593_v24 = vmax.f32 %v7592_v11, %v7450_v2  ;;  %v7209_v14 = vunpack.c.l.bf16 %v7113_v48 }
 0x91f   :  { %v7210_v16 = vunpack.c.h.bf16 %v7113_v48  ;;  %v7689_v53 = vunpack.c.l.b16 %v7629_v25  ;;  %v7690_v11 = vunpack.c.l.b16 %v7630_v58 }
 0x920   :  { %v7307_v4 = vadd.f32 %v12753_v30, %v7209_v14 }
 0x921   :  { %v7308_v19 = vadd.f32 %v12755_v26, %v7210_v16  ;;  %v7051_v29 = vpop.f32.mrf.mxu2  ;;  %v6666_v27 = vpop.f32.mrf.mxu3  ;;  %v12976_v7 = vsel %vm3496_vm2, %v7691_v54, %v7689_v53  ;;  %v12979_v21 = vsel %vm3496_vm2, %v7692_v45, %v7690_v11 }
 0x922   :  { %v7052_v62 = vadd.f32 %v7051_v29, %v6923_v47  ;;  %v6796_v61 = vadd.f32 %v6795_v5, %v6666_v27 }
 0x923   :  { %v7366_v28 = vpack.c.bf16 %v7308_v19, %v7307_v4 }
 0x924   :  { %v7114_v8 = vpack.c.bf16 %v7052_v62, %v14381_v17  ;;  %v14384_v17 = vld [vmem:[#allocation16_spill] sm:$0xff] }
 0x925   :  { %v6924_v6 = vpop.f32.mrf.mxu1  ;;  %v7451_v13 = vunpack.c.l.bf16 %v7366_v28  ;;  %v7452_v15 = vunpack.c.h.bf16 %v7366_v28  ;;  %v6798_v55 = vpop.f32.mrf.mxu0 }
 0x926   :  { %v6925_v9 = vadd.f32 %v6924_v6, %v6796_v61  ;;  %v7211_v57 = vunpack.c.l.bf16 %v7114_v8  ;;  %v7212_v59 = vunpack.c.h.bf16 %v7114_v8 }
 0x927   :  { %v7581_v43 = vmax.f32 %v7580_v52, %v7451_v13  ;;  %v7594_v39 = vmax.f32 %v7593_v24, %v7452_v15 }
 0x928   :  { %v7309_v50 = vadd.f32 %v12753_v30, %v7211_v57  ;;  %v7310_v18 = vadd.f32 %v12755_v26, %v7212_v59 }
 0x929   :  { %v7053_v10 = vpop.f32.mrf.mxu2  ;;  %v6669_v12 = vpop.f32.mrf.mxu3 }
 0x92a   :  { %v7367_v20 = vpack.c.bf16 %v7310_v18, %v7309_v50  ;;  %v7054_v38 = vadd.f32 %v7053_v10, %v6925_v9  ;;  %v6799_v41 = vadd.f32 %v6798_v55, %v6669_v12  ;;  %v14385_v10 = vld [vmem:[#allocation21_spill] sm:$0xff] }
 0x92c   :  { %v7453_v37 = vunpack.c.l.bf16 %v7367_v20  ;;  %v7454_v22 = vunpack.c.h.bf16 %v7367_v20  ;;  %v7115_v42 = vpack.c.bf16 %v7054_v38, %v14382_v0 }
 0x92d   :  { %v6927_v46 = vpop.f32.mrf.mxu1  ;;  %v6800_v44 = vpop.f32.mrf.mxu0 }
 0x92e   :  { %v6928_v1 = vadd.f32 %v6927_v46, %v6799_v41  ;;  %v7582_v63 = vmax.f32 %v7581_v43, %v7453_v37  ;;  %v7595_v35 = vmax.f32 %v7594_v39, %v7454_v22  ;;  %v7213_v23 = vunpack.c.l.bf16 %v7115_v42 }
 0x92f   :  { %v7214_v2 = vunpack.c.h.bf16 %v7115_v42 }
 0x930   :  { %v7311_v48 = vadd.f32 %v12753_v30, %v7213_v23 }
 0x931   :  { %v7312_v49 = vadd.f32 %v12755_v26, %v7214_v2  ;;  %v7056_v36 = vpop.f32.mrf.mxu2  ;;  %v6671_v24 = vpop.f32.mrf.mxu3  ;;  %v7558_v2 = vrot.slane %v12940_v51, 4 }
 0x932   :  { %v7057_v52 = vadd.f32 %v7056_v36, %v6928_v1  ;;  %v6801_v16 = vadd.f32 %v6800_v44, %v6671_v24  ;;  %v9204_v1 = vld [vmem:[%s13076_s10] sm:$0xff] }
 0x933   :  { %v7368_v47 = vpack.c.bf16 %v7312_v49, %v7311_v48  ;;  %7818 = vmatpush.bf16.msra.mxu3 %v9204_v1  ;;  %v7545_v49 = vrot.slane %v12896_v40, 4 }
 0x934   :  { %v7116_v4 = vpack.c.bf16 %v7057_v52, %v14383_v56 }
 0x935   :  { %v6929_v14 = vpop.f32.mrf.mxu1  ;;  %v7455_v5 = vunpack.c.l.bf16 %v7368_v47  ;;  %v7456_v33 = vunpack.c.h.bf16 %v7368_v47  ;;  %v6803_v29 = vpop.f32.mrf.mxu0 }
 0x936   :  { %v6930_v3 = vadd.f32 %v6929_v14, %v6801_v16  ;;  %v7215_v28 = vunpack.c.l.bf16 %v7116_v4  ;;  %v7216_v62 = vunpack.c.h.bf16 %v7116_v4  ;;  %v7559_v4 = vmax.f32 %v12940_v51, %v7558_v2 }
 0x937   :  { %v7583_v19 = vmax.f32 %v7582_v63, %v7455_v5  ;;  %v12985_v31 = vmax.f32 %v7595_v35, %v7456_v33  ;;  %v7532_v63 = vrot.slane %v12894_v34, 4  ;;  %v7571_v5 = vrot.slane %v12942_v60, 4 }
 0x938   :  { %v7313_v13 = vadd.f32 %v12753_v30, %v7215_v28  ;;  %v7314_v15 = vadd.f32 %v12755_v26, %v7216_v62  ;;  %v14386_v28 = vld [vmem:[#allocation76_spill] sm:$0xff] }
 0x939   :  { %v7058_v27 = vpop.f32.mrf.mxu2  ;;  %v6674_v58 = vpop.f32.mrf.mxu3  ;;  %v7584_v36 = vrot.slane %v7583_v19, 4  ;;  %v7533_v16 = vmax.f32 %v12894_v34, %v7532_v63 }
 0x93a   :  { %v7059_v25 = vadd.f32 %v7058_v27, %v6930_v3  ;;  %v6804_v61 = vadd.f32 %v6803_v29, %v6674_v58  ;;  %v7369_v43 = vpack.c.bf16 %v7314_v15, %v7313_v13  ;;  %v7546_v27 = vmax.f32 %v12896_v40, %v7545_v49 }
 0x93b   :  { %v7534_v34 = vrot.slane %v7533_v16, 2 }
 0x93c   :  { %v7117_v8 = vpack.c.bf16 %v7059_v25, %v14384_v17  ;;  %v7457_v38 = vunpack.c.l.bf16 %v7369_v43  ;;  %v7458_v12 = vunpack.c.h.bf16 %v7369_v43  ;;  %v7585_v25 = vmax.f32 %v7583_v19, %v7584_v36 }
 0x93d   :  { %v6932_v6 = vpop.f32.mrf.mxu1  ;;  %v6805_v54 = vpop.f32.mrf.mxu0 }
 0x93e   :  { %v6933_v32 = vadd.f32 %v6932_v6, %v6804_v61  ;;  %v7217_v45 = vunpack.c.l.bf16 %v7117_v8  ;;  %v7218_v9 = vunpack.c.h.bf16 %v7117_v8  ;;  %v7572_v8 = vmax.f32 %v12942_v60, %v7571_v5 }
 0x93f   :  { %v7586_v43 = vrot.slane %v7585_v25, 2 }
 0x940   :  { %v7315_v39 = vadd.f32 %v12753_v30, %v7217_v45  ;;  %v7316_v57 = vadd.f32 %v12755_v26, %v7218_v9  ;;  %v7547_v9 = vrot.slane %v7546_v27, 2 }
 0x941   :  { %v7061_v59 = vpop.f32.mrf.mxu2  ;;  %v6676_v53 = vpop.f32.mrf.mxu3 }
 0x942   :  { %v7062_v55 = vadd.f32 %v7061_v59, %v6933_v32  ;;  %v7370_v11 = vpack.c.bf16 %v7316_v57, %v7315_v39  ;;  %v6806_v18 = vadd.f32 %v6805_v54, %v6676_v53  ;;  %v7597_v32 = vrot.slane %v12985_v31, 4 }
 0x943   :  { %v7560_v54 = vrot.slane %v7559_v4, 2  ;;  %v7535_v59 = vmax.f32 %v7533_v16, %v7534_v34 }
 0x944   :  { %v7118_v20 = vpack.c.bf16 %v7062_v55, %v14385_v10  ;;  %v7459_v46 = vunpack.c.l.bf16 %v7370_v11  ;;  %v7460_v41 = vunpack.c.h.bf16 %v7370_v11  ;;  %v7573_v55 = vrot.slane %v7572_v8, 2 }
 0x945   :  { %v6934_v50 = vpop.f32.mrf.mxu1  ;;  %v6808_v42 = vpop.f32.mrf.mxu0  ;;  %v7598_v53 = vmax.f32 %v12985_v31, %v7597_v32  ;;  %v7561_v60 = vmax.f32 %v7559_v4, %v7560_v54  ;;  %v7536_v1 = vrot.slane %v7535_v59, 1 }
 0x946   :  { %v7219_v37 = vunpack.c.l.bf16 %v7118_v20  ;;  %v7220_v22 = vunpack.c.h.bf16 %v7118_v20  ;;  %v6935_v0 = vadd.f32 %v6934_v50, %v6806_v18  ;;  %v7603_v35 = vmax.f32 %v7457_v38, %v7459_v46  ;;  %v14387_v20 = vld [vmem:[#allocation38_spill] sm:$0xff] }
 0x947   :  { %v7616_v23 = vmax.f32 %v7458_v12, %v7460_v41  ;;  %v7548_v12 = vmax.f32 %v7546_v27, %v7547_v9  ;;  %v7587_v46 = vmax.f32 %v7585_v25, %v7586_v43  ;;  %v7574_v63 = vmax.f32 %v7572_v8, %v7573_v55  ;;  %v9218_v55 = vld [vmem:[%s13076_s10 + $0x70] sm:$0xff] }
 0x948   :  { %v7317_v44 = vadd.f32 %v12753_v30, %v7219_v37  ;;  %v7318_v48 = vadd.f32 %v12755_v26, %v7220_v22 }
 0x949   :  { %v7063_v47 = vpop.f32.mrf.mxu2  ;;  %v6679_v14 = vpop.f32.mrf.mxu3  ;;  %v7588_v49 = vrot.slane %v7587_v46, 1  ;;  %v7575_v16 = vrot.slane %v7574_v63, 1 }
 0x94a   :  { %v7371_v52 = vpack.c.bf16 %v7318_v48, %v7317_v44  ;;  %v7064_v24 = vadd.f32 %v7063_v47, %v6935_v0  ;;  %v6809_v56 = vadd.f32 %v6808_v42, %v6679_v14  ;;  %v7549_v48 = vrot.slane %v7548_v12, 1 }
 0x94b   :  { %v7537_v14 = vmax.f32 %v7535_v59, %v7536_v1  ;;  %v7589_v25 = vmax.f32 %v7587_v46, %v7588_v49  ;;  %v7576_v34 = vmax.f32 %v7574_v63, %v7575_v16  ;;  %v9216_v16 = vld [vmem:[%s13076_s10 + $0x60] sm:$0xff] }
 0x94c   :  { %v7461_v3 = vunpack.c.l.bf16 %v7371_v52  ;;  %v7462_v29 = vunpack.c.h.bf16 %v7371_v52  ;;  %v7119_v62 = vpack.c.bf16 %v7064_v24, %v14386_v28  ;;  %v14388_v28 = vld [vmem:[#allocation80_spill] sm:$0xff]  ;;  %v7550_v27 = vmax.f32 %v7548_v12, %v7549_v48 }
 0x94d   :  { %v6937_v33 = vpop.f32.mrf.mxu1  ;;  %v6810_v17 = vpop.f32.mrf.mxu0  ;;  %v7637_v43 = vpack.c.bf16 %v7589_v25, %v7589_v25  ;;  %v9215_v25 = vld [vmem:[%s13076_s10 + $0x58] sm:$0xff] }
 0x94e   :  { %v6938_v58 = vadd.f32 %v6937_v33, %v6809_v56  ;;  %v7604_v6 = vmax.f32 %v7603_v35, %v7461_v3  ;;  %v7617_v61 = vmax.f32 %v7616_v23, %v7462_v29  ;;  %v7221_v13 = vunpack.c.l.bf16 %v7119_v62 }
 0x94f   :  { %v7222_v15 = vunpack.c.h.bf16 %v7119_v62  ;;  %v7599_v35 = vrot.slane %v7598_v53, 2  ;;  %v7562_v23 = vrot.slane %v7561_v60, 1  ;;  %v7634_v9 = vpack.c.bf16 %v7550_v27, %v7550_v27 }
 0x950   :  { %v7319_v51 = vadd.f32 %v12753_v30, %v7221_v13 }
 0x951   :  { %v7320_v45 = vadd.f32 %v12755_v26, %v7222_v15  ;;  %v7066_v40 = vpop.f32.mrf.mxu2  ;;  %v6681_v57 = vpop.f32.mrf.mxu3  ;;  %v7600_v5 = vmax.f32 %v7598_v53, %v7599_v35  ;;  %v7563_v4 = vmax.f32 %v7561_v60, %v7562_v23  ;;  %v9217_v35 = vld [vmem:[%s13076_s10 + $0x68] sm:$0xff] }
 0x952   :  { %v7067_v39 = vadd.f32 %v7066_v40, %v6938_v58  ;;  %v6811_v50 = vadd.f32 %v6810_v17, %v6681_v57  ;;  %v7633_v17 = vpack.c.bf16 %v7537_v14, %v7537_v14 }
 0x953   :  { %v7372_v19 = vpack.c.bf16 %v7320_v45, %v7319_v51  ;;  %v7601_v8 = vrot.slane %v7600_v5, 1  ;;  %v7635_v32 = vpack.c.bf16 %v7563_v4, %v7563_v4  ;;  %v9219_v45 = vld [vmem:[%s13076_s10 + $0x78] sm:$0xff] }
 0x954   :  { %v7120_v38 = vpack.c.bf16 %v7067_v39, %v14387_v20  ;;  %7824 = vmatpush.bf16.msrb.mxu3 %v9219_v45  ;;  %v7693_v53 = vunpack.c.l.b16 %v7633_v17  ;;  %v14390_v4 = vld [vmem:[#allocation88_spill] sm:$0xff] }
 0x955   :  { %v6939_v11 = vpop.f32.mrf.mxu1  ;;  %v7463_v18 = vunpack.c.l.bf16 %v7372_v19  ;;  %v7464_v10 = vunpack.c.h.bf16 %v7372_v19  ;;  %v6813_v44 = vpop.f32.mrf.mxu0 }
 0x956   :  { %v6940_v41 = vadd.f32 %v6939_v11, %v6811_v50  ;;  %v7223_v0 = vunpack.c.l.bf16 %v7120_v38  ;;  %v7224_v42 = vunpack.c.h.bf16 %v7120_v38  ;;  %v7636_v11 = vpack.c.bf16 %v7576_v34, %v7576_v34  ;;  %v14389_v38 = vld [vmem:[#allocation23_spill] sm:$0xff] }
 0x957   :  { %v7605_v37 = vmax.f32 %v7604_v6, %v7463_v18  ;;  %v7618_v22 = vmax.f32 %v7617_v61, %v7464_v10  ;;  %v7602_v50 = vmax.f32 %v7600_v5, %v7601_v8  ;;  %v7695_v18 = vunpack.c.l.b16 %v7635_v32  ;;  %v9213_v32 = vld [vmem:[%s13076_s10 + $0x48] sm:$0xff] }
 0x958   :  { %v7321_v31 = vadd.f32 %v12753_v30, %v7223_v0  ;;  %v7322_v2 = vadd.f32 %v12755_v26, %v7224_v42  ;;  %7825 = vmatpush.bf16.msrb.mxu3 %v9218_v55  ;;  %v7696_v23 = vunpack.c.l.b16 %v7636_v11 }
 0x959   :  { %v7068_v36 = vpop.f32.mrf.mxu2  ;;  %v6684_v24 = vpop.f32.mrf.mxu3 }
 0x95a   :  { %v7373_v47 = vpack.c.bf16 %v7322_v2, %v7321_v31  ;;  %v7069_v52 = vadd.f32 %v7068_v36, %v6940_v41  ;;  %v6814_v56 = vadd.f32 %v6813_v44, %v6684_v24  ;;  %v7694_v41 = vunpack.c.l.b16 %v7634_v9 }
 0x95b   :  { %v7638_v31 = vpack.c.bf16 %v7602_v50, %v7602_v50  ;;  %v7702_v2 = vsel %vm3498_vm3, %v7693_v53, %v12976_v7 }
 0x95c   :  { %v7465_v3 = vunpack.c.l.bf16 %v7373_v47  ;;  %v7466_v29 = vunpack.c.h.bf16 %v7373_v47  ;;  %v7121_v62 = vpack.c.bf16 %v7069_v52, %v14388_v28  ;;  %v7703_v49 = vsel %vm3500_vm4, %v7695_v18, %v7702_v2  ;;  %7826 = vmatpush.bf16.msrb.mxu3 %v9217_v35 }
 0x95d   :  { %v6942_v33 = vpop.f32.mrf.mxu1  ;;  %v6815_v57 = vpop.f32.mrf.mxu0  ;;  %v7707_v52 = vsel %vm3498_vm3, %v7694_v41, %v12979_v21  ;;  %v7698_v7 = vunpack.c.l.b16 %v7638_v31  ;;  %v9221_v41 = vld [vmem:[#allocation8 + $0x8] sm:$0xff] }
 0x95e   :  { %v6943_v58 = vadd.f32 %v6942_v33, %v6814_v56  ;;  %v7606_v6 = vmax.f32 %v7605_v37, %v7465_v3  ;;  %v7619_v61 = vmax.f32 %v7618_v22, %v7466_v29  ;;  %v7225_v13 = vunpack.c.l.bf16 %v7121_v62 }
 0x95f   :  { %v7226_v15 = vunpack.c.h.bf16 %v7121_v62  ;;  %v7697_v22 = vunpack.c.l.b16 %v7637_v43  ;;  %v7708_v5 = vsel %vm3500_vm4, %v7696_v23, %v7707_v52 }
 0x960   :  { %v7323_v54 = vadd.f32 %v12753_v30, %v7225_v13  ;;  %v7709_v29 = vsel %vm3502_vm5, %v7698_v7, %v7708_v5  ;;  %7827 = vmatpush.bf16.msrb.mxu3 %v9216_v16  ;;  %v9214_v13 = vld [vmem:[%s13076_s10 + $0x50] sm:$0xff]  ;;  %v9238_v16 = vld [vmem:[#allocation2] ss:$0 sm:$0xff] }
 0x961   :  { %v7324_v51 = vadd.f32 %v12755_v26, %v7226_v15  ;;  %v7071_v40 = vpop.f32.mrf.mxu2  ;;  %v6686_v59 = vpop.f32.mrf.mxu3  ;;  %v7704_v47 = vsel %vm3502_vm5, %v7697_v22, %v7703_v49 }
 0x962   :  { %v7072_v39 = vadd.f32 %v7071_v40, %v6943_v58  ;;  %v6816_v60 = vadd.f32 %v6815_v57, %v6686_v59 }
 0x963   :  { %v7374_v19 = vpack.c.bf16 %v7324_v51, %v7323_v54 }
 0x964   :  { %v7122_v12 = vpack.c.bf16 %v7072_v39, %v14389_v38  ;;  %7828 = vmatpush.bf16.msrb.mxu3 %v9215_v25 }
 0x965   :  { %v7467_v10 = vunpack.c.l.bf16 %v7374_v19  ;;  %v7468_v20 = vunpack.c.h.bf16 %v7374_v19  ;;  %v6944_v46 = vpop.f32.mrf.mxu1 }
 0x966   :  { %v6945_v37 = vadd.f32 %v6944_v46, %v6816_v60  ;;  %v7227_v1 = vunpack.c.l.bf16 %v7122_v12  ;;  %v7228_v63 = vunpack.c.h.bf16 %v7122_v12  ;;  %v9223_v12 = vld [vmem:[#allocation8 + $0x18] sm:$0xff]  ;;  %v9222_v46 = vld [vmem:[#allocation8 + $0x10] sm:$0xff] }
 0x967   :  { %v7607_v0 = vmax.f32 %v7606_v6, %v7467_v10  ;;  %v7620_v42 = vmax.f32 %v7619_v61, %v7468_v20 }
 0x968   :  { %v7325_v44 = vadd.f32 %v12753_v30, %v7227_v1  ;;  %v7326_v48 = vadd.f32 %v12755_v26, %v7228_v63  ;;  %7829 = vmatpush.bf16.msrb.mxu3 %v9214_v13 }
 0x969   :  { %v7073_v36 = vpop.f32.mrf.mxu2 }
 0x96a   :  { %v7375_v24 = vpack.c.bf16 %v7326_v48, %v7325_v44  ;;  %v7074_v14 = vadd.f32 %v7073_v36, %v6945_v37  ;;  %v9220_v37 = vld [vmem:[#allocation8] sm:$0xff]  ;;  %v9236_v44 = vld [vmem:[%s13079_s13] ss:$0 sm:$0xff] }
 0x96b   :  { %v9237_v36 = vld [vmem:[#allocation10] ss:$0 sm:$0xff] }
 0x96c   :  { %v7469_v33 = vunpack.c.l.bf16 %v7375_v24  ;;  %v7470_v56 = vunpack.c.h.bf16 %v7375_v24  ;;  %v7123_v3 = vpack.c.bf16 %v7074_v14, %v14390_v4  ;;  %7830 = vmatpush.bf16.msrb.mxu3 %v9213_v32 }
 0x96e   :  { %v7608_v28 = vmax.f32 %v7607_v0, %v7469_v33  ;;  %v7621_v62 = vmax.f32 %v7620_v42, %v7470_v56  ;;  %v7229_v27 = vunpack.c.l.bf16 %v7123_v3  ;;  %v7230_v21 = vunpack.c.h.bf16 %v7123_v3  ;;  %v9235_v42 = vld [vmem:[%s13077_s11] ss:$0 sm:$0xff] }
 0x970   :  { %v7327_v58 = vadd.f32 %v12753_v30, %v7229_v27  ;;  %v7328_v6 = vadd.f32 %v12755_v26, %v7230_v21  ;;  %v9212_v26 = vld [vmem:[%s13076_s10 + $0x40] sm:$0xff] }
 0x971   :  { %7831 = vmatpush.bf16.msrb.mxu3 %v9212_v26 }
 0x972   :  { %v7376_v61 = vpack.c.bf16 %v7328_v6, %v7327_v58 }
 0x974   :  { %v7471_v15 = vunpack.c.l.bf16 %v7376_v61  ;;  %v7472_v17 = vunpack.c.h.bf16 %v7376_v61 }
 0x976   :  { %v7609_v34 = vmax.f32 %v7608_v28, %v7471_v15  ;;  %v7622_v8 = vmax.f32 %v7621_v62, %v7472_v17 }
 0x978   :  { %v7610_v54 = vrot.slane %v7609_v34, 4  ;;  %v7623_v51 = vrot.slane %v7622_v8, 4 }
 0x97a   :  { %v7611_v30 = vmax.f32 %v7609_v34, %v7610_v54  ;;  %v7624_v45 = vmax.f32 %v7622_v8, %v7623_v51 }
 0x97c   :  { %v7612_v9 = vrot.slane %v7611_v30, 2  ;;  %v7625_v43 = vrot.slane %v7624_v45, 2 }
 0x97e   :  { %v7613_v40 = vmax.f32 %v7611_v30, %v7612_v9  ;;  %v7626_v19 = vmax.f32 %v7624_v45, %v7625_v43 }
 0x980   :  { %v7614_v39 = vrot.slane %v7613_v40, 1  ;;  %v7627_v57 = vrot.slane %v7626_v19, 1 }
 0x982   :  { %v7615_v59 = vmax.f32 %v7613_v40, %v7614_v39  ;;  %v7628_v55 = vmax.f32 %v7626_v19, %v7627_v57 }
 0x984   :  { %v7639_v53 = vpack.c.bf16 %v7615_v59, %v7615_v59  ;;  %v7640_v11 = vpack.c.bf16 %v7628_v55, %v7628_v55 }
 0x986   :  { %v7699_v50 = vunpack.c.l.b16 %v7639_v53  ;;  %v7700_v60 = vunpack.c.l.b16 %v7640_v11 }
 0x988   :  { %v7705_v18 = vsel %vm3504_vm6, %v7699_v50, %v7704_v47  ;;  %v7710_v10 = vsel %vm3504_vm6, %v7700_v60, %v7709_v29 }
 0x989   :  { %v7711_v20 = vpack.c.b16 %v7705_v18, %v7705_v18  ;;  %v7712_v38 = vpack.c.b16 %v7710_v10, %v7710_v10 }
 0x98b   :  { %7819 = vmatmul.bf16.vlgmr.msra.gmra.mxu3 %v7711_v20 }
 0x98c   :  { %7883 = vmatpush.bf16.msra.mxu3 %v9223_v12 }
 0x990   :  { %7884 = vmatpush.bf16.msra.mxu3 %v9222_v46 }
 0x994   :  { %7885 = vmatpush.bf16.msra.mxu3 %v9221_v41 }
 0x998   :  { %7886 = vmatpush.bf16.msra.mxu3 %v9220_v37 }
 0x99b   :  { %7832 = vmatmul.bf16.vlgmr.msrb.gmra.mxu3 %v7712_v38 }
 0xa0e   :  { %v7820_v22 = vpop.f32.mrf.mxu3 }
 0xa0f   :  { %v7821_v1 = vadd.f32 %v9235_v42, %v7820_v22 }
 0xa16   :  { %v7822_v0 = vpop.f32.mrf.mxu3 }
 0xa1e   :  { %v7833_v63 = vpop.f32.mrf.mxu3 }
 0xa1f   :  { %v7834_v35 = vadd.f32 %v7833_v63, %v7821_v1 }
 0xa21   :  { %v7837_v23 = vmax.f32 %v7834_v35, 0.0 }
 0xa23   :  { %v7838_v31 = vpack.c.bf16 %v7837_v23, %v7837_v23 }
 0xa25   :  { %8970 = vmatmul.msk.bf16.vlgmr.msra.gmra.mxu3 %vm7875_vm11, %v7838_v31 }
 0xa26   :  { %v7835_v2 = vpop.f32.mrf.mxu3 }
 0xaa8   :  { %v7888_v48 = vpop.f32.mrf.mxu3 }
 0xaa9   :  { %v7889_v49 = vadd.f32 %v9236_v44, %v7888_v48 }
 0xaab   :  { %v7892_v47 = vmax.f32 %v7889_v49, 0.0 }
 0xaad   :  { %v7897_v52 = vmul.f32 %v9237_v36, %v7892_v47 }
 0xaaf   :  { %v7899_v24 = vsel %vm7898_vm12, %v7897_v52, 0.0 }
 0xab0   :  { %v7890_v14 = vpop.f32.mrf.mxu3  ;;  %7900 = vadd.xlane.f32.xlu0 %v7899_v24 }
 0xb23   :  { %v7901_v7 = vpop.xlane.xlu0 %7900 }
 0xb24   :  { %v7906_v5 = vadd.f32 %v9238_v16, %v7901_v7 }
 0xb26   :  { %v8971_v33 = vmul.f32 -1.442695, %v7906_v5 }
 0xb28   :  { %9239 = vpow2.f32 %v8971_v33 }
 0xb2e   :  { %v9240_v56 = vpop.eup %9239 }
 0xb2f   :  { %v7910_v4 = vadd.f32 1.0, %v9240_v56 }
 0xb31   :  { %9241 = vrcp.f32 %v7910_v4  ;;  %v7922_v62 = vand.u32 2147483648, %v7910_v4  ;;  %v7920_v21 = vand.u32 2147483647, %v7910_v4  ;;  %vm7916_vm14 = vweird.f32 %v7910_v4 }
 0xb33   :  { %v7923_v58 = vor.u32 1.1754944e-38, %v7922_v62  ;;  %vm7921_vm1 = vcmp.eq.f32.partialorder %v7920_v21, 8.507059e+37 }
 0xb37   :  { %v9242_v3 = vpop.eup %9241 }
 0xb38   :  { %v7912_v29 = vmul.f32 %v9242_v3, %v7910_v4  ;;  %vm7917_vm13 = vweird.f32 %v9242_v3 }
 0xb39   :  { %vm7918_vm15 = vmor %vm7916_vm14, %vm7917_vm13 }
 0xb3a   :  { %v7913_v28 = vsub.f32 1.0, %v7912_v29 }
 0xb3c   :  { %v7914_v27 = vmul.f32 %v9242_v3, %v7913_v28 }
 0xb3e   :  { %v7915_v25 = vadd.f32 %v9242_v3, %v7914_v27 }
 0xb40   :  { %v7919_v6 = vsel %vm7918_vm15, %v9242_v3, %v7915_v25 }
 0xb41   :  { %v7924_v61 = vsel %vm7921_vm1, %v7923_v58, %v7919_v6 }
 0xb42   :  { %7927 = vst.msk [vmem:[%s13082_s16] sm:$0x3f] %vm7926_vm0, %v7924_v61 }
 0xb43   :  { %7932 = vsyncpa [#allocation4], 1 }
 0xb44   :  { %7933 = vsyncpa [#allocation6], 1 }
 0xb45   :  { %7934 = vsyncpa [#allocation9], 1 }

</bundles_post_ra>
